<compile_context>
chip_gen: v7x
topology: tpu7x:2x2x1
jax: 0.10.0
libtpu: 0.0.40
codegen_flags: <defaults>
</compile_context>

<pallas_src>
import jax
import jax.numpy as jnp
from jax import lax
from jax.experimental import pallas as pl
from jax.experimental.pallas import tpu as pltpu

_EPS = 1e-5


# --------------------------- in-kernel helpers ---------------------------

def _zero_pad_border(pad_ref):
    """Zero the padding frame (first/last row and column) of a VMEM pad scratch.

    Only O(H+W) strip stores instead of a full O(H*W) memset; the conv interior is
    fully overwritten afterwards, so this is correct regardless of how the batch
    grid is split across TensorCores."""
    Hp, Wp, C = pad_ref.shape
    row = jnp.zeros((1, Wp, C), pad_ref.dtype)
    col = jnp.zeros((Hp, 1, C), pad_ref.dtype)
    pad_ref[0:1, :, :] = row
    pad_ref[Hp - 1:Hp, :, :] = row
    pad_ref[:, 0:1, :] = col
    pad_ref[:, Wp - 1:Wp, :] = col


def _im2col_conv3x3(pad_ref, w_ref, H, W):
    """One 'same' 3x3 conv as a single im2col MXU matmul.

    pad_ref: (H+2, W+2, Cin) zero-padded VMEM scratch (matmul dtype).
    w_ref:   (9*Cin, Cout)   VMEM weights, rows ordered (kh, kw, cin).
    Returns (H*W, Cout) float32."""
    taps = [pad_ref[dy:dy + H, dx:dx + W, :] for dy in range(3) for dx in range(3)]
    patch = jnp.concatenate(taps, axis=-1)               # (H, W, 9*Cin)
    patch = patch.reshape(H * W, patch.shape[-1])
    return jnp.dot(patch, w_ref[...], preferred_element_type=jnp.float32)


def _channel_stats(h):
    """Per-channel (sum, sum of squares) over all rows of h: (M, C) -> (2, C)."""
    return jnp.concatenate([jnp.sum(h, axis=0, keepdims=True),
                            jnp.sum(h * h, axis=0, keepdims=True)], axis=0)


# ------------------------------- kernels -------------------------------

def _conv1_kernel(x_ref, w_ref, out_ref, stat_ref, pad_ref):
    """conv3x3 (2*Cin -> Cin), no bias (cancelled by the following batch-stat BN),
    plus per-sample channel statistics for that BN."""
    _, H, W, _ = x_ref.shape
    _zero_pad_border(pad_ref)
    pad_ref[1:H + 1, 1:W + 1, :] = x_ref[0].astype(pad_ref.dtype)
    h = _im2col_conv3x3(pad_ref, w_ref, H, W)            # (H*W, Cin) f32
    out_ref[0] = h.reshape(H, W, h.shape[-1])
    stat_ref[0] = _channel_stats(h)


def _bn_relu_conv2_kernel(h_ref, aff_ref, w_ref, out_ref, stat_ref, pad_ref):
    """BN1 (folded per-channel scale/shift) + ReLU + conv3x3 (Cin -> Cin) + BN2 stats."""
    _, H, W, _ = h_ref.shape
    a = jnp.maximum(h_ref[0] * aff_ref[0:1, :] + aff_ref[1:2, :], 0.0)
    _zero_pad_border(pad_ref)
    pad_ref[1:H + 1, 1:W + 1, :] = a.astype(pad_ref.dtype)
    h2 = _im2col_conv3x3(pad_ref, w_ref, H, W)
    out_ref[0] = h2.reshape(H, W, h2.shape[-1])
    stat_ref[0] = _channel_stats(h2)


def _bn_relu_upconv_kernel(h_ref, aff_ref, wup_ref, bup_ref,
                           xout_ref, y_ref, pad_ref):
    """BN2 + ReLU -> x_out, then ConvTranspose2d(k=3, s=2, p=1, output_pad=1) as one
    (M, 4*Cin) @ (4*Cin, 4*Cout) matmul over the 4 shift taps / 4 output parity phases,
    written into a packed (H, 2, W, 2*Cout) layout."""
    _, H, W, C = h_ref.shape
    x2 = jnp.maximum(h_ref[0] * aff_ref[0:1, :] + aff_ref[1:2, :], 0.0)   # (H, W, C) f32
    xout_ref[0] = x2

    _zero_pad_border(pad_ref)                             # only row H / col W matter here
    pad_ref[0:H, 0:W, :] = x2.astype(pad_ref.dtype)       # zero pad on the high side only
    taps = [pad_ref[di:di + H, dj:dj + W, :] for di in (0, 1) for dj in (0, 1)]
    patch = jnp.concatenate(taps, axis=-1).reshape(H * W, 4 * C)
    res = jnp.dot(patch, wup_ref[...], preferred_element_type=jnp.float32)
    res = res + bup_ref[...]                              # (H*W, 4*Cout): [ee | eo | oe | oo]

    half = res.shape[-1] // 2
    # y[n, 2i+r, 2j+s, c] == packed[n, i, r, j, s*Cout + c]; wrapper reshape is free.
    y_ref[0, :, 0, :, :] = res[:, :half].reshape(H, W, half)   # even rows: [ee | eo]
    y_ref[0, :, 1, :, :] = res[:, half:].reshape(H, W, half)   # odd  rows: [oe | oo]


# ------------------------------ wrapper ------------------------------

def upsample_block_forward(x_nchw, params, matmul_dtype=jnp.bfloat16):
    """x_nchw: (N, 2*Cin, H, W). Returns (x, y) in NCHW, like the PyTorch module.

    matmul_dtype: dtype fed to the MXU (weights + im2col patches + network input).
    bf16 is the production setting for v6e/v7x; accumulation, BN statistics and
    stored intermediates stay float32."""
    N, C2, H, W = x_nchw.shape
    Cin = C2 // 2
    Cout = params["up_w"].shape[1]
    cnt = float(N * H * W)

    # TODO(synk): if the consumer accepts NHWC, drop these NCHW<->NHWC transposes.
    x = jnp.transpose(x_nchw, (0, 2, 3, 1)).astype(matmul_dtype)          # NHWC, MXU dtype

    # Conv2d weights (Cout, Cin, 3, 3) -> im2col layout (9*Cin, Cout), rows = (kh, kw, cin).
    w1 = jnp.transpose(params["conv1_w"], (2, 3, 1, 0)).reshape(9 * C2, Cin).astype(matmul_dtype)
    w2 = jnp.transpose(params["conv2_w"], (2, 3, 1, 0)).reshape(9 * Cin, Cin).astype(matmul_dtype)
    # conv1_b / conv2_b are intentionally unused: a per-channel constant added before a
    # training-mode (batch-stat) BatchNorm is exactly cancelled by the mean subtraction.

    # ConvTranspose2d weight (Cin, Cout, 3, 3) -> taps, packed as one (4*Cin, 4*Cout) matrix:
    # row blocks = shift taps [(0,0),(0,1),(1,0),(1,1)] of h, columns = phases [ee, eo, oe, oo].
    wt = jnp.transpose(params["up_w"], (2, 3, 0, 1))                       # (3, 3, Cin, Cout)
    z = jnp.zeros((Cin, Cout), wt.dtype)
    w_up = jnp.concatenate([
        jnp.concatenate([wt[1, 1], wt[1, 2], wt[2, 1], wt[2, 2]], axis=1),  # tap h[i,   j  ]
        jnp.concatenate([z,        wt[1, 0], z,        wt[2, 0]], axis=1),  # tap h[i,   j+1]
        jnp.concatenate([z,        z,        wt[0, 1], wt[0, 2]], axis=1),  # tap h[i+1, j  ]
        jnp.concatenate([z,        z,        z,        wt[0, 0]], axis=1),  # tap h[i+1, j+1]
    ], axis=0).astype(matmul_dtype)                                         # (4*Cin, 4*Cout)
    b_up = jnp.tile(params["up_b"].reshape(1, Cout), (1, 4)).astype(jnp.float32)

    cparams = pltpu.CompilerParams(dimension_semantics=("parallel",),
                                   vmem_limit_bytes=32 * 1024 * 1024)

    def full(shape):        # per-grid-step constant operand (weights / packed params)
        return pl.BlockSpec(shape, lambda n: (0,) * len(shape))

    def per_n(shape):       # one batch element per grid step
        return pl.BlockSpec((1,) + shape, lambda n: (n,) + (0,) * len(shape))

    # ---- pass 1: conv1 + per-sample BN1 statistics (grid over batch, "parallel") ----
    h1_pre, stat1 = pl.pallas_call(
        _conv1_kernel,
        grid=(N,),
        in_specs=[per_n((H, W, C2)), full((9 * C2, Cin))],
        out_specs=(per_n((H, W, Cin)), per_n((2, Cin))),
        out_shape=(jax.ShapeDtypeStruct((N, H, W, Cin), jnp.float32),
                   jax.ShapeDtypeStruct((N, 2, Cin), jnp.float32)),
        scratch_shapes=[pltpu.VMEM((H + 2, W + 2, C2), matmul_dtype)],
        compiler_params=cparams,
    )(x, w1)

    # ---- tiny cross-batch reduction + folded BN scale/shift (plain XLA) ----
    def fold_bn(stats, gamma, beta):
        s = jnp.sum(stats, axis=0)                        # (2, C)
        mean = s[0] / cnt
        var = jnp.maximum(s[1] / cnt - mean * mean, 0.0)  # biased variance (training-mode BN)
        scale = gamma * lax.rsqrt(var + _EPS)
        shift = beta - mean * scale
        return jnp.stack([scale, shift], axis=0).astype(jnp.float32)      # (2, C)

    aff1 = fold_bn(stat1, params["bn1_g"], params["bn1_b"])

    # ---- pass 2: BN1 + ReLU + conv2 + BN2 statistics ----
    h2_pre, stat2 = pl.pallas_call(
        _bn_relu_conv2_kernel,
        grid=(N,),
        in_specs=[per_n((H, W, Cin)), full((2, Cin)), full((9 * Cin, Cin))],
        out_specs=(per_n((H, W, Cin)), per_n((2, Cin))),
        out_shape=(jax.ShapeDtypeStruct((N, H, W, Cin), jnp.float32),
                   jax.ShapeDtypeStruct((N, 2, Cin), jnp.float32)),
        scratch_shapes=[pltpu.VMEM((H + 2, W + 2, Cin), matmul_dtype)],
        compiler_params=cparams,
    )(h1_pre, aff1, w2)

    aff2 = fold_bn(stat2, params["bn2_g"], params["bn2_b"])

    # ---- pass 3: BN2 + ReLU -> x_out ; transposed conv -> packed y ----
    x_out, y_pack = pl.pallas_call(
        _bn_relu_upconv_kernel,
        grid=(N,),
        in_specs=[per_n((H, W, Cin)), full((2, Cin)),
                  full((4 * Cin, 4 * Cout)), full((1, 4 * Cout))],
        out_specs=(per_n((H, W, Cin)), per_n((H, 2, W, 2 * Cout))),
        out_shape=(jax.ShapeDtypeStruct((N, H, W, Cin), jnp.float32),
                   jax.ShapeDtypeStruct((N, H, 2, W, 2 * Cout), jnp.float32)),
        scratch_shapes=[pltpu.VMEM((H + 1, W + 1, Cin), matmul_dtype)],
        compiler_params=cparams,
    )(h2_pre, aff2, w_up, b_up)

    # Packed (N, H, 2, W, 2*Cout) flattens row-major exactly to (N, 2H, 2W, Cout): free reshape.
    y = y_pack.reshape(N, 2 * H, 2 * W, Cout)

    return (jnp.transpose(x_out, (0, 3, 1, 2)),           # (N, Cin, H, W)
            jnp.transpose(y, (0, 3, 1, 2)))               # (N, Cout, 2H, 2W)


# --------------------------- pure-JAX reference ---------------------------

def _ref_forward(x, p):
    def conv(x, w, b):
        y = lax.conv_general_dilated(x, w, (1, 1), ((1, 1), (1, 1)),
                                     dimension_numbers=("NCHW", "OIHW", "NCHW"))
        return y + b[None, :, None, None]

    def bn_relu(x, g, b):
        mean = jnp.mean(x, axis=(0, 2, 3), keepdims=True)
        var = jnp.mean((x - mean) ** 2, axis=(0, 2, 3), keepdims=True)
        y = (x - mean) * lax.rsqrt(var + _EPS) * g[None, :, None, None] + b[None, :, None, None]
        return jnp.maximum(y, 0.0)

    h = bn_relu(conv(x, p["conv1_w"], p["conv1_b"]), p["bn1_g"], p["bn1_b"])
    h = bn_relu(conv(h, p["conv2_w"], p["conv2_b"]), p["bn2_g"], p["bn2_b"])
    # transposed conv via input-dilated conv with spatially-flipped, channel-swapped weights
    w_eff = jnp.transpose(p["up_w"][:, :, ::-1, ::-1], (1, 0, 2, 3))
    y = lax.conv_general_dilated(h, w_eff, (1, 1), ((1, 2), (1, 2)),
                                 lhs_dilation=(2, 2),
                                 dimension_numbers=("NCHW", "OIHW", "NCHW"))
    return h, y + p["up_b"][None, :, None, None]


# ------------------------------- main -------------------------------

if __name__ == "__main__":
    key = jax.random.PRNGKey(0)
    in_channels, out_channels = 4, 4
    N, H, W = 2, 16, 16
    ks = jax.random.split(key, 12)

    params = {
        "conv1_w": 0.1 * jax.random.normal(ks[0], (in_channels, 2 * in_channels, 3, 3), jnp.float32),
        "conv1_b": 0.1 * jax.random.normal(ks[1], (in_channels,), jnp.float32),
        "bn1_g":   1.0 + 0.1 * jax.random.normal(ks[2], (in_channels,), jnp.float32),
        "bn1_b":   0.1 * jax.random.normal(ks[3], (in_channels,), jnp.float32),
        "conv2_w": 0.1 * jax.random.normal(ks[4], (in_channels, in_channels, 3, 3), jnp.float32),
        "conv2_b": 0.1 * jax.random.normal(ks[5], (in_channels,), jnp.float32),
        "bn2_g":   1.0 + 0.1 * jax.random.normal(ks[6], (in_channels,), jnp.float32),
        "bn2_b":   0.1 * jax.random.normal(ks[7], (in_channels,), jnp.float32),
        "up_w":    0.1 * jax.random.normal(ks[8], (in_channels, out_channels, 3, 3), jnp.float32),
        "up_b":    0.1 * jax.random.normal(ks[9], (out_channels,), jnp.float32),
    }
    x = jax.random.normal(ks[10], (N, 2 * in_channels, H, W), jnp.float32)

    fwd = jax.jit(upsample_block_forward, static_argnames=("matmul_dtype",))
    x_ref_, y_ref_ = _ref_forward(x, params)

    # f32 MXU inputs: tight check against the PyTorch-semantics reference.
    x32, y32 = fwd(x, params, matmul_dtype=jnp.float32)
    jax.block_until_ready((x32, y32))
    assert x32.shape == (N, in_channels, H, W)
    assert y32.shape == (N, out_channels, 2 * H, 2 * W)
    assert jnp.allclose(x32, x_ref_, atol=1e-3, rtol=1e-3), float(jnp.max(jnp.abs(x32 - x_ref_)))
    assert jnp.allclose(y32, y_ref_, atol=1e-3, rtol=1e-3), float(jnp.max(jnp.abs(y32 - y_ref_)))

    # bf16 MXU inputs (production setting for v6e/v7x): looser tolerance from bf16 rounding
    # amplified through the two batch-norms.
    xb, yb = fwd(x, params, matmul_dtype=jnp.bfloat16)
    jax.block_until_ready((xb, yb))
    assert jnp.allclose(xb, x_ref_, atol=5e-2, rtol=5e-2), float(jnp.max(jnp.abs(xb - x_ref_)))
    assert jnp.allclose(yb, y_ref_, atol=5e-2, rtol=5e-2), float(jnp.max(jnp.abs(yb - y_ref_)))

    print("KERNEL_OK")
</pallas_src>

<mosaic_0001>
module attributes {stable_mosaic.version = 11 : i64} {
  func.func @_conv1_kernel(%arg0: i32, %arg1: memref<1x16x16x8xf32, #tpu.memory_space<vmem>>, %arg2: memref<72x4xf32, #tpu.memory_space<vmem>>, %arg3: memref<1x16x16x4xf32, #tpu.memory_space<vmem>>, %arg4: memref<1x2x4xf32, #tpu.memory_space<vmem>>, %arg5: memref<18x18x8xf32, #tpu.memory_space<vmem>>) attributes {dimension_semantics = [#tpu.dimension_semantics<parallel>], iteration_bounds = array<i64: 2>, scalar_prefetch = 0 : i64, scratch_operands = 1 : i64, tpu.core_type = #tpu.core_type<tc>, window_params = [{transform_indices = @transform_0, window_bounds = array<i64: 1, 16, 16, 8>}, {pipeline_mode = #tpu.pipeline_mode<synchronous>, transform_indices = @transform_1, window_bounds = array<i64: 72, 4>}, {transform_indices = @transform_2, window_bounds = array<i64: 1, 16, 16, 4>}, {transform_indices = @transform_3, window_bounds = array<i64: 1, 2, 4>}]} {
    %cst = arith.constant 0.000000e+00 : f32
    %0 = vector.broadcast %cst : f32 to vector<1x18x8xf32>
    %cst_0 = arith.constant 0.000000e+00 : f32
    %1 = vector.broadcast %cst_0 : f32 to vector<18x1x8xf32>
    %c0 = arith.constant 0 : index
    %c0_1 = arith.constant 0 : index
    %c0_2 = arith.constant 0 : index
    %2 = vector.load %arg5[%c0, %c0_1, %c0_2] : memref<18x18x8xf32, #tpu.memory_space<vmem>>, vector<1x18x8xf32>
    tpu.vector_store %arg5[%c0, %c0_1, %c0_2], %0 {strides = array<i32>} : memref<18x18x8xf32, #tpu.memory_space<vmem>>, vector<1x18x8xf32>,
    %c17 = arith.constant 17 : index
    %c0_3 = arith.constant 0 : index
    %c0_4 = arith.constant 0 : index
    %3 = vector.load %arg5[%c17, %c0_3, %c0_4] : memref<18x18x8xf32, #tpu.memory_space<vmem>>, vector<1x18x8xf32>
    tpu.vector_store %arg5[%c17, %c0_3, %c0_4], %0 {strides = array<i32>} : memref<18x18x8xf32, #tpu.memory_space<vmem>>, vector<1x18x8xf32>,
    %c0_5 = arith.constant 0 : index
    %c0_6 = arith.constant 0 : index
    %c0_7 = arith.constant 0 : index
    %4 = vector.load %arg5[%c0_5, %c0_6, %c0_7] : memref<18x18x8xf32, #tpu.memory_space<vmem>>, vector<18x1x8xf32>
    tpu.vector_store %arg5[%c0_5, %c0_6, %c0_7], %1 {strides = array<i32>} : memref<18x18x8xf32, #tpu.memory_space<vmem>>, vector<18x1x8xf32>,
    %c0_8 = arith.constant 0 : index
    %c17_9 = arith.constant 17 : index
    %c0_10 = arith.constant 0 : index
    %5 = vector.load %arg5[%c0_8, %c17_9, %c0_10] : memref<18x18x8xf32, #tpu.memory_space<vmem>>, vector<18x1x8xf32>
    tpu.vector_store %arg5[%c0_8, %c17_9, %c0_10], %1 {strides = array<i32>} : memref<18x18x8xf32, #tpu.memory_space<vmem>>, vector<18x1x8xf32>,
    %c0_11 = arith.constant 0 : index
    %c0_12 = arith.constant 0 : index
    %c0_13 = arith.constant 0 : index
    %c0_14 = arith.constant 0 : index
    %6 = vector.load %arg1[%c0_11, %c0_12, %c0_13, %c0_14] : memref<1x16x16x8xf32, #tpu.memory_space<vmem>>, vector<1x16x16x8xf32>
    %7 = vector.shape_cast %6 : vector<1x16x16x8xf32> to vector<16x16x8xf32>
    %c1 = arith.constant 1 : index
    %c1_15 = arith.constant 1 : index
    %c0_16 = arith.constant 0 : index
    %8 = vector.load %arg5[%c1, %c1_15, %c0_16] : memref<18x18x8xf32, #tpu.memory_space<vmem>>, vector<16x16x8xf32>
    tpu.vector_store %arg5[%c1, %c1_15, %c0_16], %7 {strides = array<i32>} : memref<18x18x8xf32, #tpu.memory_space<vmem>>, vector<16x16x8xf32>,
    %c0_17 = arith.constant 0 : index
    %c0_18 = arith.constant 0 : index
    %c0_19 = arith.constant 0 : index
    %9 = vector.load %arg5[%c0_17, %c0_18, %c0_19] : memref<18x18x8xf32, #tpu.memory_space<vmem>>, vector<16x16x8xf32>
    %c0_20 = arith.constant 0 : index
    %c1_21 = arith.constant 1 : index
    %c0_22 = arith.constant 0 : index
    %10 = vector.load %arg5[%c0_20, %c1_21, %c0_22] : memref<18x18x8xf32, #tpu.memory_space<vmem>>, vector<16x16x8xf32>
    %c0_23 = arith.constant 0 : index
    %c2 = arith.constant 2 : index
    %c0_24 = arith.constant 0 : index
    %11 = vector.load %arg5[%c0_23, %c2, %c0_24] : memref<18x18x8xf32, #tpu.memory_space<vmem>>, vector<16x16x8xf32>
    %c1_25 = arith.constant 1 : index
    %c0_26 = arith.constant 0 : index
    %c0_27 = arith.constant 0 : index
    %12 = vector.load %arg5[%c1_25, %c0_26, %c0_27] : memref<18x18x8xf32, #tpu.memory_space<vmem>>, vector<16x16x8xf32>
    %c1_28 = arith.constant 1 : index
    %c1_29 = arith.constant 1 : index
    %c0_30 = arith.constant 0 : index
    %13 = vector.load %arg5[%c1_28, %c1_29, %c0_30] : memref<18x18x8xf32, #tpu.memory_space<vmem>>, vector<16x16x8xf32>
    %c1_31 = arith.constant 1 : index
    %c2_32 = arith.constant 2 : index
    %c0_33 = arith.constant 0 : index
    %14 = vector.load %arg5[%c1_31, %c2_32, %c0_33] : memref<18x18x8xf32, #tpu.memory_space<vmem>>, vector<16x16x8xf32>
    %c2_34 = arith.constant 2 : index
    %c0_35 = arith.constant 0 : index
    %c0_36 = arith.constant 0 : index
    %15 = vector.load %arg5[%c2_34, %c0_35, %c0_36] : memref<18x18x8xf32, #tpu.memory_space<vmem>>, vector<16x16x8xf32>
    %c2_37 = arith.constant 2 : index
    %c1_38 = arith.constant 1 : index
    %c0_39 = arith.constant 0 : index
    %16 = vector.load %arg5[%c2_37, %c1_38, %c0_39] : memref<18x18x8xf32, #tpu.memory_space<vmem>>, vector<16x16x8xf32>
    %c2_40 = arith.constant 2 : index
    %c2_41 = arith.constant 2 : index
    %c0_42 = arith.constant 0 : index
    %17 = vector.load %arg5[%c2_40, %c2_41, %c0_42] : memref<18x18x8xf32, #tpu.memory_space<vmem>>, vector<16x16x8xf32>
    %18 = tpu.concatenate %9, %10, %11, %12, %13, %14, %15, %16, %17 in 2 : vector<16x16x8xf32>, vector<16x16x8xf32>, vector<16x16x8xf32>, vector<16x16x8xf32>, vector<16x16x8xf32>, vector<16x16x8xf32>, vector<16x16x8xf32>, vector<16x16x8xf32>, vector<16x16x8xf32> -> vector<16x16x72xf32>
    %19 = vector.shape_cast %18 : vector<16x16x72xf32> to vector<256x72xf32>
    %c0_43 = arith.constant 0 : index
    %c0_44 = arith.constant 0 : index
    %20 = vector.load %arg2[%c0_43, %c0_44] : memref<72x4xf32, #tpu.memory_space<vmem>>, vector<72x4xf32>
    %cst_45 = arith.constant dense<0.000000e+00> : vector<256x4xf32>
    %21 = tpu.matmul %19, %20, %cst_45 {dimension_numbers = #tpu.dot_dimension_numbers<[1], [0], [0], [1], [0, 0, 1, 1], [], []>} : vector<256x72xf32>, vector<72x4xf32>, vector<256x4xf32> -> vector<256x4xf32>
    %22 = vector.shape_cast %21 : vector<256x4xf32> to vector<16x16x4xf32>
    %c0_46 = arith.constant 0 : index
    %c0_47 = arith.constant 0 : index
    %c0_48 = arith.constant 0 : index
    %c0_49 = arith.constant 0 : index
    %23 = vector.load %arg3[%c0_46, %c0_47, %c0_48, %c0_49] : memref<1x16x16x4xf32, #tpu.memory_space<vmem>>, vector<1x16x16x4xf32>
    %24 = vector.shape_cast %23 : vector<1x16x16x4xf32> to vector<16x16x4xf32>
    %25 = vector.shape_cast %22 : vector<16x16x4xf32> to vector<1x16x16x4xf32>
    tpu.vector_store %arg3[%c0_46, %c0_47, %c0_48, %c0_49], %25 {strides = array<i32>} : memref<1x16x16x4xf32, #tpu.memory_space<vmem>>, vector<1x16x16x4xf32>,
    %cst_50 = arith.constant dense<0.000000e+00> : vector<4xf32>
    %26 = vector.multi_reduction <add>, %21, %cst_50 [0] : vector<256x4xf32> to vector<4xf32>
    %27 = vector.shape_cast %26 : vector<4xf32> to vector<1x4xf32>
    %28 = arith.mulf %21, %21 : vector<256x4xf32>
    %cst_51 = arith.constant dense<0.000000e+00> : vector<4xf32>
    %29 = vector.multi_reduction <add>, %28, %cst_51 [0] : vector<256x4xf32> to vector<4xf32>
    %30 = vector.shape_cast %29 : vector<4xf32> to vector<1x4xf32>
    %31 = tpu.concatenate %27, %30 in 0 : vector<1x4xf32>, vector<1x4xf32> -> vector<2x4xf32>
    %c0_52 = arith.constant 0 : index
    %c0_53 = arith.constant 0 : index
    %c0_54 = arith.constant 0 : index
    %32 = vector.load %arg4[%c0_52, %c0_53, %c0_54] : memref<1x2x4xf32, #tpu.memory_space<vmem>>, vector<1x2x4xf32>
    %33 = vector.shape_cast %32 : vector<1x2x4xf32> to vector<2x4xf32>
    %34 = vector.shape_cast %31 : vector<2x4xf32> to vector<1x2x4xf32>
    tpu.vector_store %arg4[%c0_52, %c0_53, %c0_54], %34 {strides = array<i32>} : memref<1x2x4xf32, #tpu.memory_space<vmem>>, vector<1x2x4xf32>,
    return
  }
  func.func @transform_0(%arg0: i32) -> (i32, i32, i32, i32) {
    %c0_i32 = arith.constant 0 : i32
    %c0_i32_0 = arith.constant 0 : i32
    %c0_i32_1 = arith.constant 0 : i32
    %c0_i32_2 = arith.constant 0 : i32
    return %arg0, %c0_i32, %c0_i32_0, %c0_i32_1 : i32, i32, i32, i32
  }
  func.func @transform_1(%arg0: i32) -> (i32, i32) {
    %c0_i32 = arith.constant 0 : i32
    %c0_i32_0 = arith.constant 0 : i32
    %c0_i32_1 = arith.constant 0 : i32
    return %c0_i32, %c0_i32_0 : i32, i32
  }
  func.func @transform_2(%arg0: i32) -> (i32, i32, i32, i32) {
    %c0_i32 = arith.constant 0 : i32
    %c0_i32_0 = arith.constant 0 : i32
    %c0_i32_1 = arith.constant 0 : i32
    %c0_i32_2 = arith.constant 0 : i32
    return %arg0, %c0_i32, %c0_i32_0, %c0_i32_1 : i32, i32, i32, i32
  }
  func.func @transform_3(%arg0: i32) -> (i32, i32, i32) {
    %c0_i32 = arith.constant 0 : i32
    %c0_i32_0 = arith.constant 0 : i32
    %c0_i32_1 = arith.constant 0 : i32
    return %arg0, %c0_i32, %c0_i32_0 : i32, i32, i32
  }
}

module attributes {stable_mosaic.version = 11 : i64} {
  func.func @_bn_relu_conv2_kernel(%arg0: i32, %arg1: memref<1x16x16x4xf32, #tpu.memory_space<vmem>>, %arg2: memref<2x4xf32, #tpu.memory_space<vmem>>, %arg3: memref<36x4xf32, #tpu.memory_space<vmem>>, %arg4: memref<1x16x16x4xf32, #tpu.memory_space<vmem>>, %arg5: memref<1x2x4xf32, #tpu.memory_space<vmem>>, %arg6: memref<18x18x4xf32, #tpu.memory_space<vmem>>) attributes {dimension_semantics = [#tpu.dimension_semantics<parallel>], iteration_bounds = array<i64: 2>, scalar_prefetch = 0 : i64, scratch_operands = 1 : i64, tpu.core_type = #tpu.core_type<tc>, window_params = [{transform_indices = @transform_0, window_bounds = array<i64: 1, 16, 16, 4>}, {pipeline_mode = #tpu.pipeline_mode<synchronous>, transform_indices = @transform_1, window_bounds = array<i64: 2, 4>}, {pipeline_mode = #tpu.pipeline_mode<synchronous>, transform_indices = @transform_2, window_bounds = array<i64: 36, 4>}, {transform_indices = @transform_3, window_bounds = array<i64: 1, 16, 16, 4>}, {transform_indices = @transform_4, window_bounds = array<i64: 1, 2, 4>}]} {
    %c0 = arith.constant 0 : index
    %c0_0 = arith.constant 0 : index
    %c0_1 = arith.constant 0 : index
    %c0_2 = arith.constant 0 : index
    %0 = vector.load %arg1[%c0, %c0_0, %c0_1, %c0_2] : memref<1x16x16x4xf32, #tpu.memory_space<vmem>>, vector<1x16x16x4xf32>
    %1 = vector.shape_cast %0 : vector<1x16x16x4xf32> to vector<16x16x4xf32>
    %c0_3 = arith.constant 0 : index
    %c0_4 = arith.constant 0 : index
    %2 = vector.load %arg2[%c0_3, %c0_4] : memref<2x4xf32, #tpu.memory_space<vmem>>, vector<1x4xf32>
    %3 = vector.shape_cast %2 : vector<1x4xf32> to vector<1x1x4xf32>
    %4 = vector.broadcast %3 : vector<1x1x4xf32> to vector<16x16x4xf32>
    %5 = arith.mulf %1, %4 : vector<16x16x4xf32>
    %c1 = arith.constant 1 : index
    %c0_5 = arith.constant 0 : index
    %6 = vector.load %arg2[%c1, %c0_5] : memref<2x4xf32, #tpu.memory_space<vmem>>, vector<1x4xf32>
    %7 = vector.shape_cast %6 : vector<1x4xf32> to vector<1x1x4xf32>
    %8 = vector.broadcast %7 : vector<1x1x4xf32> to vector<16x16x4xf32>
    %9 = arith.addf %5, %8 : vector<16x16x4xf32>
    %cst = arith.constant 0.000000e+00 : f32
    %10 = vector.broadcast %cst : f32 to vector<16x16x4xf32>
    %11 = arith.maximumf %9, %10 : vector<16x16x4xf32>
    %cst_6 = arith.constant 0.000000e+00 : f32
    %12 = vector.broadcast %cst_6 : f32 to vector<1x18x4xf32>
    %cst_7 = arith.constant 0.000000e+00 : f32
    %13 = vector.broadcast %cst_7 : f32 to vector<18x1x4xf32>
    %c0_8 = arith.constant 0 : index
    %c0_9 = arith.constant 0 : index
    %c0_10 = arith.constant 0 : index
    %14 = vector.load %arg6[%c0_8, %c0_9, %c0_10] : memref<18x18x4xf32, #tpu.memory_space<vmem>>, vector<1x18x4xf32>
    tpu.vector_store %arg6[%c0_8, %c0_9, %c0_10], %12 {strides = array<i32>} : memref<18x18x4xf32, #tpu.memory_space<vmem>>, vector<1x18x4xf32>,
    %c17 = arith.constant 17 : index
    %c0_11 = arith.constant 0 : index
    %c0_12 = arith.constant 0 : index
    %15 = vector.load %arg6[%c17, %c0_11, %c0_12] : memref<18x18x4xf32, #tpu.memory_space<vmem>>, vector<1x18x4xf32>
    tpu.vector_store %arg6[%c17, %c0_11, %c0_12], %12 {strides = array<i32>} : memref<18x18x4xf32, #tpu.memory_space<vmem>>, vector<1x18x4xf32>,
    %c0_13 = arith.constant 0 : index
    %c0_14 = arith.constant 0 : index
    %c0_15 = arith.constant 0 : index
    %16 = vector.load %arg6[%c0_13, %c0_14, %c0_15] : memref<18x18x4xf32, #tpu.memory_space<vmem>>, vector<18x1x4xf32>
    tpu.vector_store %arg6[%c0_13, %c0_14, %c0_15], %13 {strides = array<i32>} : memref<18x18x4xf32, #tpu.memory_space<vmem>>, vector<18x1x4xf32>,
    %c0_16 = arith.constant 0 : index
    %c17_17 = arith.constant 17 : index
    %c0_18 = arith.constant 0 : index
    %17 = vector.load %arg6[%c0_16, %c17_17, %c0_18] : memref<18x18x4xf32, #tpu.memory_space<vmem>>, vector<18x1x4xf32>
    tpu.vector_store %arg6[%c0_16, %c17_17, %c0_18], %13 {strides = array<i32>} : memref<18x18x4xf32, #tpu.memory_space<vmem>>, vector<18x1x4xf32>,
    %c1_19 = arith.constant 1 : index
    %c1_20 = arith.constant 1 : index
    %c0_21 = arith.constant 0 : index
    %18 = vector.load %arg6[%c1_19, %c1_20, %c0_21] : memref<18x18x4xf32, #tpu.memory_space<vmem>>, vector<16x16x4xf32>
    tpu.vector_store %arg6[%c1_19, %c1_20, %c0_21], %11 {strides = array<i32>} : memref<18x18x4xf32, #tpu.memory_space<vmem>>, vector<16x16x4xf32>,
    %c0_22 = arith.constant 0 : index
    %c0_23 = arith.constant 0 : index
    %c0_24 = arith.constant 0 : index
    %19 = vector.load %arg6[%c0_22, %c0_23, %c0_24] : memref<18x18x4xf32, #tpu.memory_space<vmem>>, vector<16x16x4xf32>
    %c0_25 = arith.constant 0 : index
    %c1_26 = arith.constant 1 : index
    %c0_27 = arith.constant 0 : index
    %20 = vector.load %arg6[%c0_25, %c1_26, %c0_27] : memref<18x18x4xf32, #tpu.memory_space<vmem>>, vector<16x16x4xf32>
    %c0_28 = arith.constant 0 : index
    %c2 = arith.constant 2 : index
    %c0_29 = arith.constant 0 : index
    %21 = vector.load %arg6[%c0_28, %c2, %c0_29] : memref<18x18x4xf32, #tpu.memory_space<vmem>>, vector<16x16x4xf32>
    %c1_30 = arith.constant 1 : index
    %c0_31 = arith.constant 0 : index
    %c0_32 = arith.constant 0 : index
    %22 = vector.load %arg6[%c1_30, %c0_31, %c0_32] : memref<18x18x4xf32, #tpu.memory_space<vmem>>, vector<16x16x4xf32>
    %c1_33 = arith.constant 1 : index
    %c1_34 = arith.constant 1 : index
    %c0_35 = arith.constant 0 : index
    %23 = vector.load %arg6[%c1_33, %c1_34, %c0_35] : memref<18x18x4xf32, #tpu.memory_space<vmem>>, vector<16x16x4xf32>
    %c1_36 = arith.constant 1 : index
    %c2_37 = arith.constant 2 : index
    %c0_38 = arith.constant 0 : index
    %24 = vector.load %arg6[%c1_36, %c2_37, %c0_38] : memref<18x18x4xf32, #tpu.memory_space<vmem>>, vector<16x16x4xf32>
    %c2_39 = arith.constant 2 : index
    %c0_40 = arith.constant 0 : index
    %c0_41 = arith.constant 0 : index
    %25 = vector.load %arg6[%c2_39, %c0_40, %c0_41] : memref<18x18x4xf32, #tpu.memory_space<vmem>>, vector<16x16x4xf32>
    %c2_42 = arith.constant 2 : index
    %c1_43 = arith.constant 1 : index
    %c0_44 = arith.constant 0 : index
    %26 = vector.load %arg6[%c2_42, %c1_43, %c0_44] : memref<18x18x4xf32, #tpu.memory_space<vmem>>, vector<16x16x4xf32>
    %c2_45 = arith.constant 2 : index
    %c2_46 = arith.constant 2 : index
    %c0_47 = arith.constant 0 : index
    %27 = vector.load %arg6[%c2_45, %c2_46, %c0_47] : memref<18x18x4xf32, #tpu.memory_space<vmem>>, vector<16x16x4xf32>
    %28 = tpu.concatenate %19, %20, %21, %22, %23, %24, %25, %26, %27 in 2 : vector<16x16x4xf32>, vector<16x16x4xf32>, vector<16x16x4xf32>, vector<16x16x4xf32>, vector<16x16x4xf32>, vector<16x16x4xf32>, vector<16x16x4xf32>, vector<16x16x4xf32>, vector<16x16x4xf32> -> vector<16x16x36xf32>
    %29 = vector.shape_cast %28 : vector<16x16x36xf32> to vector<256x36xf32>
    %c0_48 = arith.constant 0 : index
    %c0_49 = arith.constant 0 : index
    %30 = vector.load %arg3[%c0_48, %c0_49] : memref<36x4xf32, #tpu.memory_space<vmem>>, vector<36x4xf32>
    %cst_50 = arith.constant dense<0.000000e+00> : vector<256x4xf32>
    %31 = tpu.matmul %29, %30, %cst_50 {dimension_numbers = #tpu.dot_dimension_numbers<[1], [0], [0], [1], [0, 0, 1, 1], [], []>} : vector<256x36xf32>, vector<36x4xf32>, vector<256x4xf32> -> vector<256x4xf32>
    %32 = vector.shape_cast %31 : vector<256x4xf32> to vector<16x16x4xf32>
    %c0_51 = arith.constant 0 : index
    %c0_52 = arith.constant 0 : index
    %c0_53 = arith.constant 0 : index
    %c0_54 = arith.constant 0 : index
    %33 = vector.load %arg4[%c0_51, %c0_52, %c0_53, %c0_54] : memref<1x16x16x4xf32, #tpu.memory_space<vmem>>, vector<1x16x16x4xf32>
    %34 = vector.shape_cast %33 : vector<1x16x16x4xf32> to vector<16x16x4xf32>
    %35 = vector.shape_cast %32 : vector<16x16x4xf32> to vector<1x16x16x4xf32>
    tpu.vector_store %arg4[%c0_51, %c0_52, %c0_53, %c0_54], %35 {strides = array<i32>} : memref<1x16x16x4xf32, #tpu.memory_space<vmem>>, vector<1x16x16x4xf32>,
    %cst_55 = arith.constant dense<0.000000e+00> : vector<4xf32>
    %36 = vector.multi_reduction <add>, %31, %cst_55 [0] : vector<256x4xf32> to vector<4xf32>
    %37 = vector.shape_cast %36 : vector<4xf32> to vector<1x4xf32>
    %38 = arith.mulf %31, %31 : vector<256x4xf32>
    %cst_56 = arith.constant dense<0.000000e+00> : vector<4xf32>
    %39 = vector.multi_reduction <add>, %38, %cst_56 [0] : vector<256x4xf32> to vector<4xf32>
    %40 = vector.shape_cast %39 : vector<4xf32> to vector<1x4xf32>
    %41 = tpu.concatenate %37, %40 in 0 : vector<1x4xf32>, vector<1x4xf32> -> vector<2x4xf32>
    %c0_57 = arith.constant 0 : index
    %c0_58 = arith.constant 0 : index
    %c0_59 = arith.constant 0 : index
    %42 = vector.load %arg5[%c0_57, %c0_58, %c0_59] : memref<1x2x4xf32, #tpu.memory_space<vmem>>, vector<1x2x4xf32>
    %43 = vector.shape_cast %42 : vector<1x2x4xf32> to vector<2x4xf32>
    %44 = vector.shape_cast %41 : vector<2x4xf32> to vector<1x2x4xf32>
    tpu.vector_store %arg5[%c0_57, %c0_58, %c0_59], %44 {strides = array<i32>} : memref<1x2x4xf32, #tpu.memory_space<vmem>>, vector<1x2x4xf32>,
    return
  }
  func.func @transform_0(%arg0: i32) -> (i32, i32, i32, i32) {
    %c0_i32 = arith.constant 0 : i32
    %c0_i32_0 = arith.constant 0 : i32
    %c0_i32_1 = arith.constant 0 : i32
    %c0_i32_2 = arith.constant 0 : i32
    return %arg0, %c0_i32, %c0_i32_0, %c0_i32_1 : i32, i32, i32, i32
  }
  func.func @transform_1(%arg0: i32) -> (i32, i32) {
    %c0_i32 = arith.constant 0 : i32
    %c0_i32_0 = arith.constant 0 : i32
    %c0_i32_1 = arith.constant 0 : i32
    return %c0_i32, %c0_i32_0 : i32, i32
  }
  func.func @transform_2(%arg0: i32) -> (i32, i32) {
    %c0_i32 = arith.constant 0 : i32
    %c0_i32_0 = arith.constant 0 : i32
    %c0_i32_1 = arith.constant 0 : i32
    return %c0_i32, %c0_i32_0 : i32, i32
  }
  func.func @transform_3(%arg0: i32) -> (i32, i32, i32, i32) {
    %c0_i32 = arith.constant 0 : i32
    %c0_i32_0 = arith.constant 0 : i32
    %c0_i32_1 = arith.constant 0 : i32
    %c0_i32_2 = arith.constant 0 : i32
    return %arg0, %c0_i32, %c0_i32_0, %c0_i32_1 : i32, i32, i32, i32
  }
  func.func @transform_4(%arg0: i32) -> (i32, i32, i32) {
    %c0_i32 = arith.constant 0 : i32
    %c0_i32_0 = arith.constant 0 : i32
    %c0_i32_1 = arith.constant 0 : i32
    return %arg0, %c0_i32, %c0_i32_0 : i32, i32, i32
  }
}

module attributes {stable_mosaic.version = 11 : i64} {
  func.func @_bn_relu_upconv_kernel(%arg0: i32, %arg1: memref<1x16x16x4xf32, #tpu.memory_space<vmem>>, %arg2: memref<2x4xf32, #tpu.memory_space<vmem>>, %arg3: memref<16x16xf32, #tpu.memory_space<vmem>>, %arg4: memref<1x16xf32, #tpu.memory_space<vmem>>, %arg5: memref<1x16x16x4xf32, #tpu.memory_space<vmem>>, %arg6: memref<1x16x2x16x8xf32, #tpu.memory_space<vmem>>, %arg7: memref<17x17x4xf32, #tpu.memory_space<vmem>>) attributes {dimension_semantics = [#tpu.dimension_semantics<parallel>], iteration_bounds = array<i64: 2>, scalar_prefetch = 0 : i64, scratch_operands = 1 : i64, tpu.core_type = #tpu.core_type<tc>, window_params = [{transform_indices = @transform_0, window_bounds = array<i64: 1, 16, 16, 4>}, {pipeline_mode = #tpu.pipeline_mode<synchronous>, transform_indices = @transform_1, window_bounds = array<i64: 2, 4>}, {pipeline_mode = #tpu.pipeline_mode<synchronous>, transform_indices = @transform_2, window_bounds = array<i64: 16, 16>}, {pipeline_mode = #tpu.pipeline_mode<synchronous>, transform_indices = @transform_3, window_bounds = array<i64: 1, 16>}, {transform_indices = @transform_4, window_bounds = array<i64: 1, 16, 16, 4>}, {transform_indices = @transform_5, window_bounds = array<i64: 1, 16, 2, 16, 8>}]} {
    %c0 = arith.constant 0 : index
    %c0_0 = arith.constant 0 : index
    %c0_1 = arith.constant 0 : index
    %c0_2 = arith.constant 0 : index
    %0 = vector.load %arg1[%c0, %c0_0, %c0_1, %c0_2] : memref<1x16x16x4xf32, #tpu.memory_space<vmem>>, vector<1x16x16x4xf32>
    %1 = vector.shape_cast %0 : vector<1x16x16x4xf32> to vector<16x16x4xf32>
    %c0_3 = arith.constant 0 : index
    %c0_4 = arith.constant 0 : index
    %2 = vector.load %arg2[%c0_3, %c0_4] : memref<2x4xf32, #tpu.memory_space<vmem>>, vector<1x4xf32>
    %3 = vector.shape_cast %2 : vector<1x4xf32> to vector<1x1x4xf32>
    %4 = vector.broadcast %3 : vector<1x1x4xf32> to vector<16x16x4xf32>
    %5 = arith.mulf %1, %4 : vector<16x16x4xf32>
    %c1 = arith.constant 1 : index
    %c0_5 = arith.constant 0 : index
    %6 = vector.load %arg2[%c1, %c0_5] : memref<2x4xf32, #tpu.memory_space<vmem>>, vector<1x4xf32>
    %7 = vector.shape_cast %6 : vector<1x4xf32> to vector<1x1x4xf32>
    %8 = vector.broadcast %7 : vector<1x1x4xf32> to vector<16x16x4xf32>
    %9 = arith.addf %5, %8 : vector<16x16x4xf32>
    %cst = arith.constant 0.000000e+00 : f32
    %10 = vector.broadcast %cst : f32 to vector<16x16x4xf32>
    %11 = arith.maximumf %9, %10 : vector<16x16x4xf32>
    %c0_6 = arith.constant 0 : index
    %c0_7 = arith.constant 0 : index
    %c0_8 = arith.constant 0 : index
    %c0_9 = arith.constant 0 : index
    %12 = vector.load %arg5[%c0_6, %c0_7, %c0_8, %c0_9] : memref<1x16x16x4xf32, #tpu.memory_space<vmem>>, vector<1x16x16x4xf32>
    %13 = vector.shape_cast %12 : vector<1x16x16x4xf32> to vector<16x16x4xf32>
    %14 = vector.shape_cast %11 : vector<16x16x4xf32> to vector<1x16x16x4xf32>
    tpu.vector_store %arg5[%c0_6, %c0_7, %c0_8, %c0_9], %14 {strides = array<i32>} : memref<1x16x16x4xf32, #tpu.memory_space<vmem>>, vector<1x16x16x4xf32>,
    %cst_10 = arith.constant 0.000000e+00 : f32
    %15 = vector.broadcast %cst_10 : f32 to vector<1x17x4xf32>
    %cst_11 = arith.constant 0.000000e+00 : f32
    %16 = vector.broadcast %cst_11 : f32 to vector<17x1x4xf32>
    %c0_12 = arith.constant 0 : index
    %c0_13 = arith.constant 0 : index
    %c0_14 = arith.constant 0 : index
    %17 = vector.load %arg7[%c0_12, %c0_13, %c0_14] : memref<17x17x4xf32, #tpu.memory_space<vmem>>, vector<1x17x4xf32>
    tpu.vector_store %arg7[%c0_12, %c0_13, %c0_14], %15 {strides = array<i32>} : memref<17x17x4xf32, #tpu.memory_space<vmem>>, vector<1x17x4xf32>,
    %c16 = arith.constant 16 : index
    %c0_15 = arith.constant 0 : index
    %c0_16 = arith.constant 0 : index
    %18 = vector.load %arg7[%c16, %c0_15, %c0_16] : memref<17x17x4xf32, #tpu.memory_space<vmem>>, vector<1x17x4xf32>
    tpu.vector_store %arg7[%c16, %c0_15, %c0_16], %15 {strides = array<i32>} : memref<17x17x4xf32, #tpu.memory_space<vmem>>, vector<1x17x4xf32>,
    %c0_17 = arith.constant 0 : index
    %c0_18 = arith.constant 0 : index
    %c0_19 = arith.constant 0 : index
    %19 = vector.load %arg7[%c0_17, %c0_18, %c0_19] : memref<17x17x4xf32, #tpu.memory_space<vmem>>, vector<17x1x4xf32>
    tpu.vector_store %arg7[%c0_17, %c0_18, %c0_19], %16 {strides = array<i32>} : memref<17x17x4xf32, #tpu.memory_space<vmem>>, vector<17x1x4xf32>,
    %c0_20 = arith.constant 0 : index
    %c16_21 = arith.constant 16 : index
    %c0_22 = arith.constant 0 : index
    %20 = vector.load %arg7[%c0_20, %c16_21, %c0_22] : memref<17x17x4xf32, #tpu.memory_space<vmem>>, vector<17x1x4xf32>
    tpu.vector_store %arg7[%c0_20, %c16_21, %c0_22], %16 {strides = array<i32>} : memref<17x17x4xf32, #tpu.memory_space<vmem>>, vector<17x1x4xf32>,
    %c0_23 = arith.constant 0 : index
    %c0_24 = arith.constant 0 : index
    %c0_25 = arith.constant 0 : index
    %21 = vector.load %arg7[%c0_23, %c0_24, %c0_25] : memref<17x17x4xf32, #tpu.memory_space<vmem>>, vector<16x16x4xf32>
    tpu.vector_store %arg7[%c0_23, %c0_24, %c0_25], %11 {strides = array<i32>} : memref<17x17x4xf32, #tpu.memory_space<vmem>>, vector<16x16x4xf32>,
    %c0_26 = arith.constant 0 : index
    %c0_27 = arith.constant 0 : index
    %c0_28 = arith.constant 0 : index
    %22 = vector.load %arg7[%c0_26, %c0_27, %c0_28] : memref<17x17x4xf32, #tpu.memory_space<vmem>>, vector<16x16x4xf32>
    %c0_29 = arith.constant 0 : index
    %c1_30 = arith.constant 1 : index
    %c0_31 = arith.constant 0 : index
    %23 = vector.load %arg7[%c0_29, %c1_30, %c0_31] : memref<17x17x4xf32, #tpu.memory_space<vmem>>, vector<16x16x4xf32>
    %c1_32 = arith.constant 1 : index
    %c0_33 = arith.constant 0 : index
    %c0_34 = arith.constant 0 : index
    %24 = vector.load %arg7[%c1_32, %c0_33, %c0_34] : memref<17x17x4xf32, #tpu.memory_space<vmem>>, vector<16x16x4xf32>
    %c1_35 = arith.constant 1 : index
    %c1_36 = arith.constant 1 : index
    %c0_37 = arith.constant 0 : index
    %25 = vector.load %arg7[%c1_35, %c1_36, %c0_37] : memref<17x17x4xf32, #tpu.memory_space<vmem>>, vector<16x16x4xf32>
    %26 = tpu.concatenate %22, %23, %24, %25 in 2 : vector<16x16x4xf32>, vector<16x16x4xf32>, vector<16x16x4xf32>, vector<16x16x4xf32> -> vector<16x16x16xf32>
    %27 = vector.shape_cast %26 : vector<16x16x16xf32> to vector<256x16xf32>
    %c0_38 = arith.constant 0 : index
    %c0_39 = arith.constant 0 : index
    %28 = vector.load %arg3[%c0_38, %c0_39] : memref<16x16xf32, #tpu.memory_space<vmem>>, vector<16x16xf32>
    %cst_40 = arith.constant dense<0.000000e+00> : vector<256x16xf32>
    %29 = tpu.matmul %27, %28, %cst_40 {dimension_numbers = #tpu.dot_dimension_numbers<[1], [0], [0], [1], [0, 0, 1, 1], [], []>} : vector<256x16xf32>, vector<16x16xf32>, vector<256x16xf32> -> vector<256x16xf32>
    %c0_41 = arith.constant 0 : index
    %c0_42 = arith.constant 0 : index
    %30 = vector.load %arg4[%c0_41, %c0_42] : memref<1x16xf32, #tpu.memory_space<vmem>>, vector<1x16xf32>
    %31 = vector.broadcast %30 : vector<1x16xf32> to vector<256x16xf32>
    %32 = arith.addf %29, %31 : vector<256x16xf32>
    %33 = vector.extract_strided_slice %32 {offsets = [0, 0], sizes = [256, 8], strides = [1, 1]} : vector<256x16xf32> to vector<256x8xf32>
    %34 = vector.shape_cast %33 : vector<256x8xf32> to vector<16x16x8xf32>
    %c0_43 = arith.constant 0 : index
    %c0_44 = arith.constant 0 : index
    %c0_45 = arith.constant 0 : index
    %c0_46 = arith.constant 0 : index
    %c0_47 = arith.constant 0 : index
    %35 = vector.load %arg6[%c0_43, %c0_44, %c0_45, %c0_46, %c0_47] : memref<1x16x2x16x8xf32, #tpu.memory_space<vmem>>, vector<1x16x1x16x8xf32>
    %36 = vector.shape_cast %35 : vector<1x16x1x16x8xf32> to vector<16x16x8xf32>
    %37 = vector.shape_cast %34 : vector<16x16x8xf32> to vector<1x16x1x16x8xf32>
    tpu.vector_store %arg6[%c0_43, %c0_44, %c0_45, %c0_46, %c0_47], %37 {strides = array<i32>} : memref<1x16x2x16x8xf32, #tpu.memory_space<vmem>>, vector<1x16x1x16x8xf32>,
    %38 = vector.extract_strided_slice %32 {offsets = [0, 8], sizes = [256, 8], strides = [1, 1]} : vector<256x16xf32> to vector<256x8xf32>
    %39 = vector.shape_cast %38 : vector<256x8xf32> to vector<16x16x8xf32>
    %c0_48 = arith.constant 0 : index
    %c0_49 = arith.constant 0 : index
    %c1_50 = arith.constant 1 : index
    %c0_51 = arith.constant 0 : index
    %c0_52 = arith.constant 0 : index
    %40 = vector.load %arg6[%c0_48, %c0_49, %c1_50, %c0_51, %c0_52] : memref<1x16x2x16x8xf32, #tpu.memory_space<vmem>>, vector<1x16x1x16x8xf32>
    %41 = vector.shape_cast %40 : vector<1x16x1x16x8xf32> to vector<16x16x8xf32>
    %42 = vector.shape_cast %39 : vector<16x16x8xf32> to vector<1x16x1x16x8xf32>
    tpu.vector_store %arg6[%c0_48, %c0_49, %c1_50, %c0_51, %c0_52], %42 {strides = array<i32>} : memref<1x16x2x16x8xf32, #tpu.memory_space<vmem>>, vector<1x16x1x16x8xf32>,
    return
  }
  func.func @transform_0(%arg0: i32) -> (i32, i32, i32, i32) {
    %c0_i32 = arith.constant 0 : i32
    %c0_i32_0 = arith.constant 0 : i32
    %c0_i32_1 = arith.constant 0 : i32
    %c0_i32_2 = arith.constant 0 : i32
    return %arg0, %c0_i32, %c0_i32_0, %c0_i32_1 : i32, i32, i32, i32
  }
  func.func @transform_1(%arg0: i32) -> (i32, i32) {
    %c0_i32 = arith.constant 0 : i32
    %c0_i32_0 = arith.constant 0 : i32
    %c0_i32_1 = arith.constant 0 : i32
    return %c0_i32, %c0_i32_0 : i32, i32
  }
  func.func @transform_2(%arg0: i32) -> (i32, i32) {
    %c0_i32 = arith.constant 0 : i32
    %c0_i32_0 = arith.constant 0 : i32
    %c0_i32_1 = arith.constant 0 : i32
    return %c0_i32, %c0_i32_0 : i32, i32
  }
  func.func @transform_3(%arg0: i32) -> (i32, i32) {
    %c0_i32 = arith.constant 0 : i32
    %c0_i32_0 = arith.constant 0 : i32
    %c0_i32_1 = arith.constant 0 : i32
    return %c0_i32, %c0_i32_0 : i32, i32
  }
  func.func @transform_4(%arg0: i32) -> (i32, i32, i32, i32) {
    %c0_i32 = arith.constant 0 : i32
    %c0_i32_0 = arith.constant 0 : i32
    %c0_i32_1 = arith.constant 0 : i32
    %c0_i32_2 = arith.constant 0 : i32
    return %arg0, %c0_i32, %c0_i32_0, %c0_i32_1 : i32, i32, i32, i32
  }
  func.func @transform_5(%arg0: i32) -> (i32, i32, i32, i32, i32) {
    %c0_i32 = arith.constant 0 : i32
    %c0_i32_0 = arith.constant 0 : i32
    %c0_i32_1 = arith.constant 0 : i32
    %c0_i32_2 = arith.constant 0 : i32
    %c0_i32_3 = arith.constant 0 : i32
    return %arg0, %c0_i32, %c0_i32_0, %c0_i32_1, %c0_i32_2 : i32, i32, i32, i32, i32
  }
}

</mosaic_0001>

<bundles_post_ra>
// kernel: upsample_block_forward.5
= control target key start
LH: loop header
LB: loop body
LE: loop exit
PB: predicated region body
PF: predicated region fallthrough
CT: control target
= control target key end

     0   :  { %s1937_s18 = smov 0   ;;  %s2764_s0 = inlined_call_operand.vmem [shape: f32[2,16,16,4], index: 0, kind: input, shape index: {}]   ;;  %s2765_s1 = inlined_call_operand.vmem [shape: f32[2,4], index: 1, kind: input, shape index: {}]   ;;  %s2766_s2 = inlined_call_operand.vmem [shape: f32[16,16], index: 2, kind: input, shape index: {}]   ;;  %s2767_s3 = inlined_call_operand.vmem [shape: f32[1,16], index: 3, kind: input, shape index: {}]   ;;  %s2768_s4 = inlined_call_operand.vmem [shape: f32[2,16,16,4], index: 4, kind: output, shape index: {0}]   ;;  %s2769_s5 = inlined_call_operand.vmem [shape: f32[2,16,2,16,8], index: 5, kind: output, shape index: {1}]  }
   0x1 LB: > { %s1706_s19 = sadd.s32 4294967295, %s1900_s18   ;;  %p1710_p0 = scmp.ge.s32.totalorder %s1900_s18, 1  ;;  %s1900_s18 = sphi %s1937_s18, %s16_s18  }
   0x2   : > { %p190_p1 = scmp.lt.s32.totalorder %s1900_s18, 3 }
   0x4   : > { %p191_p2 = pnand %p1710_p0, %p190_p1 }
   0x5   : > { %p223_p3 = scmp.lt.s32.totalorder (!%p191_p2), %s1706_s19, 1  ;;  %vm376_vm0 = vcmask (!%p191_p2), 31744   ;;  %vm411_vm1 = vcmask (!%p191_p2), 24576   ;;  %v1902_v0 = vmov (!%p191_p2), 0.0   ;;  %v1991_v1 = vld [vmem:[%s2765_s1] ss:$0 sm:$0xff] (!%p191_p2) }
   0x6   : > { %194 = sbr.rel (%p191_p2) target bundleno = 674 (0x2a2), region = 36  ;;  %410 = vst.msk [vmem:[#allocation2 + $0x8] sm:$0xff] (!%p191_p2), %vm376_vm0, %v1902_v0  ;;  %409 = vst.msk [vmem:[#allocation2] sm:$0xff] (!%p191_p2), %vm376_vm0, %v1902_v0  ;;  %v2001_v2 = vld [vmem:[%s2765_s1 + $0x1] ss:$0 sm:$0xff] (!%p191_p2)  ;;  %s1903_s6 = smov (!%p191_p2), 4  }
   0x7   : > { %412 = vst.msk [vmem:[#allocation2 + $0x10] sm:$0x1] (!%p191_p2), %vm411_vm1, %v1902_v0  ;;  %416 = vst.msk [vmem:[#allocation2 + $0x190] sm:$0x1] (!%p191_p2), %vm411_vm1, %v1902_v0  ;;  %s1904_s11 = smov (!%p191_p2), 8   ;;  %s1905_s12 = smov (!%p191_p2), 12  }
   0x8   : > { %414 = vst.msk [vmem:[#allocation2 + $0x180] sm:$0xff] (!%p191_p2), %vm376_vm0, %v1902_v0  ;;  %415 = vst.msk [vmem:[#allocation2 + $0x188] sm:$0xff] (!%p191_p2), %vm376_vm0, %v1902_v0  ;;  %vm1028_vm2 = vcmask (!%p191_p2), 64512   ;;  %vm1061_vm3 = vcmask (!%p191_p2), 97280   ;;  %vm1103_vm4 = vcmask (!%p191_p2), 130048  }
   0x9   : > { %418 = vst.msk [vmem:[#allocation2 + $0x18] sm:$0x1] (!%p191_p2), %vm411_vm1, %v1902_v0  ;;  %419 = vst.msk [vmem:[#allocation2 + $0x30] sm:$0x1] (!%p191_p2), %vm411_vm1, %v1902_v0 }
   0xa   : > { %420 = vst.msk [vmem:[#allocation2 + $0x48] sm:$0x1] (!%p191_p2), %vm411_vm1, %v1902_v0  ;;  %421 = vst.msk [vmem:[#allocation2 + $0x60] sm:$0x1] (!%p191_p2), %vm411_vm1, %v1902_v0 }
   0xb   : > { %422 = vst.msk [vmem:[#allocation2 + $0x78] sm:$0x1] (!%p191_p2), %vm411_vm1, %v1902_v0  ;;  %423 = vst.msk [vmem:[#allocation2 + $0x90] sm:$0x1] (!%p191_p2), %vm411_vm1, %v1902_v0 }
   0xc   : > { %424 = vst.msk [vmem:[#allocation2 + $0xa8] sm:$0x1] (!%p191_p2), %vm411_vm1, %v1902_v0  ;;  %425 = vst.msk [vmem:[#allocation2 + $0xc0] sm:$0x1] (!%p191_p2), %vm411_vm1, %v1902_v0 }
   0xd   : > { %s2771_s19 = smov (!%p223_p3, %s1706_s19), 1  ;;  %426 = vst.msk [vmem:[#allocation2 + $0xd8] sm:$0x1] %vm411_vm1, %v1902_v0  ;;  %427 = vst.msk [vmem:[#allocation2 + $0xf0] sm:$0x1] %vm411_vm1, %v1902_v0 }
   0xe   : > { %428 = vst.msk [vmem:[#allocation2 + $0x108] sm:$0x1] %vm411_vm1, %v1902_v0  ;;  %429 = vst.msk [vmem:[#allocation2 + $0x120] sm:$0x1] %vm411_vm1, %v1902_v0  ;;  %s1786_s20 = sshll.u32 %s2771_s19, 8  ;;  %s1788_s13 = sshll.u32 %s2771_s19, 9 }
   0xf   : > { %430 = vst.msk [vmem:[#allocation2 + $0x138] sm:$0x1] %vm411_vm1, %v1902_v0  ;;  %431 = vst.msk [vmem:[#allocation2 + $0x150] sm:$0x1] %vm411_vm1, %v1902_v0  ;;  %s1996_s25 = scalar_lea.vmem %s2764_s0, %s1786_s20  ;;  %s2024_s30 = scalar_lea.vmem %s2768_s4, %s1786_s20 }
  0x10   : > { %432 = vst.msk [vmem:[#allocation2 + $0x168] sm:$0x1] %vm411_vm1, %v1902_v0  ;;  %435 = vst.msk [vmem:[#allocation2 + $0x28] sm:$0x1] %vm411_vm1, %v1902_v0  ;;  %v239_v3 = vld [vmem:[%s1996_s25 + $0x8] sm:$0xff]  ;;  %v238_v4 = vld [vmem:[%s1996_s25] sm:$0xff]  ;;  %s2567_s20 = scalar_lea.vmem %s2769_s5, %s1788_s13 }
  0x11   : > { %436 = vst.msk [vmem:[#allocation2 + $0x40] sm:$0x1] %vm411_vm1, %v1902_v0  ;;  %437 = vst.msk [vmem:[#allocation2 + $0x58] sm:$0x1] %vm411_vm1, %v1902_v0  ;;  %v255_v5 = vld [vmem:[%s1996_s25 + $0x88] sm:$0xff]  ;;  %v276_v6 = vmul.f32 %v1991_v1, %v239_v3  ;;  %v275_v7 = vmul.f32 %v1991_v1, %v238_v4  ;;  %v254_v9 = vld [vmem:[%s1996_s25 + $0x80] sm:$0xff] }
  0x12   : > { %438 = vst.msk [vmem:[#allocation2 + $0x70] sm:$0x1] %vm411_vm1, %v1902_v0  ;;  %439 = vst.msk [vmem:[#allocation2 + $0x88] sm:$0x1] %vm411_vm1, %v1902_v0  ;;  %v292_v8 = vmul.f32 %v1991_v1, %v255_v5  ;;  %v256_v10 = vld [vmem:[%s1996_s25 + $0x90] sm:$0xff]  ;;  %v291_v12 = vmul.f32 %v1991_v1, %v254_v9  ;;  %v257_v15 = vld [vmem:[%s1996_s25 + $0x98] sm:$0xff] }
  0x13   : > { %440 = vst.msk [vmem:[#allocation2 + $0xa0] sm:$0x1] %vm411_vm1, %v1902_v0  ;;  %441 = vst.msk [vmem:[#allocation2 + $0xb8] sm:$0x1] %vm411_vm1, %v1902_v0  ;;  %v240_v11 = vld [vmem:[%s1996_s25 + $0x10] sm:$0xff]  ;;  %v293_v13 = vmul.f32 %v1991_v1, %v256_v10  ;;  %v241_v16 = vld [vmem:[%s1996_s25 + $0x18] sm:$0xff]  ;;  %v313_v17 = vadd.f32 %v2001_v2, %v276_v6  ;;  %v312_v18 = vadd.f32 %v2001_v2, %v275_v7 }
  0x14   : > { %442 = vst.msk [vmem:[#allocation2 + $0xd0] sm:$0x1] %vm411_vm1, %v1902_v0  ;;  %443 = vst.msk [vmem:[#allocation2 + $0xe8] sm:$0x1] %vm411_vm1, %v1902_v0  ;;  %v277_v14 = vmul.f32 %v1991_v1, %v240_v11  ;;  %v329_v19 = vadd.f32 %v2001_v2, %v292_v8  ;;  %v294_v20 = vmul.f32 %v1991_v1, %v257_v15  ;;  %v258_v25 = vld [vmem:[%s1996_s25 + $0xa0] sm:$0xff]  ;;  %v259_v27 = vld [vmem:[%s1996_s25 + $0xa8] sm:$0xff] }
  0x15   : > { %444 = vst.msk [vmem:[#allocation2 + $0x100] sm:$0x1] %vm411_vm1, %v1902_v0  ;;  %445 = vst.msk [vmem:[#allocation2 + $0x118] sm:$0x1] %vm411_vm1, %v1902_v0  ;;  %v328_v21 = vadd.f32 %v2001_v2, %v291_v12  ;;  %v330_v22 = vadd.f32 %v2001_v2, %v293_v13  ;;  %v278_v24 = vmul.f32 %v1991_v1, %v241_v16  ;;  %v242_v26 = vld [vmem:[%s1996_s25 + $0x20] sm:$0xff]  ;;  %v345_v28 = vmax.f32 %v313_v17, 0.0 }
  0x16   : > { %446 = vst.msk [vmem:[#allocation2 + $0x130] sm:$0x1] %vm411_vm1, %v1902_v0  ;;  %447 = vst.msk [vmem:[#allocation2 + $0x148] sm:$0x1] %vm411_vm1, %v1902_v0  ;;  %v314_v23 = vadd.f32 %v2001_v2, %v277_v14  ;;  %v344_v29 = vmax.f32 %v312_v18, 0.0  ;;  %v361_v30 = vmax.f32 %v329_v19, 0.0  ;;  %v331_v31 = vadd.f32 %v2001_v2, %v294_v20 }
  0x17   : > { %448 = vst.msk [vmem:[#allocation2 + $0x160] sm:$0x1] %vm411_vm1, %v1902_v0  ;;  %449 = vst.msk [vmem:[#allocation2 + $0x178] sm:$0x1] %vm411_vm1, %v1902_v0  ;;  %v243_v32 = vld [vmem:[%s1996_s25 + $0x28] sm:$0xff]  ;;  %v260_v33 = vld [vmem:[%s1996_s25 + $0xb0] sm:$0xff]  ;;  %v315_v38 = vadd.f32 %v2001_v2, %v278_v24  ;;  %v295_v41 = vmul.f32 %v1991_v1, %v258_v25  ;;  %v279_v42 = vmul.f32 %v1991_v1, %v242_v26 }
  0x18   : > { %434 = vst.msk [vmem:[#allocation2 + $0x10] sm:$0x1] %vm411_vm1, %v1902_v0  ;;  %417 = vst.msk [vmem:[#allocation2] sm:$0x1] %vm411_vm1, %v1902_v0  ;;  %v244_v34 = vld [vmem:[%s1996_s25 + $0x30] sm:$0xff]  ;;  %v360_v35 = vmax.f32 %v328_v21, 0.0  ;;  %v296_v43 = vmul.f32 %v1991_v1, %v259_v27  ;;  %v280_v46 = vmul.f32 %v1991_v1, %v243_v32  ;;  %v297_v47 = vmul.f32 %v1991_v1, %v260_v33 }
  0x19   : > { %433 = vst.msk [vmem:[#allocation2 + $0x180] sm:$0x1] %vm411_vm1, %v1902_v0  ;;  %450 = vst.msk [vmem:[#allocation2 + $0x190] sm:$0x1] %vm411_vm1, %v1902_v0  ;;  %v362_v36 = vmax.f32 %v330_v22, 0.0  ;;  %v346_v37 = vmax.f32 %v314_v23, 0.0  ;;  %v281_v48 = vmul.f32 %v1991_v1, %v244_v34  ;;  %v332_v49 = vadd.f32 %v2001_v2, %v295_v41 }
  0x1a   : > { %v261_v39 = vld [vmem:[%s1996_s25 + $0xb8] sm:$0xff]  ;;  %452 = vst.msk [vmem:[#allocation2 + $0x8] sm:$0xff] %vm376_vm0, %v345_v28  ;;  %378 = vst.msk [vmem:[%s2024_s30 + $0x8] sm:$0xff] %vm376_vm0, %v345_v28  ;;  %v363_v40 = vmax.f32 %v331_v31, 0.0  ;;  %v347_v45 = vmax.f32 %v315_v38, 0.0  ;;  %v316_v50 = vadd.f32 %v2001_v2, %v279_v42  ;;  %v333_v51 = vadd.f32 %v2001_v2, %v296_v43  ;;  %v262_v57 = vld [vmem:[%s1996_s25 + $0xc0] sm:$0xff] }
  0x1b   : > { %451 = vst.msk [vmem:[#allocation2] sm:$0xff] %vm376_vm0, %v344_v29  ;;  %377 = vst.msk [vmem:[%s2024_s30] sm:$0xff] %vm376_vm0, %v344_v29  ;;  %v245_v44 = vld [vmem:[%s1996_s25 + $0x38] sm:$0xff]  ;;  %v298_v52 = vmul.f32 %v1991_v1, %v261_v39  ;;  %v317_v53 = vadd.f32 %v2001_v2, %v280_v46  ;;  %v334_v54 = vadd.f32 %v2001_v2, %v297_v47  ;;  %v246_v58 = vld [vmem:[%s1996_s25 + $0x40] sm:$0xff]  ;;  %v364_v60 = vmax.f32 %v332_v49, 0.0  ;;  %s1906_s19 = smov 120  }
  0x1c   : > { %394 = vst.msk [vmem:[%s2024_s30 + $0x88] sm:$0xff] %vm376_vm0, %v361_v30  ;;  %468 = vst.msk [vmem:[#allocation2 + $0xc8] sm:$0xff] %vm376_vm0, %v361_v30  ;;  %v318_v55 = vadd.f32 %v2001_v2, %v281_v48  ;;  %v282_v56 = vmul.f32 %v1991_v1, %v245_v44  ;;  %v263_v59 = vld [vmem:[%s1996_s25 + $0xc8] sm:$0xff]  ;;  %v348_v61 = vmax.f32 %v316_v50, 0.0  ;;  %v365_v62 = vmax.f32 %v333_v51, 0.0  ;;  %v264_v3 = vld [vmem:[%s1996_s25 + $0xd0] sm:$0xff] }
  0x1d   : > { %393 = vst.msk [vmem:[%s2024_s30 + $0x80] sm:$0xff] %vm376_vm0, %v360_v35  ;;  %467 = vst.msk [vmem:[#allocation2 + $0xc0] sm:$0xff] %vm376_vm0, %v360_v35  ;;  %v335_v63 = vadd.f32 %v2001_v2, %v298_v52  ;;  %v247_v0 = vld [vmem:[%s1996_s25 + $0x48] sm:$0xff]  ;;  %v248_v4 = vld [vmem:[%s1996_s25 + $0x50] sm:$0xff]  ;;  %v349_v5 = vmax.f32 %v317_v53, 0.0  ;;  %v366_v6 = vmax.f32 %v334_v54, 0.0  ;;  %v299_v10 = vmul.f32 %v1991_v1, %v262_v57 }
  0x1e   : > { %395 = vst.msk [vmem:[%s2024_s30 + $0x90] sm:$0xff] %vm376_vm0, %v362_v36  ;;  %469 = vst.msk [vmem:[#allocation2 + $0xd8] sm:$0xff] %vm376_vm0, %v362_v36  ;;  %v350_v7 = vmax.f32 %v318_v55, 0.0  ;;  %v319_v8 = vadd.f32 %v2001_v2, %v282_v56  ;;  %v283_v11 = vmul.f32 %v1991_v1, %v246_v58  ;;  %v300_v12 = vmul.f32 %v1991_v1, %v263_v59  ;;  %v265_v13 = vld [vmem:[%s1996_s25 + $0xd8] sm:$0xff]  ;;  %v266_v24 = vld [vmem:[%s1996_s25 + $0xe0] sm:$0xff] }
  0x1f   : > { %379 = vst.msk [vmem:[%s2024_s30 + $0x10] sm:$0xff] %vm376_vm0, %v346_v37  ;;  %453 = vst.msk [vmem:[#allocation2 + $0x18] sm:$0xff] %vm376_vm0, %v346_v37  ;;  %v367_v9 = vmax.f32 %v335_v63, 0.0  ;;  %v284_v17 = vmul.f32 %v1991_v1, %v247_v0  ;;  %v301_v18 = vmul.f32 %v1991_v1, %v264_v3  ;;  %v285_v19 = vmul.f32 %v1991_v1, %v248_v4  ;;  %v249_v20 = vld [vmem:[%s1996_s25 + $0x58] sm:$0xff]  ;;  %v250_v31 = vld [vmem:[%s1996_s25 + $0x60] sm:$0xff] }
  0x20   : > { %396 = vst.msk [vmem:[%s2024_s30 + $0x98] sm:$0xff] %vm376_vm0, %v363_v40  ;;  %470 = vst.msk [vmem:[#allocation2 + $0xe0] sm:$0xff] %vm376_vm0, %v363_v40  ;;  %v351_v16 = vmax.f32 %v319_v8, 0.0  ;;  %v336_v21 = vadd.f32 %v2001_v2, %v299_v10  ;;  %v320_v22 = vadd.f32 %v2001_v2, %v283_v11  ;;  %v337_v23 = vadd.f32 %v2001_v2, %v300_v12  ;;  %v267_v36 = vld [vmem:[%s1996_s25 + $0xe8] sm:$0xff]  ;;  %v268_v0 = vld [vmem:[%s1996_s25 + $0xf0] sm:$0xff] }
  0x21   : > { %380 = vst.msk [vmem:[%s2024_s30 + $0x18] sm:$0xff] %vm376_vm0, %v347_v45  ;;  %454 = vst.msk [vmem:[#allocation2 + $0x20] sm:$0xff] %vm376_vm0, %v347_v45  ;;  %v516_v14 = vld [vmem:[#allocation2 + $0x9] sm:$0xff]  ;;  %v321_v27 = vadd.f32 %v2001_v2, %v284_v17  ;;  %v338_v28 = vadd.f32 %v2001_v2, %v301_v18  ;;  %v322_v29 = vadd.f32 %v2001_v2, %v285_v19  ;;  %v1094_v45 = vld [vmem:[%s2766_s2] sm:$0xff] }
  0x22   : > { %397 = vst.msk [vmem:[%s2024_s30 + $0xa0] sm:$0xff] %vm376_vm0, %v364_v60  ;;  %471 = vst.msk [vmem:[#allocation2 + $0xf0] sm:$0xff] %vm376_vm0, %v364_v60  ;;  %v515_v15 = vld [vmem:[#allocation2 + $0x1] sm:$0xff]  ;;  %646 = vrot.lane.b32.xlu1 %v516_v14, %s1903_s6  ;;  %v302_v30 = vmul.f32 %v1991_v1, %v265_v13  ;;  %v368_v32 = vmax.f32 %v336_v21, 0.0  ;;  %v352_v33 = vmax.f32 %v320_v22, 0.0  ;;  %v369_v34 = vmax.f32 %v337_v23, 0.0 }
  0x23   : > { %381 = vst.msk [vmem:[%s2024_s30 + $0x20] sm:$0xff] %vm376_vm0, %v348_v61  ;;  %455 = vst.msk [vmem:[#allocation2 + $0x30] sm:$0xff] %vm376_vm0, %v348_v61  ;;  %644 = vrot.lane.b32.xlu0 %v515_v15, %s1903_s6  ;;  %v2121_v25 = vld [vmem:[#allocation2 + $0xc9] sm:$0xff]  ;;  %v286_v35 = vmul.f32 %v1991_v1, %v249_v20  ;;  %v353_v38 = vmax.f32 %v321_v27, 0.0  ;;  %v370_v39 = vmax.f32 %v338_v28, 0.0  ;;  %v354_v40 = vmax.f32 %v322_v29, 0.0 }
  0x24   : > { %398 = vst.msk [vmem:[%s2024_s30 + $0xa8] sm:$0xff] %vm376_vm0, %v365_v62  ;;  %472 = vst.msk [vmem:[#allocation2 + $0xf8] sm:$0xff] %vm376_vm0, %v365_v62  ;;  %v2123_v26 = vld [vmem:[#allocation2 + $0xc1] sm:$0xff]  ;;  %v339_v41 = vadd.f32 %v2001_v2, %v302_v30  ;;  %v303_v43 = vmul.f32 %v1991_v1, %v266_v24  ;;  %v287_v44 = vmul.f32 %v1991_v1, %v250_v31  ;;  %v252_v3 = vld [vmem:[%s1996_s25 + $0x70] sm:$0xff] }
  0x25   : > { %382 = vst.msk [vmem:[%s2024_s30 + $0x28] sm:$0xff] %vm376_vm0, %v349_v5  ;;  %456 = vst.msk [vmem:[#allocation2 + $0x38] sm:$0xff] %vm376_vm0, %v349_v5  ;;  %v251_v37 = vld [vmem:[%s1996_s25 + $0x68] sm:$0xff]  ;;  %v323_v42 = vadd.f32 %v2001_v2, %v286_v35  ;;  %v2159_v47 = vld [vmem:[#allocation2 + $0xd8] sm:$0xff]  ;;  %v304_v51 = vmul.f32 %v1991_v1, %v267_v36  ;;  %v305_v4 = vmul.f32 %v1991_v1, %v268_v0 }
  0x26   : > { %399 = vst.msk [vmem:[%s2024_s30 + $0xb0] sm:$0xff] %vm376_vm0, %v366_v6  ;;  %473 = vst.msk [vmem:[#allocation2 + $0x108] sm:$0xff] %vm376_vm0, %v366_v6  ;;  %678 = vrot.lane.b32.xlu1 %v2121_v25, %s1903_s6  ;;  %v1095_v46 = vld [vmem:[%s2766_s2 + $0x8] sm:$0xff]  ;;  %v2161_v48 = vld [vmem:[#allocation2 + $0x18] sm:$0xff]  ;;  %v371_v49 = vmax.f32 %v339_v41, 0.0  ;;  %v288_v52 = vmul.f32 %v1991_v1, %v251_v37  ;;  %v340_v54 = vadd.f32 %v2001_v2, %v303_v43 }
  0x27   : > { %383 = vst.msk [vmem:[%s2024_s30 + $0x30] sm:$0xff] %vm376_vm0, %v350_v7  ;;  %457 = vst.msk [vmem:[#allocation2 + $0x48] sm:$0xff] %vm376_vm0, %v350_v7  ;;  %676 = vrot.lane.b32.xlu0 %v2123_v26, %s1903_s6  ;;  %v1875_v50 = vpack.c.bf16 %v1095_v46, %v1094_v45  ;;  %v355_v53 = vmax.f32 %v323_v42, 0.0  ;;  %v324_v55 = vadd.f32 %v2001_v2, %v287_v44  ;;  %v2188_v60 = vld [vmem:[#allocation2 + $0xe0] sm:$0xff]  ;;  %v269_v12 = vld [vmem:[%s1996_s25 + $0xf8] sm:$0xff] }
  0x28   : > { %400 = vst.msk [vmem:[%s2024_s30 + $0xb8] sm:$0xff] %vm376_vm0, %v367_v9  ;;  %474 = vst.msk [vmem:[#allocation2 + $0x110] sm:$0xff] %vm376_vm0, %v367_v9  ;;  %v341_v56 = vadd.f32 %v2001_v2, %v304_v51  ;;  %v325_v57 = vadd.f32 %v2001_v2, %v288_v52  ;;  %v372_v58 = vmax.f32 %v340_v54, 0.0  ;;  %v2190_v61 = vld [vmem:[#allocation2 + $0x20] sm:$0xff]  ;;  %v289_v5 = vmul.f32 %v1991_v1, %v252_v3  ;;  %v253_v13 = vld [vmem:[%s1996_s25 + $0x78] sm:$0xff] }
  0x29   : > { %384 = vst.msk [vmem:[%s2024_s30 + $0x38] sm:$0xff] %vm376_vm0, %v351_v16  ;;  %458 = vst.msk [vmem:[#allocation2 + $0x50] sm:$0xff] %vm376_vm0, %v351_v16  ;;  %1876 = vmatprep.subr.bf16.mxu0 %v1875_v50  ;;  %1879 = vmatprep.subr.bf16.mxu1 %v1875_v50  ;;  %v356_v59 = vmax.f32 %v324_v55, 0.0  ;;  %v596_v6 = vld [vmem:[#allocation2 + $0xd9] sm:$0xff]  ;;  %v342_v8 = vadd.f32 %v2001_v2, %v305_v4  ;;  %v597_v14 = vld [vmem:[#allocation2 + $0xe1] sm:$0xff]  ;;  %v306_v16 = vmul.f32 %v1991_v1, %v269_v12 }
  0x2a   : > { %401 = vst.msk [vmem:[%s2024_s30 + $0xc0] sm:$0xff] %vm376_vm0, %v368_v32  ;;  %475 = vst.msk [vmem:[#allocation2 + $0x120] sm:$0xff] %vm376_vm0, %v368_v32  ;;  %804 = vrot.lane.b32.xlu1 %v2159_v47, %s1904_s11  ;;  %v373_v62 = vmax.f32 %v341_v56, 0.0  ;;  %v357_v63 = vmax.f32 %v325_v57, 0.0  ;;  %1878 = vmatpush3.bf16.msra.mxu0 %v1875_v50  ;;  %v580_v7 = vld [vmem:[#allocation2 + $0x19] sm:$0xff]  ;;  %v326_v9 = vadd.f32 %v2001_v2, %v289_v5  ;;  %v581_v15 = vld [vmem:[#allocation2 + $0x21] sm:$0xff] }
  0x2b   : > { %385 = vst.msk [vmem:[%s2024_s30 + $0x40] sm:$0xff] %vm376_vm0, %v352_v33  ;;  %459 = vst.msk [vmem:[#allocation2 + $0x60] sm:$0xff] %vm376_vm0, %v352_v33  ;;  %772 = vrot.lane.b32.xlu0 %v2161_v48, %s1904_s11  ;;  %1880 = vmatpush3.bf16.msra.mxu1 %v1875_v50  ;;  %v374_v10 = vmax.f32 %v342_v8, 0.0  ;;  %v290_v17 = vmul.f32 %v1991_v1, %v253_v13  ;;  %v343_v18 = vadd.f32 %v2001_v2, %v306_v16  ;;  %v2240_v1 = vld [vmem:[#allocation2 + $0xf0] sm:$0xff]  ;;  %v2248_v22 = vld [vmem:[#allocation2 + $0xf8] sm:$0xff] }
  0x2c   : > { %402 = vst.msk [vmem:[%s2024_s30 + $0xc8] sm:$0xff] %vm376_vm0, %v369_v34  ;;  %476 = vst.msk [vmem:[#allocation2 + $0x128] sm:$0xff] %vm376_vm0, %v369_v34  ;;  %v358_v11 = vmax.f32 %v326_v9, 0.0  ;;  %v2250_v23 = vld [vmem:[#allocation2 + $0x38] sm:$0xff]  ;;  %v483_v4 = vld [vmem:[#allocation2] sm:$0xff] }
  0x2d   : > { %386 = vst.msk [vmem:[%s2024_s30 + $0x48] sm:$0xff] %vm376_vm0, %v353_v38  ;;  %460 = vst.msk [vmem:[#allocation2 + $0x68] sm:$0xff] %vm376_vm0, %v353_v38  ;;  %v327_v19 = vadd.f32 %v2001_v2, %v290_v17  ;;  %v375_v20 = vmax.f32 %v343_v18, 0.0  ;;  %v2242_v2 = vld [vmem:[#allocation2 + $0x30] sm:$0xff]  ;;  %v599_v28 = vld [vmem:[#allocation2 + $0xf9] sm:$0xff] }
  0x2e   : > { %403 = vst.msk [vmem:[%s2024_s30 + $0xd0] sm:$0xff] %vm376_vm0, %v370_v39  ;;  %477 = vst.msk [vmem:[#allocation2 + $0x138] sm:$0xff] %vm376_vm0, %v370_v39  ;;  %806 = vrot.lane.b32.xlu1 %v2188_v60, %s1904_s11  ;;  %v598_v24 = vld [vmem:[#allocation2 + $0xf1] sm:$0xff]  ;;  %v583_v29 = vld [vmem:[#allocation2 + $0x39] sm:$0xff] }
  0x2f   : > { %387 = vst.msk [vmem:[%s2024_s30 + $0x50] sm:$0xff] %vm376_vm0, %v354_v40  ;;  %461 = vst.msk [vmem:[#allocation2 + $0x78] sm:$0xff] %vm376_vm0, %v354_v40  ;;  %774 = vrot.lane.b32.xlu0 %v2190_v61, %s1904_s11  ;;  %v359_v21 = vmax.f32 %v327_v19, 0.0  ;;  %v582_v27 = vld [vmem:[#allocation2 + $0x31] sm:$0xff]  ;;  %v2264_v30 = vld [vmem:[#allocation2 + $0x108] sm:$0xff] }
  0x30   : > { %404 = vst.msk [vmem:[%s2024_s30 + $0xd8] sm:$0xff] %vm376_vm0, %v371_v49  ;;  %478 = vst.msk [vmem:[#allocation2 + $0x140] sm:$0xff] %vm376_vm0, %v371_v49  ;;  %v2266_v31 = vld [vmem:[#allocation2 + $0x48] sm:$0xff]  ;;  %v2272_v32 = vld [vmem:[#allocation2 + $0x110] sm:$0xff] }
  0x31   : > { %388 = vst.msk [vmem:[%s2024_s30 + $0x58] sm:$0xff] %vm376_vm0, %v355_v53  ;;  %462 = vst.msk [vmem:[#allocation2 + $0x80] sm:$0xff] %vm376_vm0, %v355_v53  ;;  %v2274_v33 = vld [vmem:[#allocation2 + $0x50] sm:$0xff]  ;;  %v2288_v38 = vld [vmem:[#allocation2 + $0x120] sm:$0xff] }
  0x32   : > { %405 = vst.msk [vmem:[%s2024_s30 + $0xe0] sm:$0xff] %vm376_vm0, %v372_v58  ;;  %479 = vst.msk [vmem:[#allocation2 + $0x150] sm:$0xff] %vm376_vm0, %v372_v58  ;;  %932 = vrot.lane.b32.xlu1 %v596_v6, %s1905_s12  ;;  %v600_v34 = vld [vmem:[#allocation2 + $0x109] sm:$0xff]  ;;  %v601_v36 = vld [vmem:[#allocation2 + $0x111] sm:$0xff] }
  0x33   : > { %389 = vst.msk [vmem:[%s2024_s30 + $0x60] sm:$0xff] %vm376_vm0, %v356_v59  ;;  %463 = vst.msk [vmem:[#allocation2 + $0x90] sm:$0xff] %vm376_vm0, %v356_v59  ;;  %900 = vrot.lane.b32.xlu0 %v580_v7, %s1905_s12  ;;  %v584_v35 = vld [vmem:[#allocation2 + $0x49] sm:$0xff]  ;;  %v585_v37 = vld [vmem:[#allocation2 + $0x51] sm:$0xff] }
  0x34   : > { %406 = vst.msk [vmem:[%s2024_s30 + $0xe8] sm:$0xff] %vm376_vm0, %v373_v62  ;;  %480 = vst.msk [vmem:[#allocation2 + $0x158] sm:$0xff] %vm376_vm0, %v373_v62  ;;  %v2290_v39 = vld [vmem:[#allocation2 + $0x60] sm:$0xff]  ;;  %v2296_v40 = vld [vmem:[#allocation2 + $0x128] sm:$0xff] }
  0x35   : > { %390 = vst.msk [vmem:[%s2024_s30 + $0x68] sm:$0xff] %vm376_vm0, %v357_v63  ;;  %464 = vst.msk [vmem:[#allocation2 + $0x98] sm:$0xff] %vm376_vm0, %v357_v63  ;;  %v2298_v41 = vld [vmem:[#allocation2 + $0x68] sm:$0xff]  ;;  %v2312_v46 = vld [vmem:[#allocation2 + $0x138] sm:$0xff] }
  0x36   : > { %407 = vst.msk [vmem:[%s2024_s30 + $0xf0] sm:$0xff] %vm376_vm0, %v374_v10  ;;  %481 = vst.msk [vmem:[#allocation2 + $0x168] sm:$0xff] %vm376_vm0, %v374_v10  ;;  %934 = vrot.lane.b32.xlu1 %v597_v14, %s1905_s12  ;;  %v602_v42 = vld [vmem:[#allocation2 + $0x121] sm:$0xff]  ;;  %v603_v44 = vld [vmem:[#allocation2 + $0x129] sm:$0xff] }
  0x37   : > { %391 = vst.msk [vmem:[%s2024_s30 + $0x70] sm:$0xff] %vm376_vm0, %v358_v11  ;;  %465 = vst.msk [vmem:[#allocation2 + $0xa8] sm:$0xff] %vm376_vm0, %v358_v11  ;;  %902 = vrot.lane.b32.xlu0 %v581_v15, %s1905_s12  ;;  %v586_v43 = vld [vmem:[#allocation2 + $0x61] sm:$0xff]  ;;  %v587_v45 = vld [vmem:[#allocation2 + $0x69] sm:$0xff] }
  0x38   : > { %408 = vst.msk [vmem:[%s2024_s30 + $0xf8] sm:$0xff] %vm376_vm0, %v375_v20  ;;  %482 = vst.msk [vmem:[#allocation2 + $0x170] sm:$0xff] %vm376_vm0, %v375_v20  ;;  %v2314_v49 = vld [vmem:[#allocation2 + $0x78] sm:$0xff]  ;;  %v2320_v50 = vld [vmem:[#allocation2 + $0x140] sm:$0xff] }
  0x39   : > { %392 = vst.msk [vmem:[%s2024_s30 + $0x78] sm:$0xff] %vm376_vm0, %v359_v21  ;;  %466 = vst.msk [vmem:[#allocation2 + $0xb0] sm:$0xff] %vm376_vm0, %v359_v21  ;;  %v2322_v51 = vld [vmem:[#allocation2 + $0x80] sm:$0xff]  ;;  %v2336_v0 = vld [vmem:[#allocation2 + $0x150] sm:$0xff] }
  0x3a   : > { %680 = vrot.lane.b32.xlu1 %v596_v6, %s1903_s6  ;;  %v604_v52 = vld [vmem:[#allocation2 + $0x139] sm:$0xff]  ;;  %v605_v54 = vld [vmem:[#allocation2 + $0x141] sm:$0xff]  ;;  %v2338_v3 = vld [vmem:[#allocation2 + $0x90] sm:$0xff] }
  0x3b   : > { %648 = vrot.lane.b32.xlu0 %v580_v7, %s1903_s6  ;;  %v588_v53 = vld [vmem:[#allocation2 + $0x79] sm:$0xff]  ;;  %v589_v55 = vld [vmem:[#allocation2 + $0x81] sm:$0xff] }
  0x3c   : > { %v2340_v5 = vld [vmem:[#allocation2 + $0xc0] sm:$0xff]  ;;  %v2349_v10 = vld [vmem:[#allocation2 + $0x158] sm:$0xff]  ;;  %v484_v12 = vld [vmem:[#allocation2 + $0x8] sm:$0xff] }
  0x3d   : > { %v2351_v11 = vld [vmem:[#allocation2 + $0x98] sm:$0xff]  ;;  %v2353_v13 = vld [vmem:[#allocation2 + $0xc8] sm:$0xff] }
  0x3e   : > { %682 = vrot.lane.b32.xlu1 %v597_v14, %s1903_s6 }
  0x3f   : > { %650 = vrot.lane.b32.xlu0 %v581_v15, %s1903_s6 }
  0x42   : > { %808 = vrot.lane.b32.xlu1 %v2240_v1, %s1904_s11 }
  0x43   : > { %776 = vrot.lane.b32.xlu0 %v2242_v2, %s1904_s11 }
  0x46   : > { %810 = vrot.lane.b32.xlu1 %v2248_v22, %s1904_s11 }
  0x47   : > { %778 = vrot.lane.b32.xlu0 %v2250_v23, %s1904_s11 }
  0x4a   : > { %936 = vrot.lane.b32.xlu1 %v598_v24, %s1905_s12 }
  0x4b   : > { %904 = vrot.lane.b32.xlu0 %v582_v27, %s1905_s12 }
  0x4e   : > { %938 = vrot.lane.b32.xlu1 %v599_v28, %s1905_s12 }
  0x4f   : > { %906 = vrot.lane.b32.xlu0 %v583_v29, %s1905_s12 }
  0x52   : > { %684 = vrot.lane.b32.xlu1 %v598_v24, %s1903_s6  ;;  %v606_v24 = vld [vmem:[#allocation2 + $0x151] sm:$0xff] }
  0x53   : > { %652 = vrot.lane.b32.xlu0 %v582_v27, %s1903_s6  ;;  %v590_v27 = vld [vmem:[#allocation2 + $0x91] sm:$0xff] }
  0x56   : > { %686 = vrot.lane.b32.xlu1 %v599_v28, %s1903_s6 }
  0x57   : > { %654 = vrot.lane.b32.xlu0 %v583_v29, %s1903_s6 }
  0x5a   : > { %812 = vrot.lane.b32.xlu1 %v2264_v30, %s1904_s11 }
  0x5b   : > { %780 = vrot.lane.b32.xlu0 %v2266_v31, %s1904_s11 }
  0x5e   : > { %814 = vrot.lane.b32.xlu1 %v2272_v32, %s1904_s11 }
  0x5f   : > { %782 = vrot.lane.b32.xlu0 %v2274_v33, %s1904_s11 }
  0x62   : > { %940 = vrot.lane.b32.xlu1 %v600_v34, %s1905_s12 }
  0x63   : > { %908 = vrot.lane.b32.xlu0 %v584_v35, %s1905_s12 }
  0x66   : > { %942 = vrot.lane.b32.xlu1 %v601_v36, %s1905_s12 }
  0x67   : > { %910 = vrot.lane.b32.xlu0 %v585_v37, %s1905_s12 }
  0x6a   : > { %688 = vrot.lane.b32.xlu1 %v600_v34, %s1903_s6 }
  0x6b   : > { %656 = vrot.lane.b32.xlu0 %v584_v35, %s1903_s6 }
  0x6e   : > { %690 = vrot.lane.b32.xlu1 %v601_v36, %s1903_s6 }
  0x6f   : > { %658 = vrot.lane.b32.xlu0 %v585_v37, %s1903_s6 }
  0x72   : > { %816 = vrot.lane.b32.xlu1 %v2288_v38, %s1904_s11 }
  0x73   : > { %784 = vrot.lane.b32.xlu0 %v2290_v39, %s1904_s11 }
  0x76   : > { %818 = vrot.lane.b32.xlu1 %v2296_v40, %s1904_s11 }
  0x77   : > { %786 = vrot.lane.b32.xlu0 %v2298_v41, %s1904_s11 }
  0x7a   : > { %944 = vrot.lane.b32.xlu1 %v602_v42, %s1905_s12 }
  0x7b   : > { %912 = vrot.lane.b32.xlu0 %v586_v43, %s1905_s12 }
  0x7e   : > { %946 = vrot.lane.b32.xlu1 %v603_v44, %s1905_s12 }
  0x7f   : > { %914 = vrot.lane.b32.xlu0 %v587_v45, %s1905_s12 }
  0x82   : > { %692 = vrot.lane.b32.xlu1 %v602_v42, %s1903_s6  ;;  %v607_v42 = vld [vmem:[#allocation2 + $0x159] sm:$0xff] }
  0x83   : > { %660 = vrot.lane.b32.xlu0 %v586_v43, %s1903_s6  ;;  %v591_v43 = vld [vmem:[#allocation2 + $0x99] sm:$0xff] }
  0x86   : > { %694 = vrot.lane.b32.xlu1 %v603_v44, %s1903_s6 }
  0x87   : > { %662 = vrot.lane.b32.xlu0 %v587_v45, %s1903_s6 }
  0x8a   : > { %820 = vrot.lane.b32.xlu1 %v2312_v46, %s1904_s11 }
  0x8b   : > { %788 = vrot.lane.b32.xlu0 %v2314_v49, %s1904_s11 }
  0x8e   : > { %822 = vrot.lane.b32.xlu1 %v2320_v50, %s1904_s11 }
  0x8f   : > { %790 = vrot.lane.b32.xlu0 %v2322_v51, %s1904_s11 }
  0x92   : > { %948 = vrot.lane.b32.xlu1 %v604_v52, %s1905_s12 }
  0x93   : > { %916 = vrot.lane.b32.xlu0 %v588_v53, %s1905_s12 }
  0x94   : > { %v647_v56 = vpop.permute.xlu1 %646 }
  0x95   : > { %v645_v57 = vpop.permute.xlu0 %644  ;;  %v997_v20 = vsel %vm376_vm0, %v484_v12, %v647_v56  ;;  %v2382_v56 = vld [vmem:[#allocation2 + $0x168] sm:$0xff] }
  0x96   : > { %950 = vrot.lane.b32.xlu1 %v605_v54, %s1905_s12  ;;  %v996_v8 = vsel %vm376_vm0, %v483_v4, %v645_v57  ;;  %v2384_v57 = vld [vmem:[#allocation2 + $0xa8] sm:$0xff]  ;;  %v2394_v4 = vld [vmem:[#allocation2 + $0x170] sm:$0xff] }
  0x97   : > { %918 = vrot.lane.b32.xlu0 %v589_v55, %s1905_s12 }
  0x98   : > { %v679_v58 = vpop.permute.xlu1 %678 }
  0x99   : > { %v677_v59 = vpop.permute.xlu0 %676  ;;  %v1013_v21 = vsel %vm376_vm0, %v2353_v13, %v679_v58 }
  0x9a   : > { %696 = vrot.lane.b32.xlu1 %v604_v52, %s1903_s6  ;;  %v1012_v9 = vsel %vm376_vm0, %v2340_v5, %v677_v59 }
  0x9b   : > { %664 = vrot.lane.b32.xlu0 %v588_v53, %s1903_s6 }
  0x9c   : > { %v805_v62 = vpop.permute.xlu1 %804 }
  0x9d   : > { %v773_v63 = vpop.permute.xlu0 %772  ;;  %v1045_v14 = vsel %vm1028_vm2, %v1012_v9, %v805_v62 }
  0x9e   : > { %698 = vrot.lane.b32.xlu1 %v605_v54, %s1903_s6  ;;  %v1029_v15 = vsel %vm1028_vm2, %v996_v8, %v773_v63 }
  0x9f   : > { %666 = vrot.lane.b32.xlu0 %v589_v55, %s1903_s6 }
  0xa0   : > { %v807_v6 = vpop.permute.xlu1 %806 }
  0xa1   : > { %v775_v7 = vpop.permute.xlu0 %774  ;;  %v1046_v28 = vsel %vm1028_vm2, %v1013_v21, %v807_v6  ;;  %v2396_v6 = vld [vmem:[#allocation2 + $0xb0] sm:$0xff] }
  0xa2   : > { %824 = vrot.lane.b32.xlu1 %v2336_v0, %s1904_s11  ;;  %v1030_v29 = vsel %vm1028_vm2, %v997_v20, %v775_v7 }
  0xa3   : > { %792 = vrot.lane.b32.xlu0 %v2338_v3, %s1904_s11 }
  0xa4   : > { %v933_v16 = vpop.permute.xlu1 %932 }
  0xa5   : > { %v901_v17 = vpop.permute.xlu0 %900  ;;  %v1078_v19 = vsel %vm1061_vm3, %v1045_v14, %v933_v16  ;;  %v608_v16 = vld [vmem:[#allocation2 + $0x169] sm:$0xff] }
  0xa6   : > { %v1062_v18 = vsel %vm1061_vm3, %v1029_v15, %v901_v17  ;;  %826 = vrot.lane.b32.xlu1 %v2349_v10, %s1904_s11  ;;  %1851 = vmatprep.mubr.msk.f32.mxu1 %vm1103_vm4, %v1078_v19  ;;  %v592_v17 = vld [vmem:[#allocation2 + $0xa9] sm:$0xff] }
  0xa7   : > { %794 = vrot.lane.b32.xlu0 %v2351_v11, %s1904_s11  ;;  %1827 = vmatprep.mubr.msk.f32.mxu0 %vm1103_vm4, %v1062_v18 }
  0xa8   : > { %v935_v34 = vpop.permute.xlu1 %934 }
  0xa9   : > { %v903_v35 = vpop.permute.xlu0 %902  ;;  %v1079_v36 = vsel %vm1061_vm3, %v1046_v28, %v935_v34 }
  0xaa   : > { %v1063_v37 = vsel %vm1061_vm3, %v1030_v29, %v903_v35  ;;  %952 = vrot.lane.b32.xlu1 %v606_v24, %s1905_s12  ;;  %1852 = vmatmul.mubr.msk.f32.vlgmr.msra.gmra.mrb[0].mxu1 %vm1103_vm4, %v1079_v36 }
  0xab   : > { %920 = vrot.lane.b32.xlu0 %v590_v27, %s1905_s12  ;;  %1828 = vmatmul.mubr.msk.f32.vlgmr.msra.gmra.mrb[0].mxu0 %vm1103_vm4, %v1063_v37 }
  0xac   : > { %v681_v44 = vpop.permute.xlu1 %680 }
  0xad   : > { %v649_v45 = vpop.permute.xlu0 %648  ;;  %v1014_v62 = vsel %vm376_vm0, %v2159_v47, %v681_v44 }
  0xae   : > { %954 = vrot.lane.b32.xlu1 %v607_v42, %s1905_s12  ;;  %v998_v63 = vsel %vm376_vm0, %v2161_v48, %v649_v45 }
  0xaf   : > { %922 = vrot.lane.b32.xlu0 %v591_v43, %s1905_s12 }
  0xb0   : > { %v683_v52 = vpop.permute.xlu1 %682 }
  0xb1   : > { %v651_v53 = vpop.permute.xlu0 %650  ;;  %v1015_v47 = vsel %vm376_vm0, %v2188_v60, %v683_v52  ;;  %v609_v60 = vld [vmem:[#allocation2 + $0x171] sm:$0xff] }
  0xb2   : > { %700 = vrot.lane.b32.xlu1 %v606_v24, %s1903_s6  ;;  %v999_v48 = vsel %vm376_vm0, %v2190_v61, %v651_v53  ;;  %v593_v61 = vld [vmem:[#allocation2 + $0xb1] sm:$0xff]  ;;  %v579_v53 = vld [vmem:[#allocation2 + $0x188] sm:$0xff] }
  0xb3   : > { %668 = vrot.lane.b32.xlu0 %v590_v27, %s1903_s6 }
  0xb4   : > { %v809_v54 = vpop.permute.xlu1 %808 }
  0xb5   : > { %v777_v55 = vpop.permute.xlu0 %776  ;;  %v1047_v7 = vsel %vm1028_vm2, %v1014_v62, %v809_v54 }
  0xb6   : > { %702 = vrot.lane.b32.xlu1 %v607_v42, %s1903_s6  ;;  %v1031_v8 = vsel %vm1028_vm2, %v998_v63, %v777_v55  ;;  %v578_v42 = vld [vmem:[#allocation2 + $0x180] sm:$0xff] }
  0xb7   : > { %670 = vrot.lane.b32.xlu0 %v591_v43, %s1903_s6 }
  0xb8   : > { %v811_v58 = vpop.permute.xlu1 %810 }
  0xb9   : > { %v779_v59 = vpop.permute.xlu0 %778  ;;  %v1048_v18 = vsel %vm1028_vm2, %v1015_v47, %v811_v58 }
  0xba   : > { %828 = vrot.lane.b32.xlu1 %v2382_v56, %s1904_s11  ;;  %v1032_v19 = vsel %vm1028_vm2, %v999_v48, %v779_v59 }
  0xbb   : > { %796 = vrot.lane.b32.xlu0 %v2384_v57, %s1904_s11 }
  0xbc   : > { %v937_v9 = vpop.permute.xlu1 %936 }
  0xbd   : > { %v905_v12 = vpop.permute.xlu0 %904  ;;  %v1080_v14 = vsel %vm1061_vm3, %v1047_v7, %v937_v9 }
  0xbe   : > { %v1064_v15 = vsel %vm1061_vm3, %v1031_v8, %v905_v12  ;;  %830 = vrot.lane.b32.xlu1 %v2394_v4, %s1904_s11  ;;  %1854 = vmatprep.mubr.msk.f32.mxu1 %vm1103_vm4, %v1080_v14 }
  0xbf   : > { %798 = vrot.lane.b32.xlu0 %v2396_v6, %s1904_s11  ;;  %1830 = vmatprep.mubr.msk.f32.mxu0 %vm1103_vm4, %v1064_v15 }
  0xc0   : > { %v939_v20 = vpop.permute.xlu1 %938 }
  0xc1   : > { %v907_v21 = vpop.permute.xlu0 %906  ;;  %v1081_v24 = vsel %vm1061_vm3, %v1048_v18, %v939_v20 }
  0xc2   : > { %v1065_v27 = vsel %vm1061_vm3, %v1032_v19, %v907_v21  ;;  %956 = vrot.lane.b32.xlu1 %v608_v16, %s1905_s12  ;;  %1855 = vmatmul.mubr.msk.f32.gmra.mrb[2].mxu1 %vm1103_vm4, %v1081_v24 }
  0xc3   : > { %924 = vrot.lane.b32.xlu0 %v592_v17, %s1905_s12  ;;  %1831 = vmatmul.mubr.msk.f32.gmra.mrb[2].mxu0 %vm1103_vm4, %v1065_v27 }
  0xc4   : > { %v685_v28 = vpop.permute.xlu1 %684 }
  0xc5   : > { %v653_v29 = vpop.permute.xlu0 %652  ;;  %v1016_v45 = vsel %vm376_vm0, %v2240_v1, %v685_v28 }
  0xc6   : > { %958 = vrot.lane.b32.xlu1 %v609_v60, %s1905_s12  ;;  %v1000_v52 = vsel %vm376_vm0, %v2242_v2, %v653_v29 }
  0xc7   : > { %926 = vrot.lane.b32.xlu0 %v593_v61, %s1905_s12 }
  0xc8   : > { %v687_v34 = vpop.permute.xlu1 %686 }
  0xc9   : > { %v655_v35 = vpop.permute.xlu0 %654  ;;  %v1017_v1 = vsel %vm376_vm0, %v2248_v22, %v687_v34  ;;  %v611_v22 = vld [vmem:[#allocation2 + $0x189] sm:$0xff] }
  0xca   : > { %704 = vrot.lane.b32.xlu1 %v608_v16, %s1903_s6  ;;  %v1001_v2 = vsel %vm376_vm0, %v2250_v23, %v655_v35 }
  0xcb   : > { %672 = vrot.lane.b32.xlu0 %v592_v17, %s1903_s6 }
  0xcc   : > { %v813_v36 = vpop.permute.xlu1 %812 }
  0xcd   : > { %v781_v37 = vpop.permute.xlu0 %780  ;;  %v1049_v54 = vsel %vm1028_vm2, %v1016_v45, %v813_v36 }
  0xce   : > { %706 = vrot.lane.b32.xlu1 %v609_v60, %s1903_s6  ;;  %v1033_v55 = vsel %vm1028_vm2, %v1000_v52, %v781_v37 }
  0xcf   : > { %674 = vrot.lane.b32.xlu0 %v593_v61, %s1903_s6 }
  0xd0   : > { %v815_v43 = vpop.permute.xlu1 %814 }
  0xd1   : > { %v783_v44 = vpop.permute.xlu0 %782  ;;  %v1050_v7 = vsel %vm1028_vm2, %v1017_v1, %v815_v43 }
  0xd2   : > { %832 = vrot.lane.b32.xlu1 %v578_v42, %s1904_s11  ;;  %v1034_v8 = vsel %vm1028_vm2, %v1001_v2, %v783_v44 }
  0xd3   : > { %800 = vrot.lane.b32.xlu0 %v2340_v5, %s1904_s11  ;;  %v610_v5 = vld [vmem:[#allocation2 + $0x181] sm:$0xff] }
  0xd4   : > { %v941_v58 = vpop.permute.xlu1 %940 }
  0xd5   : > { %v909_v59 = vpop.permute.xlu0 %908  ;;  %v1082_v62 = vsel %vm1061_vm3, %v1049_v54, %v941_v58 }
  0xd6   : > { %v1066_v63 = vsel %vm1061_vm3, %v1033_v55, %v909_v59  ;;  %834 = vrot.lane.b32.xlu1 %v579_v53, %s1904_s11  ;;  %1857 = vmatprep.mubr.msk.f32.mxu1 %vm1103_vm4, %v1082_v62 }
  0xd7   : > { %802 = vrot.lane.b32.xlu0 %v2353_v13, %s1904_s11  ;;  %1833 = vmatprep.mubr.msk.f32.mxu0 %vm1103_vm4, %v1066_v63 }
  0xd8   : > { %v943_v9 = vpop.permute.xlu1 %942 }
  0xd9   : > { %v911_v12 = vpop.permute.xlu0 %910  ;;  %v1083_v14 = vsel %vm1061_vm3, %v1050_v7, %v943_v9 }
  0xda   : > { %v1067_v13 = vsel %vm1061_vm3, %v1034_v8, %v911_v12  ;;  %960 = vrot.lane.b32.xlu1 %v610_v5, %s1905_s12  ;;  %1858 = vmatmul.mubr.msk.f32.gmra.mrb[4].mxu1 %vm1103_vm4, %v1083_v14 }
  0xdb   : > { %928 = vrot.lane.b32.xlu0 %v2123_v26, %s1905_s12  ;;  %1834 = vmatmul.mubr.msk.f32.gmra.mrb[4].mxu0 %vm1103_vm4, %v1067_v13 }
  0xdc   : > { %v689_v23 = vpop.permute.xlu1 %688 }
  0xdd   : > { %v657_v15 = vpop.permute.xlu0 %656  ;;  %v1018_v26 = vsel %vm376_vm0, %v2264_v30, %v689_v23 }
  0xde   : > { %962 = vrot.lane.b32.xlu1 %v611_v22, %s1905_s12  ;;  %v1002_v20 = vsel %vm376_vm0, %v2266_v31, %v657_v15 }
  0xdf   : > { %930 = vrot.lane.b32.xlu0 %v2121_v25, %s1905_s12 }
  0xe0   : > { %v691_v47 = vpop.permute.xlu1 %690 }
  0xe1   : > { %v659_v48 = vpop.permute.xlu0 %658  ;;  %v1019_v30 = vsel %vm376_vm0, %v2272_v32, %v691_v47 }
  0xe2   : > { %v1003_v31 = vsel %vm376_vm0, %v2274_v33, %v659_v48 }
  0xe4   : > { %v817_v16 = vpop.permute.xlu1 %816 }
  0xe5   : > { %v785_v17 = vpop.permute.xlu0 %784  ;;  %v1051_v21 = vsel %vm1028_vm2, %v1018_v26, %v817_v16 }
  0xe6   : > { %v1035_v24 = vsel %vm1028_vm2, %v1002_v20, %v785_v17 }
  0xe8   : > { %v819_v18 = vpop.permute.xlu1 %818 }
  0xe9   : > { %v787_v19 = vpop.permute.xlu0 %786  ;;  %v1052_v28 = vsel %vm1028_vm2, %v1019_v30, %v819_v18 }
  0xea   : > { %v1036_v29 = vsel %vm1028_vm2, %v1003_v31, %v787_v19 }
  0xec   : > { %v945_v27 = vpop.permute.xlu1 %944 }
  0xed   : > { %v913_v60 = vpop.permute.xlu0 %912  ;;  %v1084_v25 = vsel %vm1061_vm3, %v1051_v21, %v945_v27 }
  0xee   : > { %v1068_v61 = vsel %vm1061_vm3, %v1035_v24, %v913_v60  ;;  %1860 = vmatprep.mubr.msk.f32.mxu1 %vm1103_vm4, %v1084_v25 }
  0xef   : > { %1836 = vmatprep.mubr.msk.f32.mxu0 %vm1103_vm4, %v1068_v61 }
  0xf0   : > { %v947_v34 = vpop.permute.xlu1 %946 }
  0xf1   : > { %v915_v35 = vpop.permute.xlu0 %914  ;;  %v1085_v36 = vsel %vm1061_vm3, %v1052_v28, %v947_v34 }
  0xf2   : > { %v1069_v37 = vsel %vm1061_vm3, %v1036_v29, %v915_v35  ;;  %1861 = vmatmul.mubr.msk.f32.gmra.mrb[6].mxu1 %vm1103_vm4, %v1085_v36 }
  0xf3   : > { %1837 = vmatmul.mubr.msk.f32.gmra.mrb[6].mxu0 %vm1103_vm4, %v1069_v37 }
  0xf4   : > { %v693_v42 = vpop.permute.xlu1 %692 }
  0xf5   : > { %v661_v43 = vpop.permute.xlu0 %660  ;;  %v1020_v54 = vsel %vm376_vm0, %v2288_v38, %v693_v42 }
  0xf6   : > { %v1004_v55 = vsel %vm376_vm0, %v2290_v39, %v661_v43 }
  0xf8   : > { %v695_v32 = vpop.permute.xlu1 %694 }
  0xf9   : > { %v663_v44 = vpop.permute.xlu0 %662  ;;  %v1021_v38 = vsel %vm376_vm0, %v2296_v40, %v695_v32 }
  0xfa   : > { %v1005_v39 = vsel %vm376_vm0, %v2298_v41, %v663_v44 }
  0xfc   : > { %v821_v45 = vpop.permute.xlu1 %820 }
  0xfd   : > { %v789_v33 = vpop.permute.xlu0 %788  ;;  %v1053_v58 = vsel %vm1028_vm2, %v1020_v54, %v821_v45 }
  0xfe   : > { %v1037_v59 = vsel %vm1028_vm2, %v1004_v55, %v789_v33 }
 0x100   : > { %v823_v52 = vpop.permute.xlu1 %822 }
 0x101   : > { %v791_v53 = vpop.permute.xlu0 %790  ;;  %v1054_v5 = vsel %vm1028_vm2, %v1021_v38, %v823_v52 }
 0x102   : > { %v1038_v7 = vsel %vm1028_vm2, %v1005_v39, %v791_v53 }
 0x104   : > { %v949_v62 = vpop.permute.xlu1 %948 }
 0x105   : > { %v917_v63 = vpop.permute.xlu0 %916  ;;  %v1086_v1 = vsel %vm1061_vm3, %v1053_v58, %v949_v62 }
 0x106   : > { %v1070_v2 = vsel %vm1061_vm3, %v1037_v59, %v917_v63  ;;  %1863 = vmatprep.mubr.msk.f32.mxu1 %vm1103_vm4, %v1086_v1 }
 0x107   : > { %1839 = vmatprep.mubr.msk.f32.mxu0 %vm1103_vm4, %v1070_v2 }
 0x108   : > { %v951_v8 = vpop.permute.xlu1 %950 }
 0x109   : > { %v919_v9 = vpop.permute.xlu0 %918  ;;  %v1087_v12 = vsel %vm1061_vm3, %v1054_v5, %v951_v8 }
 0x10a   : > { %v1071_v14 = vsel %vm1061_vm3, %v1038_v7, %v919_v9  ;;  %1864 = vmatmul.mubr.msk.f32.gmra.mrb[8].mxu1 %vm1103_vm4, %v1087_v12 }
 0x10b   : > { %1840 = vmatmul.mubr.msk.f32.gmra.mrb[8].mxu0 %vm1103_vm4, %v1071_v14 }
 0x10c   : > { %v697_v13 = vpop.permute.xlu1 %696 }
 0x10d   : > { %v665_v22 = vpop.permute.xlu0 %664  ;;  %v1022_v16 = vsel %vm376_vm0, %v2312_v46, %v697_v13 }
 0x10e   : > { %v1006_v17 = vsel %vm376_vm0, %v2314_v49, %v665_v22 }
 0x110   : > { %v699_v40 = vpop.permute.xlu1 %698 }
 0x111   : > { %v667_v23 = vpop.permute.xlu0 %666  ;;  %v1023_v46 = vsel %vm376_vm0, %v2320_v50, %v699_v40 }
 0x112   : > { %v1007_v49 = vsel %vm376_vm0, %v2322_v51, %v667_v23 }
 0x114   : > { %v825_v15 = vpop.permute.xlu1 %824 }
 0x115   : > { %v793_v41 = vpop.permute.xlu0 %792  ;;  %v1055_v18 = vsel %vm1028_vm2, %v1022_v16, %v825_v15 }
 0x116   : > { %v1039_v19 = vsel %vm1028_vm2, %v1006_v17, %v793_v41 }
 0x118   : > { %v827_v47 = vpop.permute.xlu1 %826 }
 0x119   : > { %v795_v48 = vpop.permute.xlu0 %794  ;;  %v1056_v27 = vsel %vm1028_vm2, %v1023_v46, %v827_v47 }
 0x11a   : > { %v1040_v60 = vsel %vm1028_vm2, %v1007_v49, %v795_v48 }
 0x11c   : > { %v953_v26 = vpop.permute.xlu1 %952 }
 0x11d   : > { %v921_v20 = vpop.permute.xlu0 %920  ;;  %v1088_v21 = vsel %vm1061_vm3, %v1055_v18, %v953_v26 }
 0x11e   : > { %v1072_v24 = vsel %vm1061_vm3, %v1039_v19, %v921_v20  ;;  %1866 = vmatprep.mubr.msk.f32.mxu1 %vm1103_vm4, %v1088_v21 }
 0x11f   : > { %1842 = vmatprep.mubr.msk.f32.mxu0 %vm1103_vm4, %v1072_v24 }
 0x120   : > { %v955_v25 = vpop.permute.xlu1 %954 }
 0x121   : > { %v923_v61 = vpop.permute.xlu0 %922  ;;  %v1089_v30 = vsel %vm1061_vm3, %v1056_v27, %v955_v25 }
 0x122   : > { %v1073_v31 = vsel %vm1061_vm3, %v1040_v60, %v923_v61  ;;  %1867 = vmatmul.mubr.msk.f32.gmra.mrb[10].mxu1 %vm1103_vm4, %v1089_v30 }
 0x123   : > { %1843 = vmatmul.mubr.msk.f32.gmra.mrb[10].mxu0 %vm1103_vm4, %v1073_v31 }
 0x124   : > { %v701_v28 = vpop.permute.xlu1 %700 }
 0x125   : > { %v669_v29 = vpop.permute.xlu0 %668  ;;  %v1024_v42 = vsel %vm376_vm0, %v2336_v0, %v701_v28 }
 0x126   : > { %v1008_v43 = vsel %vm376_vm0, %v2338_v3, %v669_v29 }
 0x128   : > { %v703_v50 = vpop.permute.xlu1 %702 }
 0x129   : > { %v671_v34 = vpop.permute.xlu0 %670  ;;  %v1025_v0 = vsel %vm376_vm0, %v2349_v10, %v703_v50 }
 0x12a   : > { %v1009_v3 = vsel %vm376_vm0, %v2351_v11, %v671_v34 }
 0x12c   : > { %v829_v35 = vpop.permute.xlu1 %828 }
 0x12d   : > { %v797_v51 = vpop.permute.xlu0 %796  ;;  %v1057_v32 = vsel %vm1028_vm2, %v1024_v42, %v829_v35 }
 0x12e   : > { %v1041_v44 = vsel %vm1028_vm2, %v1008_v43, %v797_v51 }
 0x130   : > { %v831_v36 = vpop.permute.xlu1 %830 }
 0x131   : > { %v799_v37 = vpop.permute.xlu0 %798  ;;  %v1058_v54 = vsel %vm1028_vm2, %v1025_v0, %v831_v36 }
 0x132   : > { %v1042_v55 = vsel %vm1028_vm2, %v1009_v3, %v799_v37 }
 0x134   : > { %v957_v45 = vpop.permute.xlu1 %956 }
 0x135   : > { %v925_v33 = vpop.permute.xlu0 %924  ;;  %v1090_v52 = vsel %vm1061_vm3, %v1057_v32, %v957_v45 }
 0x136   : > { %v1074_v53 = vsel %vm1061_vm3, %v1041_v44, %v925_v33  ;;  %1869 = vmatprep.mubr.msk.f32.mxu1 %vm1103_vm4, %v1090_v52 }
 0x137   : > { %1845 = vmatprep.mubr.msk.f32.mxu0 %vm1103_vm4, %v1074_v53 }
 0x138   : > { %v959_v58 = vpop.permute.xlu1 %958 }
 0x139   : > { %v927_v59 = vpop.permute.xlu0 %926  ;;  %v1091_v62 = vsel %vm1061_vm3, %v1058_v54, %v959_v58 }
 0x13a   : > { %v1075_v63 = vsel %vm1061_vm3, %v1042_v55, %v927_v59  ;;  %1870 = vmatmul.mubr.msk.f32.gmra.mrb[12].mxu1 %vm1103_vm4, %v1091_v62 }
 0x13b   : > { %1846 = vmatmul.mubr.msk.f32.gmra.mrb[12].mxu0 %vm1103_vm4, %v1075_v63 }
 0x13c   : > { %v705_v1 = vpop.permute.xlu1 %704 }
 0x13d   : > { %v673_v2 = vpop.permute.xlu0 %672  ;;  %v1026_v8 = vsel %vm376_vm0, %v2382_v56, %v705_v1 }
 0x13e   : > { %v1010_v9 = vsel %vm376_vm0, %v2384_v57, %v673_v2 }
 0x140   : > { %v707_v10 = vpop.permute.xlu1 %706 }
 0x141   : > { %v675_v38 = vpop.permute.xlu0 %674  ;;  %v1027_v56 = vsel %vm376_vm0, %v2394_v4, %v707_v10  ;;  %v2562_v4 = vld [vmem:[%s2767_s3] ss:$0 sm:$0xff] }
 0x142   : > { %v1011_v57 = vsel %vm376_vm0, %v2396_v6, %v675_v38 }
 0x144   : > { %v833_v39 = vpop.permute.xlu1 %832 }
 0x145   : > { %v801_v11 = vpop.permute.xlu0 %800  ;;  %v1059_v12 = vsel %vm1028_vm2, %v1026_v8, %v833_v39 }
 0x146   : > { %v1043_v14 = vsel %vm1028_vm2, %v1010_v9, %v801_v11 }
 0x148   : > { %v835_v5 = vpop.permute.xlu1 %834 }
 0x149   : > { %v803_v7 = vpop.permute.xlu0 %802  ;;  %v1060_v15 = vsel %vm1028_vm2, %v1027_v56, %v835_v5 }
 0x14a   : > { %v1044_v41 = vsel %vm1028_vm2, %v1011_v57, %v803_v7 }
 0x14c   : > { %v961_v13 = vpop.permute.xlu1 %960 }
 0x14d   : > { %v929_v22 = vpop.permute.xlu0 %928  ;;  %v1092_v40 = vsel %vm1061_vm3, %v1059_v12, %v961_v13 }
 0x14e   : > { %v1076_v23 = vsel %vm1061_vm3, %v1043_v14, %v929_v22  ;;  %1872 = vmatprep.mubr.msk.f32.mxu1 %vm1103_vm4, %v1092_v40 }
 0x14f   : > { %1848 = vmatprep.mubr.msk.f32.mxu0 %vm1103_vm4, %v1076_v23 }
 0x150   : > { %v963_v47 = vpop.permute.xlu1 %962 }
 0x151   : > { %v931_v48 = vpop.permute.xlu0 %930  ;;  %v1093_v16 = vsel %vm1061_vm3, %v1060_v15, %v963_v47 }
 0x152   : > { %v1077_v17 = vsel %vm1061_vm3, %v1044_v41, %v931_v48  ;;  %1873 = vmatmul.mubr.msk.f32.gmra.mrb[14].mxu1 %vm1103_vm4, %v1093_v16 }
 0x153   : > { %1849 = vmatmul.mubr.msk.f32.gmra.mrb[14].mxu0 %vm1103_vm4, %v1077_v17 }
 0x17d   : > { %v1853_v18 = vpop.f32.mrb[0].mxu1 }
 0x17e   : > { %v1829_v6 = vpop.f32.mrb[0].mxu0  ;;  %v1352_v26 = vadd.f32 %v1853_v18, %v2562_v4  ;;  %v1346_v21 = vpop.f32.mrb[1].mxu1 }
 0x17f   : > { %v1272_v19 = vadd.f32 %v1829_v6, %v2562_v4  ;;  %v1266_v20 = vpop.f32.mrb[1].mxu0  ;;  %v1347_v46 = vadd.f32 %v2562_v4, %v1346_v21 }
 0x180   : > { %v1267_v24 = vadd.f32 %v2562_v4, %v1266_v20  ;;  %1442 = vst.msk [vmem:[%s2567_s20 + $0x108] sm:$0xff] %vm1028_vm2, %v1352_v26 }
 0x181   : > { %1426 = vst.msk [vmem:[%s2567_s20 + $0x8] sm:$0xff] %vm1028_vm2, %v1272_v19  ;;  %1491 = vrot.lane.b32.xlu1 %v1272_v19, %s1906_s19  ;;  %1441 = vst.msk [vmem:[%s2567_s20 + $0x100] sm:$0xff] %vm1028_vm2, %v1347_v46 }
 0x182   : > { %1425 = vst.msk [vmem:[%s2567_s20] sm:$0xff] %vm1028_vm2, %v1267_v24  ;;  %1489 = vrot.lane.b32.xlu0 %v1267_v24, %s1906_s19 }
 0x185   : > { %1523 = vrot.lane.b32.xlu1 %v1352_v26, %s1906_s19 }
 0x186   : > { %1521 = vrot.lane.b32.xlu0 %v1347_v46, %s1906_s19 }
 0x195   : > { %v1856_v27 = vpop.f32.mrb[2].mxu1 }
 0x196   : > { %v1832_v49 = vpop.f32.mrb[2].mxu0  ;;  %v1362_v25 = vadd.f32 %v1856_v27, %v2562_v4  ;;  %v1356_v30 = vpop.f32.mrb[3].mxu1 }
 0x197   : > { %v1282_v60 = vadd.f32 %v1832_v49, %v2562_v4  ;;  %v1276_v61 = vpop.f32.mrb[3].mxu0  ;;  %v1357_v28 = vadd.f32 %v2562_v4, %v1356_v30 }
 0x198   : > { %v1277_v31 = vadd.f32 %v2562_v4, %v1276_v61  ;;  %1444 = vst.msk [vmem:[%s2567_s20 + $0x128] sm:$0xff] %vm1028_vm2, %v1362_v25 }
 0x199   : > { %1428 = vst.msk [vmem:[%s2567_s20 + $0x28] sm:$0xff] %vm1028_vm2, %v1282_v60  ;;  %1495 = vrot.lane.b32.xlu1 %v1282_v60, %s1906_s19  ;;  %1443 = vst.msk [vmem:[%s2567_s20 + $0x120] sm:$0xff] %vm1028_vm2, %v1357_v28 }
 0x19a   : > { %1427 = vst.msk [vmem:[%s2567_s20 + $0x20] sm:$0xff] %vm1028_vm2, %v1277_v31  ;;  %1493 = vrot.lane.b32.xlu0 %v1277_v31, %s1906_s19 }
 0x19d   : > { %1527 = vrot.lane.b32.xlu1 %v1362_v25, %s1906_s19 }
 0x19e   : > { %1525 = vrot.lane.b32.xlu0 %v1357_v28, %s1906_s19 }
 0x1ad   : > { %v1859_v50 = vpop.f32.mrb[4].mxu1 }
 0x1ae   : > { %v1835_v29 = vpop.f32.mrb[4].mxu0  ;;  %v1372_v35 = vadd.f32 %v1859_v50, %v2562_v4  ;;  %v1366_v36 = vpop.f32.mrb[5].mxu1 }
 0x1af   : > { %v1292_v34 = vadd.f32 %v1835_v29, %v2562_v4  ;;  %v1286_v51 = vpop.f32.mrb[5].mxu0  ;;  %v1367_v42 = vadd.f32 %v2562_v4, %v1366_v36 }
 0x1b0   : > { %v1287_v37 = vadd.f32 %v2562_v4, %v1286_v51  ;;  %1446 = vst.msk [vmem:[%s2567_s20 + $0x148] sm:$0xff] %vm1028_vm2, %v1372_v35 }
 0x1b1   : > { %1430 = vst.msk [vmem:[%s2567_s20 + $0x48] sm:$0xff] %vm1028_vm2, %v1292_v34  ;;  %1499 = vrot.lane.b32.xlu1 %v1292_v34, %s1906_s19  ;;  %1445 = vst.msk [vmem:[%s2567_s20 + $0x140] sm:$0xff] %vm1028_vm2, %v1367_v42 }
 0x1b2   : > { %1429 = vst.msk [vmem:[%s2567_s20 + $0x40] sm:$0xff] %vm1028_vm2, %v1287_v37  ;;  %1497 = vrot.lane.b32.xlu0 %v1287_v37, %s1906_s19 }
 0x1b5   : > { %1531 = vrot.lane.b32.xlu1 %v1372_v35, %s1906_s19 }
 0x1b6   : > { %1529 = vrot.lane.b32.xlu0 %v1367_v42, %s1906_s19 }
 0x1c5   : > { %v1862_v32 = vpop.f32.mrb[6].mxu1 }
 0x1c6   : > { %v1838_v43 = vpop.f32.mrb[6].mxu0  ;;  %v1382_v45 = vadd.f32 %v1862_v32, %v2562_v4  ;;  %v1376_v52 = vpop.f32.mrb[7].mxu1 }
 0x1c7   : > { %v1302_v44 = vadd.f32 %v1838_v43, %v2562_v4  ;;  %v1296_v33 = vpop.f32.mrb[7].mxu0  ;;  %v1377_v0 = vadd.f32 %v2562_v4, %v1376_v52 }
 0x1c8   : > { %v1297_v53 = vadd.f32 %v2562_v4, %v1296_v33  ;;  %1448 = vst.msk [vmem:[%s2567_s20 + $0x168] sm:$0xff] %vm1028_vm2, %v1382_v45 }
 0x1c9   : > { %1432 = vst.msk [vmem:[%s2567_s20 + $0x68] sm:$0xff] %vm1028_vm2, %v1302_v44  ;;  %1503 = vrot.lane.b32.xlu1 %v1302_v44, %s1906_s19  ;;  %1447 = vst.msk [vmem:[%s2567_s20 + $0x160] sm:$0xff] %vm1028_vm2, %v1377_v0 }
 0x1ca   : > { %1431 = vst.msk [vmem:[%s2567_s20 + $0x60] sm:$0xff] %vm1028_vm2, %v1297_v53  ;;  %1501 = vrot.lane.b32.xlu0 %v1297_v53, %s1906_s19 }
 0x1cd   : > { %1535 = vrot.lane.b32.xlu1 %v1382_v45, %s1906_s19 }
 0x1ce   : > { %1533 = vrot.lane.b32.xlu0 %v1377_v0, %s1906_s19 }
 0x1dd   : > { %v1865_v54 = vpop.f32.mrb[8].mxu1 }
 0x1de   : > { %v1841_v3 = vpop.f32.mrb[8].mxu0  ;;  %v1392_v58 = vadd.f32 %v1865_v54, %v2562_v4  ;;  %v1386_v62 = vpop.f32.mrb[9].mxu1 }
 0x1df   : > { %v1312_v55 = vadd.f32 %v1841_v3, %v2562_v4  ;;  %v1306_v59 = vpop.f32.mrb[9].mxu0  ;;  %v1387_v1 = vadd.f32 %v2562_v4, %v1386_v62 }
 0x1e0   : > { %v1307_v63 = vadd.f32 %v2562_v4, %v1306_v59  ;;  %1450 = vst.msk [vmem:[%s2567_s20 + $0x188] sm:$0xff] %vm1028_vm2, %v1392_v58 }
 0x1e1   : > { %1434 = vst.msk [vmem:[%s2567_s20 + $0x88] sm:$0xff] %vm1028_vm2, %v1312_v55  ;;  %1507 = vrot.lane.b32.xlu1 %v1312_v55, %s1906_s19  ;;  %1449 = vst.msk [vmem:[%s2567_s20 + $0x180] sm:$0xff] %vm1028_vm2, %v1387_v1 }
 0x1e2   : > { %1433 = vst.msk [vmem:[%s2567_s20 + $0x80] sm:$0xff] %vm1028_vm2, %v1307_v63  ;;  %1505 = vrot.lane.b32.xlu0 %v1307_v63, %s1906_s19 }
 0x1e5   : > { %1539 = vrot.lane.b32.xlu1 %v1392_v58, %s1906_s19 }
 0x1e6   : > { %1537 = vrot.lane.b32.xlu0 %v1387_v1, %s1906_s19 }
 0x1f3   : > { %v1492_v2 = vpop.permute.xlu1 %1491 }
 0x1f4   : > { %1753 = vst.msk [vmem:[%s2567_s20 + $0x18] sm:$0xff] %vm1028_vm2, %v1492_v2  ;;  %v1490_v10 = vpop.permute.xlu0 %1489 }
 0x1f5   : > { %1752 = vst.msk [vmem:[%s2567_s20 + $0x10] sm:$0xff] %vm1028_vm2, %v1490_v10  ;;  %v1868_v39 = vpop.f32.mrb[10].mxu1 }
 0x1f6   : > { %v1844_v38 = vpop.f32.mrb[10].mxu0  ;;  %v1402_v5 = vadd.f32 %v1868_v39, %v2562_v4  ;;  %v1396_v7 = vpop.f32.mrb[11].mxu1 }
 0x1f7   : > { %v1322_v11 = vadd.f32 %v1844_v38, %v2562_v4  ;;  %v1316_v8 = vpop.f32.mrb[11].mxu0  ;;  %v1397_v9 = vadd.f32 %v2562_v4, %v1396_v7  ;;  %v1524_v12 = vpop.permute.xlu1 %1523 }
 0x1f8   : > { %v1317_v14 = vadd.f32 %v2562_v4, %v1316_v8  ;;  %1452 = vst.msk [vmem:[%s2567_s20 + $0x1a8] sm:$0xff] %vm1028_vm2, %v1402_v5  ;;  %1769 = vst.msk [vmem:[%s2567_s20 + $0x118] sm:$0xff] %vm1028_vm2, %v1524_v12  ;;  %v1522_v13 = vpop.permute.xlu0 %1521 }
 0x1f9   : > { %1436 = vst.msk [vmem:[%s2567_s20 + $0xa8] sm:$0xff] %vm1028_vm2, %v1322_v11  ;;  %1511 = vrot.lane.b32.xlu1 %v1322_v11, %s1906_s19  ;;  %1451 = vst.msk [vmem:[%s2567_s20 + $0x1a0] sm:$0xff] %vm1028_vm2, %v1397_v9 }
 0x1fa   : > { %1435 = vst.msk [vmem:[%s2567_s20 + $0xa0] sm:$0xff] %vm1028_vm2, %v1317_v14  ;;  %1768 = vst.msk [vmem:[%s2567_s20 + $0x110] sm:$0xff] %vm1028_vm2, %v1522_v13  ;;  %1509 = vrot.lane.b32.xlu0 %v1317_v14, %s1906_s19 }
 0x1fd   : > { %1543 = vrot.lane.b32.xlu1 %v1402_v5, %s1906_s19 }
 0x1fe   : > { %1541 = vrot.lane.b32.xlu0 %v1397_v9, %s1906_s19 }
 0x20b   : > { %v1496_v22 = vpop.permute.xlu1 %1495 }
 0x20c   : > { %1755 = vst.msk [vmem:[%s2567_s20 + $0x38] sm:$0xff] %vm1028_vm2, %v1496_v22  ;;  %v1494_v40 = vpop.permute.xlu0 %1493 }
 0x20d   : > { %1754 = vst.msk [vmem:[%s2567_s20 + $0x30] sm:$0xff] %vm1028_vm2, %v1494_v40  ;;  %v1871_v56 = vpop.f32.mrb[12].mxu1 }
 0x20e   : > { %v1847_v23 = vpop.f32.mrb[12].mxu0  ;;  %v1412_v15 = vadd.f32 %v1871_v56, %v2562_v4  ;;  %v1406_v41 = vpop.f32.mrb[13].mxu1 }
 0x20f   : > { %v1332_v57 = vadd.f32 %v1847_v23, %v2562_v4  ;;  %v1326_v47 = vpop.f32.mrb[13].mxu0  ;;  %v1407_v48 = vadd.f32 %v2562_v4, %v1406_v41  ;;  %v1528_v16 = vpop.permute.xlu1 %1527 }
 0x210   : > { %v1327_v17 = vadd.f32 %v2562_v4, %v1326_v47  ;;  %1454 = vst.msk [vmem:[%s2567_s20 + $0x1c8] sm:$0xff] %vm1028_vm2, %v1412_v15  ;;  %1771 = vst.msk [vmem:[%s2567_s20 + $0x138] sm:$0xff] %vm1028_vm2, %v1528_v16  ;;  %v1526_v6 = vpop.permute.xlu0 %1525 }
 0x211   : > { %1438 = vst.msk [vmem:[%s2567_s20 + $0xc8] sm:$0xff] %vm1028_vm2, %v1332_v57  ;;  %1515 = vrot.lane.b32.xlu1 %v1332_v57, %s1906_s19  ;;  %1453 = vst.msk [vmem:[%s2567_s20 + $0x1c0] sm:$0xff] %vm1028_vm2, %v1407_v48 }
 0x212   : > { %1437 = vst.msk [vmem:[%s2567_s20 + $0xc0] sm:$0xff] %vm1028_vm2, %v1327_v17  ;;  %1770 = vst.msk [vmem:[%s2567_s20 + $0x130] sm:$0xff] %vm1028_vm2, %v1526_v6  ;;  %1513 = vrot.lane.b32.xlu0 %v1327_v17, %s1906_s19 }
 0x215   : > { %1547 = vrot.lane.b32.xlu1 %v1412_v15, %s1906_s19 }
 0x216   : > { %1545 = vrot.lane.b32.xlu0 %v1407_v48, %s1906_s19 }
 0x223   : > { %v1500_v18 = vpop.permute.xlu1 %1499 }
 0x224   : > { %1757 = vst.msk [vmem:[%s2567_s20 + $0x58] sm:$0xff] %vm1028_vm2, %v1500_v18  ;;  %v1498_v19 = vpop.permute.xlu0 %1497 }
 0x225   : > { %1756 = vst.msk [vmem:[%s2567_s20 + $0x50] sm:$0xff] %vm1028_vm2, %v1498_v19  ;;  %v1874_v20 = vpop.f32.mrb[14].mxu1 }
 0x226   : > { %v1850_v26 = vpop.f32.mrb[14].mxu0  ;;  %v1422_v24 = vadd.f32 %v1874_v20, %v2562_v4  ;;  %v1416_v46 = vpop.f32.mrb[15].mxu1 }
 0x227   : > { %v1342_v21 = vadd.f32 %v1850_v26, %v2562_v4  ;;  %v1336_v49 = vpop.f32.mrb[15].mxu0  ;;  %v1417_v27 = vadd.f32 %v2562_v4, %v1416_v46  ;;  %v1532_v60 = vpop.permute.xlu1 %1531 }
 0x228   : > { %v1337_v25 = vadd.f32 %v2562_v4, %v1336_v49  ;;  %1456 = vst.msk [vmem:[%s2567_s20 + $0x1e8] sm:$0xff] %vm1028_vm2, %v1422_v24  ;;  %1773 = vst.msk [vmem:[%s2567_s20 + $0x158] sm:$0xff] %vm1028_vm2, %v1532_v60  ;;  %v1530_v61 = vpop.permute.xlu0 %1529 }
 0x229   : > { %1440 = vst.msk [vmem:[%s2567_s20 + $0xe8] sm:$0xff] %vm1028_vm2, %v1342_v21  ;;  %1519 = vrot.lane.b32.xlu1 %v1342_v21, %s1906_s19  ;;  %1455 = vst.msk [vmem:[%s2567_s20 + $0x1e0] sm:$0xff] %vm1028_vm2, %v1417_v27 }
 0x22a   : > { %1439 = vst.msk [vmem:[%s2567_s20 + $0xe0] sm:$0xff] %vm1028_vm2, %v1337_v25  ;;  %1772 = vst.msk [vmem:[%s2567_s20 + $0x150] sm:$0xff] %vm1028_vm2, %v1530_v61  ;;  %1517 = vrot.lane.b32.xlu0 %v1337_v25, %s1906_s19 }
 0x22d   : > { %1551 = vrot.lane.b32.xlu1 %v1422_v24, %s1906_s19 }
 0x22e   : > { %1549 = vrot.lane.b32.xlu0 %v1417_v27, %s1906_s19 }
 0x23b   : > { %v1504_v4 = vpop.permute.xlu1 %1503 }
 0x23c   : > { %1759 = vst.msk [vmem:[%s2567_s20 + $0x78] sm:$0xff] %vm1028_vm2, %v1504_v4  ;;  %v1502_v30 = vpop.permute.xlu0 %1501 }
 0x23d   : > { %1758 = vst.msk [vmem:[%s2567_s20 + $0x70] sm:$0xff] %vm1028_vm2, %v1502_v30 }
 0x23f   : > { %v1536_v31 = vpop.permute.xlu1 %1535 }
 0x240   : > { %1775 = vst.msk [vmem:[%s2567_s20 + $0x178] sm:$0xff] %vm1028_vm2, %v1536_v31  ;;  %v1534_v28 = vpop.permute.xlu0 %1533 }
 0x241   : > { %1774 = vst.msk [vmem:[%s2567_s20 + $0x170] sm:$0xff] %vm1028_vm2, %v1534_v28 }
 0x253   : > { %v1508_v29 = vpop.permute.xlu1 %1507 }
 0x254   : > { %1761 = vst.msk [vmem:[%s2567_s20 + $0x98] sm:$0xff] %vm1028_vm2, %v1508_v29  ;;  %v1506_v50 = vpop.permute.xlu0 %1505 }
 0x255   : > { %1760 = vst.msk [vmem:[%s2567_s20 + $0x90] sm:$0xff] %vm1028_vm2, %v1506_v50 }
 0x257   : > { %v1540_v34 = vpop.permute.xlu1 %1539 }
 0x258   : > { %1777 = vst.msk [vmem:[%s2567_s20 + $0x198] sm:$0xff] %vm1028_vm2, %v1540_v34  ;;  %v1538_v35 = vpop.permute.xlu0 %1537 }
 0x259   : > { %1776 = vst.msk [vmem:[%s2567_s20 + $0x190] sm:$0xff] %vm1028_vm2, %v1538_v35 }
 0x26b   : > { %v1512_v51 = vpop.permute.xlu1 %1511 }
 0x26c   : > { %1763 = vst.msk [vmem:[%s2567_s20 + $0xb8] sm:$0xff] %vm1028_vm2, %v1512_v51  ;;  %v1510_v36 = vpop.permute.xlu0 %1509 }
 0x26d   : > { %1762 = vst.msk [vmem:[%s2567_s20 + $0xb0] sm:$0xff] %vm1028_vm2, %v1510_v36 }
 0x26f   : > { %v1544_v37 = vpop.permute.xlu1 %1543 }
 0x270   : > { %1779 = vst.msk [vmem:[%s2567_s20 + $0x1b8] sm:$0xff] %vm1028_vm2, %v1544_v37  ;;  %v1542_v42 = vpop.permute.xlu0 %1541 }
 0x271   : > { %1778 = vst.msk [vmem:[%s2567_s20 + $0x1b0] sm:$0xff] %vm1028_vm2, %v1542_v42 }
 0x283   : > { %v1516_v43 = vpop.permute.xlu1 %1515 }
 0x284   : > { %1765 = vst.msk [vmem:[%s2567_s20 + $0xd8] sm:$0xff] %vm1028_vm2, %v1516_v43  ;;  %v1514_v32 = vpop.permute.xlu0 %1513 }
 0x285   : > { %1764 = vst.msk [vmem:[%s2567_s20 + $0xd0] sm:$0xff] %vm1028_vm2, %v1514_v32 }
 0x287   : > { %v1548_v44 = vpop.permute.xlu1 %1547 }
 0x288   : > { %1781 = vst.msk [vmem:[%s2567_s20 + $0x1d8] sm:$0xff] %vm1028_vm2, %v1548_v44  ;;  %v1546_v45 = vpop.permute.xlu0 %1545 }
 0x289   : > { %1780 = vst.msk [vmem:[%s2567_s20 + $0x1d0] sm:$0xff] %vm1028_vm2, %v1546_v45 }
 0x29b   : > { %v1520_v33 = vpop.permute.xlu1 %1519 }
 0x29c   : > { %1767 = vst.msk [vmem:[%s2567_s20 + $0xf8] sm:$0xff] %vm1028_vm2, %v1520_v33  ;;  %v1518_v52 = vpop.permute.xlu0 %1517 }
 0x29d   : > { %1766 = vst.msk [vmem:[%s2567_s20 + $0xf0] sm:$0xff] %vm1028_vm2, %v1518_v52 }
 0x29f   : > { %v1552_v53 = vpop.permute.xlu1 %1551 }
 0x2a0   : > { %1783 = vst.msk [vmem:[%s2567_s20 + $0x1f8] sm:$0xff] %vm1028_vm2, %v1552_v53  ;;  %v1550_v0 = vpop.permute.xlu0 %1549 }
 0x2a1   : > { %1782 = vst.msk [vmem:[%s2567_s20 + $0x1f0] sm:$0xff] %vm1028_vm2, %v1550_v0 }
 0x2a2 PF: > { %s16_s18 = sadd.s32 1, %s1900_s18  }
 0x2a3   : > { %p13_p4 = scmp.ge.s32.totalorder %s16_s18, 4  }
 0x2a5   :  { %15 = sbr.rel (!%p13_p4) target bundleno = 1 (0x1), region = 81 }

// kernel: upsample_block_forward.3
= control target key start
LH: loop header
LB: loop body
LE: loop exit
PB: predicated region body
PF: predicated region fallthrough
CT: control target
= control target key end

     0   :  { %s2726_s12 = smov 0   ;;  %s4088_s0 = inlined_call_operand.vmem [shape: f32[2,16,16,8], index: 0, kind: input, shape index: {}]   ;;  %s4089_s1 = inlined_call_operand.vmem [shape: f32[72,4], index: 1, kind: input, shape index: {}]   ;;  %s4090_s2 = inlined_call_operand.vmem [shape: f32[2,16,16,4], index: 2, kind: output, shape index: {0}]   ;;  %s4091_s3 = inlined_call_operand.vmem [shape: f32[2,2,4], index: 3, kind: output, shape index: {1}]  }
   0x1 LB: > { %s2493_s13 = sadd.s32 4294967295, %s2695_s12   ;;  %p2497_p0 = scmp.ge.s32.totalorder %s2695_s12, 1  ;;  %s2695_s12 = sphi %s2726_s12, %s14_s12  }
   0x2   : > { %p140_p1 = scmp.lt.s32.totalorder %s2695_s12, 3 }
   0x4   : > { %p141_p2 = pnand %p2497_p0, %p140_p1 }
   0x6   : > { %144 = sbr.rel (%p141_p2) target bundleno = 901 (0x385), region = 28 }
   0xd   : > { %vm182_vm0 = vcmask 64512   ;;  %vm185_vm1 = vcmask 58368   ;;  %p2736_p3 = scmp.lt.s32.totalorder %s2493_s13, 1  ;;  %vm191_vm2 = vcmask 57344   ;;  %v2697_v0 = vmov 0.0   ;;  %s2698_s19 = smov 8  }
   0xe   : > { %183 = vst.msk [vmem:[#allocation2] sm:$0xff] %vm182_vm0, %v2697_v0  ;;  %184 = vst.msk [vmem:[#allocation2 + $0x8] sm:$0xff] %vm182_vm0, %v2697_v0  ;;  %s2699_s20 = smov 16   ;;  %s2700_s21 = smov 24   ;;  %vm1638_vm3 = vcmask 130048   ;;  %vm1671_vm4 = vcmask 195584  }
   0xf   : > { %188 = vst.msk [vmem:[#allocation2 + $0x198] sm:$0xff] %vm182_vm0, %v2697_v0  ;;  %189 = vst.msk [vmem:[#allocation2 + $0x1a0] sm:$0xff] %vm182_vm0, %v2697_v0  ;;  %s4198_s13 = smov (!%p2736_p3, %s2493_s13), 1  ;;  %s2701_s7 = smov 32   ;;  %vm1704_vm5 = vcmask 261120   ;;  %vm1737_vm6 = vcmask 326656  }
  0x10   : > { %186 = vst.msk [vmem:[#allocation2 + $0x10] sm:$0x3] %vm185_vm1, %v2697_v0  ;;  %190 = vst.msk [vmem:[#allocation2 + $0x1a8] sm:$0x3] %vm185_vm1, %v2697_v0  ;;  %s2537_s15 = sshll.u32 %s4198_s13, 8  ;;  %s2702_s14 = smov 40  }
  0x11   : > { %193 = vst.msk [vmem:[#allocation2 + $0x18] sm:$0x1] %vm191_vm2, %v2697_v0  ;;  %194 = vst.msk [vmem:[#allocation2 + $0x30] sm:$0x1] %vm191_vm2, %v2697_v0  ;;  %s2792_s18 = scalar_lea.vmem %s4088_s0, %s2537_s15  ;;  %s2703_s16 = smov 48   ;;  %vm1770_vm7 = vcmask 392192  }
  0x12   : > { %195 = vst.msk [vmem:[#allocation2 + $0x48] sm:$0x1] %vm191_vm2, %v2697_v0  ;;  %196 = vst.msk [vmem:[#allocation2 + $0x60] sm:$0x1] %vm191_vm2, %v2697_v0  ;;  %v228_v1 = vld [vmem:[%s2792_s18] sm:$0xff]  ;;  %v230_v2 = vld [vmem:[%s2792_s18 + $0x10] sm:$0xff]  ;;  %s3802_s23 = scalar_lea.vmem %s4090_s2, %s2537_s15 }
  0x13   : > { %197 = vst.msk [vmem:[#allocation2 + $0x78] sm:$0x1] %vm191_vm2, %v2697_v0  ;;  %198 = vst.msk [vmem:[#allocation2 + $0x90] sm:$0x1] %vm191_vm2, %v2697_v0  ;;  %v229_v3 = vld [vmem:[%s2792_s18 + $0x8] sm:$0xff]  ;;  %v232_v4 = vld [vmem:[%s2792_s18 + $0x20] sm:$0xff] }
  0x14   : > { %199 = vst.msk [vmem:[#allocation2 + $0xa8] sm:$0x1] %vm191_vm2, %v2697_v0  ;;  %200 = vst.msk [vmem:[#allocation2 + $0xc0] sm:$0x1] %vm191_vm2, %v2697_v0  ;;  %v231_v5 = vld [vmem:[%s2792_s18 + $0x18] sm:$0xff]  ;;  %v234_v6 = vld [vmem:[%s2792_s18 + $0x30] sm:$0xff] }
  0x15   : > { %201 = vst.msk [vmem:[#allocation2 + $0xd8] sm:$0x1] %vm191_vm2, %v2697_v0  ;;  %202 = vst.msk [vmem:[#allocation2 + $0xf0] sm:$0x1] %vm191_vm2, %v2697_v0  ;;  %v325_v7 = vld [vmem:[#allocation2 + $0x1] sm:$0xff]  ;;  %v235_v11 = vld [vmem:[%s2792_s18 + $0x38] sm:$0xff] }
  0x16   : > { %203 = vst.msk [vmem:[#allocation2 + $0x108] sm:$0x1] %vm191_vm2, %v2697_v0  ;;  %204 = vst.msk [vmem:[#allocation2 + $0x120] sm:$0x1] %vm191_vm2, %v2697_v0  ;;  %v233_v9 = vld [vmem:[%s2792_s18 + $0x28] sm:$0xff]  ;;  %614 = vrot.lane.b32.xlu0 %v325_v7, %s2698_s19  ;;  %v236_v10 = vld [vmem:[%s2792_s18 + $0x40] sm:$0xff] }
  0x17   : > { %205 = vst.msk [vmem:[#allocation2 + $0x138] sm:$0x1] %vm191_vm2, %v2697_v0  ;;  %206 = vst.msk [vmem:[#allocation2 + $0x150] sm:$0x1] %vm191_vm2, %v2697_v0  ;;  %v326_v8 = vld [vmem:[#allocation2 + $0x9] sm:$0xff]  ;;  %v240_v14 = vld [vmem:[%s2792_s18 + $0x60] sm:$0xff] }
  0x18   : > { %207 = vst.msk [vmem:[#allocation2 + $0x168] sm:$0x1] %vm191_vm2, %v2697_v0  ;;  %208 = vst.msk [vmem:[#allocation2 + $0x180] sm:$0x1] %vm191_vm2, %v2697_v0  ;;  %v238_v12 = vld [vmem:[%s2792_s18 + $0x50] sm:$0xff]  ;;  %v237_v13 = vld [vmem:[%s2792_s18 + $0x48] sm:$0xff] }
  0x19   : > { %211 = vst.msk [vmem:[#allocation2 + $0x29] sm:$0x1] %vm191_vm2, %v2697_v0  ;;  %212 = vst.msk [vmem:[#allocation2 + $0x41] sm:$0x1] %vm191_vm2, %v2697_v0  ;;  %v239_v15 = vld [vmem:[%s2792_s18 + $0x58] sm:$0xff]  ;;  %v242_v16 = vld [vmem:[%s2792_s18 + $0x70] sm:$0xff] }
  0x1a   : > { %213 = vst.msk [vmem:[#allocation2 + $0x59] sm:$0x1] %vm191_vm2, %v2697_v0  ;;  %214 = vst.msk [vmem:[#allocation2 + $0x71] sm:$0x1] %vm191_vm2, %v2697_v0  ;;  %v241_v17 = vld [vmem:[%s2792_s18 + $0x68] sm:$0xff]  ;;  %v244_v18 = vld [vmem:[%s2792_s18 + $0x80] sm:$0xff]  ;;  %616 = vrot.lane.b32.xlu0 %v326_v8, %s2698_s19 }
  0x1b   : > { %215 = vst.msk [vmem:[#allocation2 + $0x89] sm:$0x1] %vm191_vm2, %v2697_v0  ;;  %216 = vst.msk [vmem:[#allocation2 + $0xa1] sm:$0x1] %vm191_vm2, %v2697_v0  ;;  %v243_v19 = vld [vmem:[%s2792_s18 + $0x78] sm:$0xff]  ;;  %v246_v20 = vld [vmem:[%s2792_s18 + $0x90] sm:$0xff] }
  0x1c   : > { %217 = vst.msk [vmem:[#allocation2 + $0xb9] sm:$0x1] %vm191_vm2, %v2697_v0  ;;  %218 = vst.msk [vmem:[#allocation2 + $0xd1] sm:$0x1] %vm191_vm2, %v2697_v0  ;;  %v245_v21 = vld [vmem:[%s2792_s18 + $0x88] sm:$0xff]  ;;  %v248_v22 = vld [vmem:[%s2792_s18 + $0xa0] sm:$0xff] }
  0x1d   : > { %219 = vst.msk [vmem:[#allocation2 + $0xe9] sm:$0x1] %vm191_vm2, %v2697_v0  ;;  %220 = vst.msk [vmem:[#allocation2 + $0x101] sm:$0x1] %vm191_vm2, %v2697_v0  ;;  %v247_v23 = vld [vmem:[%s2792_s18 + $0x98] sm:$0xff]  ;;  %v250_v24 = vld [vmem:[%s2792_s18 + $0xb0] sm:$0xff] }
  0x1e   : > { %221 = vst.msk [vmem:[#allocation2 + $0x119] sm:$0x1] %vm191_vm2, %v2697_v0  ;;  %222 = vst.msk [vmem:[#allocation2 + $0x131] sm:$0x1] %vm191_vm2, %v2697_v0  ;;  %v249_v28 = vld [vmem:[%s2792_s18 + $0xa8] sm:$0xff]  ;;  %v252_v29 = vld [vmem:[%s2792_s18 + $0xc0] sm:$0xff] }
  0x1f   : > { %223 = vst.msk [vmem:[#allocation2 + $0x149] sm:$0x1] %vm191_vm2, %v2697_v0  ;;  %224 = vst.msk [vmem:[#allocation2 + $0x161] sm:$0x1] %vm191_vm2, %v2697_v0  ;;  %v251_v33 = vld [vmem:[%s2792_s18 + $0xb8] sm:$0xff]  ;;  %v254_v34 = vld [vmem:[%s2792_s18 + $0xd0] sm:$0xff] }
  0x20   : > { %225 = vst.msk [vmem:[#allocation2 + $0x179] sm:$0x1] %vm191_vm2, %v2697_v0  ;;  %226 = vst.msk [vmem:[#allocation2 + $0x191] sm:$0x1] %vm191_vm2, %v2697_v0  ;;  %v253_v35 = vld [vmem:[%s2792_s18 + $0xc8] sm:$0xff]  ;;  %v256_v36 = vld [vmem:[%s2792_s18 + $0xe0] sm:$0xff] }
  0x21   : > { %210 = vst.msk [vmem:[#allocation2 + $0x11] sm:$0x1] %vm191_vm2, %v2697_v0  ;;  %192 = vst.msk [vmem:[#allocation2] sm:$0x1] %vm191_vm2, %v2697_v0  ;;  %v255_v37 = vld [vmem:[%s2792_s18 + $0xd8] sm:$0xff]  ;;  %v257_v39 = vld [vmem:[%s2792_s18 + $0xe8] sm:$0xff] }
  0x22   : > { %209 = vst.msk [vmem:[#allocation2 + $0x198] sm:$0x1] %vm191_vm2, %v2697_v0  ;;  %227 = vst.msk [vmem:[#allocation2 + $0x1a9] sm:$0x1] %vm191_vm2, %v2697_v0  ;;  %v357_v62 = vld [vmem:[#allocation2 + $0x2] sm:$0xff]  ;;  %s2705_s22 = smov 64  }
  0x23   : > { %261 = vst.msk [vmem:[#allocation2 + $0x19] sm:$0xff] %vm182_vm0, %v228_v1  ;;  %263 = vst.msk [vmem:[#allocation2 + $0x31] sm:$0xff] %vm182_vm0, %v230_v2  ;;  %vm1803_vm8 = vcmask 457728   ;;  %vm1836_vm9 = vcmask 523264   ;;  %vm1878_vm10 = vcmask 588800   ;;  %vm2200_vm11 = vcmask 31744  }
  0x24   : > { %262 = vst.msk [vmem:[#allocation2 + $0x21] sm:$0xff] %vm182_vm0, %v229_v3  ;;  %265 = vst.msk [vmem:[#allocation2 + $0x49] sm:$0xff] %vm182_vm0, %v232_v4  ;;  %s2502_s15 = sshll.u32 %s4198_s13, 1  ;;  %vm2403_vm12 = vcmask 1040384   ;;  %vm2405_vm13 = vcmask 25600  }
  0x25   : > { %264 = vst.msk [vmem:[#allocation2 + $0x39] sm:$0xff] %vm182_vm0, %v231_v5  ;;  %267 = vst.msk [vmem:[#allocation2 + $0x61] sm:$0xff] %vm182_vm0, %v234_v6  ;;  %s181_s26 = scalar_lea.vmem %s4091_s3, %s2502_s15 }
  0x26   : > { %266 = vst.msk [vmem:[#allocation2 + $0x51] sm:$0xff] %vm182_vm0, %v233_v9  ;;  %269 = vst.msk [vmem:[#allocation2 + $0x79] sm:$0xff] %vm182_vm0, %v236_v10 }
  0x27   : > { %268 = vst.msk [vmem:[#allocation2 + $0x69] sm:$0xff] %vm182_vm0, %v235_v11  ;;  %271 = vst.msk [vmem:[#allocation2 + $0x91] sm:$0xff] %vm182_vm0, %v238_v12 }
  0x28   : > { %270 = vst.msk [vmem:[#allocation2 + $0x81] sm:$0xff] %vm182_vm0, %v237_v13  ;;  %273 = vst.msk [vmem:[#allocation2 + $0xa9] sm:$0xff] %vm182_vm0, %v240_v14  ;;  %v358_v1 = vld [vmem:[#allocation2 + $0xa] sm:$0xff] }
  0x29   : > { %272 = vst.msk [vmem:[#allocation2 + $0x99] sm:$0xff] %vm182_vm0, %v239_v15  ;;  %275 = vst.msk [vmem:[#allocation2 + $0xc1] sm:$0xff] %vm182_vm0, %v242_v16 }
  0x2a   : > { %274 = vst.msk [vmem:[#allocation2 + $0xb1] sm:$0xff] %vm182_vm0, %v241_v17  ;;  %277 = vst.msk [vmem:[#allocation2 + $0xd9] sm:$0xff] %vm182_vm0, %v244_v18  ;;  %v2837_v25 = vld [vmem:[#allocation2 + $0x19] sm:$0xff]  ;;  %v2839_v26 = vld [vmem:[#allocation2 + $0x31] sm:$0xff] }
  0x2b   : > { %276 = vst.msk [vmem:[#allocation2 + $0xc9] sm:$0xff] %vm182_vm0, %v243_v19  ;;  %279 = vst.msk [vmem:[#allocation2 + $0xf1] sm:$0xff] %vm182_vm0, %v246_v20  ;;  %618 = vrot.lane.b32.xlu1 %v2837_v25, %s2698_s19  ;;  %v2846_v27 = vld [vmem:[#allocation2 + $0x21] sm:$0xff]  ;;  %622 = vrot.lane.b32.xlu0 %v2839_v26, %s2698_s19  ;;  %v2854_v30 = vld [vmem:[#allocation2 + $0x49] sm:$0xff] }
  0x2c   : > { %278 = vst.msk [vmem:[#allocation2 + $0xe1] sm:$0xff] %vm182_vm0, %v245_v21  ;;  %281 = vst.msk [vmem:[#allocation2 + $0x109] sm:$0xff] %vm182_vm0, %v248_v22  ;;  %v2858_v31 = vld [vmem:[#allocation2 + $0x39] sm:$0xff]  ;;  %v2862_v32 = vld [vmem:[#allocation2 + $0x61] sm:$0xff] }
  0x2d   : > { %280 = vst.msk [vmem:[#allocation2 + $0xf9] sm:$0xff] %vm182_vm0, %v247_v23  ;;  %283 = vst.msk [vmem:[#allocation2 + $0x121] sm:$0xff] %vm182_vm0, %v250_v24  ;;  %v2874_v38 = vld [vmem:[#allocation2 + $0x51] sm:$0xff]  ;;  %v2882_v40 = vld [vmem:[#allocation2 + $0x79] sm:$0xff] }
  0x2e   : > { %282 = vst.msk [vmem:[#allocation2 + $0x111] sm:$0xff] %vm182_vm0, %v249_v28  ;;  %285 = vst.msk [vmem:[#allocation2 + $0x139] sm:$0xff] %vm182_vm0, %v252_v29  ;;  %v2886_v41 = vld [vmem:[#allocation2 + $0x69] sm:$0xff]  ;;  %v2890_v42 = vld [vmem:[#allocation2 + $0x91] sm:$0xff] }
  0x2f   : > { %620 = vrot.lane.b32.xlu1 %v2846_v27, %s2698_s19  ;;  %626 = vrot.lane.b32.xlu0 %v2854_v30, %s2698_s19  ;;  %284 = vst.msk [vmem:[#allocation2 + $0x129] sm:$0xff] %vm182_vm0, %v251_v33  ;;  %287 = vst.msk [vmem:[#allocation2 + $0x151] sm:$0xff] %vm182_vm0, %v254_v34  ;;  %v2894_v43 = vld [vmem:[#allocation2 + $0x81] sm:$0xff]  ;;  %v2898_v44 = vld [vmem:[#allocation2 + $0xa9] sm:$0xff] }
  0x30   : > { %286 = vst.msk [vmem:[#allocation2 + $0x141] sm:$0xff] %vm182_vm0, %v253_v35  ;;  %289 = vst.msk [vmem:[#allocation2 + $0x169] sm:$0xff] %vm182_vm0, %v256_v36  ;;  %v2902_v45 = vld [vmem:[#allocation2 + $0x99] sm:$0xff]  ;;  %v341_v46 = vld [vmem:[#allocation2 + $0xc1] sm:$0xff] }
  0x31   : > { %288 = vst.msk [vmem:[#allocation2 + $0x159] sm:$0xff] %vm182_vm0, %v255_v37  ;;  %290 = vst.msk [vmem:[#allocation2 + $0x171] sm:$0xff] %vm182_vm0, %v257_v39  ;;  %v2908_v47 = vld [vmem:[#allocation2 + $0xb1] sm:$0xff]  ;;  %v343_v48 = vld [vmem:[#allocation2 + $0xd9] sm:$0xff] }
  0x32   : > { %v342_v49 = vld [vmem:[#allocation2 + $0xc9] sm:$0xff]  ;;  %v345_v50 = vld [vmem:[#allocation2 + $0xf1] sm:$0xff]  ;;  %v2928_v0 = vld [vmem:[#allocation2 + $0x1a] sm:$0xff] }
  0x33   : > { %624 = vrot.lane.b32.xlu1 %v2858_v31, %s2698_s19  ;;  %630 = vrot.lane.b32.xlu0 %v2862_v32, %s2698_s19  ;;  %v344_v51 = vld [vmem:[#allocation2 + $0xe1] sm:$0xff]  ;;  %v347_v52 = vld [vmem:[#allocation2 + $0x109] sm:$0xff]  ;;  %v2933_v2 = vld [vmem:[#allocation2 + $0x32] sm:$0xff] }
  0x34   : > { %v346_v53 = vld [vmem:[#allocation2 + $0xf9] sm:$0xff]  ;;  %v349_v54 = vld [vmem:[#allocation2 + $0x121] sm:$0xff]  ;;  %v2940_v4 = vld [vmem:[#allocation2 + $0x4a] sm:$0xff] }
  0x35   : > { %v348_v55 = vld [vmem:[#allocation2 + $0x111] sm:$0xff]  ;;  %v351_v56 = vld [vmem:[#allocation2 + $0x139] sm:$0xff]  ;;  %v2936_v3 = vld [vmem:[#allocation2 + $0x22] sm:$0xff] }
  0x36   : > { %v350_v57 = vld [vmem:[#allocation2 + $0x129] sm:$0xff]  ;;  %v353_v58 = vld [vmem:[#allocation2 + $0x151] sm:$0xff]  ;;  %v2944_v5 = vld [vmem:[#allocation2 + $0x3a] sm:$0xff] }
  0x37   : > { %628 = vrot.lane.b32.xlu1 %v2874_v38, %s2698_s19  ;;  %634 = vrot.lane.b32.xlu0 %v2882_v40, %s2698_s19  ;;  %v352_v59 = vld [vmem:[#allocation2 + $0x141] sm:$0xff]  ;;  %v355_v60 = vld [vmem:[#allocation2 + $0x169] sm:$0xff]  ;;  %v2952_v7 = vld [vmem:[#allocation2 + $0x52] sm:$0xff] }
  0x38   : > { %v354_v61 = vld [vmem:[#allocation2 + $0x159] sm:$0xff]  ;;  %v356_v63 = vld [vmem:[#allocation2 + $0x171] sm:$0xff]  ;;  %v2948_v6 = vld [vmem:[#allocation2 + $0x62] sm:$0xff] }
  0x39   : > { %v2956_v8 = vld [vmem:[#allocation2 + $0x7a] sm:$0xff]  ;;  %v2960_v9 = vld [vmem:[#allocation2 + $0x6a] sm:$0xff]  ;;  %v2964_v10 = vld [vmem:[#allocation2 + $0x92] sm:$0xff] }
  0x3a   : > { %v2968_v11 = vld [vmem:[#allocation2 + $0x82] sm:$0xff]  ;;  %v2972_v12 = vld [vmem:[#allocation2 + $0xaa] sm:$0xff]  ;;  %v2976_v13 = vld [vmem:[#allocation2 + $0x9a] sm:$0xff] }
  0x3b   : > { %632 = vrot.lane.b32.xlu1 %v2886_v41, %s2698_s19  ;;  %638 = vrot.lane.b32.xlu0 %v2890_v42, %s2698_s19  ;;  %v2980_v14 = vld [vmem:[#allocation2 + $0xc2] sm:$0xff]  ;;  %v2984_v15 = vld [vmem:[#allocation2 + $0xb2] sm:$0xff]  ;;  %v2988_v16 = vld [vmem:[#allocation2 + $0xda] sm:$0xff] }
  0x3c   : > { %v2992_v17 = vld [vmem:[#allocation2 + $0xca] sm:$0xff]  ;;  %v377_v18 = vld [vmem:[#allocation2 + $0xf2] sm:$0xff]  ;;  %v2998_v19 = vld [vmem:[#allocation2 + $0xe2] sm:$0xff] }
  0x3d   : > { %v379_v20 = vld [vmem:[#allocation2 + $0x10a] sm:$0xff]  ;;  %v378_v21 = vld [vmem:[#allocation2 + $0xfa] sm:$0xff]  ;;  %v381_v22 = vld [vmem:[#allocation2 + $0x122] sm:$0xff] }
  0x3e   : > { %v380_v23 = vld [vmem:[#allocation2 + $0x112] sm:$0xff]  ;;  %v383_v24 = vld [vmem:[#allocation2 + $0x13a] sm:$0xff]  ;;  %v382_v29 = vld [vmem:[#allocation2 + $0x12a] sm:$0xff] }
  0x3f   : > { %636 = vrot.lane.b32.xlu1 %v2894_v43, %s2698_s19  ;;  %642 = vrot.lane.b32.xlu0 %v2898_v44, %s2698_s19  ;;  %v385_v33 = vld [vmem:[#allocation2 + $0x152] sm:$0xff]  ;;  %v384_v35 = vld [vmem:[#allocation2 + $0x142] sm:$0xff]  ;;  %v387_v37 = vld [vmem:[#allocation2 + $0x16a] sm:$0xff] }
  0x43   : > { %640 = vrot.lane.b32.xlu1 %v2902_v45, %s2698_s19  ;;  %646 = vrot.lane.b32.xlu0 %v341_v46, %s2698_s19  ;;  %v386_v46 = vld [vmem:[#allocation2 + $0x15a] sm:$0xff] }
  0x47   : > { %644 = vrot.lane.b32.xlu1 %v2908_v47, %s2698_s19  ;;  %650 = vrot.lane.b32.xlu0 %v343_v48, %s2698_s19 }
  0x4b   : > { %648 = vrot.lane.b32.xlu1 %v342_v49, %s2698_s19  ;;  %654 = vrot.lane.b32.xlu0 %v345_v50, %s2698_s19  ;;  %v3025_v50 = vld [vmem:[#allocation2 + $0x18] sm:$0xff] }
  0x4f   : > { %652 = vrot.lane.b32.xlu1 %v344_v51, %s2698_s19  ;;  %658 = vrot.lane.b32.xlu0 %v347_v52, %s2698_s19  ;;  %v388_v51 = vld [vmem:[#allocation2 + $0x172] sm:$0xff] }
  0x53   : > { %656 = vrot.lane.b32.xlu1 %v346_v53, %s2698_s19  ;;  %662 = vrot.lane.b32.xlu0 %v349_v54, %s2698_s19  ;;  %v3034_v54 = vld [vmem:[#allocation2 + $0x30] sm:$0xff] }
  0x57   : > { %660 = vrot.lane.b32.xlu1 %v348_v55, %s2698_s19  ;;  %666 = vrot.lane.b32.xlu0 %v351_v56, %s2698_s19  ;;  %v3040_v56 = vld [vmem:[#allocation2 + $0x20] sm:$0xff] }
  0x5b   : > { %664 = vrot.lane.b32.xlu1 %v350_v57, %s2698_s19  ;;  %670 = vrot.lane.b32.xlu0 %v353_v58, %s2698_s19  ;;  %v3046_v58 = vld [vmem:[#allocation2 + $0x48] sm:$0xff] }
  0x5f   : > { %668 = vrot.lane.b32.xlu1 %v352_v59, %s2698_s19  ;;  %674 = vrot.lane.b32.xlu0 %v355_v60, %s2698_s19  ;;  %v3052_v60 = vld [vmem:[#allocation2 + $0x38] sm:$0xff] }
  0x63   : > { %672 = vrot.lane.b32.xlu1 %v354_v61, %s2698_s19  ;;  %742 = vrot.lane.b32.xlu0 %v357_v62, %s2699_s20  ;;  %v3058_v62 = vld [vmem:[#allocation2 + $0x60] sm:$0xff] }
  0x67   : > { %676 = vrot.lane.b32.xlu1 %v356_v63, %s2698_s19  ;;  %746 = vrot.lane.b32.xlu0 %v2928_v0, %s2699_s20 }
  0x6b   : > { %744 = vrot.lane.b32.xlu1 %v358_v1, %s2699_s20  ;;  %750 = vrot.lane.b32.xlu0 %v2933_v2, %s2699_s20  ;;  %v3064_v1 = vld [vmem:[#allocation2 + $0x50] sm:$0xff] }
  0x6f   : > { %748 = vrot.lane.b32.xlu1 %v2936_v3, %s2699_s20  ;;  %754 = vrot.lane.b32.xlu0 %v2940_v4, %s2699_s20 }
  0x73   : > { %752 = vrot.lane.b32.xlu1 %v2944_v5, %s2699_s20  ;;  %758 = vrot.lane.b32.xlu0 %v2948_v6, %s2699_s20 }
  0x77   : > { %756 = vrot.lane.b32.xlu1 %v2952_v7, %s2699_s20  ;;  %762 = vrot.lane.b32.xlu0 %v2956_v8, %s2699_s20 }
  0x7b   : > { %760 = vrot.lane.b32.xlu1 %v2960_v9, %s2699_s20  ;;  %766 = vrot.lane.b32.xlu0 %v2964_v10, %s2699_s20 }
  0x7f   : > { %764 = vrot.lane.b32.xlu1 %v2968_v11, %s2699_s20  ;;  %770 = vrot.lane.b32.xlu0 %v2972_v12, %s2699_s20 }
  0x83   : > { %768 = vrot.lane.b32.xlu1 %v2976_v13, %s2699_s20  ;;  %774 = vrot.lane.b32.xlu0 %v2980_v14, %s2699_s20 }
  0x87   : > { %772 = vrot.lane.b32.xlu1 %v2984_v15, %s2699_s20  ;;  %778 = vrot.lane.b32.xlu0 %v2988_v16, %s2699_s20 }
  0x88   : > { %v3006_v28 = vpop.permute.xlu0 %614 }
  0x8b   : > { %776 = vrot.lane.b32.xlu1 %v2992_v17, %s2699_s20  ;;  %782 = vrot.lane.b32.xlu0 %v377_v18, %s2699_s20 }
  0x8c   : > { %v3010_v34 = vpop.permute.xlu0 %616 }
  0x8f   : > { %780 = vrot.lane.b32.xlu1 %v2998_v19, %s2699_s20  ;;  %786 = vrot.lane.b32.xlu0 %v379_v20, %s2699_s20  ;;  %v3070_v20 = vld [vmem:[#allocation2 + $0x78] sm:$0xff] }
  0x93   : > { %784 = vrot.lane.b32.xlu1 %v378_v21, %s2699_s20  ;;  %790 = vrot.lane.b32.xlu0 %v381_v22, %s2699_s20  ;;  %v3076_v22 = vld [vmem:[#allocation2 + $0x68] sm:$0xff] }
  0x97   : > { %788 = vrot.lane.b32.xlu1 %v380_v23, %s2699_s20  ;;  %794 = vrot.lane.b32.xlu0 %v383_v24, %s2699_s20  ;;  %v3082_v24 = vld [vmem:[#allocation2 + $0x90] sm:$0xff] }
  0x98   : > { %4102 = vst [vmem:[#allocation8_spill] sm:$0xff] %v3082_v24 }
  0x9b   : > { %792 = vrot.lane.b32.xlu1 %v382_v29, %s2699_s20  ;;  %798 = vrot.lane.b32.xlu0 %v385_v33, %s2699_s20  ;;  %v1869_v29 = vld [vmem:[%s4089_s1] sm:$0xff]  ;;  %v1870_v33 = vld [vmem:[%s4089_s1 + $0x8] sm:$0xff] }
  0x9d   : > { %v3014_v36 = vpop.permute.xlu1 %618  ;;  %v3016_v39 = vpop.permute.xlu0 %622 }
  0x9f   : > { %796 = vrot.lane.b32.xlu1 %v384_v35, %s2699_s20  ;;  %802 = vrot.lane.b32.xlu0 %v387_v37, %s2699_s20  ;;  %v2646_v37 = vpack.c.bf16 %v1870_v33, %v1869_v29 }
  0xa1   : > { %v3020_v48 = vpop.permute.xlu1 %620  ;;  %v3022_v49 = vpop.permute.xlu0 %626  ;;  %2647 = vmatprep.subr.bf16.mxu0 %v2646_v37  ;;  %2662 = vmatprep.subr.bf16.mxu1 %v2646_v37 }
  0xa2   : > { %2649 = vmatpush3.bf16.msra.mxu0 %v2646_v37  ;;  %2667 = vmatpush3.bf16.msra.mxu1 %v2646_v37  ;;  %v3128_v37 = vld [vmem:[#allocation2 + $0xb0] sm:$0xff] }
  0xa3   : > { %800 = vrot.lane.b32.xlu1 %v386_v46, %s2699_s20  ;;  %870 = vrot.lane.b32.xlu0 %v3025_v50, %s2700_s21  ;;  %v3094_v46 = vld [vmem:[#allocation2 + $0x80] sm:$0xff]  ;;  %4110 = vst [vmem:[#allocation16_spill] sm:$0xff] %v3128_v37 }
  0xa5   : > { %v3029_v52 = vpop.permute.xlu1 %624  ;;  %v3031_v53 = vpop.permute.xlu0 %630 }
  0xa7   : > { %804 = vrot.lane.b32.xlu1 %v388_v51, %s2699_s20  ;;  %874 = vrot.lane.b32.xlu0 %v3034_v54, %s2700_s21  ;;  %s2704_s20 = smov 56  }
  0xa9   : > { %v3038_v55 = vpop.permute.xlu1 %628  ;;  %v3042_v57 = vpop.permute.xlu0 %634 }
  0xab   : > { %872 = vrot.lane.b32.xlu1 %v3040_v56, %s2700_s21  ;;  %878 = vrot.lane.b32.xlu0 %v3046_v58, %s2700_s21 }
  0xad   : > { %v3050_v59 = vpop.permute.xlu1 %632  ;;  %v3054_v61 = vpop.permute.xlu0 %638 }
  0xae   : > { %4097 = vst [vmem:[#allocation3_spill] sm:$0xff] %v3054_v61  ;;  %v1873_v61 = vld [vmem:[%s4089_s1 + $0x20] sm:$0xff] }
  0xaf   : > { %876 = vrot.lane.b32.xlu1 %v3052_v60, %s2700_s21  ;;  %882 = vrot.lane.b32.xlu0 %v3058_v62, %s2700_s21 }
  0xb1   : > { %v3062_v63 = vpop.permute.xlu1 %636  ;;  %v3066_v18 = vpop.permute.xlu0 %642 }
  0xb2   : > { %4098 = vst [vmem:[#allocation4_spill] sm:$0xff] %v3062_v63  ;;  %4099 = vst [vmem:[#allocation5_spill] sm:$0xff] %v3066_v18  ;;  %v1871_v18 = vld [vmem:[%s4089_s1 + $0x10] sm:$0xff]  ;;  %v1874_v63 = vld [vmem:[%s4089_s1 + $0x28] sm:$0xff] }
  0xb3   : > { %880 = vrot.lane.b32.xlu1 %v3064_v1, %s2700_s21  ;;  %886 = vrot.lane.b32.xlu0 %v3070_v20, %s2700_s21 }
  0xb5   : > { %v3074_v21 = vpop.permute.xlu1 %640  ;;  %v3078_v23 = vpop.permute.xlu0 %646 }
  0xb6   : > { %4100 = vst [vmem:[#allocation6_spill] sm:$0xff] %v3074_v21  ;;  %4101 = vst [vmem:[#allocation7_spill] sm:$0xff] %v3078_v23  ;;  %v3100_v23 = vld [vmem:[#allocation2 + $0xa8] sm:$0xff] }
  0xb7   : > { %884 = vrot.lane.b32.xlu1 %v3076_v22, %s2700_s21  ;;  %890 = vrot.lane.b32.xlu0 %v3082_v24, %s2700_s21  ;;  %4105 = vst [vmem:[#allocation11_spill] sm:$0xff] %v3100_v23 }
  0xb9   : > { %v3092_v35 = vpop.permute.xlu1 %644  ;;  %v3096_v51 = vpop.permute.xlu0 %650 }
  0xba   : > { %4103 = vst [vmem:[#allocation9_spill] sm:$0xff] %v3092_v35  ;;  %4104 = vst [vmem:[#allocation10_spill] sm:$0xff] %v3096_v51  ;;  %v1872_v35 = vld [vmem:[%s4089_s1 + $0x18] sm:$0xff] }
  0xbb   : > { %888 = vrot.lane.b32.xlu1 %v3094_v46, %s2700_s21  ;;  %894 = vrot.lane.b32.xlu0 %v3100_v23, %s2700_s21  ;;  %v2650_v33 = vpack.c.bf16 %v1872_v35, %v1871_v18  ;;  %v3112_v51 = vld [vmem:[#allocation2 + $0x98] sm:$0xff]  ;;  %v2654_v35 = vpack.c.bf16 %v1874_v63, %v1873_v61 }
  0xbc   : > { %4107 = vst [vmem:[#allocation13_spill] sm:$0xff] %v3112_v51 }
  0xbd   : > { %v3110_v29 = vpop.permute.xlu1 %648  ;;  %v3114_v21 = vpop.permute.xlu0 %654  ;;  %2651 = vmatprep.subr.bf16.mxu0 %v2650_v33  ;;  %2663 = vmatprep.subr.bf16.mxu1 %v2650_v33 }
  0xbe   : > { %4106 = vst [vmem:[#allocation12_spill] sm:$0xff] %v3110_v29  ;;  %4108 = vst [vmem:[#allocation14_spill] sm:$0xff] %v3114_v21  ;;  %2653 = vmatpush3.bf16.msra.mxu0 %v2650_v33  ;;  %2668 = vmatpush3.bf16.msra.mxu1 %v2650_v33  ;;  %v1875_v29 = vld [vmem:[%s4089_s1 + $0x30] sm:$0xff] }
  0xbf   : > { %892 = vrot.lane.b32.xlu1 %v3112_v51, %s2700_s21  ;;  %998 = vrot.lane.b32.xlu0 %v2837_v25, %s2701_s7  ;;  %v1876_v25 = vld [vmem:[%s4089_s1 + $0x38] sm:$0xff] }
  0xc0   : > { %2655 = vmatprep.subr.bf16.mxu0 %v2654_v35  ;;  %2664 = vmatprep.subr.bf16.mxu1 %v2654_v35  ;;  %v2658_v63 = vpack.c.bf16 %v1876_v25, %v1875_v29 }
  0xc1   : > { %v3126_v18 = vpop.permute.xlu1 %652  ;;  %v3130_v21 = vpop.permute.xlu0 %658 }
  0xc2   : > { %4109 = vst [vmem:[#allocation15_spill] sm:$0xff] %v3126_v18  ;;  %4111 = vst [vmem:[#allocation17_spill] sm:$0xff] %v3130_v21  ;;  %2657 = vmatpush3.bf16.msra.mxu0 %v2654_v35  ;;  %2669 = vmatpush3.bf16.msra.mxu1 %v2654_v35 }
  0xc3   : > { %896 = vrot.lane.b32.xlu1 %v3128_v37, %s2700_s21  ;;  %1126 = vrot.lane.b32.xlu0 %v2928_v0, %s2702_s14  ;;  %v1877_v0 = vld [vmem:[%s4089_s1 + $0x40] sm:$0xff] }
  0xc4   : > { %2659 = vmatprep.subr.bf16.mxu0 %v2658_v63  ;;  %2665 = vmatprep.subr.bf16.mxu1 %v2658_v63 }
  0xc5   : > { %v3142_v61 = vpop.permute.xlu1 %656  ;;  %v3144_v33 = vpop.permute.xlu0 %662 }
  0xc6   : > { %4112 = vst [vmem:[#allocation18_spill] sm:$0xff] %v3142_v61  ;;  %4113 = vst [vmem:[#allocation19_spill] sm:$0xff] %v3144_v33  ;;  %2661 = vmatpush3.bf16.msra.mxu0 %v2658_v63  ;;  %2670 = vmatpush3.bf16.msra.mxu1 %v2658_v63 }
  0xc7   : > { %1000 = vrot.lane.b32.xlu1 %v2846_v27, %s2701_s7  ;;  %1254 = vrot.lane.b32.xlu0 %v3034_v54, %s2703_s16 }
  0xc8   : > { %2596 = vmatprep.subr.mxu0 %v1877_v0  ;;  %2666 = vmatprep.subr.mxu1 %v1877_v0 }
  0xc9   : > { %v3150_v21 = vpop.permute.xlu1 %660  ;;  %v3155_v29 = vpop.permute.xlu0 %666 }
  0xca   : > { %4114 = vst [vmem:[#allocation20_spill] sm:$0xff] %v3150_v21  ;;  %4115 = vst [vmem:[#allocation21_spill] sm:$0xff] %v3155_v29  ;;  %2597 = vmatpush3.msra.mxu0 %v1877_v0  ;;  %2671 = vmatpush3.msra.mxu1 %v1877_v0 }
  0xcb   : > { %1128 = vrot.lane.b32.xlu1 %v2936_v3, %s2702_s14  ;;  %1382 = vrot.lane.b32.xlu0 %v2839_v26, %s2704_s20 }
  0xcd   : > { %v3161_v27 = vpop.permute.xlu1 %664  ;;  %v3163_v35 = vpop.permute.xlu0 %670 }
  0xce   : > { %4116 = vst [vmem:[#allocation22_spill] sm:$0xff] %v3161_v27  ;;  %4117 = vst [vmem:[#allocation23_spill] sm:$0xff] %v3163_v35 }
  0xcf   : > { %1256 = vrot.lane.b32.xlu1 %v3052_v60, %s2703_s16  ;;  %1384 = vrot.lane.b32.xlu0 %v2858_v31, %s2704_s20 }
  0xd1   : > { %v3169_v25 = vpop.permute.xlu1 %668  ;;  %v3171_v63 = vpop.permute.xlu0 %674 }
  0xd2   : > { %4118 = vst [vmem:[#allocation24_spill] sm:$0xff] %v3169_v25  ;;  %4119 = vst [vmem:[#allocation25_spill] sm:$0xff] %v3171_v63 }
  0xd3   : > { %1002 = vrot.lane.b32.xlu1 %v2839_v26, %s2701_s7  ;;  %1004 = vrot.lane.b32.xlu0 %v2858_v31, %s2701_s7 }
  0xd5   : > { %v3177_v3 = vpop.permute.xlu1 %672  ;;  %v3179_v0 = vpop.permute.xlu0 %742 }
  0xd6   : > { %4120 = vst [vmem:[#allocation26_spill] sm:$0xff] %v3177_v3 }
  0xd7   : > { %1510 = vrot.lane.b32.xlu1 %v2933_v2, %s2705_s22  ;;  %1512 = vrot.lane.b32.xlu0 %v2944_v5, %s2705_s22 }
  0xd9   : > { %v3185_v35 = vpop.permute.xlu1 %676  ;;  %v3187_v63 = vpop.permute.xlu0 %746 }
  0xda   : > { %4121 = vst [vmem:[#allocation27_spill] sm:$0xff] %v3185_v35 }
  0xdb   : > { %1130 = vrot.lane.b32.xlu1 %v2933_v2, %s2702_s14  ;;  %1258 = vrot.lane.b32.xlu0 %v3046_v58, %s2703_s16 }
  0xdd   : > { %v3193_v26 = vpop.permute.xlu1 %744  ;;  %v3195_v31 = vpop.permute.xlu0 %750 }
  0xdf   : > { %1132 = vrot.lane.b32.xlu1 %v2944_v5, %s2702_s14  ;;  %1386 = vrot.lane.b32.xlu0 %v2854_v30, %s2704_s20 }
  0xe1   : > { %v3201_v3 = vpop.permute.xlu1 %748  ;;  %v3203_v35 = vpop.permute.xlu0 %754 }
  0xe3   : > { %1260 = vrot.lane.b32.xlu1 %v3064_v1, %s2703_s16  ;;  %1388 = vrot.lane.b32.xlu0 %v2874_v38, %s2704_s20 }
  0xe5   : > { %v3209_v2 = vpop.permute.xlu1 %752  ;;  %v3211_v25 = vpop.permute.xlu0 %758 }
  0xe7   : > { %1006 = vrot.lane.b32.xlu1 %v2854_v30, %s2701_s7  ;;  %1008 = vrot.lane.b32.xlu0 %v2874_v38, %s2701_s7 }
  0xe9   : > { %v3217_v5 = vpop.permute.xlu1 %756  ;;  %v3219_v29 = vpop.permute.xlu0 %762 }
  0xeb   : > { %1514 = vrot.lane.b32.xlu1 %v2940_v4, %s2705_s22  ;;  %1516 = vrot.lane.b32.xlu0 %v2952_v7, %s2705_s22 }
  0xed   : > { %v3225_v27 = vpop.permute.xlu1 %760  ;;  %v3227_v33 = vpop.permute.xlu0 %766 }
  0xee   : > { %4122 = vst [vmem:[#allocation28_spill] sm:$0xff] %v3227_v33 }
  0xef   : > { %1134 = vrot.lane.b32.xlu1 %v2940_v4, %s2702_s14  ;;  %1262 = vrot.lane.b32.xlu0 %v3058_v62, %s2703_s16 }
  0xf1   : > { %v3233_v30 = vpop.permute.xlu1 %764  ;;  %v3235_v38 = vpop.permute.xlu0 %770 }
  0xf2   : > { %4123 = vst [vmem:[#allocation29_spill] sm:$0xff] %v3233_v30  ;;  %4124 = vst [vmem:[#allocation30_spill] sm:$0xff] %v3235_v38 }
  0xf3   : > { %1136 = vrot.lane.b32.xlu1 %v2952_v7, %s2702_s14  ;;  %1390 = vrot.lane.b32.xlu0 %v2862_v32, %s2704_s20 }
  0xf5   : > { %v3241_v21 = vpop.permute.xlu1 %768  ;;  %v3243_v61 = vpop.permute.xlu0 %774 }
  0xf6   : > { %4125 = vst [vmem:[#allocation31_spill] sm:$0xff] %v3241_v21  ;;  %4126 = vst [vmem:[#allocation32_spill] sm:$0xff] %v3243_v61 }
  0xf7   : > { %1264 = vrot.lane.b32.xlu1 %v3076_v22, %s2703_s16  ;;  %1392 = vrot.lane.b32.xlu0 %v2886_v41, %s2704_s20 }
  0xf9   : > { %v3249_v4 = vpop.permute.xlu1 %772  ;;  %v3251_v18 = vpop.permute.xlu0 %778 }
  0xfa   : > { %4127 = vst [vmem:[#allocation33_spill] sm:$0xff] %v3249_v4  ;;  %4128 = vst [vmem:[#allocation34_spill] sm:$0xff] %v3251_v18 }
  0xfb   : > { %1010 = vrot.lane.b32.xlu1 %v2862_v32, %s2701_s7  ;;  %1012 = vrot.lane.b32.xlu0 %v2886_v41, %s2701_s7 }
  0xfd   : > { %v3257_v7 = vpop.permute.xlu1 %776  ;;  %v3259_v38 = vpop.permute.xlu0 %782 }
  0xfe   : > { %4129 = vst [vmem:[#allocation35_spill] sm:$0xff] %v3257_v7  ;;  %4130 = vst [vmem:[#allocation36_spill] sm:$0xff] %v3259_v38 }
  0xff   : > { %1518 = vrot.lane.b32.xlu1 %v2948_v6, %s2705_s22  ;;  %1520 = vrot.lane.b32.xlu0 %v2960_v9, %s2705_s22 }
 0x101   : > { %v3265_v61 = vpop.permute.xlu1 %780  ;;  %v3267_v4 = vpop.permute.xlu0 %786 }
 0x102   : > { %4131 = vst [vmem:[#allocation37_spill] sm:$0xff] %v3265_v61  ;;  %4132 = vst [vmem:[#allocation38_spill] sm:$0xff] %v3267_v4 }
 0x103   : > { %1138 = vrot.lane.b32.xlu1 %v2948_v6, %s2702_s14  ;;  %1266 = vrot.lane.b32.xlu0 %v3070_v20, %s2703_s16 }
 0x105   : > { %v3273_v32 = vpop.permute.xlu1 %784  ;;  %v3275_v41 = vpop.permute.xlu0 %790 }
 0x106   : > { %4133 = vst [vmem:[#allocation39_spill] sm:$0xff] %v3273_v32  ;;  %4134 = vst [vmem:[#allocation40_spill] sm:$0xff] %v3275_v41 }
 0x107   : > { %1140 = vrot.lane.b32.xlu1 %v2960_v9, %s2702_s14  ;;  %1394 = vrot.lane.b32.xlu0 %v2882_v40, %s2704_s20 }
 0x109   : > { %v3281_v38 = vpop.permute.xlu1 %788  ;;  %v3283_v61 = vpop.permute.xlu0 %794 }
 0x10a   : > { %4135 = vst [vmem:[#allocation41_spill] sm:$0xff] %v3281_v38  ;;  %4136 = vst [vmem:[#allocation42_spill] sm:$0xff] %v3283_v61 }
 0x10b   : > { %1268 = vrot.lane.b32.xlu1 %v3094_v46, %s2703_s16  ;;  %1396 = vrot.lane.b32.xlu0 %v2894_v43, %s2704_s20 }
 0x10d   : > { %v3289_v6 = vpop.permute.xlu1 %792  ;;  %v3291_v4 = vpop.permute.xlu0 %798 }
 0x10e   : > { %4137 = vst [vmem:[#allocation43_spill] sm:$0xff] %v3289_v6  ;;  %4138 = vst [vmem:[#allocation44_spill] sm:$0xff] %v3291_v4 }
 0x10f   : > { %1014 = vrot.lane.b32.xlu1 %v2882_v40, %s2701_s7  ;;  %1016 = vrot.lane.b32.xlu0 %v2894_v43, %s2701_s7 }
 0x111   : > { %v3297_v9 = vpop.permute.xlu1 %796  ;;  %v3299_v41 = vpop.permute.xlu0 %802 }
 0x112   : > { %4139 = vst [vmem:[#allocation45_spill] sm:$0xff] %v3297_v9  ;;  %4140 = vst [vmem:[#allocation46_spill] sm:$0xff] %v3299_v41 }
 0x113   : > { %1522 = vrot.lane.b32.xlu1 %v2956_v8, %s2705_s22  ;;  %1524 = vrot.lane.b32.xlu0 %v2968_v11, %s2705_s22 }
 0x115   : > { %v3305_v61 = vpop.permute.xlu1 %800  ;;  %v871_v6 = vpop.permute.xlu0 %870 }
 0x116   : > { %4141 = vst [vmem:[#allocation47_spill] sm:$0xff] %v3305_v61 }
 0x117   : > { %1142 = vrot.lane.b32.xlu1 %v2956_v8, %s2702_s14  ;;  %1270 = vrot.lane.b32.xlu0 %v3082_v24, %s2703_s16 }
 0x119   : > { %v3311_v40 = vpop.permute.xlu1 %804  ;;  %v3313_v43 = vpop.permute.xlu0 %874 }
 0x11a   : > { %4142 = vst [vmem:[#allocation48_spill] sm:$0xff] %v3311_v40 }
 0x11b   : > { %1144 = vrot.lane.b32.xlu1 %v2968_v11, %s2702_s14  ;;  %1398 = vrot.lane.b32.xlu0 %v2890_v42, %s2704_s20 }
 0x11d   : > { %v873_v41 = vpop.permute.xlu1 %872  ;;  %v3319_v4 = vpop.permute.xlu0 %878 }
 0x11f   : > { %1272 = vrot.lane.b32.xlu1 %v3112_v51, %s2703_s16  ;;  %1400 = vrot.lane.b32.xlu0 %v2902_v45, %s2704_s20  ;;  %v3374_v51 = vld [vmem:[#allocation2 + $0xc0] sm:$0xff] }
 0x121   : > { %v3325_v8 = vpop.permute.xlu1 %876  ;;  %v3327_v40 = vpop.permute.xlu0 %882 }
 0x123   : > { %1018 = vrot.lane.b32.xlu1 %v2890_v42, %s2701_s7  ;;  %1020 = vrot.lane.b32.xlu0 %v2902_v45, %s2701_s7 }
 0x125   : > { %v3333_v11 = vpop.permute.xlu1 %880  ;;  %v3335_v61 = vpop.permute.xlu0 %886 }
 0x127   : > { %1526 = vrot.lane.b32.xlu1 %v2964_v10, %s2705_s22  ;;  %1528 = vrot.lane.b32.xlu0 %v2976_v13, %s2705_s22 }
 0x129   : > { %v3341_v9 = vpop.permute.xlu1 %884  ;;  %v3343_v38 = vpop.permute.xlu0 %890 }
 0x12a   : > { %4143 = vst [vmem:[#allocation49_spill] sm:$0xff] %v3343_v38 }
 0x12b   : > { %1146 = vrot.lane.b32.xlu1 %v2964_v10, %s2702_s14  ;;  %1274 = vrot.lane.b32.xlu0 %v3100_v23, %s2703_s16  ;;  %v433_v10 = vld [vmem:[#allocation2 + $0xa9] sm:$0xff] }
 0x12d   : > { %v3349_v42 = vpop.permute.xlu1 %888  ;;  %v3351_v45 = vpop.permute.xlu0 %894 }
 0x12e   : > { %4144 = vst [vmem:[#allocation50_spill] sm:$0xff] %v3351_v45  ;;  %v294_v45 = vld [vmem:[#allocation2 + $0x8] sm:$0xff] }
 0x12f   : > { %1148 = vrot.lane.b32.xlu1 %v2976_v13, %s2702_s14  ;;  %1402 = vrot.lane.b32.xlu0 %v2898_v44, %s2704_s20  ;;  %v1607_v33 = vsel %vm182_vm0, %v294_v45, %v3010_v34 }
 0x130   : > { %v1640_v30 = vsel %vm1638_vm3, %v1607_v33, %v3193_v26 }
 0x131   : > { %v3357_v32 = vpop.permute.xlu1 %892  ;;  %v999_v18 = vpop.permute.xlu0 %998 }
 0x132   : > { %4145 = vst [vmem:[#allocation51_spill] sm:$0xff] %v3357_v32 }
 0x133   : > { %1276 = vrot.lane.b32.xlu1 %v3128_v37, %s2703_s16  ;;  %1404 = vrot.lane.b32.xlu0 %v2908_v47, %s2704_s20 }
 0x135   : > { %v3363_v7 = vpop.permute.xlu1 %896  ;;  %v1127_v23 = vpop.permute.xlu0 %1126 }
 0x136   : > { %4146 = vst [vmem:[#allocation52_spill] sm:$0xff] %v3363_v7  ;;  %v293_v7 = vld [vmem:[#allocation2] sm:$0xff] }
 0x137   : > { %1022 = vrot.lane.b32.xlu1 %v433_v10, %s2701_s7  ;;  %1024 = vrot.lane.b32.xlu0 %v2908_v47, %s2701_s7  ;;  %v1606_v10 = vsel %vm182_vm0, %v293_v7, %v3006_v28  ;;  %v1673_v28 = vsel %vm1671_vm4, %v1640_v30, %v873_v41 }
 0x138   : > { %v1639_v32 = vsel %vm1638_vm3, %v1606_v10, %v3179_v0 }
 0x139   : > { %v1001_v13 = vpop.permute.xlu1 %1000  ;;  %v1255_v44 = vpop.permute.xlu0 %1254  ;;  %v1672_v38 = vsel %vm1671_vm4, %v1639_v32, %v871_v6  ;;  %v530_v32 = vld [vmem:[#allocation2 + $0xc1] sm:$0xff] }
 0x13a   : > { %v1706_v7 = vsel %vm1704_vm5, %v1673_v28, %v1001_v13 }
 0x13b   : > { %1530 = vrot.lane.b32.xlu1 %v2972_v12, %s2705_s22  ;;  %1532 = vrot.lane.b32.xlu0 %v2984_v15, %s2705_s22 }
 0x13d   : > { %v1129_v37 = vpop.permute.xlu1 %1128  ;;  %v1383_v21 = vpop.permute.xlu0 %1382 }
 0x13e   : > { %v1739_v45 = vsel %vm1737_vm6, %v1706_v7, %v1129_v37  ;;  %v531_v37 = vld [vmem:[#allocation2 + $0xc9] sm:$0xff]  ;;  %v1609_v7 = vsel %vm182_vm0, %v3040_v56, %v3020_v48 }
 0x13f   : > { %1150 = vrot.lane.b32.xlu1 %v2972_v12, %s2702_s14  ;;  %1278 = vrot.lane.b32.xlu0 %v3374_v51, %s2703_s16  ;;  %v3384_v12 = vld [vmem:[#allocation2 + $0xc8] sm:$0xff] }
 0x141   : > { %v1257_v47 = vpop.permute.xlu1 %1256  ;;  %v1385_v24 = vpop.permute.xlu0 %1384 }
 0x142   : > { %v1772_v30 = vsel %vm1770_vm7, %v1739_v45, %v1257_v47 }
 0x143   : > { %1152 = vrot.lane.b32.xlu1 %v2984_v15, %s2702_s14  ;;  %1280 = vrot.lane.b32.xlu0 %v3384_v12, %s2703_s16  ;;  %v1705_v15 = vsel %vm1704_vm5, %v1672_v38, %v999_v18  ;;  %v1805_v41 = vsel %vm1803_vm8, %v1772_v30, %v1385_v24  ;;  %v1608_v24 = vsel %vm182_vm0, %v3025_v50, %v3014_v36 }
 0x144   : > { %v1738_v0 = vsel %vm1737_vm6, %v1705_v15, %v1127_v23  ;;  %v1641_v15 = vsel %vm1638_vm3, %v1608_v24, %v3187_v63  ;;  %v1642_v36 = vsel %vm1638_vm3, %v1609_v7, %v3201_v3  ;;  %v3444_v3 = vld [vmem:[#allocation2 + $0xe0] sm:$0xff] }
 0x145   : > { %v1003_v34 = vpop.permute.xlu1 %1002  ;;  %v1005_v33 = vpop.permute.xlu0 %1004  ;;  %v1771_v26 = vsel %vm1770_vm7, %v1738_v0, %v1255_v44  ;;  %v1674_v0 = vsel %vm1671_vm4, %v1641_v15, %v3313_v43  ;;  %v1675_v63 = vsel %vm1671_vm4, %v1642_v36, %v3325_v8 }
 0x146   : > { %v1804_v18 = vsel %vm1803_vm8, %v1771_v26, %v1383_v21  ;;  %v3430_v26 = vld [vmem:[#allocation2 + $0xd8] sm:$0xff]  ;;  %v1707_v50 = vsel %vm1704_vm5, %v1674_v0, %v1003_v34  ;;  %v1708_v56 = vsel %vm1704_vm5, %v1675_v63, %v1005_v33 }
 0x147   : > { %898 = vrot.lane.b32.xlu1 %v3374_v51, %s2700_s21  ;;  %900 = vrot.lane.b32.xlu0 %v3384_v12, %s2700_s21  ;;  %v469_v0 = vld [vmem:[#allocation2 + $0xda] sm:$0xff] }
 0x149   : > { %v1511_v38 = vpop.permute.xlu1 %1510  ;;  %v1513_v6 = vpop.permute.xlu0 %1512 }
 0x14a   : > { %v1837_v23 = vsel %vm1836_vm9, %v1804_v18, %v1511_v38  ;;  %v1838_v13 = vsel %vm1836_vm9, %v1805_v41, %v1513_v6  ;;  %v533_v6 = vld [vmem:[#allocation2 + $0xe1] sm:$0xff] }
 0x14b   : > { %1406 = vrot.lane.b32.xlu1 %v530_v32, %s2704_s20  ;;  %2598 = vmatprep.mubr.msk.f32.mxu0 %vm1878_vm10, %v1837_v23 }
 0x14c   : > { %1408 = vrot.lane.b32.xlu0 %v531_v37, %s2704_s20  ;;  %2599 = vmatmul.mubr.msk.f32.vlgmr.msra.gmra.mrb[0].mxu0 %vm1878_vm10, %v1838_v13 }
 0x14d   : > { %v1131_v21 = vpop.permute.xlu1 %1130  ;;  %v1259_v44 = vpop.permute.xlu0 %1258 }
 0x14e   : > { %v1740_v30 = vsel %vm1737_vm6, %v1707_v50, %v1131_v21 }
 0x14f   : > { %1026 = vrot.lane.b32.xlu1 %v530_v32, %s2701_s7  ;;  %v1773_v34 = vsel %vm1770_vm7, %v1740_v30, %v1259_v44 }
 0x150   : > { %1028 = vrot.lane.b32.xlu0 %v531_v37, %s2701_s7  ;;  %v532_v37 = vld [vmem:[#allocation2 + $0xd9] sm:$0xff] }
 0x151   : > { %v1133_v47 = vpop.permute.xlu1 %1132  ;;  %v1387_v10 = vpop.permute.xlu0 %1386 }
 0x152   : > { %v1806_v32 = vsel %vm1803_vm8, %v1773_v34, %v1387_v10 }
 0x153   : > { %1534 = vrot.lane.b32.xlu1 %v2980_v14, %s2705_s22 }
 0x154   : > { %1536 = vrot.lane.b32.xlu0 %v2992_v17, %s2705_s22 }
 0x155   : > { %v1261_v28 = vpop.permute.xlu1 %1260  ;;  %v1389_v45 = vpop.permute.xlu0 %1388 }
 0x157   : > { %1154 = vrot.lane.b32.xlu1 %v2980_v14, %s2702_s14  ;;  %v1741_v14 = vsel %vm1737_vm6, %v1708_v56, %v1133_v47  ;;  %v1610_v47 = vsel %vm182_vm0, %v3034_v54, %v3016_v39 }
 0x158   : > { %1282 = vrot.lane.b32.xlu0 %v3430_v26, %s2703_s16  ;;  %v1774_v8 = vsel %vm1770_vm7, %v1741_v14, %v1261_v28  ;;  %v1643_v24 = vsel %vm1638_vm3, %v1610_v47, %v3195_v31  ;;  %v1611_v28 = vsel %vm182_vm0, %v3052_v60, %v3029_v52  ;;  %v3498_v14 = vld [vmem:[#allocation2 + $0xf8] sm:$0xff] }
 0x159   : > { %v1007_v48 = vpop.permute.xlu1 %1006  ;;  %v1009_v43 = vpop.permute.xlu0 %1008  ;;  %v1807_v38 = vsel %vm1803_vm8, %v1774_v8, %v1389_v45  ;;  %v1676_v15 = vsel %vm1671_vm4, %v1643_v24, %v3319_v4  ;;  %v1644_v39 = vsel %vm1638_vm3, %v1611_v28, %v3209_v2  ;;  %v3487_v2 = vld [vmem:[#allocation2 + $0xf0] sm:$0xff] }
 0x15a   : > { %v1709_v54 = vsel %vm1704_vm5, %v1676_v15, %v1007_v48  ;;  %v1677_v31 = vsel %vm1671_vm4, %v1644_v39, %v3333_v11  ;;  %v470_v11 = vld [vmem:[#allocation2 + $0xe2] sm:$0xff]  ;;  %v566_v47 = vld [vmem:[#allocation2 + $0xf2] sm:$0xff] }
 0x15b   : > { %1156 = vrot.lane.b32.xlu1 %v2992_v17, %s2702_s14  ;;  %v1710_v60 = vsel %vm1704_vm5, %v1677_v31, %v1009_v43  ;;  %v3543_v31 = vld [vmem:[#allocation2 + $0x108] sm:$0xff] }
 0x15c   : > { %1284 = vrot.lane.b32.xlu0 %v3444_v3, %s2703_s16 }
 0x15d   : > { %v1515_v18 = vpop.permute.xlu1 %1514  ;;  %v1517_v23 = vpop.permute.xlu0 %1516 }
 0x15e   : > { %v1839_v33 = vsel %vm1836_vm9, %v1806_v32, %v1515_v18  ;;  %v1840_v17 = vsel %vm1836_vm9, %v1807_v38, %v1517_v23  ;;  %v534_v32 = vld [vmem:[#allocation2 + $0xf1] sm:$0xff]  ;;  %v535_v38 = vld [vmem:[#allocation2 + $0xf9] sm:$0xff] }
 0x15f   : > { %902 = vrot.lane.b32.xlu1 %v3430_v26, %s2700_s21  ;;  %2601 = vmatprep.mubr.msk.f32.mxu0 %vm1878_vm10, %v1839_v33  ;;  %v258_v18 = vld [vmem:[%s2792_s18 + $0xf0] sm:$0xff] }
 0x160   : > { %904 = vrot.lane.b32.xlu0 %v3444_v3, %s2700_s21  ;;  %2602 = vmatmul.mubr.msk.f32.gmra.mrb[2].mxu0 %vm1878_vm10, %v1840_v17  ;;  %291 = vst.msk [vmem:[#allocation2 + $0x181] sm:$0xff] %vm182_vm0, %v258_v18  ;;  %v259_v17 = vld [vmem:[%s2792_s18 + $0xf8] sm:$0xff]  ;;  %v568_v18 = vld [vmem:[#allocation2 + $0x10a] sm:$0xff] }
 0x161   : > { %v1135_v41 = vpop.permute.xlu1 %1134  ;;  %v1263_v13 = vpop.permute.xlu0 %1262  ;;  %292 = vst.msk [vmem:[#allocation2 + $0x189] sm:$0xff] %vm182_vm0, %v259_v17 }
 0x162   : > { %v1742_v45 = vsel %vm1737_vm6, %v1709_v54, %v1135_v41 }
 0x163   : > { %1410 = vrot.lane.b32.xlu1 %v532_v37, %s2704_s20  ;;  %v1775_v36 = vsel %vm1770_vm7, %v1742_v45, %v1263_v13  ;;  %v1613_v13 = vsel %vm182_vm0, %v3064_v1, %v3038_v55 }
 0x164   : > { %1412 = vrot.lane.b32.xlu0 %v533_v6, %s2704_s20 }
 0x165   : > { %v1137_v21 = vpop.permute.xlu1 %1136  ;;  %v1391_v44 = vpop.permute.xlu0 %1390 }
 0x166   : > { %v1743_v4 = vsel %vm1737_vm6, %v1710_v60, %v1137_v21  ;;  %v1808_v63 = vsel %vm1803_vm8, %v1775_v36, %v1391_v44 }
 0x167   : > { %1030 = vrot.lane.b32.xlu1 %v532_v37, %s2701_s7  ;;  %v1612_v37 = vsel %vm182_vm0, %v3046_v58, %v3022_v49  ;;  %v1646_v49 = vsel %vm1638_vm3, %v1613_v13, %v3217_v5 }
 0x168   : > { %1032 = vrot.lane.b32.xlu0 %v533_v6, %s2701_s7  ;;  %v1645_v6 = vsel %vm1638_vm3, %v1612_v37, %v3203_v35 }
 0x169   : > { %v1265_v10 = vpop.permute.xlu1 %1264  ;;  %v1393_v7 = vpop.permute.xlu0 %1392  ;;  %v1678_v21 = vsel %vm1671_vm4, %v1645_v6, %v3327_v40  ;;  %v567_v40 = vld [vmem:[#allocation2 + $0xfa] sm:$0xff] }
 0x16a   : > { %v1776_v50 = vsel %vm1770_vm7, %v1743_v4, %v1265_v10  ;;  %v1679_v10 = vsel %vm1671_vm4, %v1646_v49, %v3341_v9  ;;  %v3550_v4 = vld [vmem:[#allocation2 + $0x110] sm:$0xff] }
 0x16b   : > { %1538 = vrot.lane.b32.xlu1 %v2988_v16, %s2705_s22  ;;  %v1809_v48 = vsel %vm1803_vm8, %v1776_v50, %v1393_v7  ;;  %v536_v50 = vld [vmem:[#allocation2 + $0x109] sm:$0xff] }
 0x16c   : > { %1540 = vrot.lane.b32.xlu0 %v2998_v19, %s2705_s22 }
 0x16d   : > { %v1011_v52 = vpop.permute.xlu1 %1010  ;;  %v1013_v16 = vpop.permute.xlu0 %1012 }
 0x16e   : > { %v1711_v58 = vsel %vm1704_vm5, %v1678_v21, %v1011_v52  ;;  %v1712_v1 = vsel %vm1704_vm5, %v1679_v10, %v1013_v16  ;;  %v3591_v21 = vld [vmem:[#allocation2 + $0x120] sm:$0xff] }
 0x16f   : > { %1158 = vrot.lane.b32.xlu1 %v469_v0, %s2702_s14 }
 0x170   : > { %1286 = vrot.lane.b32.xlu0 %v3487_v2, %s2703_s16 }
 0x171   : > { %v1519_v19 = vpop.permute.xlu1 %1518  ;;  %v1521_v56 = vpop.permute.xlu0 %1520 }
 0x172   : > { %v1841_v30 = vsel %vm1836_vm9, %v1808_v63, %v1519_v19  ;;  %v1842_v43 = vsel %vm1836_vm9, %v1809_v48, %v1521_v56  ;;  %v1615_v48 = vsel %vm182_vm0, %v3076_v22, %v3050_v59 }
 0x173   : > { %1160 = vrot.lane.b32.xlu1 %v470_v11, %s2702_s14  ;;  %2604 = vmatprep.mubr.msk.f32.mxu0 %vm1878_vm10, %v1841_v30  ;;  %v1614_v11 = vsel %vm182_vm0, %v3058_v62, %v3031_v53  ;;  %v537_v30 = vld [vmem:[#allocation2 + $0x111] sm:$0xff]  ;;  %v1648_v53 = vsel %vm1638_vm3, %v1615_v48, %v3225_v27 }
 0x174   : > { %1288 = vrot.lane.b32.xlu0 %v3498_v14, %s2703_s16  ;;  %2605 = vmatmul.mubr.msk.f32.gmra.mrb[4].mxu0 %vm1878_vm10, %v1842_v43  ;;  %v1647_v19 = vsel %vm1638_vm3, %v1614_v11, %v3211_v25 }
 0x175   : > { %v1139_v34 = vpop.permute.xlu1 %1138  ;;  %v1267_v8 = vpop.permute.xlu0 %1266  ;;  %v1680_v56 = vsel %vm1671_vm4, %v1647_v19, %v3335_v61 }
 0x176   : > { %v1744_v35 = vsel %vm1737_vm6, %v1711_v58, %v1139_v34  ;;  %v1681_v34 = vsel %vm1671_vm4, %v1648_v53, %v3349_v42  ;;  %v3596_v58 = vld [vmem:[#allocation2 + $0x128] sm:$0xff] }
 0x177   : > { %906 = vrot.lane.b32.xlu1 %v3487_v2, %s2700_s21  ;;  %v1777_v5 = vsel %vm1770_vm7, %v1744_v35, %v1267_v8 }
 0x178   : > { %908 = vrot.lane.b32.xlu0 %v3498_v14, %s2700_s21 }
 0x179   : > { %v1141_v33 = vpop.permute.xlu1 %1140  ;;  %v1395_v23 = vpop.permute.xlu0 %1394 }
 0x17a   : > { %v1745_v24 = vsel %vm1737_vm6, %v1712_v1, %v1141_v33  ;;  %v1810_v7 = vsel %vm1803_vm8, %v1777_v5, %v1395_v23  ;;  %v569_v23 = vld [vmem:[#allocation2 + $0x112] sm:$0xff]  ;;  %v4149_v5 = vld [vmem:[#allocation29_spill] sm:$0xff] }
 0x17b   : > { %1414 = vrot.lane.b32.xlu1 %v534_v32, %s2704_s20 }
 0x17c   : > { %1416 = vrot.lane.b32.xlu0 %v535_v38, %s2704_s20 }
 0x17d   : > { %v1269_v41 = vpop.permute.xlu1 %1268  ;;  %v1397_v44 = vpop.permute.xlu0 %1396 }
 0x17e   : > { %v1778_v15 = vsel %vm1770_vm7, %v1745_v24, %v1269_v41 }
 0x17f   : > { %1034 = vrot.lane.b32.xlu1 %v534_v32, %s2701_s7  ;;  %v1811_v54 = vsel %vm1803_vm8, %v1778_v15, %v1397_v44  ;;  %v538_v15 = vld [vmem:[#allocation2 + $0x121] sm:$0xff] }
 0x180   : > { %1036 = vrot.lane.b32.xlu0 %v535_v38, %s2701_s7 }
 0x181   : > { %v1015_v55 = vpop.permute.xlu1 %1014  ;;  %v1017_v28 = vpop.permute.xlu0 %1016 }
 0x182   : > { %v1713_v62 = vsel %vm1704_vm5, %v1680_v56, %v1015_v55  ;;  %v1714_v59 = vsel %vm1704_vm5, %v1681_v34, %v1017_v28  ;;  %v4147_v55 = vld [vmem:[#allocation4_spill] sm:$0xff]  ;;  %v571_v56 = vld [vmem:[#allocation2 + $0x12a] sm:$0xff] }
 0x183   : > { %1542 = vrot.lane.b32.xlu1 %v566_v47, %s2705_s22  ;;  %v1617_v1 = vsel %vm182_vm0, %v3094_v46, %v4147_v55 }
 0x184   : > { %1544 = vrot.lane.b32.xlu0 %v567_v40, %s2705_s22 }
 0x185   : > { %v1523_v9 = vpop.permute.xlu1 %1522  ;;  %v1525_v0 = vpop.permute.xlu0 %1524 }
 0x186   : > { %v1843_v39 = vsel %vm1836_vm9, %v1810_v7, %v1523_v9  ;;  %v1844_v45 = vsel %vm1836_vm9, %v1811_v54, %v1525_v0  ;;  %v4150_v7 = vld [vmem:[#allocation51_spill] sm:$0xff] }
 0x187   : > { %1162 = vrot.lane.b32.xlu1 %v566_v47, %s2702_s14  ;;  %2607 = vmatprep.mubr.msk.f32.mxu0 %vm1878_vm10, %v1843_v39  ;;  %v1616_v47 = vsel %vm182_vm0, %v3070_v20, %v3042_v57  ;;  %v1650_v57 = vsel %vm1638_vm3, %v1617_v1, %v4149_v5  ;;  %v539_v54 = vld [vmem:[#allocation2 + $0x129] sm:$0xff] }
 0x188   : > { %1290 = vrot.lane.b32.xlu0 %v3543_v31, %s2703_s16  ;;  %2608 = vmatmul.mubr.msk.f32.gmra.mrb[6].mxu0 %vm1878_vm10, %v1844_v45  ;;  %v1649_v35 = vsel %vm1638_vm3, %v1616_v47, %v3219_v29  ;;  %v1683_v29 = vsel %vm1671_vm4, %v1650_v57, %v4150_v7  ;;  %v4158_v47 = vld [vmem:[#allocation52_spill] sm:$0xff] }
 0x189   : > { %v1143_v52 = vpop.permute.xlu1 %1142  ;;  %v1271_v60 = vpop.permute.xlu0 %1270 }
 0x18a   : > { %v1746_v25 = vsel %vm1737_vm6, %v1713_v62, %v1143_v52  ;;  %v508_v62 = vld [vmem:[#allocation2 + $0x138] sm:$0xff] }
 0x18b   : > { %1164 = vrot.lane.b32.xlu1 %v567_v40, %s2702_s14  ;;  %v1779_v32 = vsel %vm1770_vm7, %v1746_v25, %v1271_v60  ;;  %v4148_v40 = vld [vmem:[#allocation49_spill] sm:$0xff] }
 0x18c   : > { %1292 = vrot.lane.b32.xlu0 %v3550_v4, %s2703_s16  ;;  %v1682_v24 = vsel %vm1671_vm4, %v1649_v35, %v4148_v40  ;;  %v541_v40 = vld [vmem:[#allocation2 + $0x141] sm:$0xff] }
 0x18d   : > { %v1145_v16 = vpop.permute.xlu1 %1144  ;;  %v1399_v36 = vpop.permute.xlu0 %1398 }
 0x18e   : > { %v1747_v22 = vsel %vm1737_vm6, %v1714_v59, %v1145_v16  ;;  %v1812_v33 = vsel %vm1803_vm8, %v1779_v32, %v1399_v36 }
 0x18f   : > { %910 = vrot.lane.b32.xlu1 %v3543_v31, %s2700_s21 }
 0x190   : > { %912 = vrot.lane.b32.xlu0 %v3550_v4, %s2700_s21 }
 0x191   : > { %v1273_v63 = vpop.permute.xlu1 %1272  ;;  %v1401_v43 = vpop.permute.xlu0 %1400 }
 0x192   : > { %v1780_v27 = vsel %vm1770_vm7, %v1747_v22, %v1273_v63  ;;  %v4151_v22 = vld [vmem:[#allocation3_spill] sm:$0xff] }
 0x193   : > { %1418 = vrot.lane.b32.xlu1 %v536_v50, %s2704_s20  ;;  %v1813_v17 = vsel %vm1803_vm8, %v1780_v27, %v1401_v43 }
 0x194   : > { %1420 = vrot.lane.b32.xlu0 %v537_v30, %s2704_s20 }
 0x195   : > { %v1019_v8 = vpop.permute.xlu1 %1018  ;;  %v1021_v61 = vpop.permute.xlu0 %1020 }
 0x196   : > { %v1715_v20 = vsel %vm1704_vm5, %v1682_v24, %v1019_v8  ;;  %v1716_v39 = vsel %vm1704_vm5, %v1683_v29, %v1021_v61  ;;  %v509_v8 = vld [vmem:[#allocation2 + $0x140] sm:$0xff]  ;;  %v4152_v61 = vld [vmem:[#allocation8_spill] sm:$0xff] }
 0x197   : > { %1038 = vrot.lane.b32.xlu1 %v536_v50, %s2701_s7  ;;  %v1618_v32 = vsel %vm182_vm0, %v4152_v61, %v4151_v22  ;;  %v4164_v61 = vld [vmem:[#allocation33_spill] sm:$0xff] }
 0x198   : > { %1040 = vrot.lane.b32.xlu0 %v537_v30, %s2701_s7  ;;  %v570_v30 = vld [vmem:[#allocation2 + $0x122] sm:$0xff] }
 0x199   : > { %v1527_v42 = vpop.permute.xlu1 %1526  ;;  %v1529_v37 = vpop.permute.xlu0 %1528 }
 0x19a   : > { %v1845_v38 = vsel %vm1836_vm9, %v1812_v33, %v1527_v42  ;;  %v1846_v41 = vsel %vm1836_vm9, %v1813_v17, %v1529_v37  ;;  %v4154_v42 = vld [vmem:[#allocation6_spill] sm:$0xff] }
 0x19b   : > { %1546 = vrot.lane.b32.xlu1 %v568_v18, %s2705_s22  ;;  %2610 = vmatprep.mubr.msk.f32.mxu0 %vm1878_vm10, %v1845_v38  ;;  %v4155_v38 = vld [vmem:[#allocation13_spill] sm:$0xff]  ;;  %v4156_v17 = vld [vmem:[#allocation50_spill] sm:$0xff] }
 0x19c   : > { %1548 = vrot.lane.b32.xlu0 %v569_v23, %s2705_s22  ;;  %2611 = vmatmul.mubr.msk.f32.gmra.mrb[8].mxu0 %vm1878_vm10, %v1846_v41 }
 0x19d   : > { %v1147_v6 = vpop.permute.xlu1 %1146  ;;  %v1275_v13 = vpop.permute.xlu0 %1274 }
 0x19e   : > { %v1748_v9 = vsel %vm1737_vm6, %v1715_v20, %v1147_v6  ;;  %v4157_v6 = vld [vmem:[#allocation31_spill] sm:$0xff] }
 0x19f   : > { %1166 = vrot.lane.b32.xlu1 %v568_v18, %s2702_s14  ;;  %v1781_v52 = vsel %vm1770_vm7, %v1748_v9, %v1275_v13  ;;  %v4153_v18 = vld [vmem:[#allocation28_spill] sm:$0xff] }
 0x1a0   : > { %1294 = vrot.lane.b32.xlu0 %v3591_v21, %s2703_s16  ;;  %v1651_v33 = vsel %vm1638_vm3, %v1618_v32, %v4153_v18  ;;  %v542_v18 = vld [vmem:[#allocation2 + $0x151] sm:$0xff] }
 0x1a1   : > { %v1149_v44 = vpop.permute.xlu1 %1148  ;;  %v1403_v49 = vpop.permute.xlu0 %1402  ;;  %v1684_v37 = vsel %vm1671_vm4, %v1651_v33, %v4156_v17  ;;  %v543_v17 = vld [vmem:[#allocation2 + $0x159] sm:$0xff] }
 0x1a2   : > { %v1749_v0 = vsel %vm1737_vm6, %v1716_v39, %v1149_v44  ;;  %v1814_v16 = vsel %vm1803_vm8, %v1781_v52, %v1403_v49  ;;  %v540_v49 = vld [vmem:[#allocation2 + $0x139] sm:$0xff] }
 0x1a3   : > { %1168 = vrot.lane.b32.xlu1 %v569_v23, %s2702_s14  ;;  %v1619_v23 = vsel %vm182_vm0, %v4155_v38, %v4154_v42  ;;  %v572_v39 = vld [vmem:[#allocation2 + $0x13a] sm:$0xff] }
 0x1a4   : > { %1296 = vrot.lane.b32.xlu0 %v3596_v58, %s2703_s16  ;;  %v1652_v13 = vsel %vm1638_vm3, %v1619_v23, %v4157_v6 }
 0x1a5   : > { %v1277_v10 = vpop.permute.xlu1 %1276  ;;  %v1405_v28 = vpop.permute.xlu0 %1404 }
 0x1a6   : > { %v1782_v60 = vsel %vm1770_vm7, %v1749_v0, %v1277_v10  ;;  %v1685_v10 = vsel %vm1671_vm4, %v1652_v13, %v4158_v47  ;;  %v573_v0 = vld [vmem:[#allocation2 + $0x142] sm:$0xff] }
 0x1a7   : > { %914 = vrot.lane.b32.xlu1 %v3591_v21, %s2700_s21  ;;  %v1815_v11 = vsel %vm1803_vm8, %v1782_v60, %v1405_v28  ;;  %v510_v60 = vld [vmem:[#allocation2 + $0x150] sm:$0xff] }
 0x1a8   : > { %916 = vrot.lane.b32.xlu0 %v3596_v58, %s2700_s21 }
 0x1a9   : > { %v1023_v46 = vpop.permute.xlu1 %1022  ;;  %v1025_v45 = vpop.permute.xlu0 %1024 }
 0x1aa   : > { %v1717_v44 = vsel %vm1704_vm5, %v1684_v37, %v1023_v46  ;;  %v1718_v1 = vsel %vm1704_vm5, %v1685_v10, %v1025_v45 }
 0x1ab   : > { %1422 = vrot.lane.b32.xlu1 %v538_v15, %s2704_s20 }
 0x1ac   : > { %1424 = vrot.lane.b32.xlu0 %v539_v54, %s2704_s20 }
 0x1ad   : > { %v1531_v36 = vpop.permute.xlu1 %1530  ;;  %v1533_v63 = vpop.permute.xlu0 %1532 }
 0x1ae   : > { %v1847_v50 = vsel %vm1836_vm9, %v1814_v16, %v1531_v36  ;;  %v1848_v19 = vsel %vm1836_vm9, %v1815_v11, %v1533_v63  ;;  %v4159_v63 = vld [vmem:[#allocation5_spill] sm:$0xff] }
 0x1af   : > { %1042 = vrot.lane.b32.xlu1 %v538_v15, %s2701_s7  ;;  %2613 = vmatprep.mubr.msk.f32.mxu0 %vm1878_vm10, %v1847_v50  ;;  %v511_v50 = vld [vmem:[#allocation2 + $0x158] sm:$0xff] }
 0x1b0   : > { %1044 = vrot.lane.b32.xlu0 %v539_v54, %s2701_s7  ;;  %2614 = vmatmul.mubr.msk.f32.gmra.mrb[10].mxu0 %vm1878_vm10, %v1848_v19  ;;  %v4160_v19 = vld [vmem:[#allocation11_spill] sm:$0xff] }
 0x1b1   : > { %v1151_v48 = vpop.permute.xlu1 %1150  ;;  %v1279_v43 = vpop.permute.xlu0 %1278 }
 0x1b2   : > { %v1750_v35 = vsel %vm1737_vm6, %v1717_v44, %v1151_v48 }
 0x1b3   : > { %1550 = vrot.lane.b32.xlu1 %v570_v30, %s2705_s22  ;;  %v1783_v5 = vsel %vm1770_vm7, %v1750_v35, %v1279_v43  ;;  %v574_v35 = vld [vmem:[#allocation2 + $0x152] sm:$0xff] }
 0x1b4   : > { %1552 = vrot.lane.b32.xlu0 %v571_v56, %s2705_s22 }
 0x1b5   : > { %v1153_v53 = vpop.permute.xlu1 %1152  ;;  %v1281_v34 = vpop.permute.xlu0 %1280 }
 0x1b6   : > { %v1751_v24 = vsel %vm1737_vm6, %v1718_v1, %v1153_v53  ;;  %v4162_v53 = vld [vmem:[#allocation9_spill] sm:$0xff] }
 0x1b7   : > { %1170 = vrot.lane.b32.xlu1 %v570_v30, %s2702_s14  ;;  %v1784_v15 = vsel %vm1770_vm7, %v1751_v24, %v1281_v34  ;;  %v1620_v30 = vsel %vm182_vm0, %v4160_v19, %v4159_v63  ;;  %v575_v1 = vld [vmem:[#allocation2 + $0x15a] sm:$0xff] }
 0x1b8   : > { %1298 = vrot.lane.b32.xlu0 %v508_v62, %s2703_s16 }
 0x1b9   : > { %v899_v25 = vpop.permute.xlu1 %898  ;;  %v901_v59 = vpop.permute.xlu0 %900 }
 0x1bb   : > { %1172 = vrot.lane.b32.xlu1 %v571_v56, %s2702_s14  ;;  %v4161_v56 = vld [vmem:[#allocation30_spill] sm:$0xff] }
 0x1bc   : > { %1300 = vrot.lane.b32.xlu0 %v509_v8, %s2703_s16  ;;  %v1653_v43 = vsel %vm1638_vm3, %v1620_v30, %v4161_v56 }
 0x1bd   : > { %v1407_v27 = vpop.permute.xlu1 %1406 }
 0x1be   : > { %v1409_v41 = vpop.permute.xlu0 %1408  ;;  %v1816_v57 = vsel %vm1803_vm8, %v1783_v5, %v1407_v27 }
 0x1bf   : > { %918 = vrot.lane.b32.xlu1 %v508_v62, %s2700_s21  ;;  %v1817_v29 = vsel %vm1803_vm8, %v1784_v15, %v1409_v41  ;;  %v4163_v62 = vld [vmem:[#allocation16_spill] sm:$0xff] }
 0x1c0   : > { %920 = vrot.lane.b32.xlu0 %v509_v8, %s2700_s21  ;;  %v1621_v34 = vsel %vm182_vm0, %v4163_v62, %v4162_v53  ;;  %v1686_v8 = vsel %vm1671_vm4, %v1653_v43, %v899_v25 }
 0x1c1   : > { %v1027_v55 = vpop.permute.xlu1 %1026  ;;  %v1654_v32 = vsel %vm1638_vm3, %v1621_v34, %v4164_v61 }
 0x1c2   : > { %v1029_v28 = vpop.permute.xlu0 %1028  ;;  %v1719_v27 = vsel %vm1704_vm5, %v1686_v8, %v1027_v55  ;;  %v1687_v33 = vsel %vm1671_vm4, %v1654_v32, %v901_v59  ;;  %v576_v32 = vld [vmem:[#allocation2 + $0x16a] sm:$0xff] }
 0x1c3   : > { %1426 = vrot.lane.b32.xlu1 %v540_v49, %s2704_s20  ;;  %v1720_v23 = vsel %vm1704_vm5, %v1687_v33, %v1029_v28  ;;  %v512_v28 = vld [vmem:[#allocation2 + $0x168] sm:$0xff] }
 0x1c4   : > { %1428 = vrot.lane.b32.xlu0 %v541_v40, %s2704_s20 }
 0x1c5   : > { %v1535_v20 = vpop.permute.xlu1 %1534 }
 0x1c6   : > { %v1849_v7 = vsel %vm1836_vm9, %v1816_v57, %v1535_v20  ;;  %v1537_v9 = vpop.permute.xlu0 %1536  ;;  %v513_v20 = vld [vmem:[#allocation2 + $0x170] sm:$0xff] }
 0x1c7   : > { %1046 = vrot.lane.b32.xlu1 %v540_v49, %s2701_s7  ;;  %2616 = vmatprep.mubr.msk.f32.mxu0 %vm1878_vm10, %v1849_v7  ;;  %v1850_v46 = vsel %vm1836_vm9, %v1817_v29, %v1537_v9  ;;  %v4165_v7 = vld [vmem:[#allocation7_spill] sm:$0xff] }
 0x1c8   : > { %1048 = vrot.lane.b32.xlu0 %v541_v40, %s2701_s7  ;;  %2617 = vmatmul.mubr.msk.f32.gmra.mrb[12].mxu0 %vm1878_vm10, %v1850_v46  ;;  %v1622_v29 = vsel %vm182_vm0, %v3374_v51, %v4165_v7  ;;  %v4166_v46 = vld [vmem:[#allocation32_spill] sm:$0xff] }
 0x1c9   : > { %v1155_v54 = vpop.permute.xlu1 %1154 }
 0x1ca   : > { %v1283_v45 = vpop.permute.xlu0 %1282  ;;  %v1752_v42 = vsel %vm1737_vm6, %v1719_v27, %v1155_v54  ;;  %v4167_v54 = vld [vmem:[#allocation12_spill] sm:$0xff] }
 0x1cb   : > { %1554 = vrot.lane.b32.xlu1 %v572_v39, %s2705_s22  ;;  %v1785_v41 = vsel %vm1770_vm7, %v1752_v42, %v1283_v45 }
 0x1cc   : > { %1556 = vrot.lane.b32.xlu0 %v573_v0, %s2705_s22 }
 0x1cd   : > { %v1157_v52 = vpop.permute.xlu1 %1156 }
 0x1ce   : > { %v1285_v16 = vpop.permute.xlu0 %1284  ;;  %v1753_v25 = vsel %vm1737_vm6, %v1720_v23, %v1157_v52 }
 0x1cf   : > { %1174 = vrot.lane.b32.xlu1 %v572_v39, %s2702_s14  ;;  %v1786_v13 = vsel %vm1770_vm7, %v1753_v25, %v1285_v16  ;;  %v1655_v39 = vsel %vm1638_vm3, %v1622_v29, %v4166_v46  ;;  %v515_v25 = vld [vmem:[#allocation2 + $0x188] sm:$0xff] }
 0x1d0   : > { %1302 = vrot.lane.b32.xlu0 %v510_v60, %s2703_s16 }
 0x1d1   : > { %v903_v36 = vpop.permute.xlu1 %902 }
 0x1d2   : > { %v905_v11 = vpop.permute.xlu0 %904  ;;  %v1688_v45 = vsel %vm1671_vm4, %v1655_v39, %v903_v36 }
 0x1d3   : > { %1176 = vrot.lane.b32.xlu1 %v573_v0, %s2702_s14  ;;  %v1623_v0 = vsel %vm182_vm0, %v3384_v12, %v4167_v54 }
 0x1d4   : > { %1304 = vrot.lane.b32.xlu0 %v511_v50, %s2703_s16 }
 0x1d5   : > { %v1411_v48 = vpop.permute.xlu1 %1410 }
 0x1d6   : > { %v1413_v22 = vpop.permute.xlu0 %1412  ;;  %v1818_v6 = vsel %vm1803_vm8, %v1785_v41, %v1411_v48  ;;  %v545_v48 = vld [vmem:[#allocation2 + $0x171] sm:$0xff]  ;;  %v4169_v41 = vld [vmem:[#allocation10_spill] sm:$0xff] }
 0x1d7   : > { %922 = vrot.lane.b32.xlu1 %v510_v60, %s2700_s21  ;;  %v1819_v49 = vsel %vm1803_vm8, %v1786_v13, %v1413_v22  ;;  %v4168_v60 = vld [vmem:[#allocation35_spill] sm:$0xff]  ;;  %v4170_v13 = vld [vmem:[#allocation34_spill] sm:$0xff] }
 0x1d8   : > { %924 = vrot.lane.b32.xlu0 %v511_v50, %s2700_s21  ;;  %v1656_v16 = vsel %vm1638_vm3, %v1623_v0, %v4168_v60  ;;  %v544_v50 = vld [vmem:[#allocation2 + $0x169] sm:$0xff] }
 0x1d9   : > { %v1031_v38 = vpop.permute.xlu1 %1030  ;;  %v1689_v63 = vsel %vm1671_vm4, %v1656_v16, %v905_v11  ;;  %v579_v16 = vld [vmem:[#allocation2 + $0x18a] sm:$0xff] }
 0x1da   : > { %v1033_v37 = vpop.permute.xlu0 %1032  ;;  %v1721_v51 = vsel %vm1704_vm5, %v1688_v45, %v1031_v38  ;;  %v514_v38 = vld [vmem:[#allocation2 + $0x180] sm:$0xff] }
 0x1db   : > { %1430 = vrot.lane.b32.xlu1 %v542_v18, %s2704_s20  ;;  %v1722_v12 = vsel %vm1704_vm5, %v1689_v63, %v1033_v37  ;;  %v516_v63 = vld [vmem:[#allocation2 + $0x198] sm:$0xff] }
 0x1dc   : > { %1432 = vrot.lane.b32.xlu0 %v543_v17, %s2704_s20 }
 0x1dd   : > { %v1539_v59 = vpop.permute.xlu1 %1538 }
 0x1de   : > { %v1851_v44 = vsel %vm1836_vm9, %v1818_v6, %v1539_v59  ;;  %v1541_v47 = vpop.permute.xlu0 %1540  ;;  %v1624_v6 = vsel %vm182_vm0, %v3430_v26, %v4169_v41 }
 0x1df   : > { %1050 = vrot.lane.b32.xlu1 %v542_v18, %s2701_s7  ;;  %2619 = vmatprep.mubr.msk.f32.mxu0 %vm1878_vm10, %v1851_v44  ;;  %v1852_v10 = vsel %vm1836_vm9, %v1819_v49, %v1541_v47  ;;  %v577_v18 = vld [vmem:[#allocation2 + $0x172] sm:$0xff]  ;;  %v1657_v44 = vsel %vm1638_vm3, %v1624_v6, %v4170_v13 }
 0x1e0   : > { %1052 = vrot.lane.b32.xlu0 %v543_v17, %s2701_s7  ;;  %2620 = vmatmul.mubr.msk.f32.gmra.mrb[14].mxu0 %vm1878_vm10, %v1852_v10  ;;  %v4171_v49 = vld [vmem:[#allocation15_spill] sm:$0xff] }
 0x1e1   : > { %v1159_v55 = vpop.permute.xlu1 %1158  ;;  %v1625_v47 = vsel %vm182_vm0, %v3444_v3, %v4171_v49 }
 0x1e2   : > { %v1287_v40 = vpop.permute.xlu0 %1286  ;;  %v1754_v19 = vsel %vm1737_vm6, %v1721_v51, %v1159_v55  ;;  %v4172_v55 = vld [vmem:[#allocation37_spill] sm:$0xff] }
 0x1e3   : > { %1558 = vrot.lane.b32.xlu1 %v574_v35, %s2705_s22  ;;  %v1787_v43 = vsel %vm1770_vm7, %v1754_v19, %v1287_v40  ;;  %v546_v40 = vld [vmem:[#allocation2 + $0x181] sm:$0xff] }
 0x1e4   : > { %1560 = vrot.lane.b32.xlu0 %v575_v1, %s2705_s22 }
 0x1e5   : > { %v1161_v24 = vpop.permute.xlu1 %1160 }
 0x1e6   : > { %v1289_v5 = vpop.permute.xlu0 %1288  ;;  %v1755_v36 = vsel %vm1737_vm6, %v1722_v12, %v1161_v24  ;;  %v548_v12 = vld [vmem:[#allocation2 + $0x199] sm:$0xff] }
 0x1e7   : > { %1178 = vrot.lane.b32.xlu1 %v574_v35, %s2702_s14  ;;  %v1788_v62 = vsel %vm1770_vm7, %v1755_v36, %v1289_v5  ;;  %v517_v36 = vld [vmem:[#allocation2 + $0x1a0] sm:$0xff] }
 0x1e8   : > { %1306 = vrot.lane.b32.xlu0 %v512_v28, %s2703_s16 }
 0x1e9   : > { %v907_v57 = vpop.permute.xlu1 %906 }
 0x1ea   : > { %v909_v15 = vpop.permute.xlu0 %908  ;;  %v1690_v10 = vsel %vm1671_vm4, %v1657_v44, %v907_v57 }
 0x1eb   : > { %1180 = vrot.lane.b32.xlu1 %v575_v1, %s2702_s14  ;;  %v1658_v1 = vsel %vm1638_vm3, %v1625_v47, %v4172_v55  ;;  %v581_v55 = vld [vmem:[#allocation2 + $0x1a2] sm:$0xff] }
 0x1ec   : > { %1308 = vrot.lane.b32.xlu0 %v513_v20, %s2703_s16  ;;  %v1691_v24 = vsel %vm1671_vm4, %v1658_v1, %v909_v15 }
 0x1ed   : > { %v1415_v9 = vpop.permute.xlu1 %1414 }
 0x1ee   : > { %v1417_v52 = vpop.permute.xlu0 %1416  ;;  %v1820_v53 = vsel %vm1803_vm8, %v1787_v43, %v1415_v9 }
 0x1ef   : > { %926 = vrot.lane.b32.xlu1 %v512_v28, %s2700_s21  ;;  %v1821_v8 = vsel %vm1803_vm8, %v1788_v62, %v1417_v52  ;;  %v578_v52 = vld [vmem:[#allocation2 + $0x182] sm:$0xff] }
 0x1f0   : > { %928 = vrot.lane.b32.xlu0 %v513_v20, %s2700_s21  ;;  %v547_v20 = vld [vmem:[#allocation2 + $0x189] sm:$0xff] }
 0x1f1   : > { %v1035_v30 = vpop.permute.xlu1 %1034 }
 0x1f2   : > { %v1037_v56 = vpop.permute.xlu0 %1036  ;;  %v1723_v26 = vsel %vm1704_vm5, %v1690_v10, %v1035_v30 }
 0x1f3   : > { %1434 = vrot.lane.b32.xlu1 %v544_v50, %s2704_s20  ;;  %v1724_v3 = vsel %vm1704_vm5, %v1691_v24, %v1037_v56  ;;  %v4173_v56 = vld [vmem:[#allocation14_spill] sm:$0xff] }
 0x1f4   : > { %1436 = vrot.lane.b32.xlu0 %v545_v48, %s2704_s20  ;;  %v1626_v43 = vsel %vm182_vm0, %v3487_v2, %v4173_v56 }
 0x1f5   : > { %v1543_v11 = vpop.permute.xlu1 %1542 }
 0x1f6   : > { %v1853_v34 = vsel %vm1836_vm9, %v1820_v53, %v1543_v11  ;;  %v1545_v22 = vpop.permute.xlu0 %1544  ;;  %v4174_v11 = vld [vmem:[#allocation36_spill] sm:$0xff] }
 0x1f7   : > { %1054 = vrot.lane.b32.xlu1 %v544_v50, %s2701_s7  ;;  %2622 = vmatprep.mubr.msk.f32.mxu1 %vm1878_vm10, %v1853_v34  ;;  %v1854_v61 = vsel %vm1836_vm9, %v1821_v8, %v1545_v22  ;;  %v1659_v62 = vsel %vm1638_vm3, %v1626_v43, %v4174_v11  ;;  %v580_v34 = vld [vmem:[#allocation2 + $0x19a] sm:$0xff]  ;;  %v4175_v8 = vld [vmem:[#allocation18_spill] sm:$0xff] }
 0x1f8   : > { %1056 = vrot.lane.b32.xlu0 %v545_v48, %s2701_s7  ;;  %2623 = vmatmul.mubr.msk.f32.vlgmr.msra.gmra.mrb[0].mxu1 %vm1878_vm10, %v1854_v61  ;;  %v1627_v22 = vsel %vm182_vm0, %v3498_v14, %v4175_v8  ;;  %v4180_v43 = vld [vmem:[#allocation41_spill] sm:$0xff] }
 0x1f9   : > { %v1163_v27 = vpop.permute.xlu1 %1162 }
 0x1fa   : > { %v1291_v33 = vpop.permute.xlu0 %1290  ;;  %v1756_v28 = vsel %vm1737_vm6, %v1723_v26, %v1163_v27 }
 0x1fb   : > { %1562 = vrot.lane.b32.xlu1 %v576_v32, %s2705_s22  ;;  %v1789_v29 = vsel %vm1770_vm7, %v1756_v28, %v1291_v33 }
 0x1fc   : > { %1564 = vrot.lane.b32.xlu0 %v577_v18, %s2705_s22 }
 0x1fd   : > { %v1165_v42 = vpop.permute.xlu1 %1164 }
 0x1fe   : > { %v1293_v23 = vpop.permute.xlu0 %1292  ;;  %v1757_v57 = vsel %vm1737_vm6, %v1724_v3, %v1165_v42  ;;  %v549_v42 = vld [vmem:[#allocation2 + $0x1a1] sm:$0xff] }
 0x1ff   : > { %1182 = vrot.lane.b32.xlu1 %v576_v32, %s2702_s14  ;;  %v1790_v46 = vsel %vm1770_vm7, %v1757_v57, %v1293_v23  ;;  %v4176_v32 = vld [vmem:[#allocation39_spill] sm:$0xff] }
 0x200   : > { %1310 = vrot.lane.b32.xlu0 %v514_v38, %s2703_s16  ;;  %v1660_v27 = vsel %vm1638_vm3, %v1627_v22, %v4176_v32 }
 0x201   : > { %v911_v17 = vpop.permute.xlu1 %910 }
 0x202   : > { %v3748_v37 = vpop.permute.xlu0 %912  ;;  %v1692_v2 = vsel %vm1671_vm4, %v1659_v62, %v911_v17 }
 0x203   : > { %1184 = vrot.lane.b32.xlu1 %v577_v18, %s2702_s14 }
 0x204   : > { %1312 = vrot.lane.b32.xlu0 %v515_v25, %s2703_s16 }
 0x205   : > { %v1419_v59 = vpop.permute.xlu1 %1418 }
 0x206   : > { %v1421_v35 = vpop.permute.xlu0 %1420  ;;  %v1822_v9 = vsel %vm1803_vm8, %v1789_v29, %v1419_v59 }
 0x207   : > { %930 = vrot.lane.b32.xlu1 %v514_v38, %s2700_s21  ;;  %v1823_v54 = vsel %vm1803_vm8, %v1790_v46, %v1421_v35  ;;  %v1693_v38 = vsel %vm1671_vm4, %v1660_v27, %v3748_v37 }
 0x208   : > { %932 = vrot.lane.b32.xlu0 %v515_v25, %s2700_s21 }
 0x209   : > { %v1039_v5 = vpop.permute.xlu1 %1038 }
 0x20a   : > { %v1041_v7 = vpop.permute.xlu0 %1040  ;;  %v1725_v18 = vsel %vm1704_vm5, %v1692_v2, %v1039_v5 }
 0x20b   : > { %1438 = vrot.lane.b32.xlu1 %v546_v40, %s2704_s20  ;;  %v1726_v6 = vsel %vm1704_vm5, %v1693_v38, %v1041_v7 }
 0x20c   : > { %1440 = vrot.lane.b32.xlu0 %v547_v20, %s2704_s20 }
 0x20d   : > { %v1547_v15 = vpop.permute.xlu1 %1546 }
 0x20e   : > { %v1855_v39 = vsel %vm1836_vm9, %v1822_v9, %v1547_v15  ;;  %v1549_v0 = vpop.permute.xlu0 %1548 }
 0x20f   : > { %1058 = vrot.lane.b32.xlu1 %v546_v40, %s2701_s7  ;;  %2625 = vmatprep.mubr.msk.f32.mxu1 %vm1878_vm10, %v1855_v39  ;;  %v1856_v45 = vsel %vm1836_vm9, %v1823_v54, %v1549_v0  ;;  %v4177_v54 = vld [vmem:[#allocation17_spill] sm:$0xff] }
 0x210   : > { %1060 = vrot.lane.b32.xlu0 %v547_v20, %s2701_s7  ;;  %2626 = vmatmul.mubr.msk.f32.gmra.mrb[2].mxu1 %vm1878_vm10, %v1856_v45  ;;  %v1628_v0 = vsel %vm182_vm0, %v3543_v31, %v4177_v54 }
 0x211   : > { %v1167_v60 = vpop.permute.xlu1 %1166 }
 0x212   : > { %v1295_v51 = vpop.permute.xlu0 %1294  ;;  %v1758_v23 = vsel %vm1737_vm6, %v1725_v18, %v1167_v60  ;;  %v4178_v60 = vld [vmem:[#allocation38_spill] sm:$0xff] }
 0x213   : > { %1566 = vrot.lane.b32.xlu1 %v578_v52, %s2705_s22  ;;  %v1791_v10 = vsel %vm1770_vm7, %v1758_v23, %v1295_v51 }
 0x214   : > { %1568 = vrot.lane.b32.xlu0 %v579_v16, %s2705_s22 }
 0x215   : > { %v1169_v50 = vpop.permute.xlu1 %1168 }
 0x216   : > { %v1297_v19 = vpop.permute.xlu0 %1296  ;;  %v1759_v37 = vsel %vm1737_vm6, %v1726_v6, %v1169_v50 }
 0x217   : > { %1186 = vrot.lane.b32.xlu1 %v578_v52, %s2702_s14  ;;  %v1792_v24 = vsel %vm1770_vm7, %v1759_v37, %v1297_v19  ;;  %v4179_v19 = vld [vmem:[#allocation20_spill] sm:$0xff] }
 0x218   : > { %1314 = vrot.lane.b32.xlu0 %v516_v63, %s2703_s16 }
 0x219   : > { %v3786_v30 = vpop.permute.xlu1 %914 }
 0x21a   : > { %v3788_v48 = vpop.permute.xlu0 %916 }
 0x21b   : > { %1188 = vrot.lane.b32.xlu1 %v579_v16, %s2702_s14  ;;  %v1661_v16 = vsel %vm1638_vm3, %v1628_v0, %v4178_v60  ;;  %v4184_v60 = vld [vmem:[#allocation43_spill] sm:$0xff] }
 0x21c   : > { %1442 = vrot.lane.b32.xlu0 %v548_v12, %s2704_s20  ;;  %v1629_v12 = vsel %vm182_vm0, %v3550_v4, %v4179_v19  ;;  %v1694_v31 = vsel %vm1671_vm4, %v1661_v16, %v3786_v30 }
 0x21d   : > { %v1423_v53 = vpop.permute.xlu1 %1422 }
 0x21e   : > { %v1425_v61 = vpop.permute.xlu0 %1424  ;;  %v1824_v1 = vsel %vm1803_vm8, %v1791_v10, %v1423_v53  ;;  %v1662_v53 = vsel %vm1638_vm3, %v1629_v12, %v4180_v43 }
 0x21f   : > { %1316 = vrot.lane.b32.xlu1 %v517_v36, %s2703_s16  ;;  %v2600_v33 = vpop.f32.mrb[0].mxu0  ;;  %v1825_v5 = vsel %vm1803_vm8, %v1792_v24, %v1425_v61  ;;  %v1695_v8 = vsel %vm1671_vm4, %v1662_v53, %v3788_v48 }
 0x220   : > { %2202 = vst.msk [vmem:[%s3802_s23 + $0x8] sm:$0xff] %vm2200_vm11, %v2600_v33  ;;  %v2234_v14 = vsel %vm2200_vm11, %v2600_v33, 0.0  ;;  %v2303_v17 = vmul.f32 %v2600_v33, %v2600_v33  ;;  %1570 = vrot.lane.b32.xlu0 %v580_v34, %s2705_s22  ;;  %v2041_v25 = vpop.f32.mrb[1].mxu0 }
 0x221   : > { %v1043_v41 = vpop.permute.xlu1 %1042  ;;  %2201 = vst.msk [vmem:[%s3802_s23] sm:$0xff] %vm2200_vm11, %v2041_v25  ;;  %v2233_v59 = vsel %vm2200_vm11, %v2041_v25, 0.0  ;;  %v2302_v13 = vmul.f32 %v2041_v25, %v2041_v25 }
 0x222   : > { %v2335_v44 = vsel %vm2200_vm11, %v2303_v17, 0.0  ;;  %v2235_v49 = vadd.f32 %v2234_v14, %v2233_v59  ;;  %v1045_v47 = vpop.permute.xlu0 %1044  ;;  %v1727_v11 = vsel %vm1704_vm5, %v1694_v31, %v1043_v41 }
 0x223   : > { %1444 = vrot.lane.b32.xlu1 %v549_v42, %s2704_s20  ;;  %v2334_v35 = vsel %vm2200_vm11, %v2302_v13, 0.0  ;;  %v1728_v30 = vsel %vm1704_vm5, %v1695_v8, %v1045_v47 }
 0x224   : > { %v2336_v26 = vadd.f32 %v2335_v44, %v2334_v35 }
 0x225   : > { %v1551_v40 = vpop.permute.xlu1 %1550 }
 0x226   : > { %v1857_v28 = vsel %vm1836_vm9, %v1824_v1, %v1551_v40  ;;  %v1553_v3 = vpop.permute.xlu0 %1552 }
 0x227   : > { %1572 = vrot.lane.b32.xlu1 %v581_v55, %s2705_s22  ;;  %2628 = vmatprep.mubr.msk.f32.mxu1 %vm1878_vm10, %v1857_v28  ;;  %v1858_v20 = vsel %vm1836_vm9, %v1825_v5, %v1553_v3  ;;  %v4181_v28 = vld [vmem:[#allocation19_spill] sm:$0xff] }
 0x228   : > { %2629 = vmatmul.mubr.msk.f32.gmra.mrb[4].mxu1 %vm1878_vm10, %v1858_v20  ;;  %v1630_v5 = vsel %vm182_vm0, %v3591_v21, %v4181_v28 }
 0x229   : > { %v1171_v57 = vpop.permute.xlu1 %1170 }
 0x22a   : > { %v1299_v7 = vpop.permute.xlu0 %1298  ;;  %v1760_v22 = vsel %vm1737_vm6, %v1727_v11, %v1171_v57 }
 0x22b   : > { %v1793_v42 = vsel %vm1770_vm7, %v1760_v22, %v1299_v7  ;;  %v4182_v7 = vld [vmem:[#allocation40_spill] sm:$0xff] }
 0x22d   : > { %v1173_v29 = vpop.permute.xlu1 %1172 }
 0x22e   : > { %v1301_v9 = vpop.permute.xlu0 %1300  ;;  %v1761_v27 = vsel %vm1737_vm6, %v1728_v30, %v1173_v29  ;;  %v1663_v29 = vsel %vm1638_vm3, %v1630_v5, %v4182_v7 }
 0x22f   : > { %v1794_v48 = vsel %vm1770_vm7, %v1761_v27, %v1301_v9 }
 0x231   : > { %v3836_v15 = vpop.permute.xlu1 %918 }
 0x232   : > { %v3838_v46 = vpop.permute.xlu0 %920  ;;  %v1696_v0 = vsel %vm1671_vm4, %v1663_v29, %v3836_v15 }
 0x233   : > { %v2603_v39 = vpop.f32.mrb[2].mxu0 }
 0x234   : > { %2204 = vst.msk [vmem:[%s3802_s23 + $0x18] sm:$0xff] %vm2200_vm11, %v2603_v39  ;;  %v2051_v52 = vpop.f32.mrb[3].mxu0  ;;  %v2305_v51 = vmul.f32 %v2603_v39, %v2603_v39  ;;  %v2238_v62 = vsel %vm2200_vm11, %v2603_v39, 0.0  ;;  %v4183_v39 = vld [vmem:[#allocation22_spill] sm:$0xff] }
 0x235   : > { %v1427_v45 = vpop.permute.xlu1 %1426  ;;  %2203 = vst.msk [vmem:[%s3802_s23 + $0x10] sm:$0xff] %vm2200_vm11, %v2051_v52  ;;  %v2236_v50 = vsel %vm2200_vm11, %v2051_v52, 0.0  ;;  %v2304_v63 = vmul.f32 %v2051_v52, %v2051_v52  ;;  %v1631_v54 = vsel %vm182_vm0, %v3596_v58, %v4183_v39 }
 0x236   : > { %v2237_v36 = vadd.f32 %v2236_v50, %v2235_v49  ;;  %v1429_v56 = vpop.permute.xlu0 %1428  ;;  %v2339_v32 = vsel %vm2200_vm11, %v2305_v51, 0.0  ;;  %v1826_v38 = vsel %vm1803_vm8, %v1793_v42, %v1427_v45  ;;  %v1664_v21 = vsel %vm1638_vm3, %v1631_v54, %v4184_v60 }
 0x237   : > { %v2337_v34 = vsel %vm2200_vm11, %v2304_v63, 0.0  ;;  %v1827_v17 = vsel %vm1803_vm8, %v1794_v48, %v1429_v56  ;;  %v1697_v51 = vsel %vm1671_vm4, %v1664_v21, %v3838_v46  ;;  %v319_v48 = vld [vmem:[#allocation2 + $0x138] sm:$0xff] }
 0x238   : > { %v2338_v4 = vadd.f32 %v2337_v34, %v2336_v26  ;;  %v2239_v61 = vadd.f32 %v2238_v62, %v2237_v36 }
 0x239   : > { %v1047_v2 = vpop.permute.xlu1 %1046 }
 0x23a   : > { %v1049_v18 = vpop.permute.xlu0 %1048  ;;  %v2340_v33 = vadd.f32 %v2339_v32, %v2338_v4  ;;  %v1729_v16 = vsel %vm1704_vm5, %v1696_v0, %v1047_v2 }
 0x23b   : > { %v1730_v19 = vsel %vm1704_vm5, %v1697_v51, %v1049_v18 }
 0x23d   : > { %v1555_v23 = vpop.permute.xlu1 %1554 }
 0x23e   : > { %v1859_v14 = vsel %vm1836_vm9, %v1826_v38, %v1555_v23  ;;  %v1557_v25 = vpop.permute.xlu0 %1556 }
 0x23f   : > { %2631 = vmatprep.mubr.msk.f32.mxu1 %vm1878_vm10, %v1859_v14  ;;  %v1860_v41 = vsel %vm1836_vm9, %v1827_v17, %v1557_v25 }
 0x240   : > { %2632 = vmatmul.mubr.msk.f32.gmra.mrb[6].mxu1 %vm1878_vm10, %v1860_v41  ;;  %v320_v41 = vld [vmem:[#allocation2 + $0x140] sm:$0xff] }
 0x241   : > { %v1175_v6 = vpop.permute.xlu1 %1174 }
 0x242   : > { %v1303_v59 = vpop.permute.xlu0 %1302  ;;  %v1762_v50 = vsel %vm1737_vm6, %v1729_v16, %v1175_v6  ;;  %v4185_v6 = vld [vmem:[#allocation21_spill] sm:$0xff] }
 0x243   : > { %v1795_v15 = vsel %vm1770_vm7, %v1762_v50, %v1303_v59  ;;  %v1632_v59 = vsel %vm182_vm0, %v319_v48, %v4185_v6 }
 0x245   : > { %v1177_v13 = vpop.permute.xlu1 %1176 }
 0x246   : > { %v1305_v37 = vpop.permute.xlu0 %1304  ;;  %v1763_v58 = vsel %vm1737_vm6, %v1730_v19, %v1177_v13 }
 0x247   : > { %v2606_v44 = vpop.f32.mrb[4].mxu0  ;;  %v1796_v56 = vsel %vm1770_vm7, %v1763_v58, %v1305_v37  ;;  %v4186_v37 = vld [vmem:[#allocation42_spill] sm:$0xff] }
 0x248   : > { %2206 = vst.msk [vmem:[%s3802_s23 + $0x28] sm:$0xff] %vm2200_vm11, %v2606_v44  ;;  %v2061_v47 = vpop.f32.mrb[5].mxu0  ;;  %v2307_v10 = vmul.f32 %v2606_v44, %v2606_v44  ;;  %v2242_v40 = vsel %vm2200_vm11, %v2606_v44, 0.0  ;;  %v1665_v44 = vsel %vm1638_vm3, %v1632_v59, %v4186_v37 }
 0x249   : > { %v3876_v49 = vpop.permute.xlu1 %922  ;;  %2205 = vst.msk [vmem:[%s3802_s23 + $0x20] sm:$0xff] %vm2200_vm11, %v2061_v47  ;;  %v2240_v35 = vsel %vm2200_vm11, %v2061_v47, 0.0  ;;  %v2306_v55 = vmul.f32 %v2061_v47, %v2061_v47  ;;  %v4187_v47 = vld [vmem:[#allocation24_spill] sm:$0xff] }
 0x24a   : > { %v2241_v1 = vadd.f32 %v2240_v35, %v2239_v61  ;;  %v925_v26 = vpop.permute.xlu0 %924  ;;  %v2343_v9 = vsel %vm2200_vm11, %v2307_v10, 0.0  ;;  %v1633_v10 = vsel %vm182_vm0, %v320_v41, %v4187_v47  ;;  %v1698_v35 = vsel %vm1671_vm4, %v1665_v44, %v3876_v49 }
 0x24b   : > { %v2341_v24 = vsel %vm2200_vm11, %v2306_v55, 0.0 }
 0x24c   : > { %v2342_v3 = vadd.f32 %v2341_v24, %v2340_v33  ;;  %v2243_v57 = vadd.f32 %v2242_v40, %v2241_v1  ;;  %v4188_v1 = vld [vmem:[#allocation45_spill] sm:$0xff] }
 0x24d   : > { %v1431_v20 = vpop.permute.xlu1 %1430  ;;  %v1666_v40 = vsel %vm1638_vm3, %v1633_v10, %v4188_v1 }
 0x24e   : > { %v1433_v45 = vpop.permute.xlu0 %1432  ;;  %v2344_v52 = vadd.f32 %v2343_v9, %v2342_v3  ;;  %v1828_v31 = vsel %vm1803_vm8, %v1795_v15, %v1431_v20  ;;  %v1699_v28 = vsel %vm1671_vm4, %v1666_v40, %v925_v26 }
 0x24f   : > { %v1829_v46 = vsel %vm1803_vm8, %v1796_v56, %v1433_v45 }
 0x251   : > { %v1051_v63 = vpop.permute.xlu1 %1050 }
 0x252   : > { %v1053_v12 = vpop.permute.xlu0 %1052  ;;  %v1731_v24 = vsel %vm1704_vm5, %v1698_v35, %v1051_v63 }
 0x253   : > { %v1732_v20 = vsel %vm1704_vm5, %v1699_v28, %v1053_v12 }
 0x255   : > { %v1559_v36 = vpop.permute.xlu1 %1558 }
 0x256   : > { %v1861_v43 = vsel %vm1836_vm9, %v1828_v31, %v1559_v36  ;;  %v1561_v53 = vpop.permute.xlu0 %1560 }
 0x257   : > { %2634 = vmatprep.mubr.msk.f32.mxu1 %vm1878_vm10, %v1861_v43  ;;  %v1862_v11 = vsel %vm1836_vm9, %v1829_v46, %v1561_v53 }
 0x258   : > { %2635 = vmatmul.mubr.msk.f32.gmra.mrb[8].mxu1 %vm1878_vm10, %v1862_v11  ;;  %v321_v11 = vld [vmem:[#allocation2 + $0x150] sm:$0xff] }
 0x259   : > { %v1179_v62 = vpop.permute.xlu1 %1178 }
 0x25a   : > { %v1307_v34 = vpop.permute.xlu0 %1306  ;;  %v1764_v5 = vsel %vm1737_vm6, %v1731_v24, %v1179_v62  ;;  %v322_v62 = vld [vmem:[#allocation2 + $0x158] sm:$0xff] }
 0x25b   : > { %v2609_v8 = vpop.f32.mrb[6].mxu0  ;;  %v1797_v49 = vsel %vm1770_vm7, %v1764_v5, %v1307_v34  ;;  %v323_v5 = vld [vmem:[#allocation2 + $0x168] sm:$0xff] }
 0x25c   : > { %2208 = vst.msk [vmem:[%s3802_s23 + $0x38] sm:$0xff] %vm2200_vm11, %v2609_v8  ;;  %v2071_v4 = vpop.f32.mrb[7].mxu0  ;;  %v2309_v2 = vmul.f32 %v2609_v8, %v2609_v8  ;;  %v2246_v18 = vsel %vm2200_vm11, %v2609_v8, 0.0  ;;  %v4189_v8 = vld [vmem:[#allocation23_spill] sm:$0xff] }
 0x25d   : > { %v1181_v22 = vpop.permute.xlu1 %1180  ;;  %2207 = vst.msk [vmem:[%s3802_s23 + $0x30] sm:$0xff] %vm2200_vm11, %v2071_v4  ;;  %v2244_v61 = vsel %vm2200_vm11, %v2071_v4, 0.0  ;;  %v2308_v30 = vmul.f32 %v2071_v4, %v2071_v4 }
 0x25e   : > { %v2245_v32 = vadd.f32 %v2244_v61, %v2243_v57  ;;  %v1309_v27 = vpop.permute.xlu0 %1308  ;;  %v2347_v14 = vsel %vm2200_vm11, %v2309_v2, 0.0  ;;  %v1765_v57 = vsel %vm1737_vm6, %v1732_v20, %v1181_v22  ;;  %v1634_v22 = vsel %vm182_vm0, %v321_v11, %v4189_v8  ;;  %v4190_v2 = vld [vmem:[#allocation26_spill] sm:$0xff] }
 0x25f   : > { %v2345_v33 = vsel %vm2200_vm11, %v2308_v30, 0.0  ;;  %v1798_v39 = vsel %vm1770_vm7, %v1765_v57, %v1309_v27  ;;  %v1635_v61 = vsel %vm182_vm0, %v322_v62, %v4190_v2  ;;  %v4191_v30 = vld [vmem:[#allocation44_spill] sm:$0xff]  ;;  %v4192_v27 = vld [vmem:[#allocation47_spill] sm:$0xff] }
 0x260   : > { %v2346_v42 = vadd.f32 %v2345_v33, %v2344_v52  ;;  %v2247_v23 = vadd.f32 %v2246_v18, %v2245_v32  ;;  %v1667_v32 = vsel %vm1638_vm3, %v1634_v22, %v4191_v30  ;;  %v1668_v18 = vsel %vm1638_vm3, %v1635_v61, %v4192_v27 }
 0x261   : > { %v927_v38 = vpop.permute.xlu1 %926 }
 0x262   : > { %v929_v17 = vpop.permute.xlu0 %928  ;;  %v2348_v25 = vadd.f32 %v2347_v14, %v2346_v42  ;;  %v1700_v33 = vsel %vm1671_vm4, %v1667_v32, %v927_v38 }
 0x265   : > { %v1435_v13 = vpop.permute.xlu1 %1434 }
 0x266   : > { %v1437_v55 = vpop.permute.xlu0 %1436  ;;  %v1830_v29 = vsel %vm1803_vm8, %v1797_v49, %v1435_v13 }
 0x267   : > { %v1831_v26 = vsel %vm1803_vm8, %v1798_v39, %v1437_v55  ;;  %v4193_v39 = vld [vmem:[#allocation25_spill] sm:$0xff] }
 0x269   : > { %v1055_v3 = vpop.permute.xlu1 %1054 }
 0x26a   : > { %v1057_v7 = vpop.permute.xlu0 %1056  ;;  %v1733_v48 = vsel %vm1704_vm5, %v1700_v33, %v1055_v3 }
 0x26d   : > { %v1563_v9 = vpop.permute.xlu1 %1562 }
 0x26e   : > { %v1863_v54 = vsel %vm1836_vm9, %v1830_v29, %v1563_v9  ;;  %v1565_v0 = vpop.permute.xlu0 %1564 }
 0x26f   : > { %2637 = vmatprep.mubr.msk.f32.mxu1 %vm1878_vm10, %v1863_v54  ;;  %v1864_v45 = vsel %vm1836_vm9, %v1831_v26, %v1565_v0  ;;  %v2612_v52 = vpop.f32.mrb[8].mxu0  ;;  %v1636_v54 = vsel %vm182_vm0, %v323_v5, %v4193_v39 }
 0x270   : > { %2210 = vst.msk [vmem:[%s3802_s23 + $0x48] sm:$0xff] %vm2200_vm11, %v2612_v52  ;;  %2638 = vmatmul.mubr.msk.f32.gmra.mrb[10].mxu1 %vm1878_vm10, %v1864_v45  ;;  %v2081_v21 = vpop.f32.mrb[9].mxu0  ;;  %v2311_v16 = vmul.f32 %v2612_v52, %v2612_v52  ;;  %v2250_v58 = vsel %vm2200_vm11, %v2612_v52, 0.0  ;;  %v4194_v45 = vld [vmem:[#allocation46_spill] sm:$0xff] }
 0x271   : > { %v1183_v60 = vpop.permute.xlu1 %1182  ;;  %2209 = vst.msk [vmem:[%s3802_s23 + $0x40] sm:$0xff] %vm2200_vm11, %v2081_v21  ;;  %v2248_v51 = vsel %vm2200_vm11, %v2081_v21, 0.0  ;;  %v2310_v50 = vmul.f32 %v2081_v21, %v2081_v21  ;;  %v1669_v52 = vsel %vm1638_vm3, %v1636_v54, %v4194_v45 }
 0x272   : > { %v2249_v63 = vadd.f32 %v2248_v51, %v2247_v23  ;;  %v1311_v19 = vpop.permute.xlu0 %1310  ;;  %v2351_v56 = vsel %vm2200_vm11, %v2311_v16, 0.0  ;;  %v1701_v23 = vsel %vm1671_vm4, %v1668_v18, %v929_v17 }
 0x273   : > { %v2349_v12 = vsel %vm2200_vm11, %v2310_v50, 0.0  ;;  %v1734_v14 = vsel %vm1704_vm5, %v1701_v23, %v1057_v7 }
 0x274   : > { %v2350_v15 = vadd.f32 %v2349_v12, %v2348_v25  ;;  %v2251_v36 = vadd.f32 %v2250_v58, %v2249_v63  ;;  %v1766_v25 = vsel %vm1737_vm6, %v1733_v48, %v1183_v60  ;;  %v324_v63 = vld [vmem:[#allocation2 + $0x170] sm:$0xff] }
 0x275   : > { %v1185_v31 = vpop.permute.xlu1 %1184  ;;  %v1799_v13 = vsel %vm1770_vm7, %v1766_v25, %v1311_v19  ;;  %v4195_v12 = vld [vmem:[#allocation27_spill] sm:$0xff] }
 0x276   : > { %v1313_v43 = vpop.permute.xlu0 %1312  ;;  %v2352_v46 = vadd.f32 %v2351_v56, %v2350_v15  ;;  %v1767_v6 = vsel %vm1737_vm6, %v1734_v14, %v1185_v31  ;;  %v1637_v15 = vsel %vm182_vm0, %v324_v63, %v4195_v12  ;;  %v4196_v56 = vld [vmem:[#allocation48_spill] sm:$0xff] }
 0x277   : > { %v1800_v44 = vsel %vm1770_vm7, %v1767_v6, %v1313_v43  ;;  %v1670_v43 = vsel %vm1638_vm3, %v1637_v15, %v4196_v56 }
 0x279   : > { %v931_v53 = vpop.permute.xlu1 %930 }
 0x27a   : > { %v933_v34 = vpop.permute.xlu0 %932  ;;  %v1702_v60 = vsel %vm1671_vm4, %v1669_v52, %v931_v53 }
 0x27b   : > { %v1703_v53 = vsel %vm1671_vm4, %v1670_v43, %v933_v34 }
 0x27d   : > { %v1439_v4 = vpop.permute.xlu1 %1438 }
 0x27e   : > { %v1441_v42 = vpop.permute.xlu0 %1440  ;;  %v1832_v38 = vsel %vm1803_vm8, %v1799_v13, %v1439_v4 }
 0x27f   : > { %v1833_v40 = vsel %vm1803_vm8, %v1800_v44, %v1441_v42 }
 0x281   : > { %v1059_v41 = vpop.permute.xlu1 %1058 }
 0x282   : > { %v1061_v59 = vpop.permute.xlu0 %1060  ;;  %v1735_v16 = vsel %vm1704_vm5, %v1702_v60, %v1059_v41 }
 0x283   : > { %v2615_v37 = vpop.f32.mrb[10].mxu0  ;;  %v1736_v62 = vsel %vm1704_vm5, %v1703_v53, %v1061_v59 }
 0x284   : > { %2212 = vst.msk [vmem:[%s3802_s23 + $0x58] sm:$0xff] %vm2200_vm11, %v2615_v37  ;;  %v2091_v47 = vpop.f32.mrb[11].mxu0  ;;  %v2313_v10 = vmul.f32 %v2615_v37, %v2615_v37  ;;  %v2254_v3 = vsel %vm2200_vm11, %v2615_v37, 0.0 }
 0x285   : > { %v1567_v17 = vpop.permute.xlu1 %1566  ;;  %2211 = vst.msk [vmem:[%s3802_s23 + $0x50] sm:$0xff] %vm2200_vm11, %v2091_v47  ;;  %v2252_v55 = vsel %vm2200_vm11, %v2091_v47, 0.0  ;;  %v2312_v1 = vmul.f32 %v2091_v47, %v2091_v47 }
 0x286   : > { %v1865_v35 = vsel %vm1836_vm9, %v1832_v38, %v1567_v17  ;;  %v2253_v24 = vadd.f32 %v2252_v55, %v2251_v36  ;;  %v1569_v28 = vpop.permute.xlu0 %1568  ;;  %v2355_v9 = vsel %vm2200_vm11, %v2313_v10, 0.0 }
 0x287   : > { %2640 = vmatprep.mubr.msk.f32.mxu1 %vm1878_vm10, %v1865_v35  ;;  %v2353_v20 = vsel %vm2200_vm11, %v2312_v1, 0.0  ;;  %v1866_v57 = vsel %vm1836_vm9, %v1833_v40, %v1569_v28 }
 0x288   : > { %v2354_v7 = vadd.f32 %v2353_v20, %v2352_v46  ;;  %2641 = vmatmul.mubr.msk.f32.gmra.mrb[12].mxu1 %vm1878_vm10, %v1866_v57  ;;  %v2255_v29 = vadd.f32 %v2254_v3, %v2253_v24 }
 0x289   : > { %v1187_v49 = vpop.permute.xlu1 %1186 }
 0x28a   : > { %v1315_v26 = vpop.permute.xlu0 %1314  ;;  %v2356_v0 = vadd.f32 %v2355_v9, %v2354_v7  ;;  %v1768_v51 = vsel %vm1737_vm6, %v1735_v16, %v1187_v49 }
 0x28b   : > { %v1801_v58 = vsel %vm1770_vm7, %v1768_v51, %v1315_v26 }
 0x28d   : > { %v1189_v21 = vpop.permute.xlu1 %1188 }
 0x28e   : > { %v1443_v50 = vpop.permute.xlu0 %1442  ;;  %v1769_v8 = vsel %vm1737_vm6, %v1736_v62, %v1189_v21 }
 0x28f   : > { %v1834_v31 = vsel %vm1803_vm8, %v1801_v58, %v1443_v50 }
 0x291   : > { %v1317_v19 = vpop.permute.xlu1 %1316 }
 0x292   : > { %v1571_v36 = vpop.permute.xlu0 %1570  ;;  %v1802_v22 = vsel %vm1770_vm7, %v1769_v8, %v1317_v19 }
 0x293   : > { %v1867_v46 = vsel %vm1836_vm9, %v1834_v31, %v1571_v36 }
 0x294   : > { %2643 = vmatprep.mubr.msk.f32.mxu1 %vm1878_vm10, %v1867_v46 }
 0x295   : > { %v1445_v11 = vpop.permute.xlu1 %1444 }
 0x296   : > { %v1835_v4 = vsel %vm1803_vm8, %v1802_v22, %v1445_v11 }
 0x299   : > { %v1573_v2 = vpop.permute.xlu1 %1572 }
 0x29a   : > { %v1868_v61 = vsel %vm1836_vm9, %v1835_v4, %v1573_v2 }
 0x29b   : > { %2644 = vmatmul.mubr.msk.f32.gmra.mrb[14].mxu1 %vm1878_vm10, %v1868_v61  ;;  %v2618_v30 = vpop.f32.mrb[12].mxu0 }
 0x29c   : > { %2214 = vst.msk [vmem:[%s3802_s23 + $0x68] sm:$0xff] %vm2200_vm11, %v2618_v30  ;;  %v2101_v34 = vpop.f32.mrb[13].mxu0  ;;  %v2315_v32 = vmul.f32 %v2618_v30, %v2618_v30  ;;  %v2258_v42 = vsel %vm2200_vm11, %v2618_v30, 0.0 }
 0x29d   : > { %2213 = vst.msk [vmem:[%s3802_s23 + $0x60] sm:$0xff] %vm2200_vm11, %v2101_v34  ;;  %v2256_v27 = vsel %vm2200_vm11, %v2101_v34, 0.0  ;;  %v2314_v18 = vmul.f32 %v2101_v34, %v2101_v34 }
 0x29e   : > { %v2257_v33 = vadd.f32 %v2256_v27, %v2255_v29  ;;  %v2359_v25 = vsel %vm2200_vm11, %v2315_v32, 0.0 }
 0x29f   : > { %v2357_v23 = vsel %vm2200_vm11, %v2314_v18, 0.0 }
 0x2a0   : > { %v2358_v48 = vadd.f32 %v2357_v23, %v2356_v0  ;;  %v2259_v14 = vadd.f32 %v2258_v42, %v2257_v33 }
 0x2a2   : > { %v2360_v41 = vadd.f32 %v2359_v25, %v2358_v48 }
 0x2b3   : > { %v2621_v6 = vpop.f32.mrb[14].mxu0 }
 0x2b4   : > { %2216 = vst.msk [vmem:[%s3802_s23 + $0x78] sm:$0xff] %vm2200_vm11, %v2621_v6  ;;  %v2111_v59 = vpop.f32.mrb[15].mxu0  ;;  %v2317_v13 = vmul.f32 %v2621_v6, %v2621_v6  ;;  %v2262_v17 = vsel %vm2200_vm11, %v2621_v6, 0.0 }
 0x2b5   : > { %2215 = vst.msk [vmem:[%s3802_s23 + $0x70] sm:$0xff] %vm2200_vm11, %v2111_v59  ;;  %v2260_v37 = vsel %vm2200_vm11, %v2111_v59, 0.0  ;;  %v2316_v44 = vmul.f32 %v2111_v59, %v2111_v59 }
 0x2b6   : > { %v2261_v38 = vadd.f32 %v2260_v37, %v2259_v14  ;;  %v2363_v55 = vsel %vm2200_vm11, %v2317_v13, 0.0 }
 0x2b7   : > { %v2361_v47 = vsel %vm2200_vm11, %v2316_v44, 0.0 }
 0x2b8   : > { %v2263_v10 = vadd.f32 %v2262_v17, %v2261_v38  ;;  %v2362_v35 = vadd.f32 %v2361_v47, %v2360_v41 }
 0x2ba   : > { %v2364_v1 = vadd.f32 %v2363_v55, %v2362_v35 }
 0x2cb   : > { %v2624_v40 = vpop.f32.mrb[0].mxu1 }
 0x2cc   : > { %2218 = vst.msk [vmem:[%s3802_s23 + $0x88] sm:$0xff] %vm2200_vm11, %v2624_v40  ;;  %v2121_v24 = vpop.f32.mrb[1].mxu1  ;;  %v2319_v28 = vmul.f32 %v2624_v40, %v2624_v40  ;;  %v2266_v57 = vsel %vm2200_vm11, %v2624_v40, 0.0 }
 0x2cd   : > { %2217 = vst.msk [vmem:[%s3802_s23 + $0x80] sm:$0xff] %vm2200_vm11, %v2121_v24  ;;  %v2264_v5 = vsel %vm2200_vm11, %v2121_v24, 0.0  ;;  %v2318_v3 = vmul.f32 %v2121_v24, %v2121_v24 }
 0x2ce   : > { %v2265_v20 = vadd.f32 %v2264_v5, %v2263_v10  ;;  %v2367_v9 = vsel %vm2200_vm11, %v2319_v28, 0.0 }
 0x2cf   : > { %v2365_v7 = vsel %vm2200_vm11, %v2318_v3, 0.0 }
 0x2d0   : > { %v2366_v49 = vadd.f32 %v2365_v7, %v2364_v1  ;;  %v2267_v29 = vadd.f32 %v2266_v57, %v2265_v20 }
 0x2d2   : > { %v2368_v39 = vadd.f32 %v2367_v9, %v2366_v49 }
 0x2e3   : > { %v2627_v54 = vpop.f32.mrb[2].mxu1 }
 0x2e4   : > { %2220 = vst.msk [vmem:[%s3802_s23 + $0x98] sm:$0xff] %vm2200_vm11, %v2627_v54  ;;  %v2131_v26 = vpop.f32.mrb[3].mxu1  ;;  %v2321_v0 = vmul.f32 %v2627_v54, %v2627_v54  ;;  %v2270_v21 = vsel %vm2200_vm11, %v2627_v54, 0.0 }
 0x2e5   : > { %2219 = vst.msk [vmem:[%s3802_s23 + $0x90] sm:$0xff] %vm2200_vm11, %v2131_v26  ;;  %v2268_v45 = vsel %vm2200_vm11, %v2131_v26, 0.0  ;;  %v2320_v52 = vmul.f32 %v2131_v26, %v2131_v26 }
 0x2e6   : > { %v2269_v60 = vadd.f32 %v2268_v45, %v2267_v29  ;;  %v2371_v63 = vsel %vm2200_vm11, %v2321_v0, 0.0 }
 0x2e7   : > { %v2369_v16 = vsel %vm2200_vm11, %v2320_v52, 0.0 }
 0x2e8   : > { %v2370_v51 = vadd.f32 %v2369_v16, %v2368_v39  ;;  %v2271_v50 = vadd.f32 %v2270_v21, %v2269_v60 }
 0x2ea   : > { %v2372_v19 = vadd.f32 %v2371_v63, %v2370_v51 }
 0x2fb   : > { %v2630_v58 = vpop.f32.mrb[4].mxu1 }
 0x2fc   : > { %2222 = vst.msk [vmem:[%s3802_s23 + $0xa8] sm:$0xff] %vm2200_vm11, %v2630_v58  ;;  %v2141_v12 = vpop.f32.mrb[5].mxu1  ;;  %v2323_v15 = vmul.f32 %v2630_v58, %v2630_v58  ;;  %v2274_v43 = vsel %vm2200_vm11, %v2630_v58, 0.0 }
 0x2fd   : > { %2221 = vst.msk [vmem:[%s3802_s23 + $0xa0] sm:$0xff] %vm2200_vm11, %v2141_v12  ;;  %v2272_v31 = vsel %vm2200_vm11, %v2141_v12, 0.0  ;;  %v2322_v36 = vmul.f32 %v2141_v12, %v2141_v12 }
 0x2fe   : > { %v2273_v56 = vadd.f32 %v2272_v31, %v2271_v50  ;;  %v2375_v62 = vsel %vm2200_vm11, %v2323_v15, 0.0 }
 0x2ff   : > { %v2373_v46 = vsel %vm2200_vm11, %v2322_v36, 0.0 }
 0x300   : > { %v2374_v53 = vadd.f32 %v2373_v46, %v2372_v19  ;;  %v2275_v11 = vadd.f32 %v2274_v43, %v2273_v56 }
 0x302   : > { %v2376_v8 = vadd.f32 %v2375_v62, %v2374_v53 }
 0x313   : > { %v2633_v22 = vpop.f32.mrb[6].mxu1 }
 0x314   : > { %2224 = vst.msk [vmem:[%s3802_s23 + $0xb8] sm:$0xff] %vm2200_vm11, %v2633_v22  ;;  %v2151_v4 = vpop.f32.mrb[7].mxu1  ;;  %v2325_v2 = vmul.f32 %v2633_v22, %v2633_v22  ;;  %v2278_v32 = vsel %vm2200_vm11, %v2633_v22, 0.0 }
 0x315   : > { %2223 = vst.msk [vmem:[%s3802_s23 + $0xb0] sm:$0xff] %vm2200_vm11, %v2151_v4  ;;  %v2276_v61 = vsel %vm2200_vm11, %v2151_v4, 0.0  ;;  %v2324_v30 = vmul.f32 %v2151_v4, %v2151_v4 }
 0x316   : > { %v2277_v34 = vadd.f32 %v2276_v61, %v2275_v11  ;;  %v2379_v42 = vsel %vm2200_vm11, %v2325_v2, 0.0 }
 0x317   : > { %v2377_v27 = vsel %vm2200_vm11, %v2324_v30, 0.0 }
 0x318   : > { %v2378_v18 = vadd.f32 %v2377_v27, %v2376_v8  ;;  %v2279_v33 = vadd.f32 %v2278_v32, %v2277_v34 }
 0x31a   : > { %v2380_v23 = vadd.f32 %v2379_v42, %v2378_v18 }
 0x32b   : > { %v2636_v48 = vpop.f32.mrb[8].mxu1 }
 0x32c   : > { %2226 = vst.msk [vmem:[%s3802_s23 + $0xc8] sm:$0xff] %vm2200_vm11, %v2636_v48  ;;  %v2161_v14 = vpop.f32.mrb[9].mxu1  ;;  %v2327_v25 = vmul.f32 %v2636_v48, %v2636_v48  ;;  %v2282_v13 = vsel %vm2200_vm11, %v2636_v48, 0.0 }
 0x32d   : > { %2225 = vst.msk [vmem:[%s3802_s23 + $0xc0] sm:$0xff] %vm2200_vm11, %v2161_v14  ;;  %v2280_v41 = vsel %vm2200_vm11, %v2161_v14, 0.0  ;;  %v2326_v6 = vmul.f32 %v2161_v14, %v2161_v14 }
 0x32e   : > { %v2281_v59 = vadd.f32 %v2280_v41, %v2279_v33  ;;  %v2383_v17 = vsel %vm2200_vm11, %v2327_v25, 0.0 }
 0x32f   : > { %v2381_v37 = vsel %vm2200_vm11, %v2326_v6, 0.0 }
 0x330   : > { %v2382_v44 = vadd.f32 %v2381_v37, %v2380_v23  ;;  %v2283_v38 = vadd.f32 %v2282_v13, %v2281_v59 }
 0x332   : > { %v2384_v47 = vadd.f32 %v2383_v17, %v2382_v44 }
 0x343   : > { %v2639_v10 = vpop.f32.mrb[10].mxu1 }
 0x344   : > { %2228 = vst.msk [vmem:[%s3802_s23 + $0xd8] sm:$0xff] %vm2200_vm11, %v2639_v10  ;;  %v2171_v35 = vpop.f32.mrb[11].mxu1  ;;  %v2329_v55 = vmul.f32 %v2639_v10, %v2639_v10  ;;  %v2286_v28 = vsel %vm2200_vm11, %v2639_v10, 0.0 }
 0x345   : > { %2227 = vst.msk [vmem:[%s3802_s23 + $0xd0] sm:$0xff] %vm2200_vm11, %v2171_v35  ;;  %v2284_v1 = vsel %vm2200_vm11, %v2171_v35, 0.0  ;;  %v2328_v40 = vmul.f32 %v2171_v35, %v2171_v35 }
 0x346   : > { %v2285_v24 = vadd.f32 %v2284_v1, %v2283_v38  ;;  %v2387_v57 = vsel %vm2200_vm11, %v2329_v55, 0.0 }
 0x347   : > { %v2385_v5 = vsel %vm2200_vm11, %v2328_v40, 0.0 }
 0x348   : > { %v2386_v3 = vadd.f32 %v2385_v5, %v2384_v47  ;;  %v2287_v20 = vadd.f32 %v2286_v28, %v2285_v24 }
 0x34a   : > { %v2388_v7 = vadd.f32 %v2387_v57, %v2386_v3 }
 0x35b   : > { %v2642_v49 = vpop.f32.mrb[12].mxu1 }
 0x35c   : > { %2230 = vst.msk [vmem:[%s3802_s23 + $0xe8] sm:$0xff] %vm2200_vm11, %v2642_v49  ;;  %v2181_v29 = vpop.f32.mrb[13].mxu1  ;;  %v2331_v9 = vmul.f32 %v2642_v49, %v2642_v49  ;;  %v2290_v0 = vsel %vm2200_vm11, %v2642_v49, 0.0 }
 0x35d   : > { %2229 = vst.msk [vmem:[%s3802_s23 + $0xe0] sm:$0xff] %vm2200_vm11, %v2181_v29  ;;  %v2288_v39 = vsel %vm2200_vm11, %v2181_v29, 0.0  ;;  %v2330_v54 = vmul.f32 %v2181_v29, %v2181_v29 }
 0x35e   : > { %v2289_v26 = vadd.f32 %v2288_v39, %v2287_v20  ;;  %v2391_v21 = vsel %vm2200_vm11, %v2331_v9, 0.0 }
 0x35f   : > { %v2389_v45 = vsel %vm2200_vm11, %v2330_v54, 0.0 }
 0x360   : > { %v2390_v52 = vadd.f32 %v2389_v45, %v2388_v7  ;;  %v2291_v60 = vadd.f32 %v2290_v0, %v2289_v26 }
 0x362   : > { %v2392_v16 = vadd.f32 %v2391_v21, %v2390_v52 }
 0x36e   : > { %v2645_v51 = vpop.f32.mrb[14].mxu1 }
 0x36f   : > { %2232 = vst.msk [vmem:[%s3802_s23 + $0xf8] sm:$0xff] %vm2200_vm11, %v2645_v51  ;;  %v2191_v50 = vpop.f32.mrb[15].mxu1  ;;  %v2333_v63 = vmul.f32 %v2645_v51, %v2645_v51  ;;  %v2294_v15 = vsel %vm2200_vm11, %v2645_v51, 0.0 }
 0x370   : > { %2231 = vst.msk [vmem:[%s3802_s23 + $0xf0] sm:$0xff] %vm2200_vm11, %v2191_v50  ;;  %v2292_v19 = vsel %vm2200_vm11, %v2191_v50, 0.0  ;;  %v2332_v58 = vmul.f32 %v2191_v50, %v2191_v50 }
 0x371   : > { %v2293_v12 = vadd.f32 %v2292_v19, %v2291_v60  ;;  %v2395_v43 = vsel %vm2200_vm11, %v2333_v63, 0.0 }
 0x372   : > { %v2393_v31 = vsel %vm2200_vm11, %v2332_v58, 0.0 }
 0x373   : > { %v2295_v36 = vadd.f32 %v2294_v15, %v2293_v12  ;;  %v2394_v56 = vadd.f32 %v2393_v31, %v2392_v16 }
 0x375   : > { %v2296_v46 = vrot.slane %v2295_v36, 4  ;;  %v2396_v53 = vadd.f32 %v2395_v43, %v2394_v56 }
 0x377   : > { %v2297_v11 = vadd.f32 %v2296_v46, %v2295_v36  ;;  %v2397_v62 = vrot.slane %v2396_v53, 4 }
 0x379   : > { %v2298_v8 = vrot.slane %v2297_v11, 2  ;;  %v2398_v22 = vadd.f32 %v2397_v62, %v2396_v53 }
 0x37b   : > { %v2299_v4 = vadd.f32 %v2298_v8, %v2297_v11  ;;  %v2399_v2 = vrot.slane %v2398_v22, 2 }
 0x37d   : > { %v2300_v61 = vrot.slane %v2299_v4, 1  ;;  %v2400_v30 = vadd.f32 %v2399_v2, %v2398_v22 }
 0x37f   : > { %v2401_v34 = vrot.slane %v2400_v30, 1  ;;  %v2301_v32 = vadd.f32 %v2300_v61, %v2299_v4 }
 0x381   : > { %v2402_v27 = vadd.f32 %v2401_v34, %v2400_v30 }
 0x383   : > { %v2404_v18 = vsel %vm2403_vm12, %v2301_v32, %v2402_v27 }
 0x384   : > { %2406 = vst.msk [vmem:[%s181_s26] sm:$0x3] %vm2405_vm13, %v2404_v18 }
 0x385 PF: > { %s14_s12 = sadd.s32 1, %s2695_s12  }
 0x386   : > { %p11_p4 = scmp.ge.s32.totalorder %s14_s12, 4  }
 0x388   :  { %13 = sbr.rel (!%p11_p4) target bundleno = 1 (0x1), region = 73 }

// kernel: upsample_block_forward.4
= control target key start
LH: loop header
LB: loop body
LE: loop exit
PB: predicated region body
PF: predicated region fallthrough
CT: control target
= control target key end

     0   :  { %s2843_s15 = smov 0   ;;  %s4265_s0 = inlined_call_operand.vmem [shape: f32[2,16,16,4], index: 0, kind: input, shape index: {}]   ;;  %s4266_s1 = inlined_call_operand.vmem [shape: f32[2,4], index: 1, kind: input, shape index: {}]   ;;  %s4267_s2 = inlined_call_operand.vmem [shape: f32[36,4], index: 2, kind: input, shape index: {}]   ;;  %s4268_s3 = inlined_call_operand.vmem [shape: f32[2,16,16,4], index: 3, kind: output, shape index: {0}]   ;;  %s4269_s4 = inlined_call_operand.vmem [shape: f32[2,2,4], index: 4, kind: output, shape index: {1}]  }
   0x1 LB: > { %s2624_s16 = sadd.s32 4294967295, %s2807_s15   ;;  %p2628_p0 = scmp.ge.s32.totalorder %s2807_s15, 1  ;;  %s2807_s15 = sphi %s2843_s15, %s15_s15  }
   0x2   : > { %p165_p1 = scmp.lt.s32.totalorder %s2807_s15, 3 }
   0x4   : > { %p166_p2 = pnand %p2628_p0, %p165_p1 }
   0x6   : > { %169 = sbr.rel (%p166_p2) target bundleno = 902 (0x386), region = 32 }
   0xd   : > { %vm347_vm0 = vcmask 31744   ;;  %vm350_vm1 = vcmask 25600   ;;  %p2853_p3 = scmp.lt.s32.totalorder %s2624_s16, 1  ;;  %vm356_vm2 = vcmask 24576   ;;  %v2809_v0 = vmov 0.0   ;;  %s2810_s26 = smov 4  }
   0xe   : > { %348 = vst.msk [vmem:[#allocation2] sm:$0xff] %vm347_vm0, %v2809_v0  ;;  %349 = vst.msk [vmem:[#allocation2 + $0x8] sm:$0xff] %vm347_vm0, %v2809_v0  ;;  %v2909_v1 = vld [vmem:[%s4266_s1] ss:$0 sm:$0xff]  ;;  %v2921_v2 = vld [vmem:[%s4266_s1 + $0x1] ss:$0 sm:$0xff] }
   0xf   : > { %353 = vst.msk [vmem:[#allocation2 + $0x198] sm:$0xff] %vm347_vm0, %v2809_v0  ;;  %354 = vst.msk [vmem:[#allocation2 + $0x1a0] sm:$0xff] %vm347_vm0, %v2809_v0  ;;  %s4376_s16 = smov (!%p2853_p3, %s2624_s16), 1  ;;  %s2811_s27 = smov 8   ;;  %vm2104_vm3 = vcmask 1043456   ;;  %vm1771_vm4 = vcmask 64512  }
  0x10   : > { %351 = vst.msk [vmem:[#allocation2 + $0x10] sm:$0x3] %vm350_vm1, %v2809_v0  ;;  %355 = vst.msk [vmem:[#allocation2 + $0x1a8] sm:$0x3] %vm350_vm1, %v2809_v0  ;;  %s2671_s18 = sshll.u32 %s4376_s16, 8  ;;  %s2812_s28 = smov 12  }
  0x11   : > { %358 = vst.msk [vmem:[#allocation2 + $0x18] sm:$0x1] %vm356_vm2, %v2809_v0  ;;  %359 = vst.msk [vmem:[#allocation2 + $0x30] sm:$0x1] %vm356_vm2, %v2809_v0  ;;  %s2916_s23 = scalar_lea.vmem %s4265_s0, %s2671_s18  ;;  %s2813_s29 = smov 16   ;;  %vm1804_vm5 = vcmask 97280  }
  0x12   : > { %360 = vst.msk [vmem:[#allocation2 + $0x48] sm:$0x1] %vm356_vm2, %v2809_v0  ;;  %361 = vst.msk [vmem:[#allocation2 + $0x60] sm:$0x1] %vm356_vm2, %v2809_v0  ;;  %v211_v3 = vld [vmem:[%s2916_s23 + $0x10] sm:$0xff]  ;;  %v209_v4 = vld [vmem:[%s2916_s23] sm:$0xff] }
  0x13   : > { %362 = vst.msk [vmem:[#allocation2 + $0x78] sm:$0x1] %vm356_vm2, %v2809_v0  ;;  %363 = vst.msk [vmem:[#allocation2 + $0x90] sm:$0x1] %vm356_vm2, %v2809_v0  ;;  %v213_v5 = vld [vmem:[%s2916_s23 + $0x20] sm:$0xff]  ;;  %v248_v6 = vmul.f32 %v2909_v1, %v211_v3  ;;  %v246_v7 = vmul.f32 %v2909_v1, %v209_v4  ;;  %v210_v9 = vld [vmem:[%s2916_s23 + $0x8] sm:$0xff] }
  0x14   : > { %364 = vst.msk [vmem:[#allocation2 + $0xa8] sm:$0x1] %vm356_vm2, %v2809_v0  ;;  %365 = vst.msk [vmem:[#allocation2 + $0xc0] sm:$0x1] %vm356_vm2, %v2809_v0  ;;  %v250_v8 = vmul.f32 %v2909_v1, %v213_v5  ;;  %v215_v10 = vld [vmem:[%s2916_s23 + $0x30] sm:$0xff]  ;;  %v212_v11 = vld [vmem:[%s2916_s23 + $0x18] sm:$0xff]  ;;  %v247_v13 = vmul.f32 %v2909_v1, %v210_v9 }
  0x15   : > { %366 = vst.msk [vmem:[#allocation2 + $0xd8] sm:$0x1] %vm356_vm2, %v2809_v0  ;;  %367 = vst.msk [vmem:[#allocation2 + $0xf0] sm:$0x1] %vm356_vm2, %v2809_v0  ;;  %v458_v12 = vld [vmem:[#allocation2 + $0x1] sm:$0xff]  ;;  %v252_v14 = vmul.f32 %v2909_v1, %v215_v10  ;;  %v249_v15 = vmul.f32 %v2909_v1, %v212_v11  ;;  %v285_v18 = vadd.f32 %v2921_v2, %v248_v6  ;;  %v219_v27 = vld [vmem:[%s2916_s23 + $0x50] sm:$0xff] }
  0x16   : > { %368 = vst.msk [vmem:[#allocation2 + $0x108] sm:$0x1] %vm356_vm2, %v2809_v0  ;;  %369 = vst.msk [vmem:[#allocation2 + $0x120] sm:$0x1] %vm356_vm2, %v2809_v0  ;;  %v217_v16 = vld [vmem:[%s2916_s23 + $0x40] sm:$0xff]  ;;  %747 = vrot.lane.b32.xlu0 %v458_v12, %s2810_s26  ;;  %v283_v19 = vadd.f32 %v2921_v2, %v246_v7  ;;  %v287_v20 = vadd.f32 %v2921_v2, %v250_v8  ;;  %v214_v22 = vld [vmem:[%s2916_s23 + $0x28] sm:$0xff]  ;;  %v284_v23 = vadd.f32 %v2921_v2, %v247_v13 }
  0x17   : > { %370 = vst.msk [vmem:[#allocation2 + $0x138] sm:$0x1] %vm356_vm2, %v2809_v0  ;;  %371 = vst.msk [vmem:[#allocation2 + $0x150] sm:$0x1] %vm356_vm2, %v2809_v0  ;;  %v459_v17 = vld [vmem:[#allocation2 + $0x9] sm:$0xff]  ;;  %v254_v21 = vmul.f32 %v2909_v1, %v217_v16  ;;  %v289_v24 = vadd.f32 %v2921_v2, %v252_v14  ;;  %v286_v25 = vadd.f32 %v2921_v2, %v249_v15  ;;  %v216_v28 = vld [vmem:[%s2916_s23 + $0x38] sm:$0xff] }
  0x18   : > { %372 = vst.msk [vmem:[#allocation2 + $0x168] sm:$0x1] %vm356_vm2, %v2809_v0  ;;  %373 = vst.msk [vmem:[#allocation2 + $0x180] sm:$0x1] %vm356_vm2, %v2809_v0  ;;  %v251_v26 = vmul.f32 %v2909_v1, %v214_v22  ;;  %v221_v29 = vld [vmem:[%s2916_s23 + $0x60] sm:$0xff]  ;;  %v317_v30 = vmax.f32 %v285_v18, 0.0  ;;  %v256_v43 = vmul.f32 %v2909_v1, %v219_v27  ;;  %v253_v44 = vmul.f32 %v2909_v1, %v216_v28 }
  0x19   : > { %376 = vst.msk [vmem:[#allocation2 + $0x29] sm:$0x1] %vm356_vm2, %v2809_v0  ;;  %377 = vst.msk [vmem:[#allocation2 + $0x41] sm:$0x1] %vm356_vm2, %v2809_v0  ;;  %v315_v31 = vmax.f32 %v283_v19, 0.0  ;;  %v319_v32 = vmax.f32 %v287_v20, 0.0  ;;  %v291_v33 = vadd.f32 %v2921_v2, %v254_v21  ;;  %v258_v45 = vmul.f32 %v2909_v1, %v221_v29 }
  0x1a   : > { %378 = vst.msk [vmem:[#allocation2 + $0x59] sm:$0x1] %vm356_vm2, %v2809_v0  ;;  %379 = vst.msk [vmem:[#allocation2 + $0x71] sm:$0x1] %vm356_vm2, %v2809_v0  ;;  %v218_v34 = vld [vmem:[%s2916_s23 + $0x48] sm:$0xff]  ;;  %v223_v35 = vld [vmem:[%s2916_s23 + $0x70] sm:$0xff]  ;;  %v288_v40 = vadd.f32 %v2921_v2, %v251_v26  ;;  %749 = vrot.lane.b32.xlu0 %v459_v17, %s2810_s26  ;;  %v293_v51 = vadd.f32 %v2921_v2, %v256_v43  ;;  %v290_v52 = vadd.f32 %v2921_v2, %v253_v44 }
  0x1b   : > { %380 = vst.msk [vmem:[#allocation2 + $0x89] sm:$0x1] %vm356_vm2, %v2809_v0  ;;  %381 = vst.msk [vmem:[#allocation2 + $0xa1] sm:$0x1] %vm356_vm2, %v2809_v0  ;;  %v220_v36 = vld [vmem:[%s2916_s23 + $0x58] sm:$0xff]  ;;  %v316_v37 = vmax.f32 %v284_v23, 0.0  ;;  %v255_v48 = vmul.f32 %v2909_v1, %v218_v34  ;;  %v260_v49 = vmul.f32 %v2909_v1, %v223_v35  ;;  %v295_v53 = vadd.f32 %v2921_v2, %v258_v45 }
  0x1c   : > { %382 = vst.msk [vmem:[#allocation2 + $0xb9] sm:$0x1] %vm356_vm2, %v2809_v0  ;;  %383 = vst.msk [vmem:[#allocation2 + $0xd1] sm:$0x1] %vm356_vm2, %v2809_v0  ;;  %v321_v38 = vmax.f32 %v289_v24, 0.0  ;;  %v318_v39 = vmax.f32 %v286_v25, 0.0  ;;  %v257_v50 = vmul.f32 %v2909_v1, %v220_v36 }
  0x1d   : > { %384 = vst.msk [vmem:[#allocation2 + $0xe9] sm:$0x1] %vm356_vm2, %v2809_v0  ;;  %385 = vst.msk [vmem:[#allocation2 + $0x101] sm:$0x1] %vm356_vm2, %v2809_v0  ;;  %v225_v41 = vld [vmem:[%s2916_s23 + $0x80] sm:$0xff]  ;;  %v323_v42 = vmax.f32 %v291_v33, 0.0  ;;  %v292_v55 = vadd.f32 %v2921_v2, %v255_v48  ;;  %v297_v56 = vadd.f32 %v2921_v2, %v260_v49 }
  0x1e   : > { %386 = vst.msk [vmem:[#allocation2 + $0x119] sm:$0x1] %vm356_vm2, %v2809_v0  ;;  %387 = vst.msk [vmem:[#allocation2 + $0x131] sm:$0x1] %vm356_vm2, %v2809_v0  ;;  %v222_v46 = vld [vmem:[%s2916_s23 + $0x68] sm:$0xff]  ;;  %v320_v47 = vmax.f32 %v288_v40, 0.0  ;;  %v262_v54 = vmul.f32 %v2909_v1, %v225_v41  ;;  %v294_v57 = vadd.f32 %v2921_v2, %v257_v50 }
  0x1f   : > { %388 = vst.msk [vmem:[#allocation2 + $0x149] sm:$0x1] %vm356_vm2, %v2809_v0  ;;  %389 = vst.msk [vmem:[#allocation2 + $0x161] sm:$0x1] %vm356_vm2, %v2809_v0  ;;  %v259_v58 = vmul.f32 %v2909_v1, %v222_v46  ;;  %v227_v59 = vld [vmem:[%s2916_s23 + $0x90] sm:$0xff]  ;;  %v224_v60 = vld [vmem:[%s2916_s23 + $0x78] sm:$0xff] }
  0x20   : > { %390 = vst.msk [vmem:[#allocation2 + $0x179] sm:$0x1] %vm356_vm2, %v2809_v0  ;;  %391 = vst.msk [vmem:[#allocation2 + $0x191] sm:$0x1] %vm356_vm2, %v2809_v0  ;;  %v229_v61 = vld [vmem:[%s2916_s23 + $0xa0] sm:$0xff]  ;;  %v325_v62 = vmax.f32 %v293_v51, 0.0  ;;  %v299_v3 = vadd.f32 %v2921_v2, %v262_v54  ;;  %v264_v12 = vmul.f32 %v2909_v1, %v227_v59  ;;  %v261_v13 = vmul.f32 %v2909_v1, %v224_v60 }
  0x21   : > { %375 = vst.msk [vmem:[#allocation2 + $0x11] sm:$0x1] %vm356_vm2, %v2809_v0  ;;  %357 = vst.msk [vmem:[#allocation2] sm:$0x1] %vm356_vm2, %v2809_v0  ;;  %v322_v63 = vmax.f32 %v290_v52, 0.0  ;;  %v226_v4 = vld [vmem:[%s2916_s23 + $0x88] sm:$0xff]  ;;  %v296_v10 = vadd.f32 %v2921_v2, %v259_v58  ;;  %v266_v14 = vmul.f32 %v2909_v1, %v229_v61 }
  0x22   : > { %374 = vst.msk [vmem:[#allocation2 + $0x198] sm:$0x1] %vm356_vm2, %v2809_v0  ;;  %392 = vst.msk [vmem:[#allocation2 + $0x1a9] sm:$0x1] %vm356_vm2, %v2809_v0  ;;  %v327_v0 = vmax.f32 %v295_v53, 0.0  ;;  %v231_v5 = vld [vmem:[%s2916_s23 + $0xb0] sm:$0xff]  ;;  %v263_v19 = vmul.f32 %v2909_v1, %v226_v4  ;;  %v301_v23 = vadd.f32 %v2921_v2, %v264_v12  ;;  %v298_v24 = vadd.f32 %v2921_v2, %v261_v13 }
  0x23   : > { %396 = vst.msk [vmem:[#allocation2 + $0x31] sm:$0xff] %vm347_vm0, %v317_v30  ;;  %394 = vst.msk [vmem:[#allocation2 + $0x19] sm:$0xff] %vm347_vm0, %v315_v31  ;;  %v228_v6 = vld [vmem:[%s2916_s23 + $0x98] sm:$0xff]  ;;  %v324_v7 = vmax.f32 %v292_v55, 0.0  ;;  %v329_v8 = vmax.f32 %v297_v56, 0.0  ;;  %v326_v9 = vmax.f32 %v294_v57, 0.0  ;;  %v268_v20 = vmul.f32 %v2909_v1, %v231_v5 }
  0x24   : > { %398 = vst.msk [vmem:[#allocation2 + $0x49] sm:$0xff] %vm347_vm0, %v319_v32  ;;  %395 = vst.msk [vmem:[#allocation2 + $0x21] sm:$0xff] %vm347_vm0, %v316_v37  ;;  %v331_v11 = vmax.f32 %v299_v3, 0.0  ;;  %v233_v15 = vld [vmem:[%s2916_s23 + $0xc0] sm:$0xff]  ;;  %v328_v18 = vmax.f32 %v296_v10, 0.0  ;;  %v265_v21 = vmul.f32 %v2909_v1, %v228_v6  ;;  %v230_v22 = vld [vmem:[%s2916_s23 + $0xa8] sm:$0xff]  ;;  %v303_v25 = vadd.f32 %v2921_v2, %v266_v14 }
  0x25   : > { %400 = vst.msk [vmem:[#allocation2 + $0x61] sm:$0xff] %vm347_vm0, %v321_v38  ;;  %397 = vst.msk [vmem:[#allocation2 + $0x39] sm:$0xff] %vm347_vm0, %v318_v39  ;;  %v235_v26 = vld [vmem:[%s2916_s23 + $0xd0] sm:$0xff]  ;;  %v300_v29 = vadd.f32 %v2921_v2, %v263_v19  ;;  %v305_v30 = vadd.f32 %v2921_v2, %v268_v20  ;;  %v270_v32 = vmul.f32 %v2909_v1, %v233_v15  ;;  %v232_v33 = vld [vmem:[%s2916_s23 + $0xb8] sm:$0xff]  ;;  %v333_v34 = vmax.f32 %v301_v23, 0.0  ;;  %s2814_s8 = smov 20  }
  0x26   : > { %402 = vst.msk [vmem:[#allocation2 + $0x79] sm:$0xff] %vm347_vm0, %v323_v42  ;;  %399 = vst.msk [vmem:[#allocation2 + $0x51] sm:$0xff] %vm347_vm0, %v320_v47  ;;  %v302_v31 = vadd.f32 %v2921_v2, %v265_v21  ;;  %v330_v35 = vmax.f32 %v298_v24, 0.0  ;;  %v335_v36 = vmax.f32 %v303_v25, 0.0  ;;  %v267_v37 = vmul.f32 %v2909_v1, %v230_v22  ;;  %v237_v38 = vld [vmem:[%s2916_s23 + $0xe0] sm:$0xff]  ;;  %v234_v39 = vld [vmem:[%s2916_s23 + $0xc8] sm:$0xff] }
  0x27   : > { %404 = vst.msk [vmem:[#allocation2 + $0x91] sm:$0xff] %vm347_vm0, %v325_v62  ;;  %401 = vst.msk [vmem:[#allocation2 + $0x69] sm:$0xff] %vm347_vm0, %v322_v63  ;;  %v236_v40 = vld [vmem:[%s2916_s23 + $0xd8] sm:$0xff]  ;;  %v332_v41 = vmax.f32 %v300_v29, 0.0  ;;  %v337_v42 = vmax.f32 %v305_v30, 0.0  ;;  %v307_v44 = vadd.f32 %v2921_v2, %v270_v32  ;;  %v238_v45 = vld [vmem:[%s2916_s23 + $0xe8] sm:$0xff]  ;;  %v272_v47 = vmul.f32 %v2909_v1, %v235_v26 }
  0x28   : > { %406 = vst.msk [vmem:[#allocation2 + $0xa9] sm:$0xff] %vm347_vm0, %v327_v0  ;;  %403 = vst.msk [vmem:[#allocation2 + $0x81] sm:$0xff] %vm347_vm0, %v324_v7  ;;  %v334_v43 = vmax.f32 %v302_v31, 0.0  ;;  %v304_v46 = vadd.f32 %v2921_v2, %v267_v37  ;;  %v269_v48 = vmul.f32 %v2909_v1, %v232_v33  ;;  %v274_v52 = vmul.f32 %v2909_v1, %v237_v38  ;;  %v490_v31 = vld [vmem:[#allocation2 + $0x2] sm:$0xff]  ;;  %s2815_s13 = smov 24   ;;  %s2816_s19 = smov 28  }
  0x29   : > { %408 = vst.msk [vmem:[#allocation2 + $0xc1] sm:$0xff] %vm347_vm0, %v329_v8  ;;  %405 = vst.msk [vmem:[#allocation2 + $0x99] sm:$0xff] %vm347_vm0, %v326_v9  ;;  %v339_v51 = vmax.f32 %v307_v44, 0.0  ;;  %v271_v53 = vmul.f32 %v2909_v1, %v234_v39  ;;  %v273_v54 = vmul.f32 %v2909_v1, %v236_v40  ;;  %v309_v56 = vadd.f32 %v2921_v2, %v272_v47  ;;  %s2817_s20 = smov 32  }
  0x2a   : > { %v2994_v16 = vld [vmem:[#allocation2 + $0x31] sm:$0xff]  ;;  %v2996_v17 = vld [vmem:[#allocation2 + $0x19] sm:$0xff]  ;;  %410 = vst.msk [vmem:[#allocation2 + $0xd9] sm:$0xff] %vm347_vm0, %v331_v11  ;;  %407 = vst.msk [vmem:[#allocation2 + $0xb1] sm:$0xff] %vm347_vm0, %v328_v18  ;;  %v336_v55 = vmax.f32 %v304_v46, 0.0  ;;  %v306_v57 = vadd.f32 %v2921_v2, %v269_v48  ;;  %v275_v58 = vmul.f32 %v2909_v1, %v238_v45  ;;  %v311_v59 = vadd.f32 %v2921_v2, %v274_v52 }
  0x2b   : > { %755 = vrot.lane.b32.xlu0 %v2994_v16, %s2810_s26  ;;  %751 = vrot.lane.b32.xlu1 %v2996_v17, %s2810_s26  ;;  %v3014_v27 = vld [vmem:[#allocation2 + $0x49] sm:$0xff]  ;;  %v3016_v28 = vld [vmem:[#allocation2 + $0x21] sm:$0xff]  ;;  %412 = vst.msk [vmem:[#allocation2 + $0xf1] sm:$0xff] %vm347_vm0, %v333_v34  ;;  %409 = vst.msk [vmem:[#allocation2 + $0xc9] sm:$0xff] %vm347_vm0, %v330_v35  ;;  %v308_v60 = vadd.f32 %v2921_v2, %v271_v53  ;;  %v310_v61 = vadd.f32 %v2921_v2, %v273_v54  ;;  %v341_v62 = vmax.f32 %v309_v56, 0.0  ;;  %vm1837_vm6 = vcmask 130048  }
  0x2c   : > { %414 = vst.msk [vmem:[#allocation2 + $0x109] sm:$0xff] %vm347_vm0, %v335_v36  ;;  %v3040_v49 = vld [vmem:[#allocation2 + $0x61] sm:$0xff]  ;;  %v3042_v50 = vld [vmem:[#allocation2 + $0x39] sm:$0xff]  ;;  %411 = vst.msk [vmem:[#allocation2 + $0xe1] sm:$0xff] %vm347_vm0, %v332_v41  ;;  %v338_v63 = vmax.f32 %v306_v57, 0.0  ;;  %v312_v1 = vadd.f32 %v2921_v2, %v275_v58  ;;  %v343_v4 = vmax.f32 %v311_v59, 0.0 }
  0x2d   : > { %416 = vst.msk [vmem:[#allocation2 + $0x121] sm:$0xff] %vm347_vm0, %v337_v42  ;;  %413 = vst.msk [vmem:[#allocation2 + $0xf9] sm:$0xff] %vm347_vm0, %v334_v43  ;;  %v3063_v0 = vld [vmem:[#allocation2 + $0x79] sm:$0xff]  ;;  %v3065_v3 = vld [vmem:[#allocation2 + $0x51] sm:$0xff]  ;;  %v340_v5 = vmax.f32 %v308_v60, 0.0  ;;  %v342_v6 = vmax.f32 %v310_v61, 0.0 }
  0x2e   : > { %418 = vst.msk [vmem:[#allocation2 + $0x139] sm:$0xff] %vm347_vm0, %v339_v51  ;;  %415 = vst.msk [vmem:[#allocation2 + $0x111] sm:$0xff] %vm347_vm0, %v336_v55  ;;  %v344_v7 = vmax.f32 %v312_v1, 0.0  ;;  %v470_v2 = vld [vmem:[#allocation2 + $0x91] sm:$0xff]  ;;  %v3077_v8 = vld [vmem:[#allocation2 + $0x69] sm:$0xff]  ;;  %vm1870_vm7 = vcmask 162816  }
  0x2f   : > { %759 = vrot.lane.b32.xlu0 %v3014_v27, %s2810_s26  ;;  %753 = vrot.lane.b32.xlu1 %v3016_v28, %s2810_s26  ;;  %420 = vst.msk [vmem:[#allocation2 + $0x151] sm:$0xff] %vm347_vm0, %v341_v62  ;;  %417 = vst.msk [vmem:[#allocation2 + $0x129] sm:$0xff] %vm347_vm0, %v338_v63  ;;  %v472_v9 = vld [vmem:[#allocation2 + $0xa9] sm:$0xff]  ;;  %v3082_v10 = vld [vmem:[#allocation2 + $0x81] sm:$0xff]  ;;  %vm1903_vm8 = vcmask 195584   ;;  %vm1936_vm9 = vcmask 228352  }
  0x30   : > { %422 = vst.msk [vmem:[#allocation2 + $0x169] sm:$0xff] %vm347_vm0, %v343_v4  ;;  %419 = vst.msk [vmem:[#allocation2 + $0x141] sm:$0xff] %vm347_vm0, %v340_v5  ;;  %v474_v11 = vld [vmem:[#allocation2 + $0xc1] sm:$0xff]  ;;  %v3087_v12 = vld [vmem:[#allocation2 + $0x99] sm:$0xff]  ;;  %vm1969_vm10 = vcmask 261120   ;;  %vm2007_vm11 = vcmask 293888  }
  0x31   : > { %421 = vst.msk [vmem:[#allocation2 + $0x159] sm:$0xff] %vm347_vm0, %v342_v6  ;;  %423 = vst.msk [vmem:[#allocation2 + $0x171] sm:$0xff] %vm347_vm0, %v344_v7  ;;  %v476_v13 = vld [vmem:[#allocation2 + $0xd9] sm:$0xff]  ;;  %v473_v14 = vld [vmem:[#allocation2 + $0xb1] sm:$0xff]  ;;  %vm2535_vm12 = vcmask 1040384  }
  0x32   : > { %v478_v15 = vld [vmem:[#allocation2 + $0xf1] sm:$0xff]  ;;  %v475_v18 = vld [vmem:[#allocation2 + $0xc9] sm:$0xff]  ;;  %v3108_v33 = vld [vmem:[#allocation2 + $0x1a] sm:$0xff] }
  0x33   : > { %763 = vrot.lane.b32.xlu0 %v3040_v49, %s2810_s26  ;;  %757 = vrot.lane.b32.xlu1 %v3042_v50, %s2810_s26  ;;  %v480_v19 = vld [vmem:[#allocation2 + $0x109] sm:$0xff]  ;;  %v477_v20 = vld [vmem:[#allocation2 + $0xe1] sm:$0xff]  ;;  %v3113_v35 = vld [vmem:[#allocation2 + $0x32] sm:$0xff] }
  0x34   : > { %v482_v21 = vld [vmem:[#allocation2 + $0x121] sm:$0xff]  ;;  %v479_v22 = vld [vmem:[#allocation2 + $0xf9] sm:$0xff]  ;;  %v491_v36 = vld [vmem:[#allocation2 + $0xa] sm:$0xff] }
  0x35   : > { %v484_v23 = vld [vmem:[#allocation2 + $0x139] sm:$0xff]  ;;  %v481_v24 = vld [vmem:[#allocation2 + $0x111] sm:$0xff]  ;;  %v3120_v38 = vld [vmem:[#allocation2 + $0x22] sm:$0xff] }
  0x36   : > { %v486_v25 = vld [vmem:[#allocation2 + $0x151] sm:$0xff]  ;;  %v483_v26 = vld [vmem:[#allocation2 + $0x129] sm:$0xff]  ;;  %v3128_v40 = vld [vmem:[#allocation2 + $0x3a] sm:$0xff] }
  0x37   : > { %767 = vrot.lane.b32.xlu0 %v3063_v0, %s2810_s26  ;;  %761 = vrot.lane.b32.xlu1 %v3065_v3, %s2810_s26  ;;  %v488_v29 = vld [vmem:[#allocation2 + $0x169] sm:$0xff]  ;;  %v485_v30 = vld [vmem:[#allocation2 + $0x141] sm:$0xff]  ;;  %v3136_v42 = vld [vmem:[#allocation2 + $0x52] sm:$0xff] }
  0x38   : > { %v487_v32 = vld [vmem:[#allocation2 + $0x159] sm:$0xff]  ;;  %v489_v34 = vld [vmem:[#allocation2 + $0x171] sm:$0xff]  ;;  %v3126_v39 = vld [vmem:[#allocation2 + $0x62] sm:$0xff] }
  0x39   : > { %v3118_v37 = vld [vmem:[#allocation2 + $0x4a] sm:$0xff]  ;;  %v3134_v41 = vld [vmem:[#allocation2 + $0x7a] sm:$0xff]  ;;  %v3142_v43 = vld [vmem:[#allocation2 + $0x92] sm:$0xff] }
  0x3a   : > { %v3144_v44 = vld [vmem:[#allocation2 + $0x6a] sm:$0xff]  ;;  %v3152_v46 = vld [vmem:[#allocation2 + $0x82] sm:$0xff]  ;;  %v3160_v48 = vld [vmem:[#allocation2 + $0x9a] sm:$0xff] }
  0x3b   : > { %771 = vrot.lane.b32.xlu0 %v470_v2, %s2810_s26  ;;  %765 = vrot.lane.b32.xlu1 %v3077_v8, %s2810_s26  ;;  %v3150_v45 = vld [vmem:[#allocation2 + $0xaa] sm:$0xff]  ;;  %v3158_v47 = vld [vmem:[#allocation2 + $0xc2] sm:$0xff]  ;;  %v3166_v51 = vld [vmem:[#allocation2 + $0xda] sm:$0xff] }
  0x3c   : > { %v3168_v52 = vld [vmem:[#allocation2 + $0xb2] sm:$0xff]  ;;  %v3174_v54 = vld [vmem:[#allocation2 + $0xca] sm:$0xff]  ;;  %v3179_v56 = vld [vmem:[#allocation2 + $0xe2] sm:$0xff] }
  0x3d   : > { %v510_v53 = vld [vmem:[#allocation2 + $0xf2] sm:$0xff]  ;;  %v512_v55 = vld [vmem:[#allocation2 + $0x10a] sm:$0xff]  ;;  %v514_v57 = vld [vmem:[#allocation2 + $0x122] sm:$0xff] }
  0x3e   : > { %v511_v58 = vld [vmem:[#allocation2 + $0xfa] sm:$0xff]  ;;  %v513_v61 = vld [vmem:[#allocation2 + $0x112] sm:$0xff]  ;;  %v515_v1 = vld [vmem:[#allocation2 + $0x12a] sm:$0xff] }
  0x3f   : > { %775 = vrot.lane.b32.xlu0 %v472_v9, %s2810_s26  ;;  %769 = vrot.lane.b32.xlu1 %v3082_v10, %s2810_s26  ;;  %v516_v60 = vld [vmem:[#allocation2 + $0x13a] sm:$0xff]  ;;  %v518_v63 = vld [vmem:[#allocation2 + $0x152] sm:$0xff]  ;;  %v520_v4 = vld [vmem:[#allocation2 + $0x16a] sm:$0xff] }
  0x40   : > { %v517_v5 = vld [vmem:[#allocation2 + $0x142] sm:$0xff]  ;;  %v519_v2 = vld [vmem:[#allocation2 + $0x15a] sm:$0xff] }
  0x43   : > { %779 = vrot.lane.b32.xlu0 %v474_v11, %s2810_s26  ;;  %773 = vrot.lane.b32.xlu1 %v3087_v12, %s2810_s26 }
  0x47   : > { %783 = vrot.lane.b32.xlu0 %v476_v13, %s2810_s26  ;;  %777 = vrot.lane.b32.xlu1 %v473_v14, %s2810_s26  ;;  %v3204_v13 = vld [vmem:[#allocation2 + $0x18] sm:$0xff] }
  0x48   : > { %v521_v14 = vld [vmem:[#allocation2 + $0x172] sm:$0xff] }
  0x4b   : > { %787 = vrot.lane.b32.xlu0 %v478_v15, %s2810_s26  ;;  %781 = vrot.lane.b32.xlu1 %v475_v18, %s2810_s26 }
  0x4f   : > { %791 = vrot.lane.b32.xlu0 %v480_v19, %s2810_s26  ;;  %785 = vrot.lane.b32.xlu1 %v477_v20, %s2810_s26  ;;  %v3213_v19 = vld [vmem:[#allocation2 + $0x30] sm:$0xff] }
  0x53   : > { %795 = vrot.lane.b32.xlu0 %v482_v21, %s2810_s26  ;;  %789 = vrot.lane.b32.xlu1 %v479_v22, %s2810_s26  ;;  %v3222_v22 = vld [vmem:[#allocation2 + $0x48] sm:$0xff] }
  0x57   : > { %799 = vrot.lane.b32.xlu0 %v484_v23, %s2810_s26  ;;  %793 = vrot.lane.b32.xlu1 %v481_v24, %s2810_s26  ;;  %v3224_v23 = vld [vmem:[#allocation2 + $0x20] sm:$0xff] }
  0x5b   : > { %803 = vrot.lane.b32.xlu0 %v486_v25, %s2810_s26  ;;  %797 = vrot.lane.b32.xlu1 %v483_v26, %s2810_s26  ;;  %v3234_v26 = vld [vmem:[#allocation2 + $0x60] sm:$0xff] }
  0x5f   : > { %807 = vrot.lane.b32.xlu0 %v488_v29, %s2810_s26  ;;  %801 = vrot.lane.b32.xlu1 %v485_v30, %s2810_s26  ;;  %v3236_v29 = vld [vmem:[#allocation2 + $0x38] sm:$0xff] }
  0x63   : > { %875 = vrot.lane.b32.xlu0 %v490_v31, %s2811_s27  ;;  %805 = vrot.lane.b32.xlu1 %v487_v32, %s2810_s26  ;;  %v3246_v32 = vld [vmem:[#allocation2 + $0x78] sm:$0xff] }
  0x67   : > { %879 = vrot.lane.b32.xlu0 %v3108_v33, %s2811_s27  ;;  %809 = vrot.lane.b32.xlu1 %v489_v34, %s2810_s26  ;;  %v3248_v34 = vld [vmem:[#allocation2 + $0x50] sm:$0xff] }
  0x6b   : > { %883 = vrot.lane.b32.xlu0 %v3113_v35, %s2811_s27  ;;  %877 = vrot.lane.b32.xlu1 %v491_v36, %s2811_s27 }
  0x6f   : > { %887 = vrot.lane.b32.xlu0 %v3118_v37, %s2811_s27  ;;  %881 = vrot.lane.b32.xlu1 %v3120_v38, %s2811_s27 }
  0x73   : > { %891 = vrot.lane.b32.xlu0 %v3126_v39, %s2811_s27  ;;  %885 = vrot.lane.b32.xlu1 %v3128_v40, %s2811_s27 }
  0x77   : > { %895 = vrot.lane.b32.xlu0 %v3134_v41, %s2811_s27  ;;  %889 = vrot.lane.b32.xlu1 %v3136_v42, %s2811_s27 }
  0x7b   : > { %899 = vrot.lane.b32.xlu0 %v3142_v43, %s2811_s27  ;;  %893 = vrot.lane.b32.xlu1 %v3144_v44, %s2811_s27 }
  0x7f   : > { %903 = vrot.lane.b32.xlu0 %v3150_v45, %s2811_s27  ;;  %897 = vrot.lane.b32.xlu1 %v3152_v46, %s2811_s27 }
  0x83   : > { %907 = vrot.lane.b32.xlu0 %v3158_v47, %s2811_s27  ;;  %901 = vrot.lane.b32.xlu1 %v3160_v48, %s2811_s27 }
  0x87   : > { %911 = vrot.lane.b32.xlu0 %v3166_v51, %s2811_s27  ;;  %905 = vrot.lane.b32.xlu1 %v3168_v52, %s2811_s27 }
  0x88   : > { %v3184_v59 = vpop.permute.xlu0 %747 }
  0x8b   : > { %915 = vrot.lane.b32.xlu0 %v510_v53, %s2811_s27  ;;  %909 = vrot.lane.b32.xlu1 %v3174_v54, %s2811_s27 }
  0x8c   : > { %v3190_v62 = vpop.permute.xlu0 %749 }
  0x8f   : > { %919 = vrot.lane.b32.xlu0 %v512_v55, %s2811_s27  ;;  %913 = vrot.lane.b32.xlu1 %v3179_v56, %s2811_s27  ;;  %v3258_v55 = vld [vmem:[#allocation2 + $0x90] sm:$0xff] }
  0x90   : > { %4279 = vst [vmem:[#allocation7_spill] sm:$0xff] %v3258_v55 }
  0x93   : > { %923 = vrot.lane.b32.xlu0 %v514_v57, %s2811_s27  ;;  %917 = vrot.lane.b32.xlu1 %v511_v58, %s2811_s27  ;;  %v3260_v57 = vld [vmem:[#allocation2 + $0x68] sm:$0xff] }
  0x97   : > { %927 = vrot.lane.b32.xlu0 %v516_v60, %s2811_s27  ;;  %921 = vrot.lane.b32.xlu1 %v513_v61, %s2811_s27  ;;  %v3270_v61 = vld [vmem:[#allocation2 + $0xa8] sm:$0xff] }
  0x98   : > { %4282 = vst [vmem:[#allocation10_spill] sm:$0xff] %v3270_v61 }
  0x9b   : > { %931 = vrot.lane.b32.xlu0 %v518_v63, %s2811_s27  ;;  %925 = vrot.lane.b32.xlu1 %v515_v1, %s2811_s27  ;;  %v3272_v63 = vld [vmem:[#allocation2 + $0x80] sm:$0xff] }
  0x9d   : > { %v3194_v6 = vpop.permute.xlu0 %755  ;;  %v3196_v7 = vpop.permute.xlu1 %751 }
  0x9f   : > { %935 = vrot.lane.b32.xlu0 %v520_v4, %s2811_s27  ;;  %929 = vrot.lane.b32.xlu1 %v517_v5, %s2811_s27  ;;  %v3282_v5 = vld [vmem:[#allocation2 + $0x98] sm:$0xff] }
  0xa0   : > { %4285 = vst [vmem:[#allocation13_spill] sm:$0xff] %v3282_v5 }
  0xa1   : > { %v3200_v9 = vpop.permute.xlu0 %759  ;;  %v3202_v11 = vpop.permute.xlu1 %753 }
  0xa3   : > { %1003 = vrot.lane.b32.xlu0 %v3204_v13, %s2812_s28  ;;  %933 = vrot.lane.b32.xlu1 %v519_v2, %s2811_s27  ;;  %v2002_v2 = vld [vmem:[%s4267_s2] sm:$0xff] }
  0xa5   : > { %v3209_v15 = vpop.permute.xlu0 %763  ;;  %v3211_v18 = vpop.permute.xlu1 %757 }
  0xa7   : > { %1007 = vrot.lane.b32.xlu0 %v3213_v19, %s2812_s28  ;;  %937 = vrot.lane.b32.xlu1 %v521_v14, %s2811_s27  ;;  %v2003_v14 = vld [vmem:[%s4267_s2 + $0x8] sm:$0xff]  ;;  %s3980_s27 = scalar_lea.vmem %s4268_s3, %s2671_s18  ;;  %s2633_s18 = sshll.u32 %s4376_s16, 1 }
  0xa8   : > { %s208_s30 = scalar_lea.vmem %s4269_s4, %s2633_s18 }
  0xa9   : > { %v3218_v20 = vpop.permute.xlu0 %767  ;;  %v3220_v21 = vpop.permute.xlu1 %761 }
  0xab   : > { %1011 = vrot.lane.b32.xlu0 %v3222_v22, %s2812_s28  ;;  %1005 = vrot.lane.b32.xlu1 %v3224_v23, %s2812_s28 }
  0xad   : > { %v3230_v24 = vpop.permute.xlu0 %771  ;;  %v3232_v25 = vpop.permute.xlu1 %765 }
  0xae   : > { %4275 = vst [vmem:[#allocation3_spill] sm:$0xff] %v3230_v24  ;;  %v3535_v24 = vld [vmem:[#allocation2 + $0xc0] sm:$0xff] }
  0xaf   : > { %1015 = vrot.lane.b32.xlu0 %v3234_v26, %s2812_s28  ;;  %1009 = vrot.lane.b32.xlu1 %v3236_v29, %s2812_s28 }
  0xb1   : > { %v3242_v30 = vpop.permute.xlu0 %775  ;;  %v3244_v31 = vpop.permute.xlu1 %769 }
  0xb2   : > { %4276 = vst [vmem:[#allocation4_spill] sm:$0xff] %v3242_v30 }
  0xb3   : > { %1019 = vrot.lane.b32.xlu0 %v3246_v32, %s2812_s28  ;;  %1013 = vrot.lane.b32.xlu1 %v3248_v34, %s2812_s28 }
  0xb5   : > { %v3254_v36 = vpop.permute.xlu0 %779  ;;  %v3256_v53 = vpop.permute.xlu1 %773 }
  0xb6   : > { %4277 = vst [vmem:[#allocation5_spill] sm:$0xff] %v3254_v36  ;;  %4278 = vst [vmem:[#allocation6_spill] sm:$0xff] %v3256_v53  ;;  %v3298_v36 = vld [vmem:[#allocation2 + $0xb0] sm:$0xff] }
  0xb7   : > { %1023 = vrot.lane.b32.xlu0 %v3258_v55, %s2812_s28  ;;  %1017 = vrot.lane.b32.xlu1 %v3260_v57, %s2812_s28  ;;  %4288 = vst [vmem:[#allocation16_spill] sm:$0xff] %v3298_v36 }
  0xb9   : > { %v3266_v58 = vpop.permute.xlu0 %783  ;;  %v3268_v60 = vpop.permute.xlu1 %777 }
  0xba   : > { %4280 = vst [vmem:[#allocation8_spill] sm:$0xff] %v3266_v58  ;;  %4281 = vst [vmem:[#allocation9_spill] sm:$0xff] %v3268_v60 }
  0xbb   : > { %1027 = vrot.lane.b32.xlu0 %v3270_v61, %s2812_s28  ;;  %1021 = vrot.lane.b32.xlu1 %v3272_v63, %s2812_s28 }
  0xbd   : > { %v3278_v1 = vpop.permute.xlu0 %787  ;;  %v3280_v4 = vpop.permute.xlu1 %781 }
  0xbe   : > { %4283 = vst [vmem:[#allocation11_spill] sm:$0xff] %v3278_v1  ;;  %4284 = vst [vmem:[#allocation12_spill] sm:$0xff] %v3280_v4  ;;  %v2768_v1 = vpack.c.bf16 %v2003_v14, %v2002_v2  ;;  %v2005_v2 = vld [vmem:[%s4267_s2 + $0x18] sm:$0xff] }
  0xbf   : > { %1131 = vrot.lane.b32.xlu0 %v2996_v17, %s2813_s29  ;;  %1025 = vrot.lane.b32.xlu1 %v3282_v5, %s2812_s28  ;;  %v2004_v17 = vld [vmem:[%s4267_s2 + $0x10] sm:$0xff] }
  0xc0   : > { %2769 = vmatprep.subr.bf16.mxu0 %v2768_v1  ;;  %2776 = vmatprep.subr.bf16.mxu1 %v2768_v1  ;;  %v2772_v14 = vpack.c.bf16 %v2005_v2, %v2004_v17 }
  0xc1   : > { %v3294_v58 = vpop.permute.xlu0 %791  ;;  %v3296_v4 = vpop.permute.xlu1 %785  ;;  %2771 = vmatpush3.bf16.msra.mxu0 %v2768_v1  ;;  %2779 = vmatpush3.bf16.msra.mxu1 %v2768_v1  ;;  %v2006_v1 = vld [vmem:[%s4267_s2 + $0x20] sm:$0xf] }
  0xc2   : > { %4286 = vst [vmem:[#allocation14_spill] sm:$0xff] %v3294_v58  ;;  %4287 = vst [vmem:[#allocation15_spill] sm:$0xff] %v3296_v4  ;;  %2773 = vmatprep.subr.bf16.mxu0 %v2772_v14  ;;  %2777 = vmatprep.subr.bf16.mxu1 %v2772_v14 }
  0xc3   : > { %1259 = vrot.lane.b32.xlu0 %v3108_v33, %s2814_s8  ;;  %1029 = vrot.lane.b32.xlu1 %v3298_v36, %s2812_s28 }
  0xc5   : > { %v3310_v58 = vpop.permute.xlu0 %795  ;;  %v3312_v4 = vpop.permute.xlu1 %789  ;;  %2775 = vmatpush3.bf16.msra.mxu0 %v2772_v14  ;;  %2780 = vmatpush3.bf16.msra.mxu1 %v2772_v14 }
  0xc6   : > { %4289 = vst [vmem:[#allocation17_spill] sm:$0xff] %v3310_v58  ;;  %4290 = vst [vmem:[#allocation18_spill] sm:$0xff] %v3312_v4  ;;  %2718 = vmatprep.subr.msk.mxu0 %vm2104_vm3, %v2006_v1  ;;  %2778 = vmatprep.subr.msk.mxu1 %vm2104_vm3, %v2006_v1 }
  0xc7   : > { %1387 = vrot.lane.b32.xlu0 %v3213_v19, %s2815_s13  ;;  %1133 = vrot.lane.b32.xlu1 %v3016_v28, %s2813_s29 }
  0xc9   : > { %v3318_v33 = vpop.permute.xlu0 %799  ;;  %v3320_v60 = vpop.permute.xlu1 %793  ;;  %2719 = vmatpush3.msk.msra.mxu0 %vm2104_vm3, %v2006_v1  ;;  %2781 = vmatpush3.msk.msra.mxu1 %vm2104_vm3, %v2006_v1 }
  0xca   : > { %4291 = vst [vmem:[#allocation19_spill] sm:$0xff] %v3318_v33  ;;  %4292 = vst [vmem:[#allocation20_spill] sm:$0xff] %v3320_v60 }
  0xcb   : > { %1515 = vrot.lane.b32.xlu0 %v2994_v16, %s2816_s19  ;;  %1261 = vrot.lane.b32.xlu1 %v3120_v38, %s2814_s8 }
  0xcd   : > { %v3329_v28 = vpop.permute.xlu0 %803  ;;  %v3331_v17 = vpop.permute.xlu1 %797 }
  0xce   : > { %4293 = vst [vmem:[#allocation21_spill] sm:$0xff] %v3329_v28  ;;  %4294 = vst [vmem:[#allocation22_spill] sm:$0xff] %v3331_v17 }
  0xcf   : > { %1517 = vrot.lane.b32.xlu0 %v3042_v50, %s2816_s19  ;;  %1389 = vrot.lane.b32.xlu1 %v3236_v29, %s2815_s13 }
  0xd1   : > { %v3337_v2 = vpop.permute.xlu0 %807  ;;  %v3339_v14 = vpop.permute.xlu1 %801 }
  0xd2   : > { %4295 = vst [vmem:[#allocation23_spill] sm:$0xff] %v3337_v2  ;;  %4296 = vst [vmem:[#allocation24_spill] sm:$0xff] %v3339_v14 }
  0xd3   : > { %1137 = vrot.lane.b32.xlu0 %v3042_v50, %s2813_s29  ;;  %1135 = vrot.lane.b32.xlu1 %v2994_v16, %s2813_s29 }
  0xd5   : > { %v3345_v38 = vpop.permute.xlu0 %875  ;;  %v3347_v1 = vpop.permute.xlu1 %805 }
  0xd6   : > { %4297 = vst [vmem:[#allocation25_spill] sm:$0xff] %v3347_v1 }
  0xd7   : > { %1645 = vrot.lane.b32.xlu0 %v3128_v40, %s2817_s20  ;;  %1643 = vrot.lane.b32.xlu1 %v3113_v35, %s2817_s20 }
  0xd9   : > { %v3353_v2 = vpop.permute.xlu0 %879  ;;  %v3355_v28 = vpop.permute.xlu1 %809 }
  0xda   : > { %4298 = vst [vmem:[#allocation26_spill] sm:$0xff] %v3355_v28 }
  0xdb   : > { %1391 = vrot.lane.b32.xlu0 %v3222_v22, %s2815_s13  ;;  %1263 = vrot.lane.b32.xlu1 %v3113_v35, %s2814_s8 }
  0xdd   : > { %v3361_v16 = vpop.permute.xlu0 %883  ;;  %v3363_v50 = vpop.permute.xlu1 %877 }
  0xdf   : > { %1519 = vrot.lane.b32.xlu0 %v3014_v27, %s2816_s19  ;;  %1265 = vrot.lane.b32.xlu1 %v3128_v40, %s2814_s8 }
  0xe1   : > { %v3369_v1 = vpop.permute.xlu0 %887  ;;  %v3371_v33 = vpop.permute.xlu1 %881 }
  0xe3   : > { %1521 = vrot.lane.b32.xlu0 %v3065_v3, %s2816_s19  ;;  %1393 = vrot.lane.b32.xlu1 %v3248_v34, %s2815_s13 }
  0xe5   : > { %v3377_v35 = vpop.permute.xlu0 %891  ;;  %v3379_v28 = vpop.permute.xlu1 %885 }
  0xe7   : > { %1141 = vrot.lane.b32.xlu0 %v3065_v3, %s2813_s29  ;;  %1139 = vrot.lane.b32.xlu1 %v3014_v27, %s2813_s29 }
  0xe9   : > { %v3385_v40 = vpop.permute.xlu0 %895  ;;  %v3387_v14 = vpop.permute.xlu1 %889 }
  0xea   : > { %4299 = vst [vmem:[#allocation27_spill] sm:$0xff] %v3385_v40 }
  0xeb   : > { %1649 = vrot.lane.b32.xlu0 %v3136_v42, %s2817_s20  ;;  %1647 = vrot.lane.b32.xlu1 %v3118_v37, %s2817_s20 }
  0xed   : > { %v3393_v58 = vpop.permute.xlu0 %899  ;;  %v3395_v17 = vpop.permute.xlu1 %893 }
  0xee   : > { %4300 = vst [vmem:[#allocation28_spill] sm:$0xff] %v3393_v58 }
  0xef   : > { %1395 = vrot.lane.b32.xlu0 %v3234_v26, %s2815_s13  ;;  %1267 = vrot.lane.b32.xlu1 %v3118_v37, %s2814_s8 }
  0xf1   : > { %v3401_v27 = vpop.permute.xlu0 %903  ;;  %v3403_v3 = vpop.permute.xlu1 %897 }
  0xf2   : > { %4301 = vst [vmem:[#allocation29_spill] sm:$0xff] %v3401_v27  ;;  %4302 = vst [vmem:[#allocation30_spill] sm:$0xff] %v3403_v3 }
  0xf3   : > { %1523 = vrot.lane.b32.xlu0 %v3040_v49, %s2816_s19  ;;  %1269 = vrot.lane.b32.xlu1 %v3136_v42, %s2814_s8 }
  0xf5   : > { %v3409_v60 = vpop.permute.xlu0 %907  ;;  %v3411_v4 = vpop.permute.xlu1 %901 }
  0xf6   : > { %4303 = vst [vmem:[#allocation31_spill] sm:$0xff] %v3409_v60  ;;  %4304 = vst [vmem:[#allocation32_spill] sm:$0xff] %v3411_v4 }
  0xf7   : > { %1525 = vrot.lane.b32.xlu0 %v3077_v8, %s2816_s19  ;;  %1397 = vrot.lane.b32.xlu1 %v3260_v57, %s2815_s13 }
  0xf9   : > { %v3417_v37 = vpop.permute.xlu0 %911  ;;  %v3419_v27 = vpop.permute.xlu1 %905 }
  0xfa   : > { %4305 = vst [vmem:[#allocation33_spill] sm:$0xff] %v3417_v37  ;;  %4306 = vst [vmem:[#allocation34_spill] sm:$0xff] %v3419_v27  ;;  %v662_v27 = vld [vmem:[#allocation2 + $0xb1] sm:$0xff] }
  0xfb   : > { %1145 = vrot.lane.b32.xlu0 %v3077_v8, %s2813_s29  ;;  %1143 = vrot.lane.b32.xlu1 %v3040_v49, %s2813_s29 }
  0xfd   : > { %v3425_v42 = vpop.permute.xlu0 %915  ;;  %v3427_v60 = vpop.permute.xlu1 %909 }
  0xfe   : > { %4307 = vst [vmem:[#allocation35_spill] sm:$0xff] %v3425_v42  ;;  %4308 = vst [vmem:[#allocation36_spill] sm:$0xff] %v3427_v60 }
  0xff   : > { %1653 = vrot.lane.b32.xlu0 %v3144_v44, %s2817_s20  ;;  %1651 = vrot.lane.b32.xlu1 %v3126_v39, %s2817_s20 }
 0x101   : > { %v3433_v30 = vpop.permute.xlu0 %919  ;;  %v3435_v37 = vpop.permute.xlu1 %913 }
 0x102   : > { %4309 = vst [vmem:[#allocation37_spill] sm:$0xff] %v3433_v30  ;;  %4310 = vst [vmem:[#allocation38_spill] sm:$0xff] %v3435_v37 }
 0x103   : > { %1399 = vrot.lane.b32.xlu0 %v3246_v32, %s2815_s13  ;;  %1271 = vrot.lane.b32.xlu1 %v3126_v39, %s2814_s8  ;;  %v562_v39 = vld [vmem:[#allocation2 + $0x79] sm:$0xff] }
 0x105   : > { %v3441_v49 = vpop.permute.xlu0 %923  ;;  %v3443_v8 = vpop.permute.xlu1 %917 }
 0x106   : > { %4311 = vst [vmem:[#allocation39_spill] sm:$0xff] %v3441_v49  ;;  %4312 = vst [vmem:[#allocation40_spill] sm:$0xff] %v3443_v8 }
 0x107   : > { %1527 = vrot.lane.b32.xlu0 %v3063_v0, %s2816_s19  ;;  %1273 = vrot.lane.b32.xlu1 %v3144_v44, %s2814_s8 }
 0x109   : > { %v3449_v42 = vpop.permute.xlu0 %927  ;;  %v3451_v30 = vpop.permute.xlu1 %921 }
 0x10a   : > { %4313 = vst [vmem:[#allocation41_spill] sm:$0xff] %v3449_v42  ;;  %4314 = vst [vmem:[#allocation42_spill] sm:$0xff] %v3451_v30 }
 0x10b   : > { %1529 = vrot.lane.b32.xlu0 %v3082_v10, %s2816_s19  ;;  %1401 = vrot.lane.b32.xlu1 %v3272_v63, %s2815_s13 }
 0x10d   : > { %v3457_v49 = vpop.permute.xlu0 %931  ;;  %v3459_v8 = vpop.permute.xlu1 %925 }
 0x10e   : > { %4315 = vst [vmem:[#allocation43_spill] sm:$0xff] %v3457_v49  ;;  %4316 = vst [vmem:[#allocation44_spill] sm:$0xff] %v3459_v8 }
 0x10f   : > { %1149 = vrot.lane.b32.xlu0 %v3082_v10, %s2813_s29  ;;  %1147 = vrot.lane.b32.xlu1 %v562_v39, %s2813_s29  ;;  %v659_v10 = vld [vmem:[#allocation2 + $0x91] sm:$0xff] }
 0x111   : > { %v3464_v0 = vpop.permute.xlu0 %935  ;;  %v3466_v44 = vpop.permute.xlu1 %929 }
 0x112   : > { %4317 = vst [vmem:[#allocation45_spill] sm:$0xff] %v3464_v0  ;;  %4318 = vst [vmem:[#allocation46_spill] sm:$0xff] %v3466_v44 }
 0x113   : > { %1657 = vrot.lane.b32.xlu0 %v3152_v46, %s2817_s20  ;;  %1655 = vrot.lane.b32.xlu1 %v3134_v41, %s2817_s20 }
 0x115   : > { %v3472_v42 = vpop.permute.xlu0 %1003  ;;  %v3474_v49 = vpop.permute.xlu1 %933 }
 0x116   : > { %4319 = vst [vmem:[#allocation47_spill] sm:$0xff] %v3474_v49 }
 0x117   : > { %1403 = vrot.lane.b32.xlu0 %v3258_v55, %s2815_s13  ;;  %1275 = vrot.lane.b32.xlu1 %v3134_v41, %s2814_s8  ;;  %v565_v41 = vld [vmem:[#allocation2 + $0x99] sm:$0xff]  ;;  %v427_v55 = vld [vmem:[#allocation2 + $0x8] sm:$0xff] }
 0x119   : > { %v3480_v39 = vpop.permute.xlu0 %1007  ;;  %v3482_v0 = vpop.permute.xlu1 %937 }
 0x11a   : > { %4320 = vst [vmem:[#allocation48_spill] sm:$0xff] %v3482_v0 }
 0x11b   : > { %1531 = vrot.lane.b32.xlu0 %v659_v10, %s2816_s19  ;;  %1277 = vrot.lane.b32.xlu1 %v3152_v46, %s2814_s8 }
 0x11d   : > { %v3487_v44 = vpop.permute.xlu0 %1011  ;;  %v1006_v8 = vpop.permute.xlu1 %1005 }
 0x11f   : > { %1533 = vrot.lane.b32.xlu0 %v3087_v12, %s2816_s19  ;;  %1405 = vrot.lane.b32.xlu1 %v3282_v5, %s2815_s13 }
 0x121   : > { %v3493_v49 = vpop.permute.xlu0 %1015  ;;  %v3495_v30 = vpop.permute.xlu1 %1009 }
 0x123   : > { %1153 = vrot.lane.b32.xlu0 %v565_v41, %s2813_s29  ;;  %1151 = vrot.lane.b32.xlu1 %v659_v10, %s2813_s29  ;;  %v661_v10 = vld [vmem:[#allocation2 + $0xa9] sm:$0xff] }
 0x125   : > { %v3499_v0 = vpop.permute.xlu0 %1019  ;;  %v3501_v46 = vpop.permute.xlu1 %1013 }
 0x127   : > { %1661 = vrot.lane.b32.xlu0 %v3160_v48, %s2817_s20  ;;  %1659 = vrot.lane.b32.xlu1 %v3142_v43, %s2817_s20 }
 0x129   : > { %v3507_v12 = vpop.permute.xlu0 %1023  ;;  %v3509_v37 = vpop.permute.xlu1 %1017 }
 0x12a   : > { %4321 = vst [vmem:[#allocation49_spill] sm:$0xff] %v3507_v12 }
 0x12b   : > { %1407 = vrot.lane.b32.xlu0 %v3270_v61, %s2815_s13  ;;  %1279 = vrot.lane.b32.xlu1 %v3142_v43, %s2814_s8 }
 0x12d   : > { %v3515_v41 = vpop.permute.xlu0 %1027  ;;  %v3517_v60 = vpop.permute.xlu1 %1021 }
 0x12e   : > { %4322 = vst [vmem:[#allocation50_spill] sm:$0xff] %v3515_v41 }
 0x12f   : > { %1535 = vrot.lane.b32.xlu0 %v661_v10, %s2816_s19  ;;  %1281 = vrot.lane.b32.xlu1 %v3160_v48, %s2814_s8 }
 0x131   : > { %v1132_v4 = vpop.permute.xlu0 %1131  ;;  %v3522_v58 = vpop.permute.xlu1 %1025 }
 0x132   : > { %4323 = vst [vmem:[#allocation51_spill] sm:$0xff] %v3522_v58  ;;  %v3543_v58 = vld [vmem:[#allocation2 + $0xc8] sm:$0xff] }
 0x133   : > { %1537 = vrot.lane.b32.xlu0 %v662_v27, %s2816_s19  ;;  %1409 = vrot.lane.b32.xlu1 %v3298_v36, %s2815_s13 }
 0x135   : > { %v1260_v43 = vpop.permute.xlu0 %1259  ;;  %v3527_v61 = vpop.permute.xlu1 %1029 }
 0x136   : > { %4324 = vst [vmem:[#allocation52_spill] sm:$0xff] %v3527_v61 }
 0x137   : > { %1157 = vrot.lane.b32.xlu0 %v662_v27, %s2813_s29  ;;  %1155 = vrot.lane.b32.xlu1 %v661_v10, %s2813_s29  ;;  %v426_v27 = vld [vmem:[#allocation2] sm:$0xff]  ;;  %v1740_v10 = vsel %vm347_vm0, %v427_v55, %v3190_v62 }
 0x138   : > { %v1773_v12 = vsel %vm1771_vm4, %v1740_v10, %v3363_v50  ;;  %v1739_v3 = vsel %vm347_vm0, %v426_v27, %v3184_v59 }
 0x139   : > { %v1388_v41 = vpop.permute.xlu0 %1387  ;;  %v1134_v5 = vpop.permute.xlu1 %1133  ;;  %v1806_v40 = vsel %vm1804_vm5, %v1773_v12, %v1006_v8 }
 0x13a   : > { %v1839_v62 = vsel %vm1837_vm6, %v1806_v40, %v1134_v5 }
 0x13b   : > { %1665 = vrot.lane.b32.xlu0 %v3168_v52, %s2817_s20  ;;  %1663 = vrot.lane.b32.xlu1 %v3150_v45, %s2817_s20 }
 0x13d   : > { %v1516_v48 = vpop.permute.xlu0 %1515  ;;  %v1262_v53 = vpop.permute.xlu1 %1261 }
 0x13e   : > { %v1872_v59 = vsel %vm1870_vm7, %v1839_v62, %v1262_v53  ;;  %v663_v53 = vld [vmem:[#allocation2 + $0xc1] sm:$0xff]  ;;  %v1742_v62 = vsel %vm347_vm0, %v3224_v23, %v3202_v11 }
 0x13f   : > { %1411 = vrot.lane.b32.xlu0 %v3535_v24, %s2815_s13  ;;  %1283 = vrot.lane.b32.xlu1 %v3150_v45, %s2814_s8  ;;  %v1772_v45 = vsel %vm1771_vm4, %v1739_v3, %v3345_v38  ;;  %v664_v38 = vld [vmem:[#allocation2 + $0xc9] sm:$0xff] }
 0x140   : > { %v1805_v55 = vsel %vm1804_vm5, %v1772_v45, %v3472_v42  ;;  %v1741_v45 = vsel %vm347_vm0, %v3204_v13, %v3196_v7 }
 0x141   : > { %v1518_v36 = vpop.permute.xlu0 %1517  ;;  %v1390_v61 = vpop.permute.xlu1 %1389  ;;  %v1838_v12 = vsel %vm1837_vm6, %v1805_v55, %v1132_v4 }
 0x142   : > { %v1905_v27 = vsel %vm1903_vm8, %v1872_v59, %v1390_v61 }
 0x143   : > { %1413 = vrot.lane.b32.xlu0 %v3543_v58, %s2815_s13  ;;  %1285 = vrot.lane.b32.xlu1 %v3168_v52, %s2814_s8  ;;  %v1871_v52 = vsel %vm1870_vm7, %v1838_v12, %v1260_v43  ;;  %v1938_v4 = vsel %vm1936_vm9, %v1905_v27, %v1518_v36  ;;  %v3588_v12 = vld [vmem:[#allocation2 + $0xd8] sm:$0xff]  ;;  %v1774_v27 = vsel %vm1771_vm4, %v1741_v45, %v3353_v2 }
 0x144   : > { %v1904_v5 = vsel %vm1903_vm8, %v1871_v52, %v1388_v41  ;;  %v1775_v52 = vsel %vm1771_vm4, %v1742_v62, %v3371_v33 }
 0x145   : > { %v1138_v50 = vpop.permute.xlu0 %1137  ;;  %v1136_v8 = vpop.permute.xlu1 %1135  ;;  %v1937_v40 = vsel %vm1936_vm9, %v1904_v5, %v1516_v48  ;;  %v1807_v5 = vsel %vm1804_vm5, %v1774_v27, %v3480_v39  ;;  %v1808_v7 = vsel %vm1804_vm5, %v1775_v52, %v3495_v30  ;;  %v3606_v39 = vld [vmem:[#allocation2 + $0xe0] sm:$0xff] }
 0x146   : > { %v1841_v11 = vsel %vm1837_vm6, %v1808_v7, %v1138_v50  ;;  %v1840_v13 = vsel %vm1837_vm6, %v1807_v5, %v1136_v8  ;;  %v3650_v5 = vld [vmem:[#allocation2 + $0xf0] sm:$0xff] }
 0x147   : > { %1033 = vrot.lane.b32.xlu0 %v3543_v58, %s2812_s28  ;;  %1031 = vrot.lane.b32.xlu1 %v3535_v24, %s2812_s28 }
 0x149   : > { %v1646_v3 = vpop.permute.xlu0 %1645  ;;  %v1644_v42 = vpop.permute.xlu1 %1643 }
 0x14a   : > { %v1971_v61 = vsel %vm1969_vm10, %v1938_v4, %v1646_v3  ;;  %v1970_v43 = vsel %vm1969_vm10, %v1937_v40, %v1644_v42  ;;  %v665_v42 = vld [vmem:[#allocation2 + $0xd9] sm:$0xff] }
 0x14b   : > { %1541 = vrot.lane.b32.xlu0 %v664_v38, %s2816_s19  ;;  %1539 = vrot.lane.b32.xlu1 %v663_v53, %s2816_s19 }
 0x14c   : > { %2720 = vmatprep.mubr.msk.f32.mxu0 %vm2007_vm11, %v1970_v43 }
 0x14d   : > { %2721 = vmatmul.mubr.msk.f32.vlgmr.msra.gmra.mrb[0].mxu0 %vm2007_vm11, %v1971_v61  ;;  %v1392_v41 = vpop.permute.xlu0 %1391  ;;  %v1264_v10 = vpop.permute.xlu1 %1263 }
 0x14e   : > { %v1873_v23 = vsel %vm1870_vm7, %v1840_v13, %v1264_v10 }
 0x14f   : > { %1161 = vrot.lane.b32.xlu0 %v664_v38, %s2813_s29  ;;  %1159 = vrot.lane.b32.xlu1 %v663_v53, %s2813_s29 }
 0x151   : > { %v1520_v36 = vpop.permute.xlu0 %1519  ;;  %v1266_v48 = vpop.permute.xlu1 %1265 }
 0x152   : > { %v1874_v33 = vsel %vm1870_vm7, %v1841_v11, %v1266_v48  ;;  %v1744_v48 = vsel %vm347_vm0, %v3236_v29, %v3211_v18 }
 0x153   : > { %1669 = vrot.lane.b32.xlu0 %v3174_v54, %s2817_s20  ;;  %1667 = vrot.lane.b32.xlu1 %v3158_v47, %s2817_s20 }
 0x155   : > { %v1522_v55 = vpop.permute.xlu0 %1521  ;;  %v1394_v59 = vpop.permute.xlu1 %1393 }
 0x156   : > { %v1907_v30 = vsel %vm1903_vm8, %v1874_v33, %v1394_v59  ;;  %v1777_v59 = vsel %vm1771_vm4, %v1744_v48, %v3379_v28  ;;  %v239_v33 = vld [vmem:[%s2916_s23 + $0xf0] sm:$0xff]  ;;  %v1745_v48 = vsel %vm347_vm0, %v3222_v22, %v3200_v9  ;;  %v700_v22 = vld [vmem:[#allocation2 + $0xfa] sm:$0xff] }
 0x157   : > { %1415 = vrot.lane.b32.xlu0 %v3588_v12, %s2815_s13  ;;  %1287 = vrot.lane.b32.xlu1 %v3158_v47, %s2814_s8  ;;  %v1906_v47 = vsel %vm1903_vm8, %v1873_v23, %v1392_v41  ;;  %v1940_v53 = vsel %vm1936_vm9, %v1907_v30, %v1522_v55  ;;  %v1810_v52 = vsel %vm1804_vm5, %v1777_v59, %v3501_v46 }
 0x158   : > { %v1939_v50 = vsel %vm1936_vm9, %v1906_v47, %v1520_v36  ;;  %v1743_v36 = vsel %vm347_vm0, %v3213_v19, %v3194_v6  ;;  %v602_v19 = vld [vmem:[#allocation2 + $0xda] sm:$0xff]  ;;  %v1778_v59 = vsel %vm1771_vm4, %v1745_v48, %v3369_v1 }
 0x159   : > { %v1142_v2 = vpop.permute.xlu0 %1141  ;;  %v1140_v38 = vpop.permute.xlu1 %1139  ;;  %v1776_v55 = vsel %vm1771_vm4, %v1743_v36, %v3361_v16  ;;  %v2799_v47 = vld [vmem:[%s4266_s1] ss:$0 sm:$0xff] }
 0x15a   : > { %v1809_v27 = vsel %vm1804_vm5, %v1776_v55, %v3487_v44  ;;  %v1843_v6 = vsel %vm1837_vm6, %v1810_v52, %v1142_v2  ;;  %v3660_v2 = vld [vmem:[#allocation2 + $0xf8] sm:$0xff]  ;;  %v1811_v52 = vsel %vm1804_vm5, %v1778_v59, %v3493_v49  ;;  %v3761_v59 = vld [vmem:[#allocation2 + $0x120] sm:$0xff] }
 0x15b   : > { %1417 = vrot.lane.b32.xlu0 %v3606_v39, %s2815_s13  ;;  %1289 = vrot.lane.b32.xlu1 %v3174_v54, %s2814_s8  ;;  %v666_v54 = vld [vmem:[#allocation2 + $0xe1] sm:$0xff]  ;;  %v1842_v18 = vsel %vm1837_vm6, %v1809_v27, %v1140_v38 }
 0x15d   : > { %v1650_v8 = vpop.permute.xlu0 %1649  ;;  %v1648_v40 = vpop.permute.xlu1 %1647 }
 0x15e   : > { %v1973_v3 = vsel %vm1969_vm10, %v1940_v53, %v1650_v8  ;;  %v1972_v4 = vsel %vm1969_vm10, %v1939_v50, %v1648_v40  ;;  %v276_v50 = vmul.f32 %v2799_v47, %v239_v33  ;;  %v2800_v8 = vld [vmem:[%s4266_s1 + $0x1] ss:$0 sm:$0xff] }
 0x15f   : > { %1037 = vrot.lane.b32.xlu0 %v3606_v39, %s2812_s28  ;;  %1035 = vrot.lane.b32.xlu1 %v3588_v12, %s2812_s28 }
 0x160   : > { %2723 = vmatprep.mubr.msk.f32.mxu0 %vm2007_vm11, %v1972_v4  ;;  %v313_v53 = vadd.f32 %v2800_v8, %v276_v50  ;;  %v240_v4 = vld [vmem:[%s2916_s23 + $0xf8] sm:$0xff]  ;;  %v1747_v50 = vsel %vm347_vm0, %v3234_v26, %v3209_v15 }
 0x161   : > { %2724 = vmatmul.mubr.msk.f32.gmra.mrb[2].mxu0 %vm2007_vm11, %v1973_v3  ;;  %v1396_v61 = vpop.permute.xlu0 %1395  ;;  %v1268_v43 = vpop.permute.xlu1 %1267 }
 0x162   : > { %v1875_v29 = vsel %vm1870_vm7, %v1842_v18, %v1268_v43 }
 0x163   : > { %1545 = vrot.lane.b32.xlu0 %v666_v54, %s2816_s19  ;;  %1543 = vrot.lane.b32.xlu1 %v665_v42, %s2816_s19 }
 0x165   : > { %v1524_v41 = vpop.permute.xlu0 %1523  ;;  %v1270_v10 = vpop.permute.xlu1 %1269 }
 0x166   : > { %v1876_v28 = vsel %vm1870_vm7, %v1843_v6, %v1270_v10 }
 0x167   : > { %1165 = vrot.lane.b32.xlu0 %v666_v54, %s2813_s29  ;;  %1163 = vrot.lane.b32.xlu1 %v665_v42, %s2813_s29  ;;  %v345_v54 = vmax.f32 %v313_v53, 0.0  ;;  %v277_v42 = vmul.f32 %v2799_v47, %v240_v4  ;;  %v669_v47 = vld [vmem:[#allocation2 + $0x109] sm:$0xff] }
 0x169   : > { %v1526_v45 = vpop.permute.xlu0 %1525  ;;  %v1398_v62 = vpop.permute.xlu1 %1397  ;;  %424 = vst.msk [vmem:[#allocation2 + $0x181] sm:$0xff] %vm347_vm0, %v345_v54  ;;  %v314_v43 = vadd.f32 %v2800_v8, %v277_v42  ;;  %v1748_v8 = vsel %vm347_vm0, %v3260_v57, %v3232_v25 }
 0x16a   : > { %v1909_v46 = vsel %vm1903_vm8, %v1876_v28, %v1398_v62  ;;  %v1781_v4 = vsel %vm1771_vm4, %v1748_v8, %v3395_v17 }
 0x16b   : > { %1673 = vrot.lane.b32.xlu0 %v3179_v56, %s2817_s20  ;;  %1671 = vrot.lane.b32.xlu1 %v3166_v51, %s2817_s20  ;;  %v1908_v51 = vsel %vm1903_vm8, %v1875_v29, %v1396_v61  ;;  %v1942_v13 = vsel %vm1936_vm9, %v1909_v46, %v1526_v45  ;;  %v667_v61 = vld [vmem:[#allocation2 + $0xf1] sm:$0xff]  ;;  %v346_v36 = vmax.f32 %v314_v43, 0.0  ;;  %v1746_v45 = vsel %vm347_vm0, %v3248_v34, %v3220_v21  ;;  %v3711_v46 = vld [vmem:[#allocation2 + $0x108] sm:$0xff] }
 0x16c   : > { %v1941_v7 = vsel %vm1936_vm9, %v1908_v51, %v1524_v41  ;;  %v1779_v27 = vsel %vm1771_vm4, %v1746_v45, %v3387_v14  ;;  %v699_v34 = vld [vmem:[#allocation2 + $0xf2] sm:$0xff]  ;;  %v1814_v42 = vsel %vm1804_vm5, %v1781_v4, %v3517_v60 }
 0x16d   : > { %v1146_v16 = vpop.permute.xlu0 %1145  ;;  %v1144_v44 = vpop.permute.xlu1 %1143  ;;  %425 = vst.msk [vmem:[#allocation2 + $0x189] sm:$0xff] %vm347_vm0, %v346_v36  ;;  %v1812_v6 = vsel %vm1804_vm5, %v1779_v27, %v3509_v37 }
 0x16e   : > { %v1845_v9 = vsel %vm1837_vm6, %v1812_v6, %v1146_v16  ;;  %v1844_v21 = vsel %vm1837_vm6, %v1811_v52, %v1144_v44  ;;  %v3766_v6 = vld [vmem:[#allocation2 + $0x128] sm:$0xff] }
 0x16f   : > { %1419 = vrot.lane.b32.xlu0 %v3650_v5, %s2815_s13  ;;  %1291 = vrot.lane.b32.xlu1 %v602_v19, %s2814_s8 }
 0x171   : > { %v1654_v11 = vpop.permute.xlu0 %1653  ;;  %v1652_v23 = vpop.permute.xlu1 %1651 }
 0x172   : > { %v1975_v38 = vsel %vm1969_vm10, %v1942_v13, %v1654_v11  ;;  %v1974_v30 = vsel %vm1969_vm10, %v1941_v7, %v1652_v23  ;;  %v3720_v23 = vld [vmem:[#allocation2 + $0x110] sm:$0xff] }
 0x173   : > { %1421 = vrot.lane.b32.xlu0 %v3660_v2, %s2815_s13  ;;  %1293 = vrot.lane.b32.xlu1 %v3179_v56, %s2814_s8  ;;  %v668_v56 = vld [vmem:[#allocation2 + $0xf9] sm:$0xff] }
 0x174   : > { %2726 = vmatprep.mubr.msk.f32.mxu0 %vm2007_vm11, %v1974_v30  ;;  %v670_v30 = vld [vmem:[#allocation2 + $0x111] sm:$0xff] }
 0x175   : > { %2727 = vmatmul.mubr.msk.f32.gmra.mrb[4].mxu0 %vm2007_vm11, %v1975_v38  ;;  %v1400_v40 = vpop.permute.xlu0 %1399  ;;  %v1272_v3 = vpop.permute.xlu1 %1271 }
 0x176   : > { %v1877_v1 = vsel %vm1870_vm7, %v1844_v21, %v1272_v3  ;;  %v1780_v3 = vsel %vm1771_vm4, %v1747_v50, %v3377_v35  ;;  %v1750_v21 = vsel %vm347_vm0, %v3272_v63, %v3244_v31  ;;  %v671_v63 = vld [vmem:[#allocation2 + $0x121] sm:$0xff] }
 0x177   : > { %1041 = vrot.lane.b32.xlu0 %v3660_v2, %s2812_s28  ;;  %1039 = vrot.lane.b32.xlu1 %v3650_v5, %s2812_s28  ;;  %v1910_v37 = vsel %vm1903_vm8, %v1877_v1, %v1400_v40  ;;  %v1813_v54 = vsel %vm1804_vm5, %v1780_v3, %v3499_v0  ;;  %v702_v0 = vld [vmem:[#allocation2 + $0x112] sm:$0xff] }
 0x178   : > { %v4325_v1 = vld [vmem:[#allocation27_spill] sm:$0xff] }
 0x179   : > { %v1528_v41 = vpop.permute.xlu0 %1527  ;;  %v1274_v10 = vpop.permute.xlu1 %1273 }
 0x17a   : > { %v1878_v14 = vsel %vm1870_vm7, %v1845_v9, %v1274_v10  ;;  %v1943_v29 = vsel %vm1936_vm9, %v1910_v37, %v1528_v41  ;;  %v1749_v9 = vsel %vm347_vm0, %v3246_v32, %v3218_v20  ;;  %v672_v32 = vld [vmem:[#allocation2 + $0x129] sm:$0xff] }
 0x17b   : > { %1549 = vrot.lane.b32.xlu0 %v668_v56, %s2816_s19  ;;  %1547 = vrot.lane.b32.xlu1 %v667_v61, %s2816_s19 }
 0x17d   : > { %v1530_v62 = vpop.permute.xlu0 %1529  ;;  %v1402_v55 = vpop.permute.xlu1 %1401 }
 0x17e   : > { %v1911_v49 = vsel %vm1903_vm8, %v1878_v14, %v1402_v55  ;;  %v1782_v14 = vsel %vm1771_vm4, %v1749_v9, %v4325_v1 }
 0x17f   : > { %1169 = vrot.lane.b32.xlu0 %v668_v56, %s2813_s29  ;;  %1167 = vrot.lane.b32.xlu1 %v667_v61, %s2813_s29  ;;  %v1944_v16 = vsel %vm1936_vm9, %v1911_v49, %v1530_v62  ;;  %v701_v61 = vld [vmem:[#allocation2 + $0x10a] sm:$0xff]  ;;  %v4327_v49 = vld [vmem:[#allocation49_spill] sm:$0xff] }
 0x180   : > { %v1815_v37 = vsel %vm1804_vm5, %v1782_v14, %v4327_v49 }
 0x181   : > { %v1150_v18 = vpop.permute.xlu0 %1149  ;;  %v1148_v19 = vpop.permute.xlu1 %1147 }
 0x182   : > { %v1847_v15 = vsel %vm1837_vm6, %v1814_v42, %v1150_v18  ;;  %v1846_v25 = vsel %vm1837_vm6, %v1813_v54, %v1148_v19  ;;  %v4326_v18 = vld [vmem:[#allocation30_spill] sm:$0xff]  ;;  %v641_v54 = vld [vmem:[#allocation2 + $0x138] sm:$0xff] }
 0x183   : > { %1677 = vrot.lane.b32.xlu0 %v700_v22, %s2817_s20  ;;  %1675 = vrot.lane.b32.xlu1 %v699_v34, %s2817_s20  ;;  %v1783_v19 = vsel %vm1771_vm4, %v1750_v21, %v4326_v18 }
 0x185   : > { %v1658_v28 = vpop.permute.xlu0 %1657  ;;  %v1656_v44 = vpop.permute.xlu1 %1655 }
 0x186   : > { %v1977_v51 = vsel %vm1969_vm10, %v1944_v16, %v1658_v28  ;;  %v1976_v7 = vsel %vm1969_vm10, %v1943_v29, %v1656_v44  ;;  %v4328_v29 = vld [vmem:[#allocation51_spill] sm:$0xff] }
 0x187   : > { %1423 = vrot.lane.b32.xlu0 %v3711_v46, %s2815_s13  ;;  %1295 = vrot.lane.b32.xlu1 %v699_v34, %s2814_s8  ;;  %v1816_v28 = vsel %vm1804_vm5, %v1783_v19, %v4328_v29 }
 0x188   : > { %2729 = vmatprep.mubr.msk.f32.mxu0 %vm2007_vm11, %v1976_v7 }
 0x189   : > { %2730 = vmatmul.mubr.msk.f32.gmra.mrb[6].mxu0 %vm2007_vm11, %v1977_v51  ;;  %v1404_v11 = vpop.permute.xlu0 %1403  ;;  %v1276_v13 = vpop.permute.xlu1 %1275 }
 0x18a   : > { %v1879_v26 = vsel %vm1870_vm7, %v1846_v25, %v1276_v13 }
 0x18b   : > { %1425 = vrot.lane.b32.xlu0 %v3720_v23, %s2815_s13  ;;  %1297 = vrot.lane.b32.xlu1 %v700_v22, %s2814_s8  ;;  %v1912_v60 = vsel %vm1903_vm8, %v1879_v26, %v1404_v11 }
 0x18d   : > { %v1532_v33 = vpop.permute.xlu0 %1531  ;;  %v1278_v38 = vpop.permute.xlu1 %1277 }
 0x18e   : > { %v1880_v57 = vsel %vm1870_vm7, %v1847_v15, %v1278_v38  ;;  %v1945_v43 = vsel %vm1936_vm9, %v1912_v60, %v1532_v33  ;;  %v4331_v60 = vld [vmem:[#allocation6_spill] sm:$0xff] }
 0x18f   : > { %1045 = vrot.lane.b32.xlu0 %v3720_v23, %s2812_s28  ;;  %1043 = vrot.lane.b32.xlu1 %v3711_v46, %s2812_s28 }
 0x191   : > { %v1534_v53 = vpop.permute.xlu0 %1533  ;;  %v1406_v40 = vpop.permute.xlu1 %1405 }
 0x192   : > { %v1913_v56 = vsel %vm1903_vm8, %v1880_v57, %v1406_v40  ;;  %v703_v40 = vld [vmem:[#allocation2 + $0x122] sm:$0xff] }
 0x193   : > { %1553 = vrot.lane.b32.xlu0 %v670_v30, %s2816_s19  ;;  %1551 = vrot.lane.b32.xlu1 %v669_v47, %s2816_s19  ;;  %v1946_v10 = vsel %vm1936_vm9, %v1913_v56, %v1534_v53  ;;  %v704_v53 = vld [vmem:[#allocation2 + $0x12a] sm:$0xff]  ;;  %v3809_v57 = vld [vmem:[#allocation2 + $0x140] sm:$0xff] }
 0x195   : > { %v1154_v35 = vpop.permute.xlu0 %1153  ;;  %v1152_v17 = vpop.permute.xlu1 %1151 }
 0x196   : > { %v1849_v20 = vsel %vm1837_vm6, %v1816_v28, %v1154_v35  ;;  %v1848_v31 = vsel %vm1837_vm6, %v1815_v37, %v1152_v17  ;;  %v4329_v35 = vld [vmem:[#allocation3_spill] sm:$0xff] }
 0x197   : > { %1173 = vrot.lane.b32.xlu0 %v670_v30, %s2813_s29  ;;  %1171 = vrot.lane.b32.xlu1 %v669_v47, %s2813_s29  ;;  %v4330_v17 = vld [vmem:[#allocation7_spill] sm:$0xff] }
 0x198   : > { %v1751_v56 = vsel %vm347_vm0, %v4330_v17, %v4329_v35  ;;  %v4342_v17 = vld [vmem:[#allocation34_spill] sm:$0xff] }
 0x199   : > { %v1662_v41 = vpop.permute.xlu0 %1661  ;;  %v1660_v36 = vpop.permute.xlu1 %1659 }
 0x19a   : > { %v1979_v48 = vsel %vm1969_vm10, %v1946_v10, %v1662_v41  ;;  %v1978_v45 = vsel %vm1969_vm10, %v1945_v43, %v1660_v36  ;;  %v4333_v10 = vld [vmem:[#allocation28_spill] sm:$0xff] }
 0x19b   : > { %1681 = vrot.lane.b32.xlu0 %v702_v0, %s2817_s20  ;;  %1679 = vrot.lane.b32.xlu1 %v701_v61, %s2817_s20  ;;  %v1784_v36 = vsel %vm1771_vm4, %v1751_v56, %v4333_v10  ;;  %v675_v10 = vld [vmem:[#allocation2 + $0x151] sm:$0xff] }
 0x19c   : > { %2732 = vmatprep.mubr.msk.f32.mxu0 %vm2007_vm11, %v1978_v45 }
 0x19d   : > { %2733 = vmatmul.mubr.msk.f32.gmra.mrb[8].mxu0 %vm2007_vm11, %v1979_v48  ;;  %v1408_v62 = vpop.permute.xlu0 %1407  ;;  %v1280_v55 = vpop.permute.xlu1 %1279  ;;  %v4334_v48 = vld [vmem:[#allocation32_spill] sm:$0xff] }
 0x19e   : > { %v1881_v16 = vsel %vm1870_vm7, %v1848_v31, %v1280_v55 }
 0x19f   : > { %1427 = vrot.lane.b32.xlu0 %v3761_v59, %s2815_s13  ;;  %1299 = vrot.lane.b32.xlu1 %v701_v61, %s2814_s8  ;;  %v1914_v13 = vsel %vm1903_vm8, %v1881_v16, %v1408_v62  ;;  %v4335_v62 = vld [vmem:[#allocation50_spill] sm:$0xff] }
 0x1a0   : > { %v1817_v55 = vsel %vm1804_vm5, %v1784_v36, %v4335_v62  ;;  %v706_v16 = vld [vmem:[#allocation2 + $0x142] sm:$0xff] }
 0x1a1   : > { %v1536_v27 = vpop.permute.xlu0 %1535  ;;  %v1282_v52 = vpop.permute.xlu1 %1281 }
 0x1a2   : > { %v1882_v44 = vsel %vm1870_vm7, %v1849_v20, %v1282_v52  ;;  %v1947_v33 = vsel %vm1936_vm9, %v1914_v13, %v1536_v27  ;;  %v4336_v27 = vld [vmem:[#allocation52_spill] sm:$0xff] }
 0x1a3   : > { %1429 = vrot.lane.b32.xlu0 %v3766_v6, %s2815_s13  ;;  %1301 = vrot.lane.b32.xlu1 %v702_v0, %s2814_s8  ;;  %v4332_v0 = vld [vmem:[#allocation13_spill] sm:$0xff] }
 0x1a4   : > { %v1752_v61 = vsel %vm347_vm0, %v4332_v0, %v4331_v60 }
 0x1a5   : > { %v1538_v22 = vpop.permute.xlu0 %1537  ;;  %v1410_v34 = vpop.permute.xlu1 %1409  ;;  %v1785_v45 = vsel %vm1771_vm4, %v1752_v61, %v4334_v48 }
 0x1a6   : > { %v1915_v11 = vsel %vm1903_vm8, %v1882_v44, %v1410_v34  ;;  %v1818_v52 = vsel %vm1804_vm5, %v1785_v45, %v4336_v27  ;;  %v673_v34 = vld [vmem:[#allocation2 + $0x139] sm:$0xff] }
 0x1a7   : > { %1049 = vrot.lane.b32.xlu0 %v3766_v6, %s2812_s28  ;;  %1047 = vrot.lane.b32.xlu1 %v3761_v59, %s2812_s28  ;;  %v1948_v30 = vsel %vm1936_vm9, %v1915_v11, %v1538_v22  ;;  %v674_v22 = vld [vmem:[#allocation2 + $0x141] sm:$0xff]  ;;  %v643_v11 = vld [vmem:[#allocation2 + $0x150] sm:$0xff] }
 0x1a8   : > { %v705_v44 = vld [vmem:[#allocation2 + $0x13a] sm:$0xff] }
 0x1a9   : > { %v1158_v51 = vpop.permute.xlu0 %1157  ;;  %v1156_v7 = vpop.permute.xlu1 %1155 }
 0x1aa   : > { %v1851_v9 = vsel %vm1837_vm6, %v1818_v52, %v1158_v51  ;;  %v1850_v21 = vsel %vm1837_vm6, %v1817_v55, %v1156_v7 }
 0x1ab   : > { %1557 = vrot.lane.b32.xlu0 %v672_v32, %s2816_s19  ;;  %1555 = vrot.lane.b32.xlu1 %v671_v63, %s2816_s19 }
 0x1ad   : > { %v1666_v38 = vpop.permute.xlu0 %1665  ;;  %v1664_v47 = vpop.permute.xlu1 %1663 }
 0x1ae   : > { %v1981_v50 = vsel %vm1969_vm10, %v1948_v30, %v1666_v38  ;;  %v1980_v8 = vsel %vm1969_vm10, %v1947_v33, %v1664_v47  ;;  %v644_v38 = vld [vmem:[#allocation2 + $0x158] sm:$0xff] }
 0x1af   : > { %1177 = vrot.lane.b32.xlu0 %v672_v32, %s2813_s29  ;;  %1175 = vrot.lane.b32.xlu1 %v671_v63, %s2813_s29 }
 0x1b0   : > { %2735 = vmatprep.mubr.msk.f32.mxu0 %vm2007_vm11, %v1980_v8  ;;  %v4338_v8 = vld [vmem:[#allocation10_spill] sm:$0xff] }
 0x1b1   : > { %2736 = vmatmul.mubr.msk.f32.gmra.mrb[10].mxu0 %vm2007_vm11, %v1981_v50  ;;  %v1412_v3 = vpop.permute.xlu0 %1411  ;;  %v1284_v4 = vpop.permute.xlu1 %1283  ;;  %v4337_v50 = vld [vmem:[#allocation4_spill] sm:$0xff] }
 0x1b2   : > { %v1883_v1 = vsel %vm1870_vm7, %v1850_v21, %v1284_v4 }
 0x1b3   : > { %1685 = vrot.lane.b32.xlu0 %v704_v53, %s2817_s20  ;;  %1683 = vrot.lane.b32.xlu1 %v703_v40, %s2817_s20  ;;  %v1916_v37 = vsel %vm1903_vm8, %v1883_v1, %v1412_v3  ;;  %v4340_v3 = vld [vmem:[#allocation16_spill] sm:$0xff] }
 0x1b4   : > { %v707_v1 = vld [vmem:[#allocation2 + $0x152] sm:$0xff] }
 0x1b5   : > { %v1414_v42 = vpop.permute.xlu0 %1413  ;;  %v1286_v15 = vpop.permute.xlu1 %1285 }
 0x1b6   : > { %v1884_v14 = vsel %vm1870_vm7, %v1851_v9, %v1286_v15  ;;  %v4341_v15 = vld [vmem:[#allocation29_spill] sm:$0xff] }
 0x1b7   : > { %1431 = vrot.lane.b32.xlu0 %v641_v54, %s2815_s13  ;;  %1303 = vrot.lane.b32.xlu1 %v703_v40, %s2814_s8  ;;  %v1917_v49 = vsel %vm1903_vm8, %v1884_v14, %v1414_v42  ;;  %v4339_v40 = vld [vmem:[#allocation9_spill] sm:$0xff] }
 0x1b8   : > { %v1754_v4 = vsel %vm347_vm0, %v4340_v3, %v4339_v40 }
 0x1b9   : > { %v1034_v25 = vpop.permute.xlu0 %1033  ;;  %v1032_v26 = vpop.permute.xlu1 %1031  ;;  %v1787_v56 = vsel %vm1771_vm4, %v1754_v4, %v4342_v17 }
 0x1ba   : > { %v1820_v60 = vsel %vm1804_vm5, %v1787_v56, %v1034_v25 }
 0x1bb   : > { %1433 = vrot.lane.b32.xlu0 %v3809_v57, %s2815_s13  ;;  %1305 = vrot.lane.b32.xlu1 %v704_v53, %s2814_s8  ;;  %v1753_v53 = vsel %vm347_vm0, %v4338_v8, %v4337_v50  ;;  %v678_v8 = vld [vmem:[#allocation2 + $0x171] sm:$0xff] }
 0x1bc   : > { %v1786_v35 = vsel %vm1771_vm4, %v1753_v53, %v4341_v15  ;;  %v677_v53 = vld [vmem:[#allocation2 + $0x169] sm:$0xff] }
 0x1bd   : > { %v1542_v43 = vpop.permute.xlu0 %1541  ;;  %v1540_v41 = vpop.permute.xlu1 %1539  ;;  %v1819_v0 = vsel %vm1804_vm5, %v1786_v35, %v1032_v26 }
 0x1be   : > { %v1950_v29 = vsel %vm1936_vm9, %v1917_v49, %v1542_v43  ;;  %v1949_v28 = vsel %vm1936_vm9, %v1916_v37, %v1540_v41  ;;  %v676_v41 = vld [vmem:[#allocation2 + $0x159] sm:$0xff] }
 0x1bf   : > { %1053 = vrot.lane.b32.xlu0 %v3809_v57, %s2812_s28  ;;  %1051 = vrot.lane.b32.xlu1 %v641_v54, %s2812_s28 }
 0x1c1   : > { %v1162_v18 = vpop.permute.xlu0 %1161  ;;  %v1160_v19 = vpop.permute.xlu1 %1159 }
 0x1c2   : > { %v1853_v61 = vsel %vm1837_vm6, %v1820_v60, %v1162_v18  ;;  %v1852_v43 = vsel %vm1837_vm6, %v1819_v0, %v1160_v19  ;;  %v645_v19 = vld [vmem:[#allocation2 + $0x168] sm:$0xff]  ;;  %v710_v0 = vld [vmem:[#allocation2 + $0x172] sm:$0xff] }
 0x1c3   : > { %1561 = vrot.lane.b32.xlu0 %v674_v22, %s2816_s19  ;;  %1559 = vrot.lane.b32.xlu1 %v673_v34, %s2816_s19 }
 0x1c5   : > { %v1670_v20 = vpop.permute.xlu0 %1669  ;;  %v1668_v31 = vpop.permute.xlu1 %1667 }
 0x1c6   : > { %v1983_v32 = vsel %vm1969_vm10, %v1950_v29, %v1670_v20  ;;  %v1982_v63 = vsel %vm1969_vm10, %v1949_v28, %v1668_v31  ;;  %v646_v29 = vld [vmem:[#allocation2 + $0x170] sm:$0xff]  ;;  %v4343_v31 = vld [vmem:[#allocation5_spill] sm:$0xff] }
 0x1c7   : > { %1181 = vrot.lane.b32.xlu0 %v674_v22, %s2813_s29  ;;  %1179 = vrot.lane.b32.xlu1 %v673_v34, %s2813_s29  ;;  %v708_v34 = vld [vmem:[#allocation2 + $0x15a] sm:$0xff] }
 0x1c8   : > { %2738 = vmatprep.mubr.msk.f32.mxu0 %vm2007_vm11, %v1982_v63  ;;  %v4344_v63 = vld [vmem:[#allocation12_spill] sm:$0xff] }
 0x1c9   : > { %2739 = vmatmul.mubr.msk.f32.gmra.mrb[12].mxu0 %vm2007_vm11, %v1983_v32  ;;  %v1416_v51 = vpop.permute.xlu0 %1415  ;;  %v1288_v7 = vpop.permute.xlu1 %1287  ;;  %v1755_v32 = vsel %vm347_vm0, %v3535_v24, %v4343_v31 }
 0x1ca   : > { %v1885_v36 = vsel %vm1870_vm7, %v1852_v43, %v1288_v7  ;;  %v4345_v7 = vld [vmem:[#allocation31_spill] sm:$0xff] }
 0x1cb   : > { %1689 = vrot.lane.b32.xlu0 %v706_v16, %s2817_s20  ;;  %1687 = vrot.lane.b32.xlu1 %v705_v44, %s2817_s20  ;;  %v1918_v26 = vsel %vm1903_vm8, %v1885_v36, %v1416_v51 }
 0x1cd   : > { %v1418_v13 = vpop.permute.xlu0 %1417  ;;  %v1290_v33 = vpop.permute.xlu1 %1289 }
 0x1ce   : > { %v1886_v48 = vsel %vm1870_vm7, %v1853_v61, %v1290_v33  ;;  %v709_v61 = vld [vmem:[#allocation2 + $0x16a] sm:$0xff] }
 0x1cf   : > { %1435 = vrot.lane.b32.xlu0 %v643_v11, %s2815_s13  ;;  %1307 = vrot.lane.b32.xlu1 %v705_v44, %s2814_s8  ;;  %v1919_v25 = vsel %vm1903_vm8, %v1886_v48, %v1418_v13  ;;  %v4346_v13 = vld [vmem:[#allocation36_spill] sm:$0xff] }
 0x1d1   : > { %v1038_v30 = vpop.permute.xlu0 %1037  ;;  %v1036_v47 = vpop.permute.xlu1 %1035 }
 0x1d3   : > { %1437 = vrot.lane.b32.xlu0 %v644_v38, %s2815_s13  ;;  %1309 = vrot.lane.b32.xlu1 %v706_v16, %s2814_s8  ;;  %v1756_v16 = vsel %vm347_vm0, %v3543_v58, %v4344_v63 }
 0x1d4   : > { %v1789_v33 = vsel %vm1771_vm4, %v1756_v16, %v4346_v13 }
 0x1d5   : > { %v1546_v54 = vpop.permute.xlu0 %1545  ;;  %v1544_v42 = vpop.permute.xlu1 %1543 }
 0x1d6   : > { %v1952_v55 = vsel %vm1936_vm9, %v1919_v25, %v1546_v54  ;;  %v1951_v27 = vsel %vm1936_vm9, %v1918_v26, %v1544_v42  ;;  %v4347_v26 = vld [vmem:[#allocation8_spill] sm:$0xff] }
 0x1d7   : > { %1057 = vrot.lane.b32.xlu0 %v644_v38, %s2812_s28  ;;  %1055 = vrot.lane.b32.xlu1 %v643_v11, %s2812_s28  ;;  %v1788_v11 = vsel %vm1771_vm4, %v1755_v32, %v4345_v7  ;;  %v1822_v38 = vsel %vm1804_vm5, %v1789_v33, %v1038_v30  ;;  %v712_v33 = vld [vmem:[#allocation2 + $0x18a] sm:$0xff] }
 0x1d8   : > { %v1821_v50 = vsel %vm1804_vm5, %v1788_v11, %v1036_v47 }
 0x1d9   : > { %v1166_v45 = vpop.permute.xlu0 %1165  ;;  %v1164_v62 = vpop.permute.xlu1 %1163 }
 0x1da   : > { %v1855_v24 = vsel %vm1837_vm6, %v1822_v38, %v1166_v45  ;;  %v1854_v58 = vsel %vm1837_vm6, %v1821_v50, %v1164_v62  ;;  %v648_v45 = vld [vmem:[#allocation2 + $0x188] sm:$0xff] }
 0x1db   : > { %1565 = vrot.lane.b32.xlu0 %v676_v41, %s2816_s19  ;;  %1563 = vrot.lane.b32.xlu1 %v675_v10, %s2816_s19  ;;  %v711_v38 = vld [vmem:[#allocation2 + $0x182] sm:$0xff] }
 0x1dd   : > { %v1674_v52 = vpop.permute.xlu0 %1673  ;;  %v1672_v9 = vpop.permute.xlu1 %1671 }
 0x1de   : > { %v1985_v21 = vsel %vm1969_vm10, %v1952_v55, %v1674_v52  ;;  %v1984_v22 = vsel %vm1969_vm10, %v1951_v27, %v1672_v9  ;;  %v1757_v55 = vsel %vm347_vm0, %v3588_v12, %v4347_v26  ;;  %v4348_v27 = vld [vmem:[#allocation15_spill] sm:$0xff] }
 0x1df   : > { %1185 = vrot.lane.b32.xlu0 %v676_v41, %s2813_s29  ;;  %1183 = vrot.lane.b32.xlu1 %v675_v10, %s2813_s29  ;;  %v647_v10 = vld [vmem:[#allocation2 + $0x180] sm:$0xff]  ;;  %v1758_v52 = vsel %vm347_vm0, %v3606_v39, %v4348_v27 }
 0x1e0   : > { %2741 = vmatprep.mubr.msk.f32.mxu0 %vm2007_vm11, %v1984_v22  ;;  %v4349_v22 = vld [vmem:[#allocation33_spill] sm:$0xff] }
 0x1e1   : > { %2742 = vmatmul.mubr.msk.f32.gmra.mrb[14].mxu0 %vm2007_vm11, %v1985_v21  ;;  %v1420_v14 = vpop.permute.xlu0 %1419  ;;  %v1292_v18 = vpop.permute.xlu1 %1291 }
 0x1e2   : > { %v1887_v40 = vsel %vm1870_vm7, %v1854_v58, %v1292_v18  ;;  %v649_v58 = vld [vmem:[#allocation2 + $0x198] sm:$0xff] }
 0x1e3   : > { %1693 = vrot.lane.b32.xlu0 %v708_v34, %s2817_s20  ;;  %1691 = vrot.lane.b32.xlu1 %v707_v1, %s2817_s20  ;;  %v1920_v47 = vsel %vm1903_vm8, %v1887_v40, %v1420_v14  ;;  %v681_v40 = vld [vmem:[#allocation2 + $0x199] sm:$0xff] }
 0x1e5   : > { %v1422_v49 = vpop.permute.xlu0 %1421  ;;  %v1294_v37 = vpop.permute.xlu1 %1293 }
 0x1e6   : > { %v1888_v3 = vsel %vm1870_vm7, %v1855_v24, %v1294_v37  ;;  %v679_v37 = vld [vmem:[#allocation2 + $0x181] sm:$0xff] }
 0x1e7   : > { %1439 = vrot.lane.b32.xlu0 %v645_v19, %s2815_s13  ;;  %1311 = vrot.lane.b32.xlu1 %v707_v1, %s2814_s8  ;;  %v1921_v30 = vsel %vm1903_vm8, %v1888_v3, %v1422_v49  ;;  %v4350_v1 = vld [vmem:[#allocation38_spill] sm:$0xff] }
 0x1e8   : > { %v1791_v14 = vsel %vm1771_vm4, %v1758_v52, %v4350_v1  ;;  %v680_v49 = vld [vmem:[#allocation2 + $0x189] sm:$0xff] }
 0x1e9   : > { %v1042_v28 = vpop.permute.xlu0 %1041  ;;  %v1040_v20 = vpop.permute.xlu1 %1039 }
 0x1ea   : > { %v1824_v18 = vsel %vm1804_vm5, %v1791_v14, %v1042_v28 }
 0x1eb   : > { %1441 = vrot.lane.b32.xlu0 %v646_v29, %s2815_s13  ;;  %1313 = vrot.lane.b32.xlu1 %v708_v34, %s2814_s8  ;;  %v1790_v34 = vsel %vm1771_vm4, %v1757_v55, %v4349_v22 }
 0x1ed   : > { %v1550_v44 = vpop.permute.xlu0 %1549  ;;  %v1548_v51 = vpop.permute.xlu1 %1547 }
 0x1ee   : > { %v1954_v42 = vsel %vm1936_vm9, %v1921_v30, %v1550_v44  ;;  %v1953_v15 = vsel %vm1936_vm9, %v1920_v47, %v1548_v51  ;;  %v650_v30 = vld [vmem:[#allocation2 + $0x1a0] sm:$0xff]  ;;  %v4351_v47 = vld [vmem:[#allocation18_spill] sm:$0xff] }
 0x1ef   : > { %1061 = vrot.lane.b32.xlu0 %v646_v29, %s2812_s28  ;;  %1059 = vrot.lane.b32.xlu1 %v645_v19, %s2812_s28  ;;  %v1823_v19 = vsel %vm1804_vm5, %v1790_v34, %v1040_v20 }
 0x1f1   : > { %v1170_v4 = vpop.permute.xlu0 %1169  ;;  %v1168_v54 = vpop.permute.xlu1 %1167 }
 0x1f2   : > { %v1857_v12 = vsel %vm1837_vm6, %v1824_v18, %v1170_v4  ;;  %v1856_v39 = vsel %vm1837_vm6, %v1823_v19, %v1168_v54  ;;  %v713_v54 = vld [vmem:[#allocation2 + $0x19a] sm:$0xff]  ;;  %v714_v18 = vld [vmem:[#allocation2 + $0x1a2] sm:$0xff] }
 0x1f3   : > { %1569 = vrot.lane.b32.xlu0 %v678_v8, %s2816_s19  ;;  %1567 = vrot.lane.b32.xlu1 %v677_v53, %s2816_s19 }
 0x1f5   : > { %v1678_v35 = vpop.permute.xlu0 %1677  ;;  %v1676_v17 = vpop.permute.xlu1 %1675 }
 0x1f6   : > { %v1987_v56 = vsel %vm1969_vm10, %v1954_v42, %v1678_v35  ;;  %v1986_v60 = vsel %vm1969_vm10, %v1953_v15, %v1676_v17  ;;  %v1760_v42 = vsel %vm347_vm0, %v3660_v2, %v4351_v47  ;;  %v4352_v17 = vld [vmem:[#allocation11_spill] sm:$0xff]  ;;  %v4358_v47 = vld [vmem:[#allocation37_spill] sm:$0xff] }
 0x1f7   : > { %1189 = vrot.lane.b32.xlu0 %v678_v8, %s2813_s29  ;;  %1187 = vrot.lane.b32.xlu1 %v677_v53, %s2813_s29 }
 0x1f8   : > { %2744 = vmatprep.mubr.msk.f32.mxu1 %vm2007_vm11, %v1986_v60  ;;  %v4353_v60 = vld [vmem:[#allocation40_spill] sm:$0xff] }
 0x1f9   : > { %2745 = vmatmul.mubr.msk.f32.vlgmr.msra.gmra.mrb[0].mxu1 %vm2007_vm11, %v1987_v56  ;;  %v1424_v43 = vpop.permute.xlu0 %1423  ;;  %v1296_v41 = vpop.permute.xlu1 %1295  ;;  %v1759_v56 = vsel %vm347_vm0, %v3650_v5, %v4352_v17 }
 0x1fa   : > { %v1889_v29 = vsel %vm1870_vm7, %v1856_v39, %v1296_v41 }
 0x1fb   : > { %1697 = vrot.lane.b32.xlu0 %v710_v0, %s2817_s20  ;;  %1695 = vrot.lane.b32.xlu1 %v709_v61, %s2817_s20  ;;  %v1922_v20 = vsel %vm1903_vm8, %v1889_v29, %v1424_v43 }
 0x1fd   : > { %v1426_v36 = vpop.permute.xlu0 %1425  ;;  %v1298_v48 = vpop.permute.xlu1 %1297 }
 0x1fe   : > { %v1890_v31 = vsel %vm1870_vm7, %v1857_v12, %v1298_v48 }
 0x1ff   : > { %1443 = vrot.lane.b32.xlu0 %v647_v10, %s2815_s13  ;;  %1315 = vrot.lane.b32.xlu1 %v709_v61, %s2814_s8  ;;  %v1923_v28 = vsel %vm1903_vm8, %v1890_v31, %v1426_v36  ;;  %v4354_v61 = vld [vmem:[#allocation35_spill] sm:$0xff]  ;;  %v682_v36 = vld [vmem:[#allocation2 + $0x1a1] sm:$0xff] }
 0x200   : > { %v1792_v43 = vsel %vm1771_vm4, %v1759_v56, %v4354_v61 }
 0x201   : > { %v1046_v62 = vpop.permute.xlu0 %1045  ;;  %v3923_v25 = vpop.permute.xlu1 %1043 }
 0x202   : > { %v1825_v5 = vsel %vm1804_vm5, %v1792_v43, %v3923_v25 }
 0x203   : > { %1445 = vrot.lane.b32.xlu0 %v648_v45, %s2815_s13  ;;  %1317 = vrot.lane.b32.xlu1 %v710_v0, %s2814_s8  ;;  %v1793_v0 = vsel %vm1771_vm4, %v1760_v42, %v4353_v60 }
 0x204   : > { %v1826_v2 = vsel %vm1804_vm5, %v1793_v0, %v1046_v62 }
 0x205   : > { %v1554_v9 = vpop.permute.xlu0 %1553  ;;  %v1552_v21 = vpop.permute.xlu1 %1551 }
 0x206   : > { %v1956_v16 = vsel %vm1936_vm9, %v1923_v28, %v1554_v9  ;;  %v1955_v44 = vsel %vm1936_vm9, %v1922_v20, %v1552_v21 }
 0x207   : > { %1065 = vrot.lane.b32.xlu0 %v648_v45, %s2812_s28  ;;  %1063 = vrot.lane.b32.xlu1 %v647_v10, %s2812_s28 }
 0x209   : > { %v1174_v32 = vpop.permute.xlu0 %1173  ;;  %v1172_v63 = vpop.permute.xlu1 %1171 }
 0x20a   : > { %v1859_v41 = vsel %vm1837_vm6, %v1826_v2, %v1174_v32  ;;  %v1858_v48 = vsel %vm1837_vm6, %v1825_v5, %v1172_v63 }
 0x20b   : > { %1573 = vrot.lane.b32.xlu0 %v680_v49, %s2816_s19  ;;  %1571 = vrot.lane.b32.xlu1 %v679_v37, %s2816_s19 }
 0x20d   : > { %v1682_v51 = vpop.permute.xlu0 %1681  ;;  %v1680_v7 = vpop.permute.xlu1 %1679 }
 0x20e   : > { %v1989_v11 = vsel %vm1969_vm10, %v1956_v16, %v1682_v51  ;;  %v1988_v13 = vsel %vm1969_vm10, %v1955_v44, %v1680_v7 }
 0x20f   : > { %1193 = vrot.lane.b32.xlu0 %v680_v49, %s2813_s29  ;;  %1191 = vrot.lane.b32.xlu1 %v679_v37, %s2813_s29 }
 0x210   : > { %2747 = vmatprep.mubr.msk.f32.mxu1 %vm2007_vm11, %v1988_v13 }
 0x211   : > { %2748 = vmatmul.mubr.msk.f32.gmra.mrb[2].mxu1 %vm2007_vm11, %v1989_v11  ;;  %v1428_v50 = vpop.permute.xlu0 %1427  ;;  %v1300_v24 = vpop.permute.xlu1 %1299  ;;  %v4355_v11 = vld [vmem:[#allocation14_spill] sm:$0xff] }
 0x212   : > { %v1891_v52 = vsel %vm1870_vm7, %v1858_v48, %v1300_v24  ;;  %v1761_v13 = vsel %vm347_vm0, %v3711_v46, %v4355_v11 }
 0x213   : > { %1701 = vrot.lane.b32.xlu0 %v712_v33, %s2817_s20  ;;  %1699 = vrot.lane.b32.xlu1 %v711_v38, %s2817_s20  ;;  %v1924_v12 = vsel %vm1903_vm8, %v1891_v52, %v1428_v50  ;;  %v1794_v46 = vsel %vm1771_vm4, %v1761_v13, %v4358_v47 }
 0x215   : > { %v1430_v8 = vpop.permute.xlu0 %1429  ;;  %v1302_v53 = vpop.permute.xlu1 %1301 }
 0x216   : > { %v1892_v45 = vsel %vm1870_vm7, %v1859_v41, %v1302_v53 }
 0x217   : > { %1447 = vrot.lane.b32.xlu0 %v649_v58, %s2815_s13  ;;  %1319 = vrot.lane.b32.xlu1 %v711_v38, %s2814_s8  ;;  %v1925_v1 = vsel %vm1903_vm8, %v1892_v45, %v1430_v8  ;;  %v4357_v58 = vld [vmem:[#allocation42_spill] sm:$0xff] }
 0x219   : > { %v3961_v3 = vpop.permute.xlu0 %1049  ;;  %v3963_v4 = vpop.permute.xlu1 %1047 }
 0x21b   : > { %1575 = vrot.lane.b32.xlu0 %v681_v40, %s2816_s19  ;;  %1321 = vrot.lane.b32.xlu1 %v712_v33, %s2814_s8  ;;  %v4356_v33 = vld [vmem:[#allocation20_spill] sm:$0xff] }
 0x21c   : > { %v1762_v38 = vsel %vm347_vm0, %v3720_v23, %v4356_v33 }
 0x21d   : > { %v1558_v15 = vpop.permute.xlu0 %1557  ;;  %v1556_v35 = vpop.permute.xlu1 %1555  ;;  %v1795_v8 = vsel %vm1771_vm4, %v1762_v38, %v4357_v58  ;;  %v4362_v38 = vld [vmem:[#allocation39_spill] sm:$0xff] }
 0x21e   : > { %v1958_v19 = vsel %vm1936_vm9, %v1925_v1, %v1558_v15  ;;  %v1957_v37 = vsel %vm1936_vm9, %v1924_v12, %v1556_v35  ;;  %v1828_v23 = vsel %vm1804_vm5, %v1795_v8, %v3961_v3  ;;  %v1827_v15 = vsel %vm1804_vm5, %v1794_v46, %v3963_v4 }
 0x21f   : > { %1703 = vrot.lane.b32.xlu0 %v713_v54, %s2817_s20  ;;  %1449 = vrot.lane.b32.xlu1 %v650_v30, %s2815_s13 }
 0x220   : > { %v2722_v10 = vpop.f32.mrb[0].mxu0 }
 0x221   : > { %2334 = vst.msk [vmem:[%s3980_s27 + $0x8] sm:$0xff] %vm347_vm0, %v2722_v10  ;;  %v2366_v26 = vsel %vm347_vm0, %v2722_v10, 0.0  ;;  %v2435_v62 = vmul.f32 %v2722_v10, %v2722_v10  ;;  %v2174_v55 = vpop.f32.mrb[1].mxu0  ;;  %v1178_v27 = vpop.permute.xlu0 %1177 }
 0x222   : > { %2333 = vst.msk [vmem:[%s3980_s27] sm:$0xff] %vm347_vm0, %v2174_v55  ;;  %v2365_v25 = vsel %vm347_vm0, %v2174_v55, 0.0  ;;  %v2434_v9 = vmul.f32 %v2174_v55, %v2174_v55  ;;  %v1176_v21 = vpop.permute.xlu1 %1175  ;;  %v1861_v35 = vsel %vm1837_vm6, %v1828_v23, %v1178_v27 }
 0x223   : > { %v2467_v22 = vsel %vm347_vm0, %v2435_v62, 0.0  ;;  %v2367_v34 = vadd.f32 %v2366_v26, %v2365_v25  ;;  %1577 = vrot.lane.b32.xlu1 %v682_v36, %s2816_s19  ;;  %v1860_v60 = vsel %vm1837_vm6, %v1827_v15, %v1176_v21 }
 0x224   : > { %v2466_v14 = vsel %vm347_vm0, %v2434_v9, 0.0 }
 0x225   : > { %v2468_v39 = vadd.f32 %v2467_v22, %v2466_v14  ;;  %v1686_v49 = vpop.permute.xlu0 %1685 }
 0x226   : > { %v1991_v29 = vsel %vm1969_vm10, %v1958_v19, %v1686_v49  ;;  %v1684_v31 = vpop.permute.xlu1 %1683 }
 0x227   : > { %v1990_v32 = vsel %vm1969_vm10, %v1957_v37, %v1684_v31  ;;  %1705 = vrot.lane.b32.xlu1 %v714_v18, %s2817_s20 }
 0x228   : > { %2750 = vmatprep.mubr.msk.f32.mxu1 %vm2007_vm11, %v1990_v32 }
 0x229   : > { %2751 = vmatmul.mubr.msk.f32.gmra.mrb[4].mxu1 %vm2007_vm11, %v1991_v29  ;;  %v1432_v63 = vpop.permute.xlu0 %1431  ;;  %v4359_v29 = vld [vmem:[#allocation22_spill] sm:$0xff] }
 0x22a   : > { %v1304_v28 = vpop.permute.xlu1 %1303  ;;  %v1764_v31 = vsel %vm347_vm0, %v3766_v6, %v4359_v29 }
 0x22b   : > { %v1893_v5 = vsel %vm1870_vm7, %v1860_v60, %v1304_v28 }
 0x22c   : > { %v1926_v48 = vsel %vm1903_vm8, %v1893_v5, %v1432_v63 }
 0x22d   : > { %v1434_v20 = vpop.permute.xlu0 %1433 }
 0x22e   : > { %v1306_v16 = vpop.permute.xlu1 %1305 }
 0x22f   : > { %v1894_v0 = vsel %vm1870_vm7, %v1861_v35, %v1306_v16 }
 0x230   : > { %v1927_v4 = vsel %vm1903_vm8, %v1894_v0, %v1434_v20  ;;  %v4360_v20 = vld [vmem:[#allocation17_spill] sm:$0xff] }
 0x231   : > { %v4011_v44 = vpop.permute.xlu0 %1053  ;;  %v1763_v16 = vsel %vm347_vm0, %v3761_v59, %v4360_v20 }
 0x232   : > { %v4013_v51 = vpop.permute.xlu1 %1051 }
 0x234   : > { %v2725_v7 = vpop.f32.mrb[2].mxu0 }
 0x235   : > { %2336 = vst.msk [vmem:[%s3980_s27 + $0x18] sm:$0xff] %vm347_vm0, %v2725_v7  ;;  %v2184_v50 = vpop.f32.mrb[3].mxu0  ;;  %v1562_v24 = vpop.permute.xlu0 %1561  ;;  %v2437_v53 = vmul.f32 %v2725_v7, %v2725_v7  ;;  %v2370_v17 = vsel %vm347_vm0, %v2725_v7, 0.0  ;;  %v4361_v7 = vld [vmem:[#allocation44_spill] sm:$0xff] }
 0x236   : > { %2335 = vst.msk [vmem:[%s3980_s27 + $0x10] sm:$0xff] %vm347_vm0, %v2184_v50  ;;  %v2368_v40 = vsel %vm347_vm0, %v2184_v50, 0.0  ;;  %v2436_v54 = vmul.f32 %v2184_v50, %v2184_v50  ;;  %v1560_v30 = vpop.permute.xlu1 %1559  ;;  %v1960_v36 = vsel %vm1936_vm9, %v1927_v4, %v1562_v24  ;;  %v1797_v11 = vsel %vm1771_vm4, %v1764_v31, %v4361_v7 }
 0x237   : > { %v2369_v42 = vadd.f32 %v2368_v40, %v2367_v34  ;;  %v2471_v3 = vsel %vm347_vm0, %v2437_v53, 0.0  ;;  %v1959_v26 = vsel %vm1936_vm9, %v1926_v48, %v1560_v30  ;;  %v1796_v50 = vsel %vm1771_vm4, %v1763_v16, %v4362_v38 }
 0x238   : > { %v2469_v56 = vsel %vm347_vm0, %v2436_v54, 0.0  ;;  %v1830_v24 = vsel %vm1804_vm5, %v1797_v11, %v4011_v44  ;;  %v1829_v58 = vsel %vm1804_vm5, %v1796_v50, %v4013_v51 }
 0x239   : > { %v2470_v61 = vadd.f32 %v2469_v56, %v2468_v39  ;;  %v1182_v43 = vpop.permute.xlu0 %1181  ;;  %v2371_v2 = vadd.f32 %v2370_v17, %v2369_v42 }
 0x23a   : > { %v1180_v41 = vpop.permute.xlu1 %1179  ;;  %v1863_v8 = vsel %vm1837_vm6, %v1830_v24, %v1182_v43 }
 0x23b   : > { %v2472_v10 = vadd.f32 %v2471_v3, %v2470_v61  ;;  %v1862_v59 = vsel %vm1837_vm6, %v1829_v58, %v1180_v41 }
 0x23d   : > { %v1690_v45 = vpop.permute.xlu0 %1689 }
 0x23e   : > { %v1993_v62 = vsel %vm1969_vm10, %v1960_v36, %v1690_v45  ;;  %v1688_v55 = vpop.permute.xlu1 %1687 }
 0x23f   : > { %v1992_v27 = vsel %vm1969_vm10, %v1959_v26, %v1688_v55  ;;  %v452_v55 = vld [vmem:[#allocation2 + $0x138] sm:$0xff] }
 0x240   : > { %2753 = vmatprep.mubr.msk.f32.mxu1 %vm2007_vm11, %v1992_v27 }
 0x241   : > { %2754 = vmatmul.mubr.msk.f32.gmra.mrb[6].mxu1 %vm2007_vm11, %v1993_v62  ;;  %v1436_v52 = vpop.permute.xlu0 %1435 }
 0x242   : > { %v1308_v25 = vpop.permute.xlu1 %1307 }
 0x243   : > { %v1895_v54 = vsel %vm1870_vm7, %v1862_v59, %v1308_v25 }
 0x244   : > { %v1928_v44 = vsel %vm1903_vm8, %v1895_v54, %v1436_v52  ;;  %v4363_v52 = vld [vmem:[#allocation24_spill] sm:$0xff] }
 0x245   : > { %v1438_v9 = vpop.permute.xlu0 %1437  ;;  %v1766_v25 = vsel %vm347_vm0, %v3809_v57, %v4363_v52 }
 0x246   : > { %v1310_v21 = vpop.permute.xlu1 %1309 }
 0x247   : > { %v1896_v53 = vsel %vm1870_vm7, %v1863_v8, %v1310_v21  ;;  %v4364_v21 = vld [vmem:[#allocation19_spill] sm:$0xff] }
 0x248   : > { %v2728_v22 = vpop.f32.mrb[4].mxu0  ;;  %v1929_v47 = vsel %vm1903_vm8, %v1896_v53, %v1438_v9 }
 0x249   : > { %2338 = vst.msk [vmem:[%s3980_s27 + $0x28] sm:$0xff] %vm347_vm0, %v2728_v22  ;;  %v2194_v34 = vpop.f32.mrb[5].mxu0  ;;  %v4051_v1 = vpop.permute.xlu0 %1057  ;;  %v2439_v14 = vmul.f32 %v2728_v22, %v2728_v22  ;;  %v2374_v49 = vsel %vm347_vm0, %v2728_v22, 0.0  ;;  %v1765_v22 = vsel %vm347_vm0, %v452_v55, %v4364_v21 }
 0x24a   : > { %2337 = vst.msk [vmem:[%s3980_s27 + $0x20] sm:$0xff] %vm347_vm0, %v2194_v34  ;;  %v2372_v18 = vsel %vm347_vm0, %v2194_v34, 0.0  ;;  %v2438_v19 = vmul.f32 %v2194_v34, %v2194_v34  ;;  %v1056_v12 = vpop.permute.xlu1 %1055  ;;  %v4365_v34 = vld [vmem:[#allocation46_spill] sm:$0xff] }
 0x24b   : > { %v2373_v39 = vadd.f32 %v2372_v18, %v2371_v2  ;;  %v2475_v13 = vsel %vm347_vm0, %v2439_v14, 0.0  ;;  %v1799_v14 = vsel %vm1771_vm4, %v1766_v25, %v4365_v34 }
 0x24c   : > { %v2473_v37 = vsel %vm347_vm0, %v2438_v19, 0.0  ;;  %v4366_v19 = vld [vmem:[#allocation41_spill] sm:$0xff] }
 0x24d   : > { %v2474_v32 = vadd.f32 %v2473_v37, %v2472_v10  ;;  %v1566_v63 = vpop.permute.xlu0 %1565  ;;  %v2375_v28 = vadd.f32 %v2374_v49, %v2373_v39  ;;  %v1798_v39 = vsel %vm1771_vm4, %v1765_v22, %v4366_v19  ;;  %v1832_v49 = vsel %vm1804_vm5, %v1799_v14, %v4051_v1 }
 0x24e   : > { %v1564_v33 = vpop.permute.xlu1 %1563  ;;  %v1962_v46 = vsel %vm1936_vm9, %v1929_v47, %v1566_v63  ;;  %v1831_v37 = vsel %vm1804_vm5, %v1798_v39, %v1056_v12 }
 0x24f   : > { %v2476_v6 = vadd.f32 %v2475_v13, %v2474_v32  ;;  %v1961_v51 = vsel %vm1936_vm9, %v1928_v44, %v1564_v33 }
 0x251   : > { %v1186_v40 = vpop.permute.xlu0 %1185 }
 0x252   : > { %v1184_v30 = vpop.permute.xlu1 %1183  ;;  %v1865_v29 = vsel %vm1837_vm6, %v1832_v49, %v1186_v40 }
 0x253   : > { %v1864_v57 = vsel %vm1837_vm6, %v1831_v37, %v1184_v30 }
 0x255   : > { %v1694_v23 = vpop.permute.xlu0 %1693 }
 0x256   : > { %v1995_v42 = vsel %vm1969_vm10, %v1962_v46, %v1694_v23  ;;  %v1692_v15 = vpop.permute.xlu1 %1691 }
 0x257   : > { %v1994_v35 = vsel %vm1969_vm10, %v1961_v51, %v1692_v15  ;;  %v454_v15 = vld [vmem:[#allocation2 + $0x150] sm:$0xff] }
 0x258   : > { %2756 = vmatprep.mubr.msk.f32.mxu1 %vm2007_vm11, %v1994_v35  ;;  %v455_v35 = vld [vmem:[#allocation2 + $0x158] sm:$0xff] }
 0x259   : > { %2757 = vmatmul.mubr.msk.f32.gmra.mrb[8].mxu1 %vm2007_vm11, %v1995_v42  ;;  %v1440_v17 = vpop.permute.xlu0 %1439 }
 0x25a   : > { %v1312_v56 = vpop.permute.xlu1 %1311 }
 0x25b   : > { %v1897_v63 = vsel %vm1870_vm7, %v1864_v57, %v1312_v56  ;;  %v4367_v56 = vld [vmem:[#allocation21_spill] sm:$0xff] }
 0x25c   : > { %v2731_v60 = vpop.f32.mrb[6].mxu0  ;;  %v1930_v1 = vsel %vm1903_vm8, %v1897_v63, %v1440_v17 }
 0x25d   : > { %2340 = vst.msk [vmem:[%s3980_s27 + $0x38] sm:$0xff] %vm347_vm0, %v2731_v60  ;;  %v2204_v0 = vpop.f32.mrb[7].mxu0  ;;  %v1442_v61 = vpop.permute.xlu0 %1441  ;;  %v2441_v43 = vmul.f32 %v2731_v60, %v2731_v60  ;;  %v2378_v10 = vsel %vm347_vm0, %v2731_v60, 0.0  ;;  %v1767_v60 = vsel %vm347_vm0, %v454_v15, %v4367_v56 }
 0x25e   : > { %2339 = vst.msk [vmem:[%s3980_s27 + $0x30] sm:$0xff] %vm347_vm0, %v2204_v0  ;;  %v2376_v2 = vsel %vm347_vm0, %v2204_v0, 0.0  ;;  %v2440_v5 = vmul.f32 %v2204_v0, %v2204_v0  ;;  %v1314_v3 = vpop.permute.xlu1 %1313  ;;  %v4368_v0 = vld [vmem:[#allocation25_spill] sm:$0xff] }
 0x25f   : > { %v2377_v41 = vadd.f32 %v2376_v2, %v2375_v28  ;;  %v2479_v26 = vsel %vm347_vm0, %v2441_v43, 0.0  ;;  %v1898_v31 = vsel %vm1870_vm7, %v1865_v29, %v1314_v3  ;;  %v4369_v2 = vld [vmem:[#allocation43_spill] sm:$0xff] }
 0x260   : > { %v2477_v4 = vsel %vm347_vm0, %v2440_v5, 0.0  ;;  %v1931_v20 = vsel %vm1903_vm8, %v1898_v31, %v1442_v61  ;;  %v1768_v61 = vsel %vm347_vm0, %v455_v35, %v4368_v0  ;;  %v1800_v5 = vsel %vm1771_vm4, %v1767_v60, %v4369_v2  ;;  %v4370_v3 = vld [vmem:[#allocation47_spill] sm:$0xff] }
 0x261   : > { %v2478_v36 = vadd.f32 %v2477_v4, %v2476_v6  ;;  %v1062_v48 = vpop.permute.xlu0 %1061  ;;  %v2379_v45 = vadd.f32 %v2378_v10, %v2377_v41  ;;  %v1801_v41 = vsel %vm1771_vm4, %v1768_v61, %v4370_v3 }
 0x262   : > { %v1060_v62 = vpop.permute.xlu1 %1059  ;;  %v1834_v4 = vsel %vm1804_vm5, %v1801_v41, %v1062_v48 }
 0x263   : > { %v2480_v27 = vadd.f32 %v2479_v26, %v2478_v36  ;;  %v1833_v36 = vsel %vm1804_vm5, %v1800_v5, %v1060_v62 }
 0x265   : > { %v1570_v9 = vpop.permute.xlu0 %1569 }
 0x266   : > { %v1568_v18 = vpop.permute.xlu1 %1567  ;;  %v1964_v16 = vsel %vm1936_vm9, %v1931_v20, %v1570_v9 }
 0x267   : > { %v1963_v12 = vsel %vm1936_vm9, %v1930_v1, %v1568_v18  ;;  %v456_v18 = vld [vmem:[#allocation2 + $0x168] sm:$0xff] }
 0x269   : > { %v1190_v32 = vpop.permute.xlu0 %1189 }
 0x26a   : > { %v1188_v28 = vpop.permute.xlu1 %1187 }
 0x26b   : > { %v1866_v26 = vsel %vm1837_vm6, %v1833_v36, %v1188_v28  ;;  %v4371_v28 = vld [vmem:[#allocation23_spill] sm:$0xff] }
 0x26c   : > { %v1769_v20 = vsel %vm347_vm0, %v456_v18, %v4371_v28 }
 0x26d   : > { %v1698_v7 = vpop.permute.xlu0 %1697 }
 0x26e   : > { %v1997_v11 = vsel %vm1969_vm10, %v1964_v16, %v1698_v7  ;;  %v1696_v13 = vpop.permute.xlu1 %1695 }
 0x26f   : > { %v1996_v33 = vsel %vm1969_vm10, %v1963_v12, %v1696_v13  ;;  %v4372_v12 = vld [vmem:[#allocation45_spill] sm:$0xff] }
 0x270   : > { %v2734_v38 = vpop.f32.mrb[8].mxu0  ;;  %2759 = vmatprep.mubr.msk.f32.mxu1 %vm2007_vm11, %v1996_v33 }
 0x271   : > { %2342 = vst.msk [vmem:[%s3980_s27 + $0x48] sm:$0xff] %vm347_vm0, %v2734_v38  ;;  %v2214_v50 = vpop.f32.mrb[9].mxu0  ;;  %2760 = vmatmul.mubr.msk.f32.gmra.mrb[10].mxu1 %vm2007_vm11, %v1997_v11  ;;  %v1444_v24 = vpop.permute.xlu0 %1443  ;;  %v2443_v6 = vmul.f32 %v2734_v38, %v2734_v38  ;;  %v2382_v40 = vsel %vm347_vm0, %v2734_v38, 0.0  ;;  %v1802_v11 = vsel %vm1771_vm4, %v1769_v20, %v4372_v12 }
 0x272   : > { %2341 = vst.msk [vmem:[%s3980_s27 + $0x40] sm:$0xff] %vm347_vm0, %v2214_v50  ;;  %v2380_v58 = vsel %vm347_vm0, %v2214_v50, 0.0  ;;  %v2442_v8 = vmul.f32 %v2214_v50, %v2214_v50  ;;  %v1316_v59 = vpop.permute.xlu1 %1315 }
 0x273   : > { %v2381_v53 = vadd.f32 %v2380_v58, %v2379_v45  ;;  %v2483_v44 = vsel %vm347_vm0, %v2443_v6, 0.0  ;;  %v1867_v45 = vsel %vm1837_vm6, %v1834_v4, %v1190_v32  ;;  %v1899_v55 = vsel %vm1870_vm7, %v1866_v26, %v1316_v59 }
 0x274   : > { %v2481_v54 = vsel %vm347_vm0, %v2442_v8, 0.0  ;;  %v1932_v21 = vsel %vm1903_vm8, %v1899_v55, %v1444_v24 }
 0x275   : > { %v2482_v30 = vadd.f32 %v2481_v54, %v2480_v27  ;;  %v1446_v47 = vpop.permute.xlu0 %1445  ;;  %v2383_v46 = vadd.f32 %v2382_v40, %v2381_v53  ;;  %v457_v53 = vld [vmem:[#allocation2 + $0x170] sm:$0xff] }
 0x276   : > { %v1318_v23 = vpop.permute.xlu1 %1317 }
 0x277   : > { %v2484_v51 = vadd.f32 %v2483_v44, %v2482_v30  ;;  %v1900_v27 = vsel %vm1870_vm7, %v1867_v45, %v1318_v23  ;;  %v4374_v23 = vld [vmem:[#allocation48_spill] sm:$0xff] }
 0x278   : > { %v1933_v9 = vsel %vm1903_vm8, %v1900_v27, %v1446_v47 }
 0x279   : > { %v1066_v42 = vpop.permute.xlu0 %1065 }
 0x27a   : > { %v1064_v17 = vpop.permute.xlu1 %1063 }
 0x27b   : > { %v1835_v38 = vsel %vm1804_vm5, %v1802_v11, %v1064_v17 }
 0x27d   : > { %v1574_v43 = vpop.permute.xlu0 %1573 }
 0x27e   : > { %v1572_v10 = vpop.permute.xlu1 %1571  ;;  %v1966_v48 = vsel %vm1936_vm9, %v1933_v9, %v1574_v43 }
 0x27f   : > { %v1965_v62 = vsel %vm1936_vm9, %v1932_v21, %v1572_v10 }
 0x281   : > { %v1194_v52 = vpop.permute.xlu0 %1193 }
 0x282   : > { %v1192_v25 = vpop.permute.xlu1 %1191 }
 0x283   : > { %v1868_v24 = vsel %vm1837_vm6, %v1835_v38, %v1192_v25 }
 0x284   : > { %v2737_v22 = vpop.f32.mrb[10].mxu0 }
 0x285   : > { %2344 = vst.msk [vmem:[%s3980_s27 + $0x58] sm:$0xff] %vm347_vm0, %v2737_v22  ;;  %v2224_v34 = vpop.f32.mrb[11].mxu0  ;;  %v1702_v14 = vpop.permute.xlu0 %1701  ;;  %v2445_v19 = vmul.f32 %v2737_v22, %v2737_v22  ;;  %v2386_v32 = vsel %vm347_vm0, %v2737_v22, 0.0 }
 0x286   : > { %2343 = vst.msk [vmem:[%s3980_s27 + $0x50] sm:$0xff] %vm347_vm0, %v2224_v34  ;;  %v2384_v39 = vsel %vm347_vm0, %v2224_v34, 0.0  ;;  %v2444_v49 = vmul.f32 %v2224_v34, %v2224_v34  ;;  %v1999_v37 = vsel %vm1969_vm10, %v1966_v48, %v1702_v14  ;;  %v1700_v29 = vpop.permute.xlu1 %1699 }
 0x287   : > { %v2385_v57 = vadd.f32 %v2384_v39, %v2383_v46  ;;  %v1998_v31 = vsel %vm1969_vm10, %v1965_v62, %v1700_v29  ;;  %v2487_v13 = vsel %vm347_vm0, %v2445_v19, 0.0  ;;  %v4373_v46 = vld [vmem:[#allocation26_spill] sm:$0xff] }
 0x288   : > { %v2485_v63 = vsel %vm347_vm0, %v2444_v49, 0.0  ;;  %2762 = vmatprep.mubr.msk.f32.mxu1 %vm2007_vm11, %v1998_v31  ;;  %v1770_v44 = vsel %vm347_vm0, %v457_v53, %v4373_v46 }
 0x289   : > { %v2486_v16 = vadd.f32 %v2485_v63, %v2484_v51  ;;  %2763 = vmatmul.mubr.msk.f32.gmra.mrb[12].mxu1 %vm2007_vm11, %v1999_v37  ;;  %v1448_v1 = vpop.permute.xlu0 %1447  ;;  %v2387_v7 = vadd.f32 %v2386_v32, %v2385_v57  ;;  %v1803_v51 = vsel %vm1771_vm4, %v1770_v44, %v4374_v23 }
 0x28a   : > { %v1320_v33 = vpop.permute.xlu1 %1319  ;;  %v1836_v15 = vsel %vm1804_vm5, %v1803_v51, %v1066_v42 }
 0x28b   : > { %v2488_v50 = vadd.f32 %v2487_v13, %v2486_v16  ;;  %v1901_v6 = vsel %vm1870_vm7, %v1868_v24, %v1320_v33  ;;  %v1869_v17 = vsel %vm1837_vm6, %v1836_v15, %v1194_v52 }
 0x28c   : > { %v1934_v59 = vsel %vm1903_vm8, %v1901_v6, %v1448_v1 }
 0x28d   : > { %v1576_v58 = vpop.permute.xlu0 %1575 }
 0x28e   : > { %v1322_v8 = vpop.permute.xlu1 %1321  ;;  %v1967_v40 = vsel %vm1936_vm9, %v1934_v59, %v1576_v58 }
 0x28f   : > { %v1902_v56 = vsel %vm1870_vm7, %v1869_v17, %v1322_v8 }
 0x291   : > { %v1704_v54 = vpop.permute.xlu0 %1703 }
 0x292   : > { %v2000_v30 = vsel %vm1969_vm10, %v1967_v40, %v1704_v54  ;;  %v1450_v47 = vpop.permute.xlu1 %1449 }
 0x293   : > { %2765 = vmatprep.mubr.msk.f32.mxu1 %vm2007_vm11, %v2000_v30  ;;  %v1935_v60 = vsel %vm1903_vm8, %v1902_v56, %v1450_v47 }
 0x296   : > { %v1578_v35 = vpop.permute.xlu1 %1577 }
 0x297   : > { %v1968_v0 = vsel %vm1936_vm9, %v1935_v60, %v1578_v35 }
 0x29a   : > { %v1706_v61 = vpop.permute.xlu1 %1705 }
 0x29b   : > { %v2001_v43 = vsel %vm1969_vm10, %v1968_v0, %v1706_v61 }
 0x29c   : > { %v2740_v2 = vpop.f32.mrb[12].mxu0  ;;  %2766 = vmatmul.mubr.msk.f32.gmra.mrb[14].mxu1 %vm2007_vm11, %v2001_v43 }
 0x29d   : > { %2346 = vst.msk [vmem:[%s3980_s27 + $0x68] sm:$0xff] %vm347_vm0, %v2740_v2  ;;  %v2234_v5 = vpop.f32.mrb[13].mxu0  ;;  %v2447_v42 = vmul.f32 %v2740_v2, %v2740_v2  ;;  %v2390_v4 = vsel %vm347_vm0, %v2740_v2, 0.0 }
 0x29e   : > { %2345 = vst.msk [vmem:[%s3980_s27 + $0x60] sm:$0xff] %vm347_vm0, %v2234_v5  ;;  %v2388_v3 = vsel %vm347_vm0, %v2234_v5, 0.0  ;;  %v2446_v41 = vmul.f32 %v2234_v5, %v2234_v5 }
 0x29f   : > { %v2389_v10 = vadd.f32 %v2388_v3, %v2387_v7  ;;  %v2491_v55 = vsel %vm347_vm0, %v2447_v42, 0.0 }
 0x2a0   : > { %v2489_v36 = vsel %vm347_vm0, %v2446_v41, 0.0 }
 0x2a1   : > { %v2490_v45 = vadd.f32 %v2489_v36, %v2488_v50  ;;  %v2391_v26 = vadd.f32 %v2390_v4, %v2389_v10 }
 0x2a3   : > { %v2492_v27 = vadd.f32 %v2491_v55, %v2490_v45 }
 0x2b4   : > { %v2743_v52 = vpop.f32.mrb[14].mxu0 }
 0x2b5   : > { %2348 = vst.msk [vmem:[%s3980_s27 + $0x78] sm:$0xff] %vm347_vm0, %v2743_v52  ;;  %v2244_v25 = vpop.f32.mrb[15].mxu0  ;;  %v2449_v9 = vmul.f32 %v2743_v52, %v2743_v52  ;;  %v2394_v62 = vsel %vm347_vm0, %v2743_v52, 0.0 }
 0x2b6   : > { %2347 = vst.msk [vmem:[%s3980_s27 + $0x70] sm:$0xff] %vm347_vm0, %v2244_v25  ;;  %v2392_v21 = vsel %vm347_vm0, %v2244_v25, 0.0  ;;  %v2448_v22 = vmul.f32 %v2244_v25, %v2244_v25 }
 0x2b7   : > { %v2393_v48 = vadd.f32 %v2392_v21, %v2391_v26  ;;  %v2495_v19 = vsel %vm347_vm0, %v2449_v9, 0.0 }
 0x2b8   : > { %v2493_v34 = vsel %vm347_vm0, %v2448_v22, 0.0 }
 0x2b9   : > { %v2395_v14 = vadd.f32 %v2394_v62, %v2393_v48  ;;  %v2494_v18 = vadd.f32 %v2493_v34, %v2492_v27 }
 0x2bb   : > { %v2496_v39 = vadd.f32 %v2495_v19, %v2494_v18 }
 0x2cc   : > { %v2746_v49 = vpop.f32.mrb[0].mxu1 }
 0x2cd   : > { %2350 = vst.msk [vmem:[%s3980_s27 + $0x88] sm:$0xff] %vm347_vm0, %v2746_v49  ;;  %v2254_v37 = vpop.f32.mrb[1].mxu1  ;;  %v2451_v29 = vmul.f32 %v2746_v49, %v2746_v49  ;;  %v2398_v63 = vsel %vm347_vm0, %v2746_v49, 0.0 }
 0x2ce   : > { %2349 = vst.msk [vmem:[%s3980_s27 + $0x80] sm:$0xff] %vm347_vm0, %v2254_v37  ;;  %v2396_v57 = vsel %vm347_vm0, %v2254_v37, 0.0  ;;  %v2450_v31 = vmul.f32 %v2254_v37, %v2254_v37 }
 0x2cf   : > { %v2397_v32 = vadd.f32 %v2396_v57, %v2395_v14  ;;  %v2499_v1 = vsel %vm347_vm0, %v2451_v29, 0.0 }
 0x2d0   : > { %v2497_v28 = vsel %vm347_vm0, %v2450_v31, 0.0 }
 0x2d1   : > { %v2498_v20 = vadd.f32 %v2497_v28, %v2496_v39  ;;  %v2399_v16 = vadd.f32 %v2398_v63, %v2397_v32 }
 0x2d3   : > { %v2500_v7 = vadd.f32 %v2499_v1, %v2498_v20 }
 0x2e4   : > { %v2749_v12 = vpop.f32.mrb[2].mxu1 }
 0x2e5   : > { %2352 = vst.msk [vmem:[%s3980_s27 + $0x98] sm:$0xff] %vm347_vm0, %v2749_v12  ;;  %v2264_v11 = vpop.f32.mrb[3].mxu1  ;;  %v2453_v13 = vmul.f32 %v2749_v12, %v2749_v12  ;;  %v2402_v24 = vsel %vm347_vm0, %v2749_v12, 0.0 }
 0x2e6   : > { %2351 = vst.msk [vmem:[%s3980_s27 + $0x90] sm:$0xff] %vm347_vm0, %v2264_v11  ;;  %v2400_v33 = vsel %vm347_vm0, %v2264_v11, 0.0  ;;  %v2452_v38 = vmul.f32 %v2264_v11, %v2264_v11 }
 0x2e7   : > { %v2401_v50 = vadd.f32 %v2400_v33, %v2399_v16  ;;  %v2503_v59 = vsel %vm347_vm0, %v2453_v13, 0.0 }
 0x2e8   : > { %v2501_v6 = vsel %vm347_vm0, %v2452_v38, 0.0 }
 0x2e9   : > { %v2502_v58 = vadd.f32 %v2501_v6, %v2500_v7  ;;  %v2403_v8 = vadd.f32 %v2402_v24, %v2401_v50 }
 0x2eb   : > { %v2504_v53 = vadd.f32 %v2503_v59, %v2502_v58 }
 0x2fc   : > { %v2752_v40 = vpop.f32.mrb[4].mxu1 }
 0x2fd   : > { %2354 = vst.msk [vmem:[%s3980_s27 + $0xa8] sm:$0xff] %vm347_vm0, %v2752_v40  ;;  %v2274_v54 = vpop.f32.mrb[5].mxu1  ;;  %v2455_v30 = vmul.f32 %v2752_v40, %v2752_v40  ;;  %v2406_v23 = vsel %vm347_vm0, %v2752_v40, 0.0 }
 0x2fe   : > { %2353 = vst.msk [vmem:[%s3980_s27 + $0xa0] sm:$0xff] %vm347_vm0, %v2274_v54  ;;  %v2404_v47 = vsel %vm347_vm0, %v2274_v54, 0.0  ;;  %v2454_v46 = vmul.f32 %v2274_v54, %v2274_v54 }
 0x2ff   : > { %v2405_v44 = vadd.f32 %v2404_v47, %v2403_v8  ;;  %v2507_v17 = vsel %vm347_vm0, %v2455_v30, 0.0 }
 0x300   : > { %v2505_v51 = vsel %vm347_vm0, %v2454_v46, 0.0 }
 0x301   : > { %v2506_v15 = vadd.f32 %v2505_v51, %v2504_v53  ;;  %v2407_v35 = vadd.f32 %v2406_v23, %v2405_v44 }
 0x303   : > { %v2508_v56 = vadd.f32 %v2507_v17, %v2506_v15 }
 0x314   : > { %v2755_v60 = vpop.f32.mrb[6].mxu1 }
 0x315   : > { %2356 = vst.msk [vmem:[%s3980_s27 + $0xb8] sm:$0xff] %vm347_vm0, %v2755_v60  ;;  %v2284_v0 = vpop.f32.mrb[7].mxu1  ;;  %v2457_v61 = vmul.f32 %v2755_v60, %v2755_v60  ;;  %v2410_v42 = vsel %vm347_vm0, %v2755_v60, 0.0 }
 0x316   : > { %2355 = vst.msk [vmem:[%s3980_s27 + $0xb0] sm:$0xff] %vm347_vm0, %v2284_v0  ;;  %v2408_v43 = vsel %vm347_vm0, %v2284_v0, 0.0  ;;  %v2456_v2 = vmul.f32 %v2284_v0, %v2284_v0 }
 0x317   : > { %v2409_v5 = vadd.f32 %v2408_v43, %v2407_v35  ;;  %v2511_v4 = vsel %vm347_vm0, %v2457_v61, 0.0 }
 0x318   : > { %v2509_v3 = vsel %vm347_vm0, %v2456_v2, 0.0 }
 0x319   : > { %v2510_v41 = vadd.f32 %v2509_v3, %v2508_v56  ;;  %v2411_v10 = vadd.f32 %v2410_v42, %v2409_v5 }
 0x31b   : > { %v2512_v36 = vadd.f32 %v2511_v4, %v2510_v41 }
 0x32c   : > { %v2758_v45 = vpop.f32.mrb[8].mxu1 }
 0x32d   : > { %2358 = vst.msk [vmem:[%s3980_s27 + $0xc8] sm:$0xff] %vm347_vm0, %v2758_v45  ;;  %v2294_v26 = vpop.f32.mrb[9].mxu1  ;;  %v2459_v55 = vmul.f32 %v2758_v45, %v2758_v45  ;;  %v2414_v9 = vsel %vm347_vm0, %v2758_v45, 0.0 }
 0x32e   : > { %2357 = vst.msk [vmem:[%s3980_s27 + $0xc0] sm:$0xff] %vm347_vm0, %v2294_v26  ;;  %v2412_v27 = vsel %vm347_vm0, %v2294_v26, 0.0  ;;  %v2458_v52 = vmul.f32 %v2294_v26, %v2294_v26 }
 0x32f   : > { %v2413_v25 = vadd.f32 %v2412_v27, %v2411_v10  ;;  %v2515_v62 = vsel %vm347_vm0, %v2459_v55, 0.0 }
 0x330   : > { %v2513_v21 = vsel %vm347_vm0, %v2458_v52, 0.0 }
 0x331   : > { %v2514_v22 = vadd.f32 %v2513_v21, %v2512_v36  ;;  %v2415_v48 = vadd.f32 %v2414_v9, %v2413_v25 }
 0x333   : > { %v2516_v34 = vadd.f32 %v2515_v62, %v2514_v22 }
 0x344   : > { %v2761_v14 = vpop.f32.mrb[10].mxu1 }
 0x345   : > { %2360 = vst.msk [vmem:[%s3980_s27 + $0xd8] sm:$0xff] %vm347_vm0, %v2761_v14  ;;  %v2304_v18 = vpop.f32.mrb[11].mxu1  ;;  %v2461_v19 = vmul.f32 %v2761_v14, %v2761_v14  ;;  %v2418_v29 = vsel %vm347_vm0, %v2761_v14, 0.0 }
 0x346   : > { %2359 = vst.msk [vmem:[%s3980_s27 + $0xd0] sm:$0xff] %vm347_vm0, %v2304_v18  ;;  %v2416_v39 = vsel %vm347_vm0, %v2304_v18, 0.0  ;;  %v2460_v49 = vmul.f32 %v2304_v18, %v2304_v18 }
 0x347   : > { %v2417_v37 = vadd.f32 %v2416_v39, %v2415_v48  ;;  %v2519_v63 = vsel %vm347_vm0, %v2461_v19, 0.0 }
 0x348   : > { %v2517_v57 = vsel %vm347_vm0, %v2460_v49, 0.0 }
 0x349   : > { %v2518_v31 = vadd.f32 %v2517_v57, %v2516_v34  ;;  %v2419_v32 = vadd.f32 %v2418_v29, %v2417_v37 }
 0x34b   : > { %v2520_v28 = vadd.f32 %v2519_v63, %v2518_v31 }
 0x35c   : > { %v2764_v20 = vpop.f32.mrb[12].mxu1 }
 0x35d   : > { %2362 = vst.msk [vmem:[%s3980_s27 + $0xe8] sm:$0xff] %vm347_vm0, %v2764_v20  ;;  %v2314_v16 = vpop.f32.mrb[13].mxu1  ;;  %v2463_v1 = vmul.f32 %v2764_v20, %v2764_v20  ;;  %v2422_v13 = vsel %vm347_vm0, %v2764_v20, 0.0 }
 0x35e   : > { %2361 = vst.msk [vmem:[%s3980_s27 + $0xe0] sm:$0xff] %vm347_vm0, %v2314_v16  ;;  %v2420_v7 = vsel %vm347_vm0, %v2314_v16, 0.0  ;;  %v2462_v12 = vmul.f32 %v2314_v16, %v2314_v16 }
 0x35f   : > { %v2421_v11 = vadd.f32 %v2420_v7, %v2419_v32  ;;  %v2523_v24 = vsel %vm347_vm0, %v2463_v1, 0.0 }
 0x360   : > { %v2521_v33 = vsel %vm347_vm0, %v2462_v12, 0.0 }
 0x361   : > { %v2522_v38 = vadd.f32 %v2521_v33, %v2520_v28  ;;  %v2423_v50 = vadd.f32 %v2422_v13, %v2421_v11 }
 0x363   : > { %v2524_v6 = vadd.f32 %v2523_v24, %v2522_v38 }
 0x36f   : > { %v2767_v58 = vpop.f32.mrb[14].mxu1 }
 0x370   : > { %2364 = vst.msk [vmem:[%s3980_s27 + $0xf8] sm:$0xff] %vm347_vm0, %v2767_v58  ;;  %v2324_v8 = vpop.f32.mrb[15].mxu1  ;;  %v2465_v59 = vmul.f32 %v2767_v58, %v2767_v58  ;;  %v2426_v30 = vsel %vm347_vm0, %v2767_v58, 0.0 }
 0x371   : > { %2363 = vst.msk [vmem:[%s3980_s27 + $0xf0] sm:$0xff] %vm347_vm0, %v2324_v8  ;;  %v2424_v53 = vsel %vm347_vm0, %v2324_v8, 0.0  ;;  %v2464_v40 = vmul.f32 %v2324_v8, %v2324_v8 }
 0x372   : > { %v2425_v54 = vadd.f32 %v2424_v53, %v2423_v50  ;;  %v2527_v23 = vsel %vm347_vm0, %v2465_v59, 0.0 }
 0x373   : > { %v2525_v47 = vsel %vm347_vm0, %v2464_v40, 0.0 }
 0x374   : > { %v2427_v46 = vadd.f32 %v2426_v30, %v2425_v54  ;;  %v2526_v44 = vadd.f32 %v2525_v47, %v2524_v6 }
 0x376   : > { %v2428_v51 = vrot.slane %v2427_v46, 4  ;;  %v2528_v15 = vadd.f32 %v2527_v23, %v2526_v44 }
 0x378   : > { %v2429_v35 = vadd.f32 %v2428_v51, %v2427_v46  ;;  %v2529_v17 = vrot.slane %v2528_v15, 4 }
 0x37a   : > { %v2430_v56 = vrot.slane %v2429_v35, 2  ;;  %v2530_v60 = vadd.f32 %v2529_v17, %v2528_v15 }
 0x37c   : > { %v2431_v0 = vadd.f32 %v2430_v56, %v2429_v35  ;;  %v2531_v61 = vrot.slane %v2530_v60, 2 }
 0x37e   : > { %v2432_v43 = vrot.slane %v2431_v0, 1  ;;  %v2532_v2 = vadd.f32 %v2531_v61, %v2530_v60 }
 0x380   : > { %v2533_v5 = vrot.slane %v2532_v2, 1  ;;  %v2433_v42 = vadd.f32 %v2432_v43, %v2431_v0 }
 0x382   : > { %v2534_v3 = vadd.f32 %v2533_v5, %v2532_v2 }
 0x384   : > { %v2536_v41 = vsel %vm2535_vm12, %v2433_v42, %v2534_v3 }
 0x385   : > { %2537 = vst.msk [vmem:[%s208_s30] sm:$0x3] %vm350_vm1, %v2536_v41 }
 0x386 PF: > { %s15_s15 = sadd.s32 1, %s2807_s15  }
 0x387   : > { %p12_p4 = scmp.ge.s32.totalorder %s15_s15, 4  }
 0x389   :  { %14 = sbr.rel (!%p12_p4) target bundleno = 1 (0x1), region = 77 }

</bundles_post_ra>
